<compile_context>
chip_gen: v6e
topology: v6e:2x2x1
jax: 0.10.0
libtpu: 0.0.40
codegen_flags: <defaults>
</compile_context>

<pallas_src>
import functools

import jax
import jax.numpy as jnp
from jax import lax
from jax.experimental import pallas as pl
from jax.experimental.pallas import tpu as pltpu

_EPS = 1e-5     # nn.BatchNorm2d default
_C1P = 16       # conv1 out-channels 12 padded to 16 (bf16 sublane pack)
_C2P = 32       # conv2 out-channels 20 padded to 32
_C3 = 32        # conv3 out-channels (already aligned)
_LANE = 128


# ----------------------------------------------------------------------------
# Fused kernel
# ----------------------------------------------------------------------------
def _convnet_kernel(cols1_ref, w1_ref, b1_ref, g1_ref, be1_ref,
                    w2_ref, b2_ref, w3_ref, b3_ref, g3_ref, be3_ref,
                    mask_ref, fcw_ref, fcb_ref,
                    out_ref,
                    pool_ref, cols2_ref, cols3_ref, y3_ref, feats_ref,
                    *, batch, hw, w_img):
    # cols1_ref: (27, B*H*W) bf16, columns ordered (b, g, ho, wo); g = pool member
    # pool_ref : (16, B*hw) f32 scratch, columns (b, ho, wo)
    # cols2/3  : stacked-tap im2col scratches (bf16)
    # feats_ref: (B, C3*hw) f32 scratch, PyTorch NCHW flatten order
    n_cols = batch * hw
    bf16 = jnp.bfloat16

    # ---- conv1 (one GEMM over all images) + bias + BN1(batch stats) + ReLU ----
    y1 = jnp.dot(w1_ref[...], cols1_ref[...], preferred_element_type=jnp.float32)
    y1 = y1 + b1_ref[...]
    inv1 = 1.0 / float(batch * 4 * hw)                  # B*H*W columns
    mean1 = jnp.sum(y1, axis=1, keepdims=True) * inv1
    ym1 = y1 - mean1
    var1 = jnp.sum(ym1 * ym1, axis=1, keepdims=True) * inv1
    y1 = jnp.maximum(ym1 * lax.rsqrt(var1 + _EPS) * g1_ref[...] + be1_ref[...], 0.0)

    # ---- MaxPool2d(2): columns are (b, g, ho, wo) -> max over the four
    #      lane-aligned g-slabs of each image; result columns are (b, ho, wo).
    for b in range(batch):
        base = b * 4 * hw
        m = y1[:, base:base + hw]
        for g in range(1, 4):
            m = jnp.maximum(m, y1[:, base + g * hw:base + (g + 1) * hw])
        pool_ref[:, b * hw:(b + 1) * hw] = m

    # ---- conv2 im2col in VMEM: roll (XLU) + zero-pad mask (VPU); each tap is
    #      a 16-row block so conv2 becomes one stacked-K (K=144) GEMM.
    pooled = pool_ref[...]
    for t in range(9):
        kh, kw = t // 3, t % 3
        off = (kh - 1) * w_img + (kw - 1)               # flat in-image shift
        shifted = pooled if off == 0 else pltpu.roll(pooled, shift=(-off) % n_cols, axis=1)
        tap = shifted * mask_ref[pl.ds(t, 1), :]
        cols2_ref[t * _C1P:(t + 1) * _C1P, :] = tap.astype(bf16)

    # ---- conv2 + bias + ReLU ----
    y2 = jnp.dot(w2_ref[...], cols2_ref[...], preferred_element_type=jnp.float32)
    y2 = jnp.maximum(y2 + b2_ref[...], 0.0)

    # ---- conv3 im2col in VMEM (same trick, 32-row tap blocks, K=288) ----
    for t in range(9):
        kh, kw = t // 3, t % 3
        off = (kh - 1) * w_img + (kw - 1)
        shifted = y2 if off == 0 else pltpu.roll(y2, shift=(-off) % n_cols, axis=1)
        tap = shifted * mask_ref[pl.ds(t, 1), :]
        cols3_ref[t * _C2P:(t + 1) * _C2P, :] = tap.astype(bf16)

    # ---- conv3 + bias + BN3(batch stats) + ReLU ----
    y3 = jnp.dot(w3_ref[...], cols3_ref[...], preferred_element_type=jnp.float32)
    y3 = y3 + b3_ref[...]
    inv3 = 1.0 / float(n_cols)
    mean3 = jnp.sum(y3, axis=1, keepdims=True) * inv3
    ym3 = y3 - mean3
    var3 = jnp.sum(ym3 * ym3, axis=1, keepdims=True) * inv3
    y3_ref[...] = jnp.maximum(
        ym3 * lax.rsqrt(var3 + _EPS) * g3_ref[...] + be3_ref[...], 0.0)

    # ---- flatten (C3, B*HW) -> (B, C3*HW) in VMEM (PyTorch .view on NCHW) ----
    for b in range(batch):
        for c in range(_C3):
            feats_ref[b:b + 1, c * hw:(c + 1) * hw] = y3_ref[c:c + 1, b * hw:(b + 1) * hw]

    # ---- fc: (B, 8192) @ (8192, 128), bf16 operands, f32 accumulation ----
    out_ref[...] = jnp.dot(feats_ref[...].astype(bf16), fcw_ref[...],
                           preferred_element_type=jnp.float32) + fcb_ref[...]


# ----------------------------------------------------------------------------
# JAX-side glue (weight-independent, tiny)
# ----------------------------------------------------------------------------
def _conv1_cols(x):
    """(B, 3, H, W) -> im2col (27, B*H*W); columns ordered (b, g, ho, wo) where
    g = 2*gh + gw is the member of each 2x2 pooling window, so the fused kernel
    can max-pool over four lane-aligned slabs per image."""
    B, Cin, H, W = x.shape
    Ho, Wo = H // 2, W // 2
    xp = jnp.pad(x, ((0, 0), (0, 0), (1, 1), (1, 1)))
    taps = [xp[:, :, kh:kh + H, kw:kw + W] for kh in range(3) for kw in range(3)]
    s = jnp.stack(taps, axis=2)                      # (B, Cin, 9, H, W)
    s = s.reshape(B, Cin, 9, Ho, 2, Wo, 2)           # h = 2*ho+gh, w = 2*wo+gw
    s = s.transpose(0, 1, 2, 4, 6, 3, 5)             # (B, Cin, 9, gh, gw, Ho, Wo)
    s = s.reshape(B, Cin, 9, 4 * Ho * Wo)            # in-image col = g*HoWo + ho*Wo + wo
    return s.transpose(1, 2, 0, 3).reshape(Cin * 9, B * H * W)


def _pad_masks(h, w, batch):
    """(9, batch*h*w) zero-padding masks for the in-kernel roll-based im2col
    (shared by conv2 and conv3 — same spatial dims)."""
    hh = jnp.arange(h).reshape(h, 1)
    ww = jnp.arange(w).reshape(1, w)
    rows = []
    for kh in range(3):
        for kw in range(3):
            dh, dw = kh - 1, kw - 1
            m = ((hh + dh >= 0) & (hh + dh < h) & (ww + dw >= 0) & (ww + dw < w))
            rows.append(jnp.tile(m.reshape(1, h * w).astype(jnp.float32), (1, batch)))
    return jnp.concatenate(rows, axis=0)


def prepare_params(w1, b1, g1, be1, w2, b2, w3, b3, g3, be3, fcw, fcb):
    """One-time parameter prep: pad ragged channel dims (12->16, 20->32),
    reorder conv2/conv3 weights to match the in-kernel stacked-tap im2col,
    pre-transpose + lane-pad the fc weight, cast MXU operands to bf16."""
    c1, c2, c3 = w1.shape[0], w2.shape[0], w3.shape[0]
    nc, kfc = fcw.shape
    npad = ((nc + _LANE - 1) // _LANE) * _LANE

    def col(v, rows):
        return jnp.zeros((rows, 1), jnp.float32).at[:v.shape[0], 0].set(v)

    w1p = jnp.zeros((_C1P, w1.shape[1] * 9), jnp.float32)     # K = cin*9 + tap
    w1p = w1p.at[:c1].set(w1.reshape(c1, -1))
    w2p = jnp.zeros((_C2P, 9, _C1P), jnp.float32)             # K = tap*16 + cin
    w2p = w2p.at[:c2, :, :c1].set(w2.transpose(0, 2, 3, 1).reshape(c2, 9, c1))
    w3p = jnp.zeros((c3, 9, _C2P), jnp.float32)               # K = tap*32 + cin
    w3p = w3p.at[:, :, :c2].set(w3.transpose(0, 2, 3, 1).reshape(c3, 9, c2))
    fcwt = jnp.zeros((kfc, npad), jnp.float32).at[:, :nc].set(fcw.T)

    return {
        "w1": w1p.astype(jnp.bfloat16),
        "b1": col(b1, _C1P), "g1": col(g1, _C1P), "be1": col(be1, _C1P),
        "w2": w2p.reshape(_C2P, 9 * _C1P).astype(jnp.bfloat16),
        "b2": col(b2, _C2P),
        "w3": w3p.reshape(c3, 9 * _C2P).astype(jnp.bfloat16),
        "b3": col(b3, c3), "g3": col(g3, c3), "be3": col(be3, c3),
        "fcw_t": fcwt.astype(jnp.bfloat16),
        "fcb": jnp.zeros((1, npad), jnp.float32).at[0, :nc].set(fcb),
    }


# ----------------------------------------------------------------------------
# Forward pass (mirrors ConvNet.forward) — a single pallas_call
# ----------------------------------------------------------------------------
def convnet_forward(x, p, *, num_classes):
    batch, _, h, w = x.shape
    hp, wp = h // 2, w // 2
    hw = hp * wp
    n_cols = batch * hw
    npad = p["fcw_t"].shape[1]

    cols1 = _conv1_cols(x).astype(jnp.bfloat16)   # (27, B*H*W)
    mask = _pad_masks(hp, wp, batch)              # (9, B*hw)

    flops = 2 * (_C1P * cols1.shape[0] * (batch * h * w)
                 + _C2P * 9 * _C1P * n_cols
                 + _C3 * 9 * _C2P * n_cols
                 + batch * _C3 * hw * npad)
    bytes_accessed = (cols1.size * 2 + mask.size * 4 + p["fcw_t"].size * 2
                      + sum(p[k].size * (2 if p[k].dtype == jnp.bfloat16 else 4)
                            for k in ("w1", "b1", "g1", "be1", "w2", "b2",
                                      "w3", "b3", "g3", "be3", "fcb"))
                      + batch * npad * 4)

    kernel = functools.partial(_convnet_kernel, batch=batch, hw=hw, w_img=wp)
    vmem = pl.BlockSpec(memory_space=pltpu.MemorySpace.VMEM)
    out = pl.pallas_call(
        kernel,
        out_shape=jax.ShapeDtypeStruct((batch, npad), jnp.float32),
        in_specs=[vmem] * 14,
        out_specs=vmem,
        scratch_shapes=[
            pltpu.VMEM((_C1P, n_cols), jnp.float32),        # pooled conv1 output
            pltpu.VMEM((9 * _C1P, n_cols), jnp.bfloat16),   # conv2 stacked im2col
            pltpu.VMEM((9 * _C2P, n_cols), jnp.bfloat16),   # conv3 stacked im2col
            pltpu.VMEM((_C3, n_cols), jnp.float32),         # conv3 output
            pltpu.VMEM((batch, _C3 * hw), jnp.float32),     # flattened features
        ],
        cost_estimate=pl.CostEstimate(flops=int(flops), transcendentals=48,
                                      bytes_accessed=int(bytes_accessed)),
    )(cols1, p["w1"], p["b1"], p["g1"], p["be1"],
      p["w2"], p["b2"], p["w3"], p["b3"], p["g3"], p["be3"],
      mask, p["fcw_t"], p["fcb"])
    return out[:, :num_classes]


# ----------------------------------------------------------------------------
# Pure-JAX f32 reference (independent of the kernel's layout tricks)
# ----------------------------------------------------------------------------
def _reference_forward(x, raw):
    (w1, b1, g1, be1, w2, b2, w3, b3, g3, be3, fcw, fcb) = raw

    def conv(v, wgt, bias):
        out = lax.conv_general_dilated(v, wgt, (1, 1), ((1, 1), (1, 1)),
                                       dimension_numbers=("NCHW", "OIHW", "NCHW"))
        return out + bias.reshape(1, -1, 1, 1)

    def bn(v, g, be):
        mean = jnp.mean(v, axis=(0, 2, 3), keepdims=True)
        var = jnp.mean((v - mean) ** 2, axis=(0, 2, 3), keepdims=True)
        return ((v - mean) * lax.rsqrt(var + _EPS)
                * g.reshape(1, -1, 1, 1) + be.reshape(1, -1, 1, 1))

    v = jnp.maximum(bn(conv(x, w1, b1), g1, be1), 0.0)
    B, C, H, W = v.shape
    v = v.reshape(B, C, H // 2, 2, W // 2, 2).max(axis=(3, 5))
    v = jnp.maximum(conv(v, w2, b2), 0.0)
    v = jnp.maximum(bn(conv(v, w3, b3), g3, be3), 0.0)
    return v.reshape(B, -1) @ fcw.T + fcb


if __name__ == "__main__":
    num_classes = 100
    key = jax.random.PRNGKey(0)
    ks = jax.random.split(key, 13)

    raw = (
        jax.random.normal(ks[0], (12, 3, 3, 3), jnp.float32) * 0.1,    # conv1 w
        jax.random.normal(ks[1], (12,), jnp.float32) * 0.1,            # conv1 b
        jax.random.uniform(ks[2], (12,), jnp.float32, 0.5, 1.5),       # bn1 gamma
        jax.random.normal(ks[3], (12,), jnp.float32) * 0.1,            # bn1 beta
        jax.random.normal(ks[4], (20, 12, 3, 3), jnp.float32) * 0.1,   # conv2 w
        jax.random.normal(ks[5], (20,), jnp.float32) * 0.1,            # conv2 b
        jax.random.normal(ks[6], (32, 20, 3, 3), jnp.float32) * 0.1,   # conv3 w
        jax.random.normal(ks[7], (32,), jnp.float32) * 0.1,            # conv3 b
        jax.random.uniform(ks[8], (32,), jnp.float32, 0.5, 1.5),       # bn3 gamma
        jax.random.normal(ks[9], (32,), jnp.float32) * 0.1,            # bn3 beta
        jax.random.normal(ks[10], (num_classes, 32 * 16 * 16), jnp.float32) * 0.02,
        jax.random.normal(ks[11], (num_classes,), jnp.float32) * 0.1,
    )
    params = prepare_params(*raw)   # one-time pad / reorder / transpose / bf16 cast

    # Spatial 32x32 / 3 input channels are fixed by fc.in_features
    # (16*16*32 after one 2x pool).  Batch kept small.
    x = jax.random.normal(ks[12], (2, 3, 32, 32), jnp.float32)

    fwd = jax.jit(functools.partial(convnet_forward, num_classes=num_classes))
    out = jax.block_until_ready(fwd(x, params))
    assert out.shape == (2, num_classes), out.shape
    assert bool(jnp.all(jnp.isfinite(out)))

    # Loose check vs an f32 reference (kernel uses bf16 MXU operands, f32 accum).
    ref = _reference_forward(x, raw)
    tol = 0.05 * float(jnp.max(jnp.abs(ref))) + 0.15
    err = float(jnp.max(jnp.abs(out - ref)))
    assert err < tol, (err, tol)
    print("KERNEL_OK")
</pallas_src>

<mosaic_0001>
module attributes {stable_mosaic.version = 11 : i64} {
  func.func @_convnet_kernel(%arg0: memref<27x2048xbf16, #tpu.memory_space<vmem>>, %arg1: memref<16x27xbf16, #tpu.memory_space<vmem>>, %arg2: memref<16x1xf32, #tpu.memory_space<vmem>>, %arg3: memref<16x1xf32, #tpu.memory_space<vmem>>, %arg4: memref<16x1xf32, #tpu.memory_space<vmem>>, %arg5: memref<32x144xbf16, #tpu.memory_space<vmem>>, %arg6: memref<32x1xf32, #tpu.memory_space<vmem>>, %arg7: memref<32x288xbf16, #tpu.memory_space<vmem>>, %arg8: memref<32x1xf32, #tpu.memory_space<vmem>>, %arg9: memref<32x1xf32, #tpu.memory_space<vmem>>, %arg10: memref<32x1xf32, #tpu.memory_space<vmem>>, %arg11: memref<9x512xf32, #tpu.memory_space<vmem>>, %arg12: memref<8192x128xbf16, #tpu.memory_space<vmem>>, %arg13: memref<1x128xf32, #tpu.memory_space<vmem>>, %arg14: memref<2x128xf32, #tpu.memory_space<vmem>>, %arg15: memref<16x512xf32, #tpu.memory_space<vmem>>, %arg16: memref<144x512xbf16, #tpu.memory_space<vmem>>, %arg17: memref<288x512xbf16, #tpu.memory_space<vmem>>, %arg18: memref<32x512xf32, #tpu.memory_space<vmem>>, %arg19: memref<2x8192xf32, #tpu.memory_space<vmem>>) attributes {dimension_semantics = [], scalar_prefetch = 0 : i64, scratch_operands = 5 : i64, tpu.core_type = #tpu.core_type<tc>} {
    %c0 = arith.constant 0 : index
    %c0_0 = arith.constant 0 : index
    %0 = vector.load %arg1[%c0, %c0_0] : memref<16x27xbf16, #tpu.memory_space<vmem>>, vector<16x27xbf16>
    %c0_1 = arith.constant 0 : index
    %c0_2 = arith.constant 0 : index
    %1 = vector.load %arg0[%c0_1, %c0_2] : memref<27x2048xbf16, #tpu.memory_space<vmem>>, vector<27x2048xbf16>
    %cst = arith.constant dense<0.000000e+00> : vector<16x2048xf32>
    %2 = tpu.matmul %0, %1, %cst {dimension_numbers = #tpu.dot_dimension_numbers<[1], [0], [0], [1], [0, 0, 1, 1], [], []>} : vector<16x27xbf16>, vector<27x2048xbf16>, vector<16x2048xf32> -> vector<16x2048xf32>
    %c0_3 = arith.constant 0 : index
    %c0_4 = arith.constant 0 : index
    %3 = vector.load %arg2[%c0_3, %c0_4] : memref<16x1xf32, #tpu.memory_space<vmem>>, vector<16x1xf32>
    %4 = vector.broadcast %3 : vector<16x1xf32> to vector<16x2048xf32>
    %5 = arith.addf %2, %4 : vector<16x2048xf32>
    %cst_5 = arith.constant dense<0.000000e+00> : vector<16xf32>
    %6 = vector.multi_reduction <add>, %5, %cst_5 [1] : vector<16x2048xf32> to vector<16xf32>
    %7 = vector.shape_cast %6 : vector<16xf32> to vector<16x1xf32>
    %cst_6 = arith.constant 4.8828125E-4 : f32
    %8 = vector.broadcast %cst_6 : f32 to vector<16x1xf32>
    %9 = arith.mulf %7, %8 : vector<16x1xf32>
    %10 = vector.broadcast %9 : vector<16x1xf32> to vector<16x2048xf32>
    %11 = arith.subf %5, %10 : vector<16x2048xf32>
    %12 = arith.mulf %11, %11 : vector<16x2048xf32>
    %cst_7 = arith.constant dense<0.000000e+00> : vector<16xf32>
    %13 = vector.multi_reduction <add>, %12, %cst_7 [1] : vector<16x2048xf32> to vector<16xf32>
    %14 = vector.shape_cast %13 : vector<16xf32> to vector<16x1xf32>
    %cst_8 = arith.constant 4.8828125E-4 : f32
    %15 = vector.broadcast %cst_8 : f32 to vector<16x1xf32>
    %16 = arith.mulf %14, %15 : vector<16x1xf32>
    %cst_9 = arith.constant 9.99999974E-6 : f32
    %17 = vector.broadcast %cst_9 : f32 to vector<16x1xf32>
    %18 = arith.addf %16, %17 : vector<16x1xf32>
    %19 = math.rsqrt %18 : vector<16x1xf32>
    %20 = vector.broadcast %19 : vector<16x1xf32> to vector<16x2048xf32>
    %21 = arith.mulf %11, %20 : vector<16x2048xf32>
    %c0_10 = arith.constant 0 : index
    %c0_11 = arith.constant 0 : index
    %22 = vector.load %arg3[%c0_10, %c0_11] : memref<16x1xf32, #tpu.memory_space<vmem>>, vector<16x1xf32>
    %23 = vector.broadcast %22 : vector<16x1xf32> to vector<16x2048xf32>
    %24 = arith.mulf %21, %23 : vector<16x2048xf32>
    %c0_12 = arith.constant 0 : index
    %c0_13 = arith.constant 0 : index
    %25 = vector.load %arg4[%c0_12, %c0_13] : memref<16x1xf32, #tpu.memory_space<vmem>>, vector<16x1xf32>
    %26 = vector.broadcast %25 : vector<16x1xf32> to vector<16x2048xf32>
    %27 = arith.addf %24, %26 : vector<16x2048xf32>
    %cst_14 = arith.constant 0.000000e+00 : f32
    %28 = vector.broadcast %cst_14 : f32 to vector<16x2048xf32>
    %29 = arith.maximumf %27, %28 : vector<16x2048xf32>
    %30 = vector.extract_strided_slice %29 {offsets = [0, 0], sizes = [16, 256], strides = [1, 1]} : vector<16x2048xf32> to vector<16x256xf32>
    %31 = vector.extract_strided_slice %29 {offsets = [0, 256], sizes = [16, 256], strides = [1, 1]} : vector<16x2048xf32> to vector<16x256xf32>
    %32 = arith.maximumf %30, %31 : vector<16x256xf32>
    %33 = vector.extract_strided_slice %29 {offsets = [0, 512], sizes = [16, 256], strides = [1, 1]} : vector<16x2048xf32> to vector<16x256xf32>
    %34 = arith.maximumf %32, %33 : vector<16x256xf32>
    %35 = vector.extract_strided_slice %29 {offsets = [0, 768], sizes = [16, 256], strides = [1, 1]} : vector<16x2048xf32> to vector<16x256xf32>
    %36 = arith.maximumf %34, %35 : vector<16x256xf32>
    %c0_15 = arith.constant 0 : index
    %c0_16 = arith.constant 0 : index
    %37 = vector.load %arg15[%c0_15, %c0_16] : memref<16x512xf32, #tpu.memory_space<vmem>>, vector<16x256xf32>
    tpu.vector_store %arg15[%c0_15, %c0_16], %36 {strides = array<i32>} : memref<16x512xf32, #tpu.memory_space<vmem>>, vector<16x256xf32>,
    %38 = vector.extract_strided_slice %29 {offsets = [0, 1024], sizes = [16, 256], strides = [1, 1]} : vector<16x2048xf32> to vector<16x256xf32>
    %39 = vector.extract_strided_slice %29 {offsets = [0, 1280], sizes = [16, 256], strides = [1, 1]} : vector<16x2048xf32> to vector<16x256xf32>
    %40 = arith.maximumf %38, %39 : vector<16x256xf32>
    %41 = vector.extract_strided_slice %29 {offsets = [0, 1536], sizes = [16, 256], strides = [1, 1]} : vector<16x2048xf32> to vector<16x256xf32>
    %42 = arith.maximumf %40, %41 : vector<16x256xf32>
    %43 = vector.extract_strided_slice %29 {offsets = [0, 1792], sizes = [16, 256], strides = [1, 1]} : vector<16x2048xf32> to vector<16x256xf32>
    %44 = arith.maximumf %42, %43 : vector<16x256xf32>
    %c0_17 = arith.constant 0 : index
    %c256 = arith.constant 256 : index
    %45 = vector.load %arg15[%c0_17, %c256] : memref<16x512xf32, #tpu.memory_space<vmem>>, vector<16x256xf32>
    tpu.vector_store %arg15[%c0_17, %c256], %44 {strides = array<i32>} : memref<16x512xf32, #tpu.memory_space<vmem>>, vector<16x256xf32>,
    %c0_18 = arith.constant 0 : index
    %c0_19 = arith.constant 0 : index
    %46 = vector.load %arg15[%c0_18, %c0_19] : memref<16x512xf32, #tpu.memory_space<vmem>>, vector<16x512xf32>
    %c17_i32 = arith.constant 17 : i32
    %47 = tpu.dynamic_rotate %46 by %c17_i32 dim 1 : vector<16x512xf32>, i32 -> vector<16x512xf32>
    %c0_20 = arith.constant 0 : index
    %c0_21 = arith.constant 0 : index
    %48 = vector.load %arg11[%c0_20, %c0_21] : memref<9x512xf32, #tpu.memory_space<vmem>>, vector<1x512xf32>
    %49 = vector.broadcast %48 : vector<1x512xf32> to vector<16x512xf32>
    %50 = arith.mulf %47, %49 : vector<16x512xf32>
    %51 = arith.truncf %50 : vector<16x512xf32> to vector<16x512xbf16>
    %c0_22 = arith.constant 0 : index
    %c0_23 = arith.constant 0 : index
    %52 = vector.load %arg16[%c0_22, %c0_23] : memref<144x512xbf16, #tpu.memory_space<vmem>>, vector<16x512xbf16>
    tpu.vector_store %arg16[%c0_22, %c0_23], %51 {strides = array<i32>} : memref<144x512xbf16, #tpu.memory_space<vmem>>, vector<16x512xbf16>,
    %c16_i32 = arith.constant 16 : i32
    %53 = tpu.dynamic_rotate %46 by %c16_i32 dim 1 : vector<16x512xf32>, i32 -> vector<16x512xf32>
    %c1 = arith.constant 1 : index
    %c0_24 = arith.constant 0 : index
    %54 = vector.load %arg11[%c1, %c0_24] : memref<9x512xf32, #tpu.memory_space<vmem>>, vector<1x512xf32>
    %55 = vector.broadcast %54 : vector<1x512xf32> to vector<16x512xf32>
    %56 = arith.mulf %53, %55 : vector<16x512xf32>
    %57 = arith.truncf %56 : vector<16x512xf32> to vector<16x512xbf16>
    %c16 = arith.constant 16 : index
    %c0_25 = arith.constant 0 : index
    %58 = vector.load %arg16[%c16, %c0_25] : memref<144x512xbf16, #tpu.memory_space<vmem>>, vector<16x512xbf16>
    tpu.vector_store %arg16[%c16, %c0_25], %57 {strides = array<i32>} : memref<144x512xbf16, #tpu.memory_space<vmem>>, vector<16x512xbf16>,
    %c15_i32 = arith.constant 15 : i32
    %59 = tpu.dynamic_rotate %46 by %c15_i32 dim 1 : vector<16x512xf32>, i32 -> vector<16x512xf32>
    %c2 = arith.constant 2 : index
    %c0_26 = arith.constant 0 : index
    %60 = vector.load %arg11[%c2, %c0_26] : memref<9x512xf32, #tpu.memory_space<vmem>>, vector<1x512xf32>
    %61 = vector.broadcast %60 : vector<1x512xf32> to vector<16x512xf32>
    %62 = arith.mulf %59, %61 : vector<16x512xf32>
    %63 = arith.truncf %62 : vector<16x512xf32> to vector<16x512xbf16>
    %c32 = arith.constant 32 : index
    %c0_27 = arith.constant 0 : index
    %64 = vector.load %arg16[%c32, %c0_27] : memref<144x512xbf16, #tpu.memory_space<vmem>>, vector<16x512xbf16>
    tpu.vector_store %arg16[%c32, %c0_27], %63 {strides = array<i32>} : memref<144x512xbf16, #tpu.memory_space<vmem>>, vector<16x512xbf16>,
    %c1_i32 = arith.constant 1 : i32
    %65 = tpu.dynamic_rotate %46 by %c1_i32 dim 1 : vector<16x512xf32>, i32 -> vector<16x512xf32>
    %c3 = arith.constant 3 : index
    %c0_28 = arith.constant 0 : index
    %66 = vector.load %arg11[%c3, %c0_28] : memref<9x512xf32, #tpu.memory_space<vmem>>, vector<1x512xf32>
    %67 = vector.broadcast %66 : vector<1x512xf32> to vector<16x512xf32>
    %68 = arith.mulf %65, %67 : vector<16x512xf32>
    %69 = arith.truncf %68 : vector<16x512xf32> to vector<16x512xbf16>
    %c48 = arith.constant 48 : index
    %c0_29 = arith.constant 0 : index
    %70 = vector.load %arg16[%c48, %c0_29] : memref<144x512xbf16, #tpu.memory_space<vmem>>, vector<16x512xbf16>
    tpu.vector_store %arg16[%c48, %c0_29], %69 {strides = array<i32>} : memref<144x512xbf16, #tpu.memory_space<vmem>>, vector<16x512xbf16>,
    %c4 = arith.constant 4 : index
    %c0_30 = arith.constant 0 : index
    %71 = vector.load %arg11[%c4, %c0_30] : memref<9x512xf32, #tpu.memory_space<vmem>>, vector<1x512xf32>
    %72 = vector.broadcast %71 : vector<1x512xf32> to vector<16x512xf32>
    %73 = arith.mulf %46, %72 : vector<16x512xf32>
    %74 = arith.truncf %73 : vector<16x512xf32> to vector<16x512xbf16>
    %c64 = arith.constant 64 : index
    %c0_31 = arith.constant 0 : index
    %75 = vector.load %arg16[%c64, %c0_31] : memref<144x512xbf16, #tpu.memory_space<vmem>>, vector<16x512xbf16>
    tpu.vector_store %arg16[%c64, %c0_31], %74 {strides = array<i32>} : memref<144x512xbf16, #tpu.memory_space<vmem>>, vector<16x512xbf16>,
    %c511_i32 = arith.constant 511 : i32
    %76 = tpu.dynamic_rotate %46 by %c511_i32 dim 1 : vector<16x512xf32>, i32 -> vector<16x512xf32>
    %c5 = arith.constant 5 : index
    %c0_32 = arith.constant 0 : index
    %77 = vector.load %arg11[%c5, %c0_32] : memref<9x512xf32, #tpu.memory_space<vmem>>, vector<1x512xf32>
    %78 = vector.broadcast %77 : vector<1x512xf32> to vector<16x512xf32>
    %79 = arith.mulf %76, %78 : vector<16x512xf32>
    %80 = arith.truncf %79 : vector<16x512xf32> to vector<16x512xbf16>
    %c80 = arith.constant 80 : index
    %c0_33 = arith.constant 0 : index
    %81 = vector.load %arg16[%c80, %c0_33] : memref<144x512xbf16, #tpu.memory_space<vmem>>, vector<16x512xbf16>
    tpu.vector_store %arg16[%c80, %c0_33], %80 {strides = array<i32>} : memref<144x512xbf16, #tpu.memory_space<vmem>>, vector<16x512xbf16>,
    %c497_i32 = arith.constant 497 : i32
    %82 = tpu.dynamic_rotate %46 by %c497_i32 dim 1 : vector<16x512xf32>, i32 -> vector<16x512xf32>
    %c6 = arith.constant 6 : index
    %c0_34 = arith.constant 0 : index
    %83 = vector.load %arg11[%c6, %c0_34] : memref<9x512xf32, #tpu.memory_space<vmem>>, vector<1x512xf32>
    %84 = vector.broadcast %83 : vector<1x512xf32> to vector<16x512xf32>
    %85 = arith.mulf %82, %84 : vector<16x512xf32>
    %86 = arith.truncf %85 : vector<16x512xf32> to vector<16x512xbf16>
    %c96 = arith.constant 96 : index
    %c0_35 = arith.constant 0 : index
    %87 = vector.load %arg16[%c96, %c0_35] : memref<144x512xbf16, #tpu.memory_space<vmem>>, vector<16x512xbf16>
    tpu.vector_store %arg16[%c96, %c0_35], %86 {strides = array<i32>} : memref<144x512xbf16, #tpu.memory_space<vmem>>, vector<16x512xbf16>,
    %c496_i32 = arith.constant 496 : i32
    %88 = tpu.dynamic_rotate %46 by %c496_i32 dim 1 : vector<16x512xf32>, i32 -> vector<16x512xf32>
    %c7 = arith.constant 7 : index
    %c0_36 = arith.constant 0 : index
    %89 = vector.load %arg11[%c7, %c0_36] : memref<9x512xf32, #tpu.memory_space<vmem>>, vector<1x512xf32>
    %90 = vector.broadcast %89 : vector<1x512xf32> to vector<16x512xf32>
    %91 = arith.mulf %88, %90 : vector<16x512xf32>
    %92 = arith.truncf %91 : vector<16x512xf32> to vector<16x512xbf16>
    %c112 = arith.constant 112 : index
    %c0_37 = arith.constant 0 : index
    %93 = vector.load %arg16[%c112, %c0_37] : memref<144x512xbf16, #tpu.memory_space<vmem>>, vector<16x512xbf16>
    tpu.vector_store %arg16[%c112, %c0_37], %92 {strides = array<i32>} : memref<144x512xbf16, #tpu.memory_space<vmem>>, vector<16x512xbf16>,
    %c495_i32 = arith.constant 495 : i32
    %94 = tpu.dynamic_rotate %46 by %c495_i32 dim 1 : vector<16x512xf32>, i32 -> vector<16x512xf32>
    %c8 = arith.constant 8 : index
    %c0_38 = arith.constant 0 : index
    %95 = vector.load %arg11[%c8, %c0_38] : memref<9x512xf32, #tpu.memory_space<vmem>>, vector<1x512xf32>
    %96 = vector.broadcast %95 : vector<1x512xf32> to vector<16x512xf32>
    %97 = arith.mulf %94, %96 : vector<16x512xf32>
    %98 = arith.truncf %97 : vector<16x512xf32> to vector<16x512xbf16>
    %c128 = arith.constant 128 : index
    %c0_39 = arith.constant 0 : index
    %99 = vector.load %arg16[%c128, %c0_39] : memref<144x512xbf16, #tpu.memory_space<vmem>>, vector<16x512xbf16>
    tpu.vector_store %arg16[%c128, %c0_39], %98 {strides = array<i32>} : memref<144x512xbf16, #tpu.memory_space<vmem>>, vector<16x512xbf16>,
    %c0_40 = arith.constant 0 : index
    %c0_41 = arith.constant 0 : index
    %100 = vector.load %arg5[%c0_40, %c0_41] : memref<32x144xbf16, #tpu.memory_space<vmem>>, vector<32x144xbf16>
    %c0_42 = arith.constant 0 : index
    %c0_43 = arith.constant 0 : index
    %101 = vector.load %arg16[%c0_42, %c0_43] : memref<144x512xbf16, #tpu.memory_space<vmem>>, vector<144x512xbf16>
    %cst_44 = arith.constant dense<0.000000e+00> : vector<32x512xf32>
    %102 = tpu.matmul %100, %101, %cst_44 {dimension_numbers = #tpu.dot_dimension_numbers<[1], [0], [0], [1], [0, 0, 1, 1], [], []>} : vector<32x144xbf16>, vector<144x512xbf16>, vector<32x512xf32> -> vector<32x512xf32>
    %c0_45 = arith.constant 0 : index
    %c0_46 = arith.constant 0 : index
    %103 = vector.load %arg6[%c0_45, %c0_46] : memref<32x1xf32, #tpu.memory_space<vmem>>, vector<32x1xf32>
    %104 = vector.broadcast %103 : vector<32x1xf32> to vector<32x512xf32>
    %105 = arith.addf %102, %104 : vector<32x512xf32>
    %cst_47 = arith.constant 0.000000e+00 : f32
    %106 = vector.broadcast %cst_47 : f32 to vector<32x512xf32>
    %107 = arith.maximumf %105, %106 : vector<32x512xf32>
    %c17_i32_48 = arith.constant 17 : i32
    %108 = tpu.dynamic_rotate %107 by %c17_i32_48 dim 1 : vector<32x512xf32>, i32 -> vector<32x512xf32>
    %c0_49 = arith.constant 0 : index
    %c0_50 = arith.constant 0 : index
    %109 = vector.load %arg11[%c0_49, %c0_50] : memref<9x512xf32, #tpu.memory_space<vmem>>, vector<1x512xf32>
    %110 = vector.broadcast %109 : vector<1x512xf32> to vector<32x512xf32>
    %111 = arith.mulf %108, %110 : vector<32x512xf32>
    %112 = arith.truncf %111 : vector<32x512xf32> to vector<32x512xbf16>
    %c0_51 = arith.constant 0 : index
    %c0_52 = arith.constant 0 : index
    %113 = vector.load %arg17[%c0_51, %c0_52] : memref<288x512xbf16, #tpu.memory_space<vmem>>, vector<32x512xbf16>
    tpu.vector_store %arg17[%c0_51, %c0_52], %112 {strides = array<i32>} : memref<288x512xbf16, #tpu.memory_space<vmem>>, vector<32x512xbf16>,
    %c16_i32_53 = arith.constant 16 : i32
    %114 = tpu.dynamic_rotate %107 by %c16_i32_53 dim 1 : vector<32x512xf32>, i32 -> vector<32x512xf32>
    %c1_54 = arith.constant 1 : index
    %c0_55 = arith.constant 0 : index
    %115 = vector.load %arg11[%c1_54, %c0_55] : memref<9x512xf32, #tpu.memory_space<vmem>>, vector<1x512xf32>
    %116 = vector.broadcast %115 : vector<1x512xf32> to vector<32x512xf32>
    %117 = arith.mulf %114, %116 : vector<32x512xf32>
    %118 = arith.truncf %117 : vector<32x512xf32> to vector<32x512xbf16>
    %c32_56 = arith.constant 32 : index
    %c0_57 = arith.constant 0 : index
    %119 = vector.load %arg17[%c32_56, %c0_57] : memref<288x512xbf16, #tpu.memory_space<vmem>>, vector<32x512xbf16>
    tpu.vector_store %arg17[%c32_56, %c0_57], %118 {strides = array<i32>} : memref<288x512xbf16, #tpu.memory_space<vmem>>, vector<32x512xbf16>,
    %c15_i32_58 = arith.constant 15 : i32
    %120 = tpu.dynamic_rotate %107 by %c15_i32_58 dim 1 : vector<32x512xf32>, i32 -> vector<32x512xf32>
    %c2_59 = arith.constant 2 : index
    %c0_60 = arith.constant 0 : index
    %121 = vector.load %arg11[%c2_59, %c0_60] : memref<9x512xf32, #tpu.memory_space<vmem>>, vector<1x512xf32>
    %122 = vector.broadcast %121 : vector<1x512xf32> to vector<32x512xf32>
    %123 = arith.mulf %120, %122 : vector<32x512xf32>
    %124 = arith.truncf %123 : vector<32x512xf32> to vector<32x512xbf16>
    %c64_61 = arith.constant 64 : index
    %c0_62 = arith.constant 0 : index
    %125 = vector.load %arg17[%c64_61, %c0_62] : memref<288x512xbf16, #tpu.memory_space<vmem>>, vector<32x512xbf16>
    tpu.vector_store %arg17[%c64_61, %c0_62], %124 {strides = array<i32>} : memref<288x512xbf16, #tpu.memory_space<vmem>>, vector<32x512xbf16>,
    %c1_i32_63 = arith.constant 1 : i32
    %126 = tpu.dynamic_rotate %107 by %c1_i32_63 dim 1 : vector<32x512xf32>, i32 -> vector<32x512xf32>
    %c3_64 = arith.constant 3 : index
    %c0_65 = arith.constant 0 : index
    %127 = vector.load %arg11[%c3_64, %c0_65] : memref<9x512xf32, #tpu.memory_space<vmem>>, vector<1x512xf32>
    %128 = vector.broadcast %127 : vector<1x512xf32> to vector<32x512xf32>
    %129 = arith.mulf %126, %128 : vector<32x512xf32>
    %130 = arith.truncf %129 : vector<32x512xf32> to vector<32x512xbf16>
    %c96_66 = arith.constant 96 : index
    %c0_67 = arith.constant 0 : index
    %131 = vector.load %arg17[%c96_66, %c0_67] : memref<288x512xbf16, #tpu.memory_space<vmem>>, vector<32x512xbf16>
    tpu.vector_store %arg17[%c96_66, %c0_67], %130 {strides = array<i32>} : memref<288x512xbf16, #tpu.memory_space<vmem>>, vector<32x512xbf16>,
    %c4_68 = arith.constant 4 : index
    %c0_69 = arith.constant 0 : index
    %132 = vector.load %arg11[%c4_68, %c0_69] : memref<9x512xf32, #tpu.memory_space<vmem>>, vector<1x512xf32>
    %133 = vector.broadcast %132 : vector<1x512xf32> to vector<32x512xf32>
    %134 = arith.mulf %107, %133 : vector<32x512xf32>
    %135 = arith.truncf %134 : vector<32x512xf32> to vector<32x512xbf16>
    %c128_70 = arith.constant 128 : index
    %c0_71 = arith.constant 0 : index
    %136 = vector.load %arg17[%c128_70, %c0_71] : memref<288x512xbf16, #tpu.memory_space<vmem>>, vector<32x512xbf16>
    tpu.vector_store %arg17[%c128_70, %c0_71], %135 {strides = array<i32>} : memref<288x512xbf16, #tpu.memory_space<vmem>>, vector<32x512xbf16>,
    %c511_i32_72 = arith.constant 511 : i32
    %137 = tpu.dynamic_rotate %107 by %c511_i32_72 dim 1 : vector<32x512xf32>, i32 -> vector<32x512xf32>
    %c5_73 = arith.constant 5 : index
    %c0_74 = arith.constant 0 : index
    %138 = vector.load %arg11[%c5_73, %c0_74] : memref<9x512xf32, #tpu.memory_space<vmem>>, vector<1x512xf32>
    %139 = vector.broadcast %138 : vector<1x512xf32> to vector<32x512xf32>
    %140 = arith.mulf %137, %139 : vector<32x512xf32>
    %141 = arith.truncf %140 : vector<32x512xf32> to vector<32x512xbf16>
    %c160 = arith.constant 160 : index
    %c0_75 = arith.constant 0 : index
    %142 = vector.load %arg17[%c160, %c0_75] : memref<288x512xbf16, #tpu.memory_space<vmem>>, vector<32x512xbf16>
    tpu.vector_store %arg17[%c160, %c0_75], %141 {strides = array<i32>} : memref<288x512xbf16, #tpu.memory_space<vmem>>, vector<32x512xbf16>,
    %c497_i32_76 = arith.constant 497 : i32
    %143 = tpu.dynamic_rotate %107 by %c497_i32_76 dim 1 : vector<32x512xf32>, i32 -> vector<32x512xf32>
    %c6_77 = arith.constant 6 : index
    %c0_78 = arith.constant 0 : index
    %144 = vector.load %arg11[%c6_77, %c0_78] : memref<9x512xf32, #tpu.memory_space<vmem>>, vector<1x512xf32>
    %145 = vector.broadcast %144 : vector<1x512xf32> to vector<32x512xf32>
    %146 = arith.mulf %143, %145 : vector<32x512xf32>
    %147 = arith.truncf %146 : vector<32x512xf32> to vector<32x512xbf16>
    %c192 = arith.constant 192 : index
    %c0_79 = arith.constant 0 : index
    %148 = vector.load %arg17[%c192, %c0_79] : memref<288x512xbf16, #tpu.memory_space<vmem>>, vector<32x512xbf16>
    tpu.vector_store %arg17[%c192, %c0_79], %147 {strides = array<i32>} : memref<288x512xbf16, #tpu.memory_space<vmem>>, vector<32x512xbf16>,
    %c496_i32_80 = arith.constant 496 : i32
    %149 = tpu.dynamic_rotate %107 by %c496_i32_80 dim 1 : vector<32x512xf32>, i32 -> vector<32x512xf32>
    %c7_81 = arith.constant 7 : index
    %c0_82 = arith.constant 0 : index
    %150 = vector.load %arg11[%c7_81, %c0_82] : memref<9x512xf32, #tpu.memory_space<vmem>>, vector<1x512xf32>
    %151 = vector.broadcast %150 : vector<1x512xf32> to vector<32x512xf32>
    %152 = arith.mulf %149, %151 : vector<32x512xf32>
    %153 = arith.truncf %152 : vector<32x512xf32> to vector<32x512xbf16>
    %c224 = arith.constant 224 : index
    %c0_83 = arith.constant 0 : index
    %154 = vector.load %arg17[%c224, %c0_83] : memref<288x512xbf16, #tpu.memory_space<vmem>>, vector<32x512xbf16>
    tpu.vector_store %arg17[%c224, %c0_83], %153 {strides = array<i32>} : memref<288x512xbf16, #tpu.memory_space<vmem>>, vector<32x512xbf16>,
    %c495_i32_84 = arith.constant 495 : i32
    %155 = tpu.dynamic_rotate %107 by %c495_i32_84 dim 1 : vector<32x512xf32>, i32 -> vector<32x512xf32>
    %c8_85 = arith.constant 8 : index
    %c0_86 = arith.constant 0 : index
    %156 = vector.load %arg11[%c8_85, %c0_86] : memref<9x512xf32, #tpu.memory_space<vmem>>, vector<1x512xf32>
    %157 = vector.broadcast %156 : vector<1x512xf32> to vector<32x512xf32>
    %158 = arith.mulf %155, %157 : vector<32x512xf32>
    %159 = arith.truncf %158 : vector<32x512xf32> to vector<32x512xbf16>
    %c256_87 = arith.constant 256 : index
    %c0_88 = arith.constant 0 : index
    %160 = vector.load %arg17[%c256_87, %c0_88] : memref<288x512xbf16, #tpu.memory_space<vmem>>, vector<32x512xbf16>
    tpu.vector_store %arg17[%c256_87, %c0_88], %159 {strides = array<i32>} : memref<288x512xbf16, #tpu.memory_space<vmem>>, vector<32x512xbf16>,
    %c0_89 = arith.constant 0 : index
    %c0_90 = arith.constant 0 : index
    %161 = vector.load %arg7[%c0_89, %c0_90] : memref<32x288xbf16, #tpu.memory_space<vmem>>, vector<32x288xbf16>
    %c0_91 = arith.constant 0 : index
    %c0_92 = arith.constant 0 : index
    %162 = vector.load %arg17[%c0_91, %c0_92] : memref<288x512xbf16, #tpu.memory_space<vmem>>, vector<288x512xbf16>
    %cst_93 = arith.constant dense<0.000000e+00> : vector<32x512xf32>
    %163 = tpu.matmul %161, %162, %cst_93 {dimension_numbers = #tpu.dot_dimension_numbers<[1], [0], [0], [1], [0, 0, 1, 1], [], []>} : vector<32x288xbf16>, vector<288x512xbf16>, vector<32x512xf32> -> vector<32x512xf32>
    %c0_94 = arith.constant 0 : index
    %c0_95 = arith.constant 0 : index
    %164 = vector.load %arg8[%c0_94, %c0_95] : memref<32x1xf32, #tpu.memory_space<vmem>>, vector<32x1xf32>
    %165 = vector.broadcast %164 : vector<32x1xf32> to vector<32x512xf32>
    %166 = arith.addf %163, %165 : vector<32x512xf32>
    %cst_96 = arith.constant dense<0.000000e+00> : vector<32xf32>
    %167 = vector.multi_reduction <add>, %166, %cst_96 [1] : vector<32x512xf32> to vector<32xf32>
    %168 = vector.shape_cast %167 : vector<32xf32> to vector<32x1xf32>
    %cst_97 = arith.constant 0.001953125 : f32
    %169 = vector.broadcast %cst_97 : f32 to vector<32x1xf32>
    %170 = arith.mulf %168, %169 : vector<32x1xf32>
    %171 = vector.broadcast %170 : vector<32x1xf32> to vector<32x512xf32>
    %172 = arith.subf %166, %171 : vector<32x512xf32>
    %173 = arith.mulf %172, %172 : vector<32x512xf32>
    %cst_98 = arith.constant dense<0.000000e+00> : vector<32xf32>
    %174 = vector.multi_reduction <add>, %173, %cst_98 [1] : vector<32x512xf32> to vector<32xf32>
    %175 = vector.shape_cast %174 : vector<32xf32> to vector<32x1xf32>
    %cst_99 = arith.constant 0.001953125 : f32
    %176 = vector.broadcast %cst_99 : f32 to vector<32x1xf32>
    %177 = arith.mulf %175, %176 : vector<32x1xf32>
    %cst_100 = arith.constant 9.99999974E-6 : f32
    %178 = vector.broadcast %cst_100 : f32 to vector<32x1xf32>
    %179 = arith.addf %177, %178 : vector<32x1xf32>
    %180 = math.rsqrt %179 : vector<32x1xf32>
    %181 = vector.broadcast %180 : vector<32x1xf32> to vector<32x512xf32>
    %182 = arith.mulf %172, %181 : vector<32x512xf32>
    %c0_101 = arith.constant 0 : index
    %c0_102 = arith.constant 0 : index
    %183 = vector.load %arg9[%c0_101, %c0_102] : memref<32x1xf32, #tpu.memory_space<vmem>>, vector<32x1xf32>
    %184 = vector.broadcast %183 : vector<32x1xf32> to vector<32x512xf32>
    %185 = arith.mulf %182, %184 : vector<32x512xf32>
    %c0_103 = arith.constant 0 : index
    %c0_104 = arith.constant 0 : index
    %186 = vector.load %arg10[%c0_103, %c0_104] : memref<32x1xf32, #tpu.memory_space<vmem>>, vector<32x1xf32>
    %187 = vector.broadcast %186 : vector<32x1xf32> to vector<32x512xf32>
    %188 = arith.addf %185, %187 : vector<32x512xf32>
    %cst_105 = arith.constant 0.000000e+00 : f32
    %189 = vector.broadcast %cst_105 : f32 to vector<32x512xf32>
    %190 = arith.maximumf %188, %189 : vector<32x512xf32>
    %c0_106 = arith.constant 0 : index
    %c0_107 = arith.constant 0 : index
    %191 = vector.load %arg18[%c0_106, %c0_107] : memref<32x512xf32, #tpu.memory_space<vmem>>, vector<32x512xf32>
    tpu.vector_store %arg18[%c0_106, %c0_107], %190 {strides = array<i32>} : memref<32x512xf32, #tpu.memory_space<vmem>>, vector<32x512xf32>,
    %c0_108 = arith.constant 0 : index
    %c0_109 = arith.constant 0 : index
    %192 = vector.load %arg18[%c0_108, %c0_109] : memref<32x512xf32, #tpu.memory_space<vmem>>, vector<1x256xf32>
    %c0_110 = arith.constant 0 : index
    %c0_111 = arith.constant 0 : index
    %193 = vector.load %arg19[%c0_110, %c0_111] : memref<2x8192xf32, #tpu.memory_space<vmem>>, vector<1x256xf32>
    tpu.vector_store %arg19[%c0_110, %c0_111], %192 {strides = array<i32>} : memref<2x8192xf32, #tpu.memory_space<vmem>>, vector<1x256xf32>,
    %c1_112 = arith.constant 1 : index
    %c0_113 = arith.constant 0 : index
    %194 = vector.load %arg18[%c1_112, %c0_113] : memref<32x512xf32, #tpu.memory_space<vmem>>, vector<1x256xf32>
    %c0_114 = arith.constant 0 : index
    %c256_115 = arith.constant 256 : index
    %195 = vector.load %arg19[%c0_114, %c256_115] : memref<2x8192xf32, #tpu.memory_space<vmem>>, vector<1x256xf32>
    tpu.vector_store %arg19[%c0_114, %c256_115], %194 {strides = array<i32>} : memref<2x8192xf32, #tpu.memory_space<vmem>>, vector<1x256xf32>,
    %c2_116 = arith.constant 2 : index
    %c0_117 = arith.constant 0 : index
    %196 = vector.load %arg18[%c2_116, %c0_117] : memref<32x512xf32, #tpu.memory_space<vmem>>, vector<1x256xf32>
    %c0_118 = arith.constant 0 : index
    %c512 = arith.constant 512 : index
    %197 = vector.load %arg19[%c0_118, %c512] : memref<2x8192xf32, #tpu.memory_space<vmem>>, vector<1x256xf32>
    tpu.vector_store %arg19[%c0_118, %c512], %196 {strides = array<i32>} : memref<2x8192xf32, #tpu.memory_space<vmem>>, vector<1x256xf32>,
    %c3_119 = arith.constant 3 : index
    %c0_120 = arith.constant 0 : index
    %198 = vector.load %arg18[%c3_119, %c0_120] : memref<32x512xf32, #tpu.memory_space<vmem>>, vector<1x256xf32>
    %c0_121 = arith.constant 0 : index
    %c768 = arith.constant 768 : index
    %199 = vector.load %arg19[%c0_121, %c768] : memref<2x8192xf32, #tpu.memory_space<vmem>>, vector<1x256xf32>
    tpu.vector_store %arg19[%c0_121, %c768], %198 {strides = array<i32>} : memref<2x8192xf32, #tpu.memory_space<vmem>>, vector<1x256xf32>,
    %c4_122 = arith.constant 4 : index
    %c0_123 = arith.constant 0 : index
    %200 = vector.load %arg18[%c4_122, %c0_123] : memref<32x512xf32, #tpu.memory_space<vmem>>, vector<1x256xf32>
    %c0_124 = arith.constant 0 : index
    %c1024 = arith.constant 1024 : index
    %201 = vector.load %arg19[%c0_124, %c1024] : memref<2x8192xf32, #tpu.memory_space<vmem>>, vector<1x256xf32>
    tpu.vector_store %arg19[%c0_124, %c1024], %200 {strides = array<i32>} : memref<2x8192xf32, #tpu.memory_space<vmem>>, vector<1x256xf32>,
    %c5_125 = arith.constant 5 : index
    %c0_126 = arith.constant 0 : index
    %202 = vector.load %arg18[%c5_125, %c0_126] : memref<32x512xf32, #tpu.memory_space<vmem>>, vector<1x256xf32>
    %c0_127 = arith.constant 0 : index
    %c1280 = arith.constant 1280 : index
    %203 = vector.load %arg19[%c0_127, %c1280] : memref<2x8192xf32, #tpu.memory_space<vmem>>, vector<1x256xf32>
    tpu.vector_store %arg19[%c0_127, %c1280], %202 {strides = array<i32>} : memref<2x8192xf32, #tpu.memory_space<vmem>>, vector<1x256xf32>,
    %c6_128 = arith.constant 6 : index
    %c0_129 = arith.constant 0 : index
    %204 = vector.load %arg18[%c6_128, %c0_129] : memref<32x512xf32, #tpu.memory_space<vmem>>, vector<1x256xf32>
    %c0_130 = arith.constant 0 : index
    %c1536 = arith.constant 1536 : index
    %205 = vector.load %arg19[%c0_130, %c1536] : memref<2x8192xf32, #tpu.memory_space<vmem>>, vector<1x256xf32>
    tpu.vector_store %arg19[%c0_130, %c1536], %204 {strides = array<i32>} : memref<2x8192xf32, #tpu.memory_space<vmem>>, vector<1x256xf32>,
    %c7_131 = arith.constant 7 : index
    %c0_132 = arith.constant 0 : index
    %206 = vector.load %arg18[%c7_131, %c0_132] : memref<32x512xf32, #tpu.memory_space<vmem>>, vector<1x256xf32>
    %c0_133 = arith.constant 0 : index
    %c1792 = arith.constant 1792 : index
    %207 = vector.load %arg19[%c0_133, %c1792] : memref<2x8192xf32, #tpu.memory_space<vmem>>, vector<1x256xf32>
    tpu.vector_store %arg19[%c0_133, %c1792], %206 {strides = array<i32>} : memref<2x8192xf32, #tpu.memory_space<vmem>>, vector<1x256xf32>,
    %c8_134 = arith.constant 8 : index
    %c0_135 = arith.constant 0 : index
    %208 = vector.load %arg18[%c8_134, %c0_135] : memref<32x512xf32, #tpu.memory_space<vmem>>, vector<1x256xf32>
    %c0_136 = arith.constant 0 : index
    %c2048 = arith.constant 2048 : index
    %209 = vector.load %arg19[%c0_136, %c2048] : memref<2x8192xf32, #tpu.memory_space<vmem>>, vector<1x256xf32>
    tpu.vector_store %arg19[%c0_136, %c2048], %208 {strides = array<i32>} : memref<2x8192xf32, #tpu.memory_space<vmem>>, vector<1x256xf32>,
    %c9 = arith.constant 9 : index
    %c0_137 = arith.constant 0 : index
    %210 = vector.load %arg18[%c9, %c0_137] : memref<32x512xf32, #tpu.memory_space<vmem>>, vector<1x256xf32>
    %c0_138 = arith.constant 0 : index
    %c2304 = arith.constant 2304 : index
    %211 = vector.load %arg19[%c0_138, %c2304] : memref<2x8192xf32, #tpu.memory_space<vmem>>, vector<1x256xf32>
    tpu.vector_store %arg19[%c0_138, %c2304], %210 {strides = array<i32>} : memref<2x8192xf32, #tpu.memory_space<vmem>>, vector<1x256xf32>,
    %c10 = arith.constant 10 : index
    %c0_139 = arith.constant 0 : index
    %212 = vector.load %arg18[%c10, %c0_139] : memref<32x512xf32, #tpu.memory_space<vmem>>, vector<1x256xf32>
    %c0_140 = arith.constant 0 : index
    %c2560 = arith.constant 2560 : index
    %213 = vector.load %arg19[%c0_140, %c2560] : memref<2x8192xf32, #tpu.memory_space<vmem>>, vector<1x256xf32>
    tpu.vector_store %arg19[%c0_140, %c2560], %212 {strides = array<i32>} : memref<2x8192xf32, #tpu.memory_space<vmem>>, vector<1x256xf32>,
    %c11 = arith.constant 11 : index
    %c0_141 = arith.constant 0 : index
    %214 = vector.load %arg18[%c11, %c0_141] : memref<32x512xf32, #tpu.memory_space<vmem>>, vector<1x256xf32>
    %c0_142 = arith.constant 0 : index
    %c2816 = arith.constant 2816 : index
    %215 = vector.load %arg19[%c0_142, %c2816] : memref<2x8192xf32, #tpu.memory_space<vmem>>, vector<1x256xf32>
    tpu.vector_store %arg19[%c0_142, %c2816], %214 {strides = array<i32>} : memref<2x8192xf32, #tpu.memory_space<vmem>>, vector<1x256xf32>,
    %c12 = arith.constant 12 : index
    %c0_143 = arith.constant 0 : index
    %216 = vector.load %arg18[%c12, %c0_143] : memref<32x512xf32, #tpu.memory_space<vmem>>, vector<1x256xf32>
    %c0_144 = arith.constant 0 : index
    %c3072 = arith.constant 3072 : index
    %217 = vector.load %arg19[%c0_144, %c3072] : memref<2x8192xf32, #tpu.memory_space<vmem>>, vector<1x256xf32>
    tpu.vector_store %arg19[%c0_144, %c3072], %216 {strides = array<i32>} : memref<2x8192xf32, #tpu.memory_space<vmem>>, vector<1x256xf32>,
    %c13 = arith.constant 13 : index
    %c0_145 = arith.constant 0 : index
    %218 = vector.load %arg18[%c13, %c0_145] : memref<32x512xf32, #tpu.memory_space<vmem>>, vector<1x256xf32>
    %c0_146 = arith.constant 0 : index
    %c3328 = arith.constant 3328 : index
    %219 = vector.load %arg19[%c0_146, %c3328] : memref<2x8192xf32, #tpu.memory_space<vmem>>, vector<1x256xf32>
    tpu.vector_store %arg19[%c0_146, %c3328], %218 {strides = array<i32>} : memref<2x8192xf32, #tpu.memory_space<vmem>>, vector<1x256xf32>,
    %c14 = arith.constant 14 : index
    %c0_147 = arith.constant 0 : index
    %220 = vector.load %arg18[%c14, %c0_147] : memref<32x512xf32, #tpu.memory_space<vmem>>, vector<1x256xf32>
    %c0_148 = arith.constant 0 : index
    %c3584 = arith.constant 3584 : index
    %221 = vector.load %arg19[%c0_148, %c3584] : memref<2x8192xf32, #tpu.memory_space<vmem>>, vector<1x256xf32>
    tpu.vector_store %arg19[%c0_148, %c3584], %220 {strides = array<i32>} : memref<2x8192xf32, #tpu.memory_space<vmem>>, vector<1x256xf32>,
    %c15 = arith.constant 15 : index
    %c0_149 = arith.constant 0 : index
    %222 = vector.load %arg18[%c15, %c0_149] : memref<32x512xf32, #tpu.memory_space<vmem>>, vector<1x256xf32>
    %c0_150 = arith.constant 0 : index
    %c3840 = arith.constant 3840 : index
    %223 = vector.load %arg19[%c0_150, %c3840] : memref<2x8192xf32, #tpu.memory_space<vmem>>, vector<1x256xf32>
    tpu.vector_store %arg19[%c0_150, %c3840], %222 {strides = array<i32>} : memref<2x8192xf32, #tpu.memory_space<vmem>>, vector<1x256xf32>,
    %c16_151 = arith.constant 16 : index
    %c0_152 = arith.constant 0 : index
    %224 = vector.load %arg18[%c16_151, %c0_152] : memref<32x512xf32, #tpu.memory_space<vmem>>, vector<1x256xf32>
    %c0_153 = arith.constant 0 : index
    %c4096 = arith.constant 4096 : index
    %225 = vector.load %arg19[%c0_153, %c4096] : memref<2x8192xf32, #tpu.memory_space<vmem>>, vector<1x256xf32>
    tpu.vector_store %arg19[%c0_153, %c4096], %224 {strides = array<i32>} : memref<2x8192xf32, #tpu.memory_space<vmem>>, vector<1x256xf32>,
    %c17 = arith.constant 17 : index
    %c0_154 = arith.constant 0 : index
    %226 = vector.load %arg18[%c17, %c0_154] : memref<32x512xf32, #tpu.memory_space<vmem>>, vector<1x256xf32>
    %c0_155 = arith.constant 0 : index
    %c4352 = arith.constant 4352 : index
    %227 = vector.load %arg19[%c0_155, %c4352] : memref<2x8192xf32, #tpu.memory_space<vmem>>, vector<1x256xf32>
    tpu.vector_store %arg19[%c0_155, %c4352], %226 {strides = array<i32>} : memref<2x8192xf32, #tpu.memory_space<vmem>>, vector<1x256xf32>,
    %c18 = arith.constant 18 : index
    %c0_156 = arith.constant 0 : index
    %228 = vector.load %arg18[%c18, %c0_156] : memref<32x512xf32, #tpu.memory_space<vmem>>, vector<1x256xf32>
    %c0_157 = arith.constant 0 : index
    %c4608 = arith.constant 4608 : index
    %229 = vector.load %arg19[%c0_157, %c4608] : memref<2x8192xf32, #tpu.memory_space<vmem>>, vector<1x256xf32>
    tpu.vector_store %arg19[%c0_157, %c4608], %228 {strides = array<i32>} : memref<2x8192xf32, #tpu.memory_space<vmem>>, vector<1x256xf32>,
    %c19 = arith.constant 19 : index
    %c0_158 = arith.constant 0 : index
    %230 = vector.load %arg18[%c19, %c0_158] : memref<32x512xf32, #tpu.memory_space<vmem>>, vector<1x256xf32>
    %c0_159 = arith.constant 0 : index
    %c4864 = arith.constant 4864 : index
    %231 = vector.load %arg19[%c0_159, %c4864] : memref<2x8192xf32, #tpu.memory_space<vmem>>, vector<1x256xf32>
    tpu.vector_store %arg19[%c0_159, %c4864], %230 {strides = array<i32>} : memref<2x8192xf32, #tpu.memory_space<vmem>>, vector<1x256xf32>,
    %c20 = arith.constant 20 : index
    %c0_160 = arith.constant 0 : index
    %232 = vector.load %arg18[%c20, %c0_160] : memref<32x512xf32, #tpu.memory_space<vmem>>, vector<1x256xf32>
    %c0_161 = arith.constant 0 : index
    %c5120 = arith.constant 5120 : index
    %233 = vector.load %arg19[%c0_161, %c5120] : memref<2x8192xf32, #tpu.memory_space<vmem>>, vector<1x256xf32>
    tpu.vector_store %arg19[%c0_161, %c5120], %232 {strides = array<i32>} : memref<2x8192xf32, #tpu.memory_space<vmem>>, vector<1x256xf32>,
    %c21 = arith.constant 21 : index
    %c0_162 = arith.constant 0 : index
    %234 = vector.load %arg18[%c21, %c0_162] : memref<32x512xf32, #tpu.memory_space<vmem>>, vector<1x256xf32>
    %c0_163 = arith.constant 0 : index
    %c5376 = arith.constant 5376 : index
    %235 = vector.load %arg19[%c0_163, %c5376] : memref<2x8192xf32, #tpu.memory_space<vmem>>, vector<1x256xf32>
    tpu.vector_store %arg19[%c0_163, %c5376], %234 {strides = array<i32>} : memref<2x8192xf32, #tpu.memory_space<vmem>>, vector<1x256xf32>,
    %c22 = arith.constant 22 : index
    %c0_164 = arith.constant 0 : index
    %236 = vector.load %arg18[%c22, %c0_164] : memref<32x512xf32, #tpu.memory_space<vmem>>, vector<1x256xf32>
    %c0_165 = arith.constant 0 : index
    %c5632 = arith.constant 5632 : index
    %237 = vector.load %arg19[%c0_165, %c5632] : memref<2x8192xf32, #tpu.memory_space<vmem>>, vector<1x256xf32>
    tpu.vector_store %arg19[%c0_165, %c5632], %236 {strides = array<i32>} : memref<2x8192xf32, #tpu.memory_space<vmem>>, vector<1x256xf32>,
    %c23 = arith.constant 23 : index
    %c0_166 = arith.constant 0 : index
    %238 = vector.load %arg18[%c23, %c0_166] : memref<32x512xf32, #tpu.memory_space<vmem>>, vector<1x256xf32>
    %c0_167 = arith.constant 0 : index
    %c5888 = arith.constant 5888 : index
    %239 = vector.load %arg19[%c0_167, %c5888] : memref<2x8192xf32, #tpu.memory_space<vmem>>, vector<1x256xf32>
    tpu.vector_store %arg19[%c0_167, %c5888], %238 {strides = array<i32>} : memref<2x8192xf32, #tpu.memory_space<vmem>>, vector<1x256xf32>,
    %c24 = arith.constant 24 : index
    %c0_168 = arith.constant 0 : index
    %240 = vector.load %arg18[%c24, %c0_168] : memref<32x512xf32, #tpu.memory_space<vmem>>, vector<1x256xf32>
    %c0_169 = arith.constant 0 : index
    %c6144 = arith.constant 6144 : index
    %241 = vector.load %arg19[%c0_169, %c6144] : memref<2x8192xf32, #tpu.memory_space<vmem>>, vector<1x256xf32>
    tpu.vector_store %arg19[%c0_169, %c6144], %240 {strides = array<i32>} : memref<2x8192xf32, #tpu.memory_space<vmem>>, vector<1x256xf32>,
    %c25 = arith.constant 25 : index
    %c0_170 = arith.constant 0 : index
    %242 = vector.load %arg18[%c25, %c0_170] : memref<32x512xf32, #tpu.memory_space<vmem>>, vector<1x256xf32>
    %c0_171 = arith.constant 0 : index
    %c6400 = arith.constant 6400 : index
    %243 = vector.load %arg19[%c0_171, %c6400] : memref<2x8192xf32, #tpu.memory_space<vmem>>, vector<1x256xf32>
    tpu.vector_store %arg19[%c0_171, %c6400], %242 {strides = array<i32>} : memref<2x8192xf32, #tpu.memory_space<vmem>>, vector<1x256xf32>,
    %c26 = arith.constant 26 : index
    %c0_172 = arith.constant 0 : index
    %244 = vector.load %arg18[%c26, %c0_172] : memref<32x512xf32, #tpu.memory_space<vmem>>, vector<1x256xf32>
    %c0_173 = arith.constant 0 : index
    %c6656 = arith.constant 6656 : index
    %245 = vector.load %arg19[%c0_173, %c6656] : memref<2x8192xf32, #tpu.memory_space<vmem>>, vector<1x256xf32>
    tpu.vector_store %arg19[%c0_173, %c6656], %244 {strides = array<i32>} : memref<2x8192xf32, #tpu.memory_space<vmem>>, vector<1x256xf32>,
    %c27 = arith.constant 27 : index
    %c0_174 = arith.constant 0 : index
    %246 = vector.load %arg18[%c27, %c0_174] : memref<32x512xf32, #tpu.memory_space<vmem>>, vector<1x256xf32>
    %c0_175 = arith.constant 0 : index
    %c6912 = arith.constant 6912 : index
    %247 = vector.load %arg19[%c0_175, %c6912] : memref<2x8192xf32, #tpu.memory_space<vmem>>, vector<1x256xf32>
    tpu.vector_store %arg19[%c0_175, %c6912], %246 {strides = array<i32>} : memref<2x8192xf32, #tpu.memory_space<vmem>>, vector<1x256xf32>,
    %c28 = arith.constant 28 : index
    %c0_176 = arith.constant 0 : index
    %248 = vector.load %arg18[%c28, %c0_176] : memref<32x512xf32, #tpu.memory_space<vmem>>, vector<1x256xf32>
    %c0_177 = arith.constant 0 : index
    %c7168 = arith.constant 7168 : index
    %249 = vector.load %arg19[%c0_177, %c7168] : memref<2x8192xf32, #tpu.memory_space<vmem>>, vector<1x256xf32>
    tpu.vector_store %arg19[%c0_177, %c7168], %248 {strides = array<i32>} : memref<2x8192xf32, #tpu.memory_space<vmem>>, vector<1x256xf32>,
    %c29 = arith.constant 29 : index
    %c0_178 = arith.constant 0 : index
    %250 = vector.load %arg18[%c29, %c0_178] : memref<32x512xf32, #tpu.memory_space<vmem>>, vector<1x256xf32>
    %c0_179 = arith.constant 0 : index
    %c7424 = arith.constant 7424 : index
    %251 = vector.load %arg19[%c0_179, %c7424] : memref<2x8192xf32, #tpu.memory_space<vmem>>, vector<1x256xf32>
    tpu.vector_store %arg19[%c0_179, %c7424], %250 {strides = array<i32>} : memref<2x8192xf32, #tpu.memory_space<vmem>>, vector<1x256xf32>,
    %c30 = arith.constant 30 : index
    %c0_180 = arith.constant 0 : index
    %252 = vector.load %arg18[%c30, %c0_180] : memref<32x512xf32, #tpu.memory_space<vmem>>, vector<1x256xf32>
    %c0_181 = arith.constant 0 : index
    %c7680 = arith.constant 7680 : index
    %253 = vector.load %arg19[%c0_181, %c7680] : memref<2x8192xf32, #tpu.memory_space<vmem>>, vector<1x256xf32>
    tpu.vector_store %arg19[%c0_181, %c7680], %252 {strides = array<i32>} : memref<2x8192xf32, #tpu.memory_space<vmem>>, vector<1x256xf32>,
    %c31 = arith.constant 31 : index
    %c0_182 = arith.constant 0 : index
    %254 = vector.load %arg18[%c31, %c0_182] : memref<32x512xf32, #tpu.memory_space<vmem>>, vector<1x256xf32>
    %c0_183 = arith.constant 0 : index
    %c7936 = arith.constant 7936 : index
    %255 = vector.load %arg19[%c0_183, %c7936] : memref<2x8192xf32, #tpu.memory_space<vmem>>, vector<1x256xf32>
    tpu.vector_store %arg19[%c0_183, %c7936], %254 {strides = array<i32>} : memref<2x8192xf32, #tpu.memory_space<vmem>>, vector<1x256xf32>,
    %c0_184 = arith.constant 0 : index
    %c256_185 = arith.constant 256 : index
    %256 = vector.load %arg18[%c0_184, %c256_185] : memref<32x512xf32, #tpu.memory_space<vmem>>, vector<1x256xf32>
    %c1_186 = arith.constant 1 : index
    %c0_187 = arith.constant 0 : index
    %257 = vector.load %arg19[%c1_186, %c0_187] : memref<2x8192xf32, #tpu.memory_space<vmem>>, vector<1x256xf32>
    tpu.vector_store %arg19[%c1_186, %c0_187], %256 {strides = array<i32>} : memref<2x8192xf32, #tpu.memory_space<vmem>>, vector<1x256xf32>,
    %c1_188 = arith.constant 1 : index
    %c256_189 = arith.constant 256 : index
    %258 = vector.load %arg18[%c1_188, %c256_189] : memref<32x512xf32, #tpu.memory_space<vmem>>, vector<1x256xf32>
    %c1_190 = arith.constant 1 : index
    %c256_191 = arith.constant 256 : index
    %259 = vector.load %arg19[%c1_190, %c256_191] : memref<2x8192xf32, #tpu.memory_space<vmem>>, vector<1x256xf32>
    tpu.vector_store %arg19[%c1_190, %c256_191], %258 {strides = array<i32>} : memref<2x8192xf32, #tpu.memory_space<vmem>>, vector<1x256xf32>,
    %c2_192 = arith.constant 2 : index
    %c256_193 = arith.constant 256 : index
    %260 = vector.load %arg18[%c2_192, %c256_193] : memref<32x512xf32, #tpu.memory_space<vmem>>, vector<1x256xf32>
    %c1_194 = arith.constant 1 : index
    %c512_195 = arith.constant 512 : index
    %261 = vector.load %arg19[%c1_194, %c512_195] : memref<2x8192xf32, #tpu.memory_space<vmem>>, vector<1x256xf32>
    tpu.vector_store %arg19[%c1_194, %c512_195], %260 {strides = array<i32>} : memref<2x8192xf32, #tpu.memory_space<vmem>>, vector<1x256xf32>,
    %c3_196 = arith.constant 3 : index
    %c256_197 = arith.constant 256 : index
    %262 = vector.load %arg18[%c3_196, %c256_197] : memref<32x512xf32, #tpu.memory_space<vmem>>, vector<1x256xf32>
    %c1_198 = arith.constant 1 : index
    %c768_199 = arith.constant 768 : index
    %263 = vector.load %arg19[%c1_198, %c768_199] : memref<2x8192xf32, #tpu.memory_space<vmem>>, vector<1x256xf32>
    tpu.vector_store %arg19[%c1_198, %c768_199], %262 {strides = array<i32>} : memref<2x8192xf32, #tpu.memory_space<vmem>>, vector<1x256xf32>,
    %c4_200 = arith.constant 4 : index
    %c256_201 = arith.constant 256 : index
    %264 = vector.load %arg18[%c4_200, %c256_201] : memref<32x512xf32, #tpu.memory_space<vmem>>, vector<1x256xf32>
    %c1_202 = arith.constant 1 : index
    %c1024_203 = arith.constant 1024 : index
    %265 = vector.load %arg19[%c1_202, %c1024_203] : memref<2x8192xf32, #tpu.memory_space<vmem>>, vector<1x256xf32>
    tpu.vector_store %arg19[%c1_202, %c1024_203], %264 {strides = array<i32>} : memref<2x8192xf32, #tpu.memory_space<vmem>>, vector<1x256xf32>,
    %c5_204 = arith.constant 5 : index
    %c256_205 = arith.constant 256 : index
    %266 = vector.load %arg18[%c5_204, %c256_205] : memref<32x512xf32, #tpu.memory_space<vmem>>, vector<1x256xf32>
    %c1_206 = arith.constant 1 : index
    %c1280_207 = arith.constant 1280 : index
    %267 = vector.load %arg19[%c1_206, %c1280_207] : memref<2x8192xf32, #tpu.memory_space<vmem>>, vector<1x256xf32>
    tpu.vector_store %arg19[%c1_206, %c1280_207], %266 {strides = array<i32>} : memref<2x8192xf32, #tpu.memory_space<vmem>>, vector<1x256xf32>,
    %c6_208 = arith.constant 6 : index
    %c256_209 = arith.constant 256 : index
    %268 = vector.load %arg18[%c6_208, %c256_209] : memref<32x512xf32, #tpu.memory_space<vmem>>, vector<1x256xf32>
    %c1_210 = arith.constant 1 : index
    %c1536_211 = arith.constant 1536 : index
    %269 = vector.load %arg19[%c1_210, %c1536_211] : memref<2x8192xf32, #tpu.memory_space<vmem>>, vector<1x256xf32>
    tpu.vector_store %arg19[%c1_210, %c1536_211], %268 {strides = array<i32>} : memref<2x8192xf32, #tpu.memory_space<vmem>>, vector<1x256xf32>,
    %c7_212 = arith.constant 7 : index
    %c256_213 = arith.constant 256 : index
    %270 = vector.load %arg18[%c7_212, %c256_213] : memref<32x512xf32, #tpu.memory_space<vmem>>, vector<1x256xf32>
    %c1_214 = arith.constant 1 : index
    %c1792_215 = arith.constant 1792 : index
    %271 = vector.load %arg19[%c1_214, %c1792_215] : memref<2x8192xf32, #tpu.memory_space<vmem>>, vector<1x256xf32>
    tpu.vector_store %arg19[%c1_214, %c1792_215], %270 {strides = array<i32>} : memref<2x8192xf32, #tpu.memory_space<vmem>>, vector<1x256xf32>,
    %c8_216 = arith.constant 8 : index
    %c256_217 = arith.constant 256 : index
    %272 = vector.load %arg18[%c8_216, %c256_217] : memref<32x512xf32, #tpu.memory_space<vmem>>, vector<1x256xf32>
    %c1_218 = arith.constant 1 : index
    %c2048_219 = arith.constant 2048 : index
    %273 = vector.load %arg19[%c1_218, %c2048_219] : memref<2x8192xf32, #tpu.memory_space<vmem>>, vector<1x256xf32>
    tpu.vector_store %arg19[%c1_218, %c2048_219], %272 {strides = array<i32>} : memref<2x8192xf32, #tpu.memory_space<vmem>>, vector<1x256xf32>,
    %c9_220 = arith.constant 9 : index
    %c256_221 = arith.constant 256 : index
    %274 = vector.load %arg18[%c9_220, %c256_221] : memref<32x512xf32, #tpu.memory_space<vmem>>, vector<1x256xf32>
    %c1_222 = arith.constant 1 : index
    %c2304_223 = arith.constant 2304 : index
    %275 = vector.load %arg19[%c1_222, %c2304_223] : memref<2x8192xf32, #tpu.memory_space<vmem>>, vector<1x256xf32>
    tpu.vector_store %arg19[%c1_222, %c2304_223], %274 {strides = array<i32>} : memref<2x8192xf32, #tpu.memory_space<vmem>>, vector<1x256xf32>,
    %c10_224 = arith.constant 10 : index
    %c256_225 = arith.constant 256 : index
    %276 = vector.load %arg18[%c10_224, %c256_225] : memref<32x512xf32, #tpu.memory_space<vmem>>, vector<1x256xf32>
    %c1_226 = arith.constant 1 : index
    %c2560_227 = arith.constant 2560 : index
    %277 = vector.load %arg19[%c1_226, %c2560_227] : memref<2x8192xf32, #tpu.memory_space<vmem>>, vector<1x256xf32>
    tpu.vector_store %arg19[%c1_226, %c2560_227], %276 {strides = array<i32>} : memref<2x8192xf32, #tpu.memory_space<vmem>>, vector<1x256xf32>,
    %c11_228 = arith.constant 11 : index
    %c256_229 = arith.constant 256 : index
    %278 = vector.load %arg18[%c11_228, %c256_229] : memref<32x512xf32, #tpu.memory_space<vmem>>, vector<1x256xf32>
    %c1_230 = arith.constant 1 : index
    %c2816_231 = arith.constant 2816 : index
    %279 = vector.load %arg19[%c1_230, %c2816_231] : memref<2x8192xf32, #tpu.memory_space<vmem>>, vector<1x256xf32>
    tpu.vector_store %arg19[%c1_230, %c2816_231], %278 {strides = array<i32>} : memref<2x8192xf32, #tpu.memory_space<vmem>>, vector<1x256xf32>,
    %c12_232 = arith.constant 12 : index
    %c256_233 = arith.constant 256 : index
    %280 = vector.load %arg18[%c12_232, %c256_233] : memref<32x512xf32, #tpu.memory_space<vmem>>, vector<1x256xf32>
    %c1_234 = arith.constant 1 : index
    %c3072_235 = arith.constant 3072 : index
    %281 = vector.load %arg19[%c1_234, %c3072_235] : memref<2x8192xf32, #tpu.memory_space<vmem>>, vector<1x256xf32>
    tpu.vector_store %arg19[%c1_234, %c3072_235], %280 {strides = array<i32>} : memref<2x8192xf32, #tpu.memory_space<vmem>>, vector<1x256xf32>,
    %c13_236 = arith.constant 13 : index
    %c256_237 = arith.constant 256 : index
    %282 = vector.load %arg18[%c13_236, %c256_237] : memref<32x512xf32, #tpu.memory_space<vmem>>, vector<1x256xf32>
    %c1_238 = arith.constant 1 : index
    %c3328_239 = arith.constant 3328 : index
    %283 = vector.load %arg19[%c1_238, %c3328_239] : memref<2x8192xf32, #tpu.memory_space<vmem>>, vector<1x256xf32>
    tpu.vector_store %arg19[%c1_238, %c3328_239], %282 {strides = array<i32>} : memref<2x8192xf32, #tpu.memory_space<vmem>>, vector<1x256xf32>,
    %c14_240 = arith.constant 14 : index
    %c256_241 = arith.constant 256 : index
    %284 = vector.load %arg18[%c14_240, %c256_241] : memref<32x512xf32, #tpu.memory_space<vmem>>, vector<1x256xf32>
    %c1_242 = arith.constant 1 : index
    %c3584_243 = arith.constant 3584 : index
    %285 = vector.load %arg19[%c1_242, %c3584_243] : memref<2x8192xf32, #tpu.memory_space<vmem>>, vector<1x256xf32>
    tpu.vector_store %arg19[%c1_242, %c3584_243], %284 {strides = array<i32>} : memref<2x8192xf32, #tpu.memory_space<vmem>>, vector<1x256xf32>,
    %c15_244 = arith.constant 15 : index
    %c256_245 = arith.constant 256 : index
    %286 = vector.load %arg18[%c15_244, %c256_245] : memref<32x512xf32, #tpu.memory_space<vmem>>, vector<1x256xf32>
    %c1_246 = arith.constant 1 : index
    %c3840_247 = arith.constant 3840 : index
    %287 = vector.load %arg19[%c1_246, %c3840_247] : memref<2x8192xf32, #tpu.memory_space<vmem>>, vector<1x256xf32>
    tpu.vector_store %arg19[%c1_246, %c3840_247], %286 {strides = array<i32>} : memref<2x8192xf32, #tpu.memory_space<vmem>>, vector<1x256xf32>,
    %c16_248 = arith.constant 16 : index
    %c256_249 = arith.constant 256 : index
    %288 = vector.load %arg18[%c16_248, %c256_249] : memref<32x512xf32, #tpu.memory_space<vmem>>, vector<1x256xf32>
    %c1_250 = arith.constant 1 : index
    %c4096_251 = arith.constant 4096 : index
    %289 = vector.load %arg19[%c1_250, %c4096_251] : memref<2x8192xf32, #tpu.memory_space<vmem>>, vector<1x256xf32>
    tpu.vector_store %arg19[%c1_250, %c4096_251], %288 {strides = array<i32>} : memref<2x8192xf32, #tpu.memory_space<vmem>>, vector<1x256xf32>,
    %c17_252 = arith.constant 17 : index
    %c256_253 = arith.constant 256 : index
    %290 = vector.load %arg18[%c17_252, %c256_253] : memref<32x512xf32, #tpu.memory_space<vmem>>, vector<1x256xf32>
    %c1_254 = arith.constant 1 : index
    %c4352_255 = arith.constant 4352 : index
    %291 = vector.load %arg19[%c1_254, %c4352_255] : memref<2x8192xf32, #tpu.memory_space<vmem>>, vector<1x256xf32>
    tpu.vector_store %arg19[%c1_254, %c4352_255], %290 {strides = array<i32>} : memref<2x8192xf32, #tpu.memory_space<vmem>>, vector<1x256xf32>,
    %c18_256 = arith.constant 18 : index
    %c256_257 = arith.constant 256 : index
    %292 = vector.load %arg18[%c18_256, %c256_257] : memref<32x512xf32, #tpu.memory_space<vmem>>, vector<1x256xf32>
    %c1_258 = arith.constant 1 : index
    %c4608_259 = arith.constant 4608 : index
    %293 = vector.load %arg19[%c1_258, %c4608_259] : memref<2x8192xf32, #tpu.memory_space<vmem>>, vector<1x256xf32>
    tpu.vector_store %arg19[%c1_258, %c4608_259], %292 {strides = array<i32>} : memref<2x8192xf32, #tpu.memory_space<vmem>>, vector<1x256xf32>,
    %c19_260 = arith.constant 19 : index
    %c256_261 = arith.constant 256 : index
    %294 = vector.load %arg18[%c19_260, %c256_261] : memref<32x512xf32, #tpu.memory_space<vmem>>, vector<1x256xf32>
    %c1_262 = arith.constant 1 : index
    %c4864_263 = arith.constant 4864 : index
    %295 = vector.load %arg19[%c1_262, %c4864_263] : memref<2x8192xf32, #tpu.memory_space<vmem>>, vector<1x256xf32>
    tpu.vector_store %arg19[%c1_262, %c4864_263], %294 {strides = array<i32>} : memref<2x8192xf32, #tpu.memory_space<vmem>>, vector<1x256xf32>,
    %c20_264 = arith.constant 20 : index
    %c256_265 = arith.constant 256 : index
    %296 = vector.load %arg18[%c20_264, %c256_265] : memref<32x512xf32, #tpu.memory_space<vmem>>, vector<1x256xf32>
    %c1_266 = arith.constant 1 : index
    %c5120_267 = arith.constant 5120 : index
    %297 = vector.load %arg19[%c1_266, %c5120_267] : memref<2x8192xf32, #tpu.memory_space<vmem>>, vector<1x256xf32>
    tpu.vector_store %arg19[%c1_266, %c5120_267], %296 {strides = array<i32>} : memref<2x8192xf32, #tpu.memory_space<vmem>>, vector<1x256xf32>,
    %c21_268 = arith.constant 21 : index
    %c256_269 = arith.constant 256 : index
    %298 = vector.load %arg18[%c21_268, %c256_269] : memref<32x512xf32, #tpu.memory_space<vmem>>, vector<1x256xf32>
    %c1_270 = arith.constant 1 : index
    %c5376_271 = arith.constant 5376 : index
    %299 = vector.load %arg19[%c1_270, %c5376_271] : memref<2x8192xf32, #tpu.memory_space<vmem>>, vector<1x256xf32>
    tpu.vector_store %arg19[%c1_270, %c5376_271], %298 {strides = array<i32>} : memref<2x8192xf32, #tpu.memory_space<vmem>>, vector<1x256xf32>,
    %c22_272 = arith.constant 22 : index
    %c256_273 = arith.constant 256 : index
    %300 = vector.load %arg18[%c22_272, %c256_273] : memref<32x512xf32, #tpu.memory_space<vmem>>, vector<1x256xf32>
    %c1_274 = arith.constant 1 : index
    %c5632_275 = arith.constant 5632 : index
    %301 = vector.load %arg19[%c1_274, %c5632_275] : memref<2x8192xf32, #tpu.memory_space<vmem>>, vector<1x256xf32>
    tpu.vector_store %arg19[%c1_274, %c5632_275], %300 {strides = array<i32>} : memref<2x8192xf32, #tpu.memory_space<vmem>>, vector<1x256xf32>,
    %c23_276 = arith.constant 23 : index
    %c256_277 = arith.constant 256 : index
    %302 = vector.load %arg18[%c23_276, %c256_277] : memref<32x512xf32, #tpu.memory_space<vmem>>, vector<1x256xf32>
    %c1_278 = arith.constant 1 : index
    %c5888_279 = arith.constant 5888 : index
    %303 = vector.load %arg19[%c1_278, %c5888_279] : memref<2x8192xf32, #tpu.memory_space<vmem>>, vector<1x256xf32>
    tpu.vector_store %arg19[%c1_278, %c5888_279], %302 {strides = array<i32>} : memref<2x8192xf32, #tpu.memory_space<vmem>>, vector<1x256xf32>,
    %c24_280 = arith.constant 24 : index
    %c256_281 = arith.constant 256 : index
    %304 = vector.load %arg18[%c24_280, %c256_281] : memref<32x512xf32, #tpu.memory_space<vmem>>, vector<1x256xf32>
    %c1_282 = arith.constant 1 : index
    %c6144_283 = arith.constant 6144 : index
    %305 = vector.load %arg19[%c1_282, %c6144_283] : memref<2x8192xf32, #tpu.memory_space<vmem>>, vector<1x256xf32>
    tpu.vector_store %arg19[%c1_282, %c6144_283], %304 {strides = array<i32>} : memref<2x8192xf32, #tpu.memory_space<vmem>>, vector<1x256xf32>,
    %c25_284 = arith.constant 25 : index
    %c256_285 = arith.constant 256 : index
    %306 = vector.load %arg18[%c25_284, %c256_285] : memref<32x512xf32, #tpu.memory_space<vmem>>, vector<1x256xf32>
    %c1_286 = arith.constant 1 : index
    %c6400_287 = arith.constant 6400 : index
    %307 = vector.load %arg19[%c1_286, %c6400_287] : memref<2x8192xf32, #tpu.memory_space<vmem>>, vector<1x256xf32>
    tpu.vector_store %arg19[%c1_286, %c6400_287], %306 {strides = array<i32>} : memref<2x8192xf32, #tpu.memory_space<vmem>>, vector<1x256xf32>,
    %c26_288 = arith.constant 26 : index
    %c256_289 = arith.constant 256 : index
    %308 = vector.load %arg18[%c26_288, %c256_289] : memref<32x512xf32, #tpu.memory_space<vmem>>, vector<1x256xf32>
    %c1_290 = arith.constant 1 : index
    %c6656_291 = arith.constant 6656 : index
    %309 = vector.load %arg19[%c1_290, %c6656_291] : memref<2x8192xf32, #tpu.memory_space<vmem>>, vector<1x256xf32>
    tpu.vector_store %arg19[%c1_290, %c6656_291], %308 {strides = array<i32>} : memref<2x8192xf32, #tpu.memory_space<vmem>>, vector<1x256xf32>,
    %c27_292 = arith.constant 27 : index
    %c256_293 = arith.constant 256 : index
    %310 = vector.load %arg18[%c27_292, %c256_293] : memref<32x512xf32, #tpu.memory_space<vmem>>, vector<1x256xf32>
    %c1_294 = arith.constant 1 : index
    %c6912_295 = arith.constant 6912 : index
    %311 = vector.load %arg19[%c1_294, %c6912_295] : memref<2x8192xf32, #tpu.memory_space<vmem>>, vector<1x256xf32>
    tpu.vector_store %arg19[%c1_294, %c6912_295], %310 {strides = array<i32>} : memref<2x8192xf32, #tpu.memory_space<vmem>>, vector<1x256xf32>,
    %c28_296 = arith.constant 28 : index
    %c256_297 = arith.constant 256 : index
    %312 = vector.load %arg18[%c28_296, %c256_297] : memref<32x512xf32, #tpu.memory_space<vmem>>, vector<1x256xf32>
    %c1_298 = arith.constant 1 : index
    %c7168_299 = arith.constant 7168 : index
    %313 = vector.load %arg19[%c1_298, %c7168_299] : memref<2x8192xf32, #tpu.memory_space<vmem>>, vector<1x256xf32>
    tpu.vector_store %arg19[%c1_298, %c7168_299], %312 {strides = array<i32>} : memref<2x8192xf32, #tpu.memory_space<vmem>>, vector<1x256xf32>,
    %c29_300 = arith.constant 29 : index
    %c256_301 = arith.constant 256 : index
    %314 = vector.load %arg18[%c29_300, %c256_301] : memref<32x512xf32, #tpu.memory_space<vmem>>, vector<1x256xf32>
    %c1_302 = arith.constant 1 : index
    %c7424_303 = arith.constant 7424 : index
    %315 = vector.load %arg19[%c1_302, %c7424_303] : memref<2x8192xf32, #tpu.memory_space<vmem>>, vector<1x256xf32>
    tpu.vector_store %arg19[%c1_302, %c7424_303], %314 {strides = array<i32>} : memref<2x8192xf32, #tpu.memory_space<vmem>>, vector<1x256xf32>,
    %c30_304 = arith.constant 30 : index
    %c256_305 = arith.constant 256 : index
    %316 = vector.load %arg18[%c30_304, %c256_305] : memref<32x512xf32, #tpu.memory_space<vmem>>, vector<1x256xf32>
    %c1_306 = arith.constant 1 : index
    %c7680_307 = arith.constant 7680 : index
    %317 = vector.load %arg19[%c1_306, %c7680_307] : memref<2x8192xf32, #tpu.memory_space<vmem>>, vector<1x256xf32>
    tpu.vector_store %arg19[%c1_306, %c7680_307], %316 {strides = array<i32>} : memref<2x8192xf32, #tpu.memory_space<vmem>>, vector<1x256xf32>,
    %c31_308 = arith.constant 31 : index
    %c256_309 = arith.constant 256 : index
    %318 = vector.load %arg18[%c31_308, %c256_309] : memref<32x512xf32, #tpu.memory_space<vmem>>, vector<1x256xf32>
    %c1_310 = arith.constant 1 : index
    %c7936_311 = arith.constant 7936 : index
    %319 = vector.load %arg19[%c1_310, %c7936_311] : memref<2x8192xf32, #tpu.memory_space<vmem>>, vector<1x256xf32>
    tpu.vector_store %arg19[%c1_310, %c7936_311], %318 {strides = array<i32>} : memref<2x8192xf32, #tpu.memory_space<vmem>>, vector<1x256xf32>,
    %c0_312 = arith.constant 0 : index
    %c0_313 = arith.constant 0 : index
    %320 = vector.load %arg19[%c0_312, %c0_313] : memref<2x8192xf32, #tpu.memory_space<vmem>>, vector<2x8192xf32>
    %321 = arith.truncf %320 : vector<2x8192xf32> to vector<2x8192xbf16>
    %c0_314 = arith.constant 0 : index
    %c0_315 = arith.constant 0 : index
    %322 = vector.load %arg12[%c0_314, %c0_315] : memref<8192x128xbf16, #tpu.memory_space<vmem>>, vector<8192x128xbf16>
    %cst_316 = arith.constant dense<0.000000e+00> : vector<2x128xf32>
    %323 = tpu.matmul %321, %322, %cst_316 {dimension_numbers = #tpu.dot_dimension_numbers<[1], [0], [0], [1], [0, 0, 1, 1], [], []>} : vector<2x8192xbf16>, vector<8192x128xbf16>, vector<2x128xf32> -> vector<2x128xf32>
    %c0_317 = arith.constant 0 : index
    %c0_318 = arith.constant 0 : index
    %324 = vector.load %arg13[%c0_317, %c0_318] : memref<1x128xf32, #tpu.memory_space<vmem>>, vector<1x128xf32>
    %325 = vector.broadcast %324 : vector<1x128xf32> to vector<2x128xf32>
    %326 = arith.addf %323, %325 : vector<2x128xf32>
    %c0_319 = arith.constant 0 : index
    %c0_320 = arith.constant 0 : index
    %327 = vector.load %arg14[%c0_319, %c0_320] : memref<2x128xf32, #tpu.memory_space<vmem>>, vector<2x128xf32>
    tpu.vector_store %arg14[%c0_319, %c0_320], %326 {strides = array<i32>} : memref<2x128xf32, #tpu.memory_space<vmem>>, vector<2x128xf32>,
    return
  }
}

</mosaic_0001>

<bundles_post_ra>
// kernel: convnet_forward.1
= control target key start
LH: loop header
LB: loop body
LE: loop exit
PB: predicated region body
PF: predicated region fallthrough
CT: control target
= control target key end

     0   :  { %vm248_vm0 = vcmask 1044480   ;;  %vm249_vm1 = vcmask 1045504   ;;  %v12661_v3 = vmov 65535   ;;  %v17300_v15 = vmov 0   ;;  %s17284_s0 = inlined_call_operand.vmem [shape: bf16[27,2048], index: 0, kind: input, shape index: {}]   ;;  %s17285_s1 = inlined_call_operand.vmem [shape: bf16[16,27], index: 1, kind: input, shape index: {}]   ;;  %s17286_s2 = inlined_call_operand.vmem [shape: f32[16,1], index: 2, kind: input, shape index: {}]   ;;  %s17287_s3 = inlined_call_operand.vmem [shape: f32[16,1], index: 3, kind: input, shape index: {}]   ;;  %s17288_s4 = inlined_call_operand.vmem [shape: f32[16,1], index: 4, kind: input, shape index: {}]   ;;  %s17289_s5 = inlined_call_operand.vmem [shape: bf16[32,144], index: 5, kind: input, shape index: {}]   ;;  %s17290_s6 = inlined_call_operand.vmem [shape: f32[32,1], index: 6, kind: input, shape index: {}]   ;;  %s17291_s7 = inlined_call_operand.vmem [shape: bf16[32,288], index: 7, kind: input, shape index: {}]   ;;  %s17292_s8 = inlined_call_operand.vmem [shape: f32[32,1], index: 8, kind: input, shape index: {}]   ;;  %s17293_s9 = inlined_call_operand.vmem [shape: f32[32,1], index: 9, kind: input, shape index: {}]   ;;  %s17294_s10 = inlined_call_operand.vmem [shape: f32[32,1], index: 10, kind: input, shape index: {}]   ;;  %s17295_s11 = inlined_call_operand.vmem [shape: f32[9,512], index: 11, kind: input, shape index: {}]   ;;  %s17296_s12 = inlined_call_operand.vmem [shape: bf16[8192,128], index: 12, kind: input, shape index: {}]   ;;  %s17297_s13 = inlined_call_operand.vmem [shape: f32[1,128], index: 13, kind: input, shape index: {}]   ;;  %s17298_s14 = inlined_call_operand.hbm [shape: f32[2,128], index: 14, kind: output, shape index: {}]  }
   0x1   :  { %v67_v0 = vld [vmem:[%s17284_s0 + $0x80] sm:$0xff]  ;;  %v250_v4 = vsel %vm248_vm0, 4294967295, %v12661_v3  ;;  %v68_v5 = vld [vmem:[%s17284_s0 + $0x88] sm:$0xff]  ;;  %332 = vmatprep.mubr.bf16.mxu0 %v17300_v15  ;;  %375 = vmatprep.mubr.bf16.mxu1 %v17300_v15  ;;  %v69_v22 = vld [vmem:[%s17284_s0 + $0x90] sm:$0xff]  ;;  %vm244_vm2 = vcmask 220160  }
   0x2   :  { %v75_v1 = vld [vmem:[%s17284_s0 + $0xc0] sm:$0x33]  ;;  %v76_v6 = vld [vmem:[%s17284_s0 + $0xc8] sm:$0x33]  ;;  %v12763_v9 = vsel %vm249_vm1, %v250_v4, 0  ;;  %12082 = vset.pattern.permute.xlu0 %v17300_v15  ;;  %v70_v24 = vld [vmem:[%s17284_s0 + $0x98] sm:$0xff]  ;;  %12083 = vset.pattern.permute.xlu1 %v17300_v15 }
   0x3   :  { %v10364_v2 = vcombine.high %v67_v0, %v75_v1  ;;  %v10363_v7 = vcombine.low %v67_v0, %v75_v1  ;;  %v51_v8 = vld [vmem:[%s17284_s0] sm:$0xff]  ;;  %v10366_v10 = vcombine.high %v68_v5, %v76_v6  ;;  %v10365_v11 = vcombine.low %v68_v5, %v76_v6  ;;  %v52_v13 = vld [vmem:[%s17284_s0 + $0x8] sm:$0xff]  ;;  %v77_v23 = vld [vmem:[%s17284_s0 + $0xd0] sm:$0x33] }
   0x4   :  { %v59_v12 = vld [vmem:[%s17284_s0 + $0x40] sm:$0xff]  ;;  %v60_v14 = vld [vmem:[%s17284_s0 + $0x48] sm:$0xff]  ;;  %v10368_v25 = vcombine.high %v69_v22, %v77_v23  ;;  %v78_v26 = vld [vmem:[%s17284_s0 + $0xd8] sm:$0x33]  ;;  %v10367_v28 = vcombine.low %v69_v22, %v77_v23 }
   0x5   :  { %v256_v16 = vand.u32 %v10364_v2, %v12763_v9  ;;  %v253_v17 = vand.u32 %v10363_v7, %v12763_v9  ;;  %v10348_v18 = vcombine.high %v51_v8, %v59_v12  ;;  %v262_v19 = vand.u32 %v10366_v10, %v12763_v9  ;;  %v12797_v31 = vld [vmem:[%s17285_s1] sm:$0xff]   ;;  %v53_v34 = vld [vmem:[%s17284_s0 + $0x10] sm:$0xff]  ;;  %v54_v37 = vld [vmem:[%s17284_s0 + $0x18] sm:$0xff] }
   0x6   :  { %v259_v20 = vand.u32 %v10365_v11, %v12763_v9  ;;  %v10350_v21 = vcombine.high %v52_v13, %v60_v14  ;;  %v10347_v27 = vcombine.low %v51_v8, %v59_v12  ;;  %v10370_v29 = vcombine.high %v70_v24, %v78_v26  ;;  %v61_v35 = vld [vmem:[%s17284_s0 + $0x50] sm:$0xff]  ;;  %v71_v38 = vld [vmem:[%s17284_s0 + $0xa0] sm:$0xff]  ;;  %v62_v40 = vld [vmem:[%s17284_s0 + $0x58] sm:$0xff] }
   0x7   :  { %312 = vmatprep.subr.bf16.mxu0 %v256_v16  ;;  %355 = vmatprep.subr.bf16.mxu1 %v262_v19  ;;  %v10349_v30 = vcombine.low %v52_v13, %v60_v14  ;;  %v268_v32 = vand.u32 %v10368_v25, %v12763_v9  ;;  %v10369_v33 = vcombine.low %v70_v24, %v78_v26  ;;  %v79_v39 = vld [vmem:[%s17284_s0 + $0xe0] sm:$0x33]  ;;  %v72_v41 = vld [vmem:[%s17284_s0 + $0xa8] sm:$0xff]  ;;  %v73_v54 = vld [vmem:[%s17284_s0 + $0xb0] sm:$0xff] }
   0x8   :  { %313 = vmatpush1.bf16.msra.mxu0 %v253_v17  ;;  %356 = vmatpush1.bf16.msra.mxu1 %v259_v20  ;;  %v274_v36 = vand.u32 %v10370_v29, %v12763_v9  ;;  %v80_v42 = vld [vmem:[%s17284_s0 + $0xe8] sm:$0x33]  ;;  %v265_v43 = vand.u32 %v10367_v28, %v12763_v9  ;;  %v10352_v45 = vcombine.high %v53_v34, %v61_v35  ;;  %v83_v49 = vld [vmem:[%s17286_s2] sm:$0xff]  ;;  %v81_v55 = vld [vmem:[%s17284_s0 + $0xf0] sm:$0x33] }
   0x9   :  { %314 = vmatprep.subr.bf16.mxu0 %v10348_v18  ;;  %357 = vmatprep.subr.bf16.mxu1 %v10350_v21  ;;  %v271_v44 = vand.u32 %v10369_v33, %v12763_v9  ;;  %v10372_v46 = vcombine.high %v71_v38, %v79_v39  ;;  %v10354_v47 = vcombine.high %v54_v37, %v62_v40  ;;  %v55_v52 = vld [vmem:[%s17284_s0 + $0x20] sm:$0xff]  ;;  %v56_v59 = vld [vmem:[%s17284_s0 + $0x28] sm:$0xff]  ;;  %v74_v61 = vld [vmem:[%s17284_s0 + $0xb8] sm:$0xff] }
   0xa   :  { %v10374_v48 = vcombine.high %v72_v41, %v80_v42  ;;  %v10351_v50 = vcombine.low %v53_v34, %v61_v35  ;;  %v10371_v51 = vcombine.low %v71_v38, %v79_v39  ;;  %v63_v53 = vld [vmem:[%s17284_s0 + $0x60] sm:$0xff]  ;;  %v10353_v56 = vcombine.low %v54_v37, %v62_v40  ;;  %v64_v60 = vld [vmem:[%s17284_s0 + $0x68] sm:$0xff]  ;;  %v82_v62 = vld [vmem:[%s17284_s0 + $0xf8] sm:$0x33]  ;;  %87 = vperm.xlu0 %12082, %v83_v49  }
   0xb   :  { %v280_v57 = vand.u32 %v10372_v46, %v12763_v9  ;;  %v10373_v58 = vcombine.low %v72_v41, %v80_v42  ;;  %v84_v0 = vld [vmem:[%s17286_s2 + $0x8] sm:$0xff]  ;;  %v10356_v3 = vcombine.high %v55_v52, %v63_v53  ;;  %v10376_v4 = vcombine.high %v73_v54, %v81_v55  ;;  %v57_v10 = vld [vmem:[%s17284_s0 + $0x30] sm:$0xff]  ;;  %v58_v16 = vld [vmem:[%s17284_s0 + $0x38] sm:$0xff] }
   0xc   :  { %315 = vmatpush1.bf16.msra.mxu0 %v10347_v27  ;;  %358 = vmatpush1.bf16.msra.mxu1 %v10349_v30  ;;  %v286_v63 = vand.u32 %v10374_v48, %v12763_v9  ;;  %v277_v1 = vand.u32 %v10371_v51, %v12763_v9  ;;  %v10358_v5 = vcombine.high %v56_v59, %v64_v60  ;;  %v65_v11 = vld [vmem:[%s17284_s0 + $0x70] sm:$0xff]  ;;  %v66_v17 = vld [vmem:[%s17284_s0 + $0x78] sm:$0xff] }
   0xd   :  { %398 = vmatprep.subr.bf16.mxu0 %v268_v32  ;;  %441 = vmatprep.subr.bf16.mxu1 %v274_v36  ;;  %v283_v2 = vand.u32 %v10373_v58, %v12763_v9  ;;  %v10378_v6 = vcombine.high %v74_v61, %v82_v62  ;;  %v10355_v7 = vcombine.low %v55_v52, %v63_v53 }
   0xe   :  { %92 = vperm.xlu0 %12082, %v84_v0   ;;  %v10375_v8 = vcombine.low %v73_v54, %v81_v55  ;;  %v10357_v12 = vcombine.low %v56_v59, %v64_v60  ;;  %v292_v13 = vand.u32 %v10376_v4, %v12763_v9  ;;  %v10377_v14 = vcombine.low %v74_v61, %v82_v62 }
   0xf   :  { %10379 = vmatmul.mubr.msk.bf16.vlgmr.msra.gmra.mxu0 %vm244_vm2, %v12797_v31  ;;  %10380 = vmatmul.mubr.msk.bf16.vlgmr.msra.gmra.mxu1 %vm244_vm2, %v12797_v31  ;;  %v298_v18 = vand.u32 %v10378_v6, %v12763_v9  ;;  %v10360_v21 = vcombine.high %v57_v10, %v65_v11  ;;  %v10362_v22 = vcombine.high %v58_v16, %v66_v17 }
  0x10   :  { %399 = vmatpush1.bf16.msra.mxu0 %v265_v43  ;;  %442 = vmatpush1.bf16.msra.mxu1 %v271_v44  ;;  %v289_v19 = vand.u32 %v10375_v8, %v12763_v9  ;;  %v295_v20 = vand.u32 %v10377_v14, %v12763_v9  ;;  %v10359_v23 = vcombine.low %v57_v10, %v65_v11 }
  0x11   :  { %400 = vmatprep.subr.bf16.mxu0 %v10352_v45  ;;  %443 = vmatprep.subr.bf16.mxu1 %v10354_v47  ;;  %v10361_v24 = vcombine.low %v58_v16, %v66_v17 }
  0x12   :  { %418 = vmatprep.mubr.bf16.mxu0 %v17300_v15  ;;  %461 = vmatprep.mubr.bf16.mxu1 %v17300_v15 }
  0x14   :  { %401 = vmatpush1.bf16.msra.mxu0 %v10351_v50  ;;  %444 = vmatpush1.bf16.msra.mxu1 %v10353_v56 }
  0x15   :  { %484 = vmatprep.subr.bf16.mxu0 %v280_v57  ;;  %527 = vmatprep.subr.bf16.mxu1 %v286_v63 }
  0x17   :  { %10381 = vmatmul.mubr.msk.bf16.vlgmr.msra.gmra.mxu0 %vm244_vm2, %v12797_v31  ;;  %10382 = vmatmul.mubr.msk.bf16.vlgmr.msra.gmra.mxu1 %vm244_vm2, %v12797_v31 }
  0x18   :  { %485 = vmatpush1.bf16.msra.mxu0 %v277_v1  ;;  %528 = vmatpush1.bf16.msra.mxu1 %v283_v2 }
  0x19   :  { %486 = vmatprep.subr.bf16.mxu0 %v10356_v3  ;;  %529 = vmatprep.subr.bf16.mxu1 %v10358_v5 }
  0x1a   :  { %504 = vmatprep.mubr.bf16.mxu0 %v17300_v15  ;;  %547 = vmatprep.mubr.bf16.mxu1 %v17300_v15 }
  0x1c   :  { %487 = vmatpush1.bf16.msra.mxu0 %v10355_v7  ;;  %530 = vmatpush1.bf16.msra.mxu1 %v10357_v12 }
  0x1d   :  { %570 = vmatprep.subr.bf16.mxu0 %v292_v13  ;;  %613 = vmatprep.subr.bf16.mxu1 %v298_v18 }
  0x1f   :  { %10383 = vmatmul.mubr.msk.bf16.vlgmr.msra.gmra.mxu0 %vm244_vm2, %v12797_v31  ;;  %10384 = vmatmul.mubr.msk.bf16.vlgmr.msra.gmra.mxu1 %vm244_vm2, %v12797_v31 }
  0x20   :  { %571 = vmatpush1.bf16.msra.mxu0 %v289_v19  ;;  %614 = vmatpush1.bf16.msra.mxu1 %v295_v20 }
  0x21   :  { %572 = vmatprep.subr.bf16.mxu0 %v10360_v21  ;;  %615 = vmatprep.subr.bf16.mxu1 %v10362_v22 }
  0x22   :  { %590 = vmatprep.mubr.bf16.mxu0 %v17300_v15  ;;  %633 = vmatprep.mubr.bf16.mxu1 %v17300_v15 }
  0x24   :  { %573 = vmatpush1.bf16.msra.mxu0 %v10359_v23  ;;  %616 = vmatpush1.bf16.msra.mxu1 %v10361_v24 }
  0x27   :  { %10385 = vmatmul.mubr.msk.bf16.vlgmr.msra.gmra.mxu0 %vm244_vm2, %v12797_v31  ;;  %10386 = vmatmul.mubr.msk.bf16.vlgmr.msra.gmra.mxu1 %vm244_vm2, %v12797_v31 }
  0x85   :  { %v12899_v9 = vpop.permute.xlu0 %87 }
  0x89   :  { %v12912_v35 = vpop.permute.xlu0 %92 }
  0xcf   :  { %v334_v25 = vpop.f32.mrf.mxu0  ;;  %v377_v26 = vpop.f32.mrf.mxu1 }
  0xd0   :  { %v12902_v28 = vadd.f32 %v334_v25, %v12899_v9  ;;  %v12908_v33 = vadd.f32 %v377_v26, %v12899_v9 }
  0xd1   :  { %v336_v27 = vpop.f32.mrf.mxu0  ;;  %v379_v30 = vpop.f32.mrf.mxu1 }
  0xd2   :  { %v12905_v29 = vadd.f32 %v336_v27, %v12899_v9  ;;  %v12915_v37 = vadd.f32 %v379_v30, %v12899_v9 }
  0xd3   :  { %v338_v32 = vpop.f32.mrf.mxu0  ;;  %v381_v31 = vpop.f32.mrf.mxu1 }
  0xd4   :  { %v644_v34 = vadd.f32 %v12905_v29, %v12902_v28  ;;  %v12919_v39 = vadd.f32 %v338_v32, %v12912_v35  ;;  %v12926_v44 = vadd.f32 %v381_v31, %v12912_v35 }
  0xd5   :  { %v340_v36 = vpop.f32.mrf.mxu0  ;;  %v383_v41 = vpop.f32.mrf.mxu1 }
  0xd6   :  { %v645_v38 = vadd.f32 %v644_v34, %v12908_v33  ;;  %v12922_v40 = vadd.f32 %v340_v36, %v12912_v35  ;;  %v12934_v49 = vadd.f32 %v383_v41, %v12912_v35 }
  0xd7   :  { %v420_v42 = vpop.f32.mrf.mxu0  ;;  %v463_v47 = vpop.f32.mrf.mxu1 }
  0xd8   :  { %v646_v43 = vadd.f32 %v645_v38, %v12915_v37  ;;  %v661_v45 = vadd.f32 %v12922_v40, %v12919_v39  ;;  %v12931_v46 = vadd.f32 %v420_v42, %v12899_v9  ;;  %v12943_v56 = vadd.f32 %v463_v47, %v12899_v9 }
  0xd9   :  { %v422_v48 = vpop.f32.mrf.mxu0  ;;  %v465_v53 = vpop.f32.mrf.mxu1 }
  0xda   :  { %v662_v50 = vadd.f32 %v661_v45, %v12926_v44  ;;  %v647_v51 = vadd.f32 %v646_v43, %v12931_v46  ;;  %v12939_v52 = vadd.f32 %v422_v48, %v12899_v9  ;;  %v12950_v61 = vadd.f32 %v465_v53, %v12899_v9 }
  0xdb   :  { %v424_v54 = vpop.f32.mrf.mxu0  ;;  %v467_v59 = vpop.f32.mrf.mxu1 }
  0xdc   :  { %v663_v55 = vadd.f32 %v662_v50, %v12934_v49  ;;  %v648_v57 = vadd.f32 %v647_v51, %v12939_v52  ;;  %v12947_v58 = vadd.f32 %v424_v54, %v12912_v35  ;;  %v12959_v4 = vadd.f32 %v467_v59, %v12912_v35 }
  0xdd   :  { %v426_v60 = vpop.f32.mrf.mxu0  ;;  %v469_v1 = vpop.f32.mrf.mxu1 }
  0xde   :  { %v649_v62 = vadd.f32 %v648_v57, %v12943_v56  ;;  %v664_v63 = vadd.f32 %v663_v55, %v12947_v58  ;;  %v12955_v0 = vadd.f32 %v426_v60, %v12912_v35  ;;  %v12966_v10 = vadd.f32 %v469_v1, %v12912_v35 }
  0xdf   :  { %v506_v2 = vpop.f32.mrf.mxu0  ;;  %v549_v7 = vpop.f32.mrf.mxu1 }
  0xe0   :  { %v650_v3 = vadd.f32 %v649_v62, %v12950_v61  ;;  %v665_v5 = vadd.f32 %v664_v63, %v12955_v0  ;;  %v12963_v6 = vadd.f32 %v506_v2, %v12899_v9  ;;  %v12975_v18 = vadd.f32 %v549_v7, %v12899_v9 }
  0xe1   :  { %v508_v8 = vpop.f32.mrf.mxu0  ;;  %v551_v14 = vpop.f32.mrf.mxu1 }
  0xe2   :  { %v666_v11 = vadd.f32 %v665_v5, %v12959_v4  ;;  %v651_v12 = vadd.f32 %v650_v3, %v12963_v6  ;;  %v12971_v13 = vadd.f32 %v508_v8, %v12899_v9  ;;  %v12982_v23 = vadd.f32 %v551_v14, %v12899_v9  ;;  %v817_v14 = vld [vmem:[%s17287_s3 + $0x8] sm:$0xff] }
  0xe3   :  { %v510_v16 = vpop.f32.mrf.mxu0  ;;  %v553_v21 = vpop.f32.mrf.mxu1 }
  0xe4   :  { %v667_v17 = vadd.f32 %v666_v11, %v12966_v10  ;;  %v652_v19 = vadd.f32 %v651_v12, %v12971_v13  ;;  %v12979_v20 = vadd.f32 %v510_v16, %v12912_v35  ;;  %v12991_v34 = vadd.f32 %v553_v21, %v12912_v35  ;;  %v816_v12 = vld [vmem:[%s17287_s3] sm:$0xff]  ;;  %v861_v16 = vld [vmem:[%s17288_s4 + $0x8] sm:$0xff] }
  0xe5   :  { %v512_v22 = vpop.f32.mrf.mxu0  ;;  %v555_v27 = vpop.f32.mrf.mxu1 }
  0xe6   :  { %v653_v24 = vadd.f32 %v652_v19, %v12975_v18  ;;  %v668_v25 = vadd.f32 %v667_v17, %v12979_v20  ;;  %v12987_v26 = vadd.f32 %v512_v22, %v12912_v35  ;;  %v12998_v42 = vadd.f32 %v555_v27, %v12912_v35 }
  0xe7   :  { %v592_v30 = vpop.f32.mrf.mxu0  ;;  %v635_v38 = vpop.f32.mrf.mxu1 }
  0xe8   :  { %v654_v32 = vadd.f32 %v653_v24, %v12982_v23  ;;  %v669_v31 = vadd.f32 %v668_v25, %v12987_v26  ;;  %v12995_v36 = vadd.f32 %v592_v30, %v12899_v9  ;;  %v13007_v53 = vadd.f32 %v635_v38, %v12899_v9 }
  0xe9   :  { %v594_v41 = vpop.f32.mrf.mxu0  ;;  %v637_v48 = vpop.f32.mrf.mxu1 }
  0xea   :  { %v670_v43 = vadd.f32 %v669_v31, %v12991_v34  ;;  %v655_v45 = vadd.f32 %v654_v32, %v12995_v36  ;;  %v13003_v47 = vadd.f32 %v594_v41, %v12899_v9  ;;  %v13014_v60 = vadd.f32 %v637_v48, %v12899_v9 }
  0xeb   :  { %v596_v50 = vpop.f32.mrf.mxu0  ;;  %v639_v57 = vpop.f32.mrf.mxu1 }
  0xec   :  { %v671_v51 = vadd.f32 %v670_v43, %v12998_v42  ;;  %v656_v54 = vadd.f32 %v655_v45, %v13003_v47  ;;  %v13011_v55 = vadd.f32 %v596_v50, %v12912_v35  ;;  %v13022_v3 = vadd.f32 %v639_v57, %v12912_v35 }
  0xed   :  { %v598_v59 = vpop.f32.mrf.mxu0  ;;  %v641_v2 = vpop.f32.mrf.mxu1 }
  0xee   :  { %v672_v62 = vadd.f32 %v671_v51, %v13011_v55  ;;  %v13018_v63 = vadd.f32 %v598_v59, %v12912_v35  ;;  %v657_v1 = vadd.f32 %v656_v54, %v13007_v53  ;;  %v13027_v8 = vadd.f32 %v641_v2, %v12912_v35  ;;  %v860_v35 = vld [vmem:[%s17288_s4] sm:$0xff] }
  0xf0   :  { %v673_v5 = vadd.f32 %v672_v62, %v13018_v63  ;;  %v658_v7 = vadd.f32 %v657_v1, %v13014_v60 }
  0xf2   :  { %659 = vadd.xlane.f32.xlu1 %v658_v7  ;;  %v674_v9 = vadd.f32 %v673_v5, %v13022_v3 }
  0xf4   :  { %v675_v11 = vadd.f32 %v674_v9, %v13027_v8 }
  0xf6   :  { %676 = vadd.xlane.f32.xlu1 %v675_v11 }
 0x107   :  { %820 = vperm.xlu1 %12083, %v816_v12  }
 0x10b   :  { %825 = vperm.xlu1 %12083, %v817_v14  }
 0x10f   :  { %864 = vperm.xlu1 %12083, %v860_v35  }
 0x113   :  { %869 = vperm.xlu1 %12083, %v861_v16  }
 0x114   :  { %19 = vsyncpa [#allocation8], 0  ;;  %s12663_s3 = smov 112   ;;  %s12664_s4 = smov 113   ;;  %vm1970_vm4 = vcmask 130048   ;;  %vm3823_vm12 = vcmask 261120  }
 0x115   :  { %s12665_s22 = smov 127   ;;  %s12666_s23 = smov 1  }
 0x116   :  { %s12667_s24 = smov 15   ;;  %s12668_s2 = smov 16  }
 0x117   :  { %s12669_s25 = smov 17   ;;  %s12670_s26 = smov 111  }
 0x17b   :  { %v660_v17 = vpop.xlane.xlu1 %659 }
 0x17c   :  { %v13043_v19 = vmul.f32 0.00048828125, %v660_v17 }
 0x17e   :  { %v13047_v21 = vsub.f32 %v12902_v28, %v13043_v19  ;;  %v13051_v22 = vsub.f32 %v12905_v29, %v13043_v19  ;;  %v13055_v25 = vsub.f32 %v12908_v33, %v13043_v19  ;;  %v13065_v28 = vsub.f32 %v12915_v37, %v13043_v19 }
 0x17f   :  { %v677_v24 = vpop.xlane.xlu1 %676  ;;  %v13069_v29 = vsub.f32 %v12931_v46, %v13043_v19  ;;  %v13083_v37 = vsub.f32 %v12939_v52, %v13043_v19  ;;  %v13089_v45 = vsub.f32 %v12943_v56, %v13043_v19  ;;  %v13103_v51 = vsub.f32 %v12950_v61, %v13043_v19 }
 0x180   :  { %v712_v27 = vmul.f32 %v13047_v21, %v13047_v21  ;;  %v713_v30 = vmul.f32 %v13051_v22, %v13051_v22  ;;  %v13061_v32 = vmul.f32 0.00048828125, %v677_v24  ;;  %v714_v33 = vmul.f32 %v13055_v25, %v13055_v25 }
 0x181   :  { %v715_v46 = vmul.f32 %v13065_v28, %v13065_v28  ;;  %v717_v56 = vmul.f32 %v13083_v37, %v13083_v37  ;;  %v718_v59 = vmul.f32 %v13089_v45, %v13089_v45  ;;  %v13137_v11 = vsub.f32 %v12975_v18, %v13043_v19 }
 0x182   :  { %v744_v31 = vadd.f32 %v713_v30, %v712_v27  ;;  %v13075_v38 = vsub.f32 %v12919_v39, %v13061_v32  ;;  %v13079_v41 = vsub.f32 %v12922_v40, %v13061_v32  ;;  %v716_v39 = vmul.f32 %v13069_v29, %v13069_v29 }
 0x183   :  { %v13095_v40 = vsub.f32 %v12926_v44, %v13061_v32  ;;  %v13109_v57 = vsub.f32 %v12934_v49, %v13061_v32  ;;  %v13113_v44 = vsub.f32 %v12963_v6, %v13043_v19  ;;  %v13119_v61 = vsub.f32 %v12947_v58, %v13061_v32 }
 0x184   :  { %v745_v43 = vadd.f32 %v744_v31, %v714_v33  ;;  %v728_v52 = vmul.f32 %v13075_v38, %v13075_v38  ;;  %v729_v50 = vmul.f32 %v13079_v41, %v13079_v41  ;;  %v13125_v49 = vsub.f32 %v12971_v13, %v13043_v19 }
 0x185   :  { %v730_v1 = vmul.f32 %v13095_v40, %v13095_v40  ;;  %v719_v6 = vmul.f32 %v13103_v51, %v13103_v51  ;;  %v13131_v7 = vsub.f32 %v12955_v0, %v13061_v32  ;;  %v731_v58 = vmul.f32 %v13109_v57, %v13109_v57 }
 0x186   :  { %v746_v48 = vadd.f32 %v745_v43, %v715_v46  ;;  %v761_v2 = vadd.f32 %v729_v50, %v728_v52  ;;  %v720_v13 = vmul.f32 %v13113_v44, %v13113_v44  ;;  %v13143_v14 = vsub.f32 %v12959_v4, %v13061_v32 }
 0x187   :  { %v732_v0 = vmul.f32 %v13119_v61, %v13119_v61  ;;  %v13149_v16 = vsub.f32 %v12982_v23, %v13043_v19  ;;  %v721_v18 = vmul.f32 %v13125_v49, %v13125_v49  ;;  %v13155_v24 = vsub.f32 %v12966_v10, %v13061_v32 }
 0x188   :  { %v747_v54 = vadd.f32 %v746_v48, %v716_v39  ;;  %v762_v9 = vadd.f32 %v761_v2, %v730_v1  ;;  %v733_v4 = vmul.f32 %v13131_v7, %v13131_v7  ;;  %v13161_v30 = vsub.f32 %v12995_v36, %v13043_v19 }
 0x189   :  { %v722_v23 = vmul.f32 %v13137_v11, %v13137_v11  ;;  %v13167_v31 = vsub.f32 %v12979_v20, %v13061_v32  ;;  %v734_v10 = vmul.f32 %v13143_v14, %v13143_v14  ;;  %v13173_v43 = vsub.f32 %v13003_v47, %v13043_v19 }
 0x18a   :  { %v748_v62 = vadd.f32 %v747_v54, %v717_v56  ;;  %v763_v35 = vadd.f32 %v762_v9, %v731_v58  ;;  %v723_v36 = vmul.f32 %v13149_v16, %v13149_v16  ;;  %v13179_v48 = vsub.f32 %v12987_v26, %v13061_v32 }
 0x18b   :  { %v735_v20 = vmul.f32 %v13155_v24, %v13155_v24  ;;  %v694_v50 = vsub.f32 %v13007_v53, %v13043_v19  ;;  %v724_v56 = vmul.f32 %v13161_v30, %v13161_v30  ;;  %v13189_v54 = vsub.f32 %v12991_v34, %v13061_v32 }
 0x18c   :  { %v749_v5 = vadd.f32 %v748_v62, %v718_v59  ;;  %v764_v27 = vadd.f32 %v763_v35, %v732_v0  ;;  %v736_v59 = vmul.f32 %v13167_v31, %v13167_v31  ;;  %v13195_v62 = vsub.f32 %v13014_v60, %v13043_v19 }
 0x18d   :  { %v725_v1 = vmul.f32 %v13173_v43, %v13173_v43  ;;  %v13201_v2 = vsub.f32 %v12998_v42, %v13061_v32  ;;  %v737_v34 = vmul.f32 %v13179_v48, %v13179_v48  ;;  %v13207_v9 = vsub.f32 %v13011_v55, %v13061_v32 }
 0x18e   :  { %v750_v12 = vadd.f32 %v749_v5, %v719_v6  ;;  %v765_v46 = vadd.f32 %v764_v27, %v733_v4  ;;  %v726_v5 = vmul.f32 %v694_v50, %v694_v50  ;;  %v738_v60 = vmul.f32 %v13189_v54, %v13189_v54 }
 0x18f   :  { %v13215_v42 = vsub.f32 %v13018_v63, %v13061_v32  ;;  %v739_v0 = vmul.f32 %v13201_v2, %v13201_v2  ;;  %v13221_v55 = vsub.f32 %v13022_v3, %v13061_v32  ;;  %v13227_v27 = vsub.f32 %v13027_v8, %v13061_v32 }
 0x190   :  { %v751_v17 = vadd.f32 %v750_v12, %v720_v13  ;;  %v766_v52 = vadd.f32 %v765_v46, %v734_v10  ;;  %v727_v13 = vmul.f32 %v13195_v62, %v13195_v62 }
 0x191   :  { %v741_v63 = vmul.f32 %v13215_v42, %v13215_v42  ;;  %v743_v3 = vmul.f32 %v13227_v27, %v13227_v27 }
 0x192   :  { %v752_v33 = vadd.f32 %v751_v17, %v721_v18  ;;  %v767_v26 = vadd.f32 %v766_v52, %v735_v20  ;;  %v740_v17 = vmul.f32 %v13207_v9, %v13207_v9 }
 0x194   :  { %v753_v39 = vadd.f32 %v752_v33, %v722_v23  ;;  %v768_v6 = vadd.f32 %v767_v26, %v736_v59  ;;  %v742_v33 = vmul.f32 %v13221_v55, %v13221_v55 }
 0x196   :  { %v754_v47 = vadd.f32 %v753_v39, %v723_v36  ;;  %v769_v19 = vadd.f32 %v768_v6, %v737_v34  ;;  %v13235_v39 = vpop.permute.xlu1 %820 }
 0x198   :  { %v755_v53 = vadd.f32 %v754_v47, %v724_v56  ;;  %v770_v35 = vadd.f32 %v769_v19, %v738_v60 }
 0x19a   :  { %v756_v58 = vadd.f32 %v755_v53, %v725_v1  ;;  %v771_v4 = vadd.f32 %v770_v35, %v739_v0  ;;  %v13237_v20 = vpop.permute.xlu1 %825 }
 0x19c   :  { %v757_v12 = vadd.f32 %v756_v58, %v726_v5  ;;  %v772_v23 = vadd.f32 %v771_v4, %v740_v17 }
 0x19e   :  { %v758_v18 = vadd.f32 %v757_v12, %v727_v13  ;;  %v773_v10 = vadd.f32 %v772_v23, %v741_v63  ;;  %v13239_v8 = vpop.permute.xlu1 %864 }
 0x1a0   :  { %759 = vadd.xlane.f32.xlu0 %v758_v18  ;;  %v774_v46 = vadd.f32 %v773_v10, %v742_v33 }
 0x1a2   :  { %v775_v36 = vadd.f32 %v774_v46, %v743_v3  ;;  %v13241_v47 = vpop.permute.xlu1 %869 }
 0x1a4   :  { %776 = vadd.xlane.f32.xlu1 %v775_v36 }
 0x229   :  { %v760_v32 = vpop.xlane.xlu0 %759 }
 0x22a   :  { %v778_v52 = vmul.f32 0.00048828125, %v760_v32 }
 0x22c   :  { %v780_v56 = vadd.f32 1e-05, %v778_v52 }
 0x22d   :  { %v777_v59 = vpop.xlane.xlu1 %776 }
 0x22e   :  { %12627 = vrsqrt.f32 %v780_v56  ;;  %v779_v26 = vmul.f32 0.00048828125, %v777_v59 }
 0x230   :  { %v781_v1 = vadd.f32 1e-05, %v779_v26 }
 0x232   :  { %12629 = vrsqrt.f32 %v781_v1 }
 0x23b   :  { %v12628_v53 = vpop.eup %12627 }
 0x23c   :  { %v792_v34 = vmul.f32 %v12628_v53, %v13113_v44  ;;  %v794_v6 = vmul.f32 %v12628_v53, %v13137_v11  ;;  %v796_v5 = vmul.f32 %v12628_v53, %v13161_v30  ;;  %v798_v58 = vmul.f32 %v12628_v53, %v694_v50 }
 0x23d   :  { %v785_v60 = vmul.f32 %v12628_v53, %v13051_v22  ;;  %v787_v19 = vmul.f32 %v12628_v53, %v13065_v28  ;;  %v789_v13 = vmul.f32 %v12628_v53, %v13083_v37  ;;  %v791_v12 = vmul.f32 %v12628_v53, %v13103_v51 }
 0x23e   :  { %v836_v0 = vmul.f32 %v13235_v39, %v792_v34  ;;  %v838_v35 = vmul.f32 %v13235_v39, %v794_v6  ;;  %v840_v18 = vmul.f32 %v13235_v39, %v796_v5  ;;  %v842_v44 = vmul.f32 %v13235_v39, %v798_v58 }
 0x23f   :  { %v829_v11 = vmul.f32 %v13235_v39, %v785_v60  ;;  %v831_v30 = vmul.f32 %v13235_v39, %v787_v19  ;;  %v833_v22 = vmul.f32 %v13235_v39, %v789_v13  ;;  %v835_v28 = vmul.f32 %v13235_v39, %v791_v12 }
 0x240   :  { %v880_v37 = vadd.f32 %v13239_v8, %v836_v0  ;;  %v882_v51 = vadd.f32 %v13239_v8, %v838_v35  ;;  %v884_v50 = vadd.f32 %v13239_v8, %v840_v18  ;;  %v886_v17 = vadd.f32 %v13239_v8, %v842_v44  ;;  %v13278_v44 = vpop.eup %12629 }
 0x241   :  { %v873_v4 = vadd.f32 %v13239_v8, %v829_v11  ;;  %v875_v63 = vadd.f32 %v13239_v8, %v831_v30  ;;  %v877_v23 = vadd.f32 %v13239_v8, %v833_v22  ;;  %v879_v33 = vadd.f32 %v13239_v8, %v835_v28 }
 0x242   :  { %v912_v10 = vmax.f32 %v880_v37, 0.0  ;;  %v914_v3 = vmax.f32 %v882_v51, 0.0  ;;  %v916_v46 = vmax.f32 %v884_v50, 0.0  ;;  %v918_v36 = vmax.f32 %v886_v17, 0.0 }
 0x243   :  { %v905_v32 = vmax.f32 %v873_v4, 0.0  ;;  %v907_v52 = vmax.f32 %v875_v63, 0.0  ;;  %v909_v56 = vmax.f32 %v877_v23, 0.0  ;;  %v911_v59 = vmax.f32 %v879_v33, 0.0 }
 0x244   :  { %v952_v26 = vmax.f32 %v912_v10, %v914_v3  ;;  %v793_v1 = vmul.f32 %v12628_v53, %v13125_v49  ;;  %v795_v34 = vmul.f32 %v12628_v53, %v13149_v16  ;;  %v797_v6 = vmul.f32 %v12628_v53, %v13173_v43 }
 0x245   :  { %v937_v5 = vmax.f32 %v905_v32, %v907_v52  ;;  %v799_v58 = vmul.f32 %v12628_v53, %v13195_v62  ;;  %v784_v60 = vmul.f32 %v12628_v53, %v13047_v21  ;;  %v786_v19 = vmul.f32 %v12628_v53, %v13055_v25 }
 0x246   :  { %v956_v13 = vmax.f32 %v952_v26, %v916_v46  ;;  %v837_v12 = vmul.f32 %v13235_v39, %v793_v1  ;;  %v839_v0 = vmul.f32 %v13235_v39, %v795_v34  ;;  %v841_v35 = vmul.f32 %v13235_v39, %v797_v6 }
 0x247   :  { %v941_v18 = vmax.f32 %v937_v5, %v909_v56  ;;  %v843_v49 = vmul.f32 %v13235_v39, %v799_v58  ;;  %v788_v16 = vmul.f32 %v12628_v53, %v13069_v29  ;;  %v790_v43 = vmul.f32 %v12628_v53, %v13089_v45 }
 0x248   :  { %v13280_v62 = vmax.f32 %v956_v13, %v918_v36  ;;  %v881_v21 = vadd.f32 %v13239_v8, %v837_v12  ;;  %v883_v25 = vadd.f32 %v13239_v8, %v839_v0  ;;  %v885_v11 = vadd.f32 %v13239_v8, %v841_v35 }
 0x249   :  { %v13285_v30 = vmax.f32 %v941_v18, %v911_v59  ;;  %v887_v22 = vadd.f32 %v13239_v8, %v843_v49  ;;  %v828_v28 = vmul.f32 %v13235_v39, %v784_v60  ;;  %v830_v29 = vmul.f32 %v13235_v39, %v786_v19 }
 0x24a   :  { %1548 = vrot.lane.b32.xlu1 %v13280_v62, %s12663_s3  ;;  %v913_v45 = vmax.f32 %v881_v21, 0.0  ;;  %v915_v53 = vmax.f32 %v883_v25, 0.0  ;;  %v917_v37 = vmax.f32 %v885_v11, 0.0  ;;  %v832_v51 = vmul.f32 %v13235_v39, %v788_v16 }
 0x24b   :  { %1544 = vrot.lane.b32.xlu0 %v13285_v30, %s12663_s3  ;;  %v919_v50 = vmax.f32 %v887_v22, 0.0  ;;  %v834_v17 = vmul.f32 %v13235_v39, %v790_v43  ;;  %v872_v4 = vadd.f32 %v13239_v8, %v828_v28  ;;  %v874_v63 = vadd.f32 %v13239_v8, %v830_v29 }
 0x24c   :  { %v953_v23 = vmax.f32 %v913_v45, %v915_v53  ;;  %v876_v33 = vadd.f32 %v13239_v8, %v832_v51  ;;  %v801_v10 = vmul.f32 %v13278_v44, %v13079_v41  ;;  %v803_v3 = vmul.f32 %v13278_v44, %v13109_v57 }
 0x24d   :  { %v878_v46 = vadd.f32 %v13239_v8, %v834_v17  ;;  %v904_v36 = vmax.f32 %v872_v4, 0.0  ;;  %v906_v32 = vmax.f32 %v874_v63, 0.0  ;;  %v805_v39 = vmul.f32 %v13278_v44, %v13131_v7 }
 0x24e   :  { %v957_v52 = vmax.f32 %v953_v23, %v917_v37  ;;  %v908_v56 = vmax.f32 %v876_v33, 0.0  ;;  %v807_v59 = vmul.f32 %v13278_v44, %v13155_v24  ;;  %v845_v26 = vmul.f32 %v13237_v20, %v801_v10 }
 0x24f   :  { %v910_v1 = vmax.f32 %v878_v46, 0.0  ;;  %v936_v34 = vmax.f32 %v904_v36, %v906_v32  ;;  %v847_v41 = vmul.f32 %v13237_v20, %v803_v3  ;;  %v849_v57 = vmul.f32 %v13237_v20, %v805_v39 }
 0x250   :  { %v13311_v6 = vmax.f32 %v957_v52, %v919_v50  ;;  %v851_v8 = vmul.f32 %v13237_v20, %v807_v59  ;;  %v889_v5 = vadd.f32 %v13241_v47, %v845_v26  ;;  %v808_v7 = vmul.f32 %v13278_v44, %v13167_v31 }
 0x251   :  { %v940_v58 = vmax.f32 %v936_v34, %v908_v56  ;;  %v891_v24 = vadd.f32 %v13241_v47, %v847_v41  ;;  %v893_v60 = vadd.f32 %v13241_v47, %v849_v57  ;;  %v810_v19 = vmul.f32 %v13278_v44, %v13189_v54 }
 0x252   :  { %1552 = vrot.lane.b32.xlu0 %v13311_v6, %s12663_s3  ;;  %v895_v13 = vadd.f32 %v13241_v47, %v851_v8  ;;  %v921_v12 = vmax.f32 %v889_v5, 0.0  ;;  %v812_v0 = vmul.f32 %v13278_v44, %v13207_v9  ;;  %v814_v31 = vmul.f32 %v13278_v44, %v13221_v55 }
 0x253   :  { %v13328_v35 = vmax.f32 %v940_v58, %v910_v1  ;;  %v923_v18 = vmax.f32 %v891_v24, 0.0  ;;  %v925_v49 = vmax.f32 %v893_v60, 0.0  ;;  %v852_v16 = vmul.f32 %v13237_v20, %v808_v7 }
 0x254   :  { %v927_v43 = vmax.f32 %v895_v13, 0.0  ;;  %v854_v54 = vmul.f32 %v13237_v20, %v810_v19  ;;  %v856_v21 = vmul.f32 %v13237_v20, %v812_v0  ;;  %v858_v25 = vmul.f32 %v13237_v20, %v814_v31 }
 0x255   :  { %1540 = vrot.lane.b32.xlu1 %v13328_v35, %s12663_s3  ;;  %v939_v9 = vmax.f32 %v921_v12, %v923_v18  ;;  %v896_v11 = vadd.f32 %v13241_v47, %v852_v16  ;;  %v800_v55 = vmul.f32 %v13278_v44, %v13075_v38  ;;  %v802_v22 = vmul.f32 %v13278_v44, %v13095_v40  ;;  %v1750_v16 = vld [vmem:[%s17290_s6 + $0x10] sm:$0xff] }
 0x256   :  { %1460 = vrot.lane.b32.xlu0 %v13285_v30, %s12664_s4  ;;  %v898_v28 = vadd.f32 %v13241_v47, %v854_v54  ;;  %v900_v29 = vadd.f32 %v13241_v47, %v856_v21  ;;  %v902_v45 = vadd.f32 %v13241_v47, %v858_v25  ;;  %v804_v53 = vmul.f32 %v13278_v44, %v13119_v61  ;;  %v1748_v25 = vld [vmem:[%s17290_s6] sm:$0xff] }
 0x257   :  { %v943_v37 = vmax.f32 %v939_v9, %v925_v49  ;;  %v928_v51 = vmax.f32 %v896_v11, 0.0  ;;  %v806_v38 = vmul.f32 %v13278_v44, %v13143_v14  ;;  %v844_v40 = vmul.f32 %v13237_v20, %v800_v55 }
 0x258   :  { %v930_v50 = vmax.f32 %v898_v28, 0.0  ;;  %v932_v17 = vmax.f32 %v900_v29, 0.0  ;;  %v934_v4 = vmax.f32 %v902_v45, 0.0  ;;  %v846_v63 = vmul.f32 %v13237_v20, %v802_v22  ;;  %v10421_v28 = vld [vmem:[%s17295_s11 + $0x7] ss:$8 sm:$0xf] }
 0x259   :  { %v13352_v23 = vmax.f32 %v943_v37, %v927_v43  ;;  %v848_v33 = vmul.f32 %v13237_v20, %v804_v53  ;;  %v850_v10 = vmul.f32 %v13237_v20, %v806_v38  ;;  %v888_v61 = vadd.f32 %v13241_v47, %v844_v40  ;;  %v12085_v53 = vld [vmem:[%s17289_s5 + $0x4] ss:$8 sps:$4 sm:$0xff]  }
 0x25a   :  { %1464 = vrot.lane.b32.xlu0 %v13280_v62, %s12664_s4  ;;  %v954_v3 = vmax.f32 %v928_v51, %v930_v50  ;;  %v890_v14 = vadd.f32 %v13241_v47, %v846_v63  ;;  %v809_v46 = vmul.f32 %v13278_v44, %v13179_v48  ;;  %v811_v36 = vmul.f32 %v13278_v44, %v13201_v2 }
 0x25b   :  { %1546 = vrot.lane.b32.xlu1 %v13352_v23, %s12663_s3  ;;  %v892_v32 = vadd.f32 %v13241_v47, %v848_v33  ;;  %v894_v39 = vadd.f32 %v13241_v47, %v850_v10  ;;  %v920_v52 = vmax.f32 %v888_v61, 0.0  ;;  %v813_v56 = vmul.f32 %v13278_v44, %v13215_v42  ;;  %10471 = vmatprep.mubr.msk.bf16.mxu0 %vm1970_vm4, %v12085_v53 }
 0x25c   :  { %v958_v59 = vmax.f32 %v954_v3, %v932_v17  ;;  %v922_v26 = vmax.f32 %v890_v14, 0.0  ;;  %v815_v1 = vmul.f32 %v13278_v44, %v13227_v27  ;;  %v853_v48 = vmul.f32 %v13237_v20, %v809_v46  ;;  %10473 = vmatprep.mubr.msk.bf16.mxu1 %vm1970_vm4, %v12085_v53 }
 0x25d   :  { %v924_v34 = vmax.f32 %v892_v32, 0.0  ;;  %v855_v2 = vmul.f32 %v13237_v20, %v811_v36  ;;  %v857_v41 = vmul.f32 %v13237_v20, %v813_v56  ;;  %v926_v44 = vmax.f32 %v894_v39, 0.0 }
 0x25e   :  { %v13375_v57 = vmax.f32 %v958_v59, %v934_v4  ;;  %1456 = vrot.lane.b32.xlu0 %v13328_v35, %s12664_s4  ;;  %v938_v8 = vmax.f32 %v920_v52, %v922_v26  ;;  %v859_v42 = vmul.f32 %v13237_v20, %v815_v1  ;;  %v897_v5 = vadd.f32 %v13241_v47, %v853_v48 }
 0x25f   :  { %v899_v7 = vadd.f32 %v13241_v47, %v855_v2  ;;  %v901_v27 = vadd.f32 %v13241_v47, %v857_v41  ;;  %v17299_v54 = vlaneseq  ;;  %v1751_v2 = vld [vmem:[%s17290_s6 + $0x18] sm:$0xff] }
 0x260   :  { %1550 = vrot.lane.b32.xlu1 %v13375_v57, %s12663_s3  ;;  %v942_v58 = vmax.f32 %v938_v8, %v924_v34  ;;  %v929_v24 = vmax.f32 %v897_v5, 0.0  ;;  %v903_v60 = vadd.f32 %v13241_v47, %v859_v42 }
 0x261   :  { %v931_v19 = vmax.f32 %v899_v7, 0.0  ;;  %v933_v20 = vmax.f32 %v901_v27, 0.0  ;;  %v13501_v11 = vand.u32 127, %v17299_v54  ;;  %v13504_v55 = vshrl.u32 %v17299_v54, 7 }
 0x262   :  { %v13386_v13 = vmax.f32 %v942_v58, %v926_v44  ;;  %1468 = vrot.lane.b32.xlu0 %v13311_v6, %s12664_s4  ;;  %v935_v0 = vmax.f32 %v903_v60, 0.0  ;;  %v1749_v60 = vld [vmem:[%s17290_s6 + $0x8] sm:$0xff] }
 0x263   :  { %v955_v12 = vmax.f32 %v929_v24, %v931_v19  ;;  %17394 = vst [vmem:[#allocation10_spill] sm:$0xff] %v13504_v55  ;;  %v13514_v45 = vsub.s32 1, %v13504_v55  ;;  %vm1556_vm3 = vcmp.lt.s32.totalorder %v13501_v11, 112  ;;  %v13529_v40 = vsub.s32 0, %v13504_v55 }
 0x264   :  { %1542 = vrot.lane.b32.xlu1 %v13386_v13, %s12663_s3  ;;  %v13540_v46 = vsub.s32 2, %v13504_v55  ;;  %v13543_v36 = vsub.s32 3, %v13504_v55  ;;  %v10416_v24 = vld [vmem:[%s17295_s11 + $0x6] ss:$8 sm:$0xf]  ;;  %vm1472_vm5 = vcmp.lt.s32.totalorder %v13501_v11, 113 }
 0x265   :  { %v959_v31 = vmax.f32 %v955_v12, %v933_v20  ;;  %v1575_v37 = vrot.slane %v10421_v28, %v13514_v45  ;;  %17395 = vst [vmem:[#allocation11_spill] sm:$0xff] %v13529_v40  ;;  %v1571_v63 = vrot.slane %v10421_v28, %v13529_v40  ;;  %vm1388_vm6 = vcmp.lt.s32.totalorder %v13501_v11, 127 }
 0x266   :  { %1376 = vrot.lane.b32.xlu0 %v13285_v30, %s12665_s22  ;;  %17396 = vst [vmem:[#allocation12_spill] sm:$0xff] %v13540_v46  ;;  %17397 = vst [vmem:[#allocation13_spill] sm:$0xff] %v13543_v36  ;;  %v1579_v59 = vrot.slane %v10421_v28, %v13540_v46  ;;  %v1583_v26 = vrot.slane %v10421_v28, %v13543_v36  ;;  %vm1245_vm7 = vcmp.lt.s32.totalorder %v13501_v11, 1  ;;  %vm1161_vm8 = vcmp.lt.s32.totalorder %v13501_v11, 15 }
 0x267   :  { %v13394_v18 = vmax.f32 %v959_v31, %v935_v0  ;;  %v1491_v31 = vrot.slane %v10416_v24, %v13514_v45  ;;  %vm1077_vm9 = vcmp.lt.s32.totalorder %v13501_v11, 16  ;;  %vm994_vm10 = vcmp.lt.s32.totalorder %v13501_v11, 17 }
 0x268   :  { %vm1640_vm11 = vcmp.lt.s32.totalorder %v13501_v11, 111 }
 0x269   :  { %1554 = vrot.lane.b32.xlu1 %v13394_v18, %s12663_s3 }
 0x26a   :  { %1380 = vrot.lane.b32.xlu0 %v13280_v62, %s12665_s22 }
 0x26d   :  { %1462 = vrot.lane.b32.xlu1 %v13352_v23, %s12664_s4 }
 0x26e   :  { %1372 = vrot.lane.b32.xlu0 %v13328_v35, %s12665_s22 }
 0x271   :  { %1466 = vrot.lane.b32.xlu1 %v13375_v57, %s12664_s4 }
 0x272   :  { %1384 = vrot.lane.b32.xlu0 %v13311_v6, %s12665_s22 }
 0x275   :  { %1458 = vrot.lane.b32.xlu1 %v13386_v13, %s12664_s4 }
 0x276   :  { %1229 = vrot.lane.b32.xlu0 %v13328_v35, %s12666_s23 }
 0x279   :  { %1470 = vrot.lane.b32.xlu1 %v13394_v18, %s12664_s4 }
 0x27a   :  { %1233 = vrot.lane.b32.xlu0 %v13285_v30, %s12666_s23 }
 0x27d   :  { %1378 = vrot.lane.b32.xlu1 %v13352_v23, %s12665_s22 }
 0x27e   :  { %1237 = vrot.lane.b32.xlu0 %v13280_v62, %s12666_s23 }
 0x281   :  { %1382 = vrot.lane.b32.xlu1 %v13375_v57, %s12665_s22 }
 0x282   :  { %1241 = vrot.lane.b32.xlu0 %v13311_v6, %s12666_s23 }
 0x285   :  { %1374 = vrot.lane.b32.xlu1 %v13386_v13, %s12665_s22 }
 0x286   :  { %1145 = vrot.lane.b32.xlu0 %v13328_v35, %s12667_s24 }
 0x289   :  { %1386 = vrot.lane.b32.xlu1 %v13394_v18, %s12665_s22 }
 0x28a   :  { %1149 = vrot.lane.b32.xlu0 %v13285_v30, %s12667_s24 }
 0x28d   :  { %1231 = vrot.lane.b32.xlu1 %v13386_v13, %s12666_s23 }
 0x28e   :  { %1153 = vrot.lane.b32.xlu0 %v13280_v62, %s12667_s24 }
 0x291   :  { %1235 = vrot.lane.b32.xlu1 %v13352_v23, %s12666_s23 }
 0x292   :  { %1157 = vrot.lane.b32.xlu0 %v13311_v6, %s12667_s24 }
 0x295   :  { %1239 = vrot.lane.b32.xlu1 %v13375_v57, %s12666_s23 }
 0x296   :  { %1061 = vrot.lane.b32.xlu0 %v13328_v35, %s12668_s2 }
 0x299   :  { %1243 = vrot.lane.b32.xlu1 %v13394_v18, %s12666_s23 }
 0x29a   :  { %1065 = vrot.lane.b32.xlu0 %v13285_v30, %s12668_s2 }
 0x29d   :  { %1147 = vrot.lane.b32.xlu1 %v13386_v13, %s12667_s24 }
 0x29e   :  { %1069 = vrot.lane.b32.xlu0 %v13280_v62, %s12668_s2 }
 0x2a1   :  { %1151 = vrot.lane.b32.xlu1 %v13352_v23, %s12667_s24 }
 0x2a2   :  { %1073 = vrot.lane.b32.xlu0 %v13311_v6, %s12668_s2 }
 0x2a5   :  { %1155 = vrot.lane.b32.xlu1 %v13375_v57, %s12667_s24 }
 0x2a6   :  { %976 = vrot.lane.b32.xlu0 %v13328_v35, %s12669_s25 }
 0x2a9   :  { %1159 = vrot.lane.b32.xlu1 %v13394_v18, %s12667_s24 }
 0x2aa   :  { %980 = vrot.lane.b32.xlu0 %v13285_v30, %s12669_s25 }
 0x2ad   :  { %1063 = vrot.lane.b32.xlu1 %v13386_v13, %s12668_s2 }
 0x2ae   :  { %984 = vrot.lane.b32.xlu0 %v13280_v62, %s12669_s25 }
 0x2b1   :  { %1067 = vrot.lane.b32.xlu1 %v13352_v23, %s12668_s2 }
 0x2b2   :  { %988 = vrot.lane.b32.xlu0 %v13311_v6, %s12669_s25 }
 0x2b5   :  { %1071 = vrot.lane.b32.xlu1 %v13375_v57, %s12668_s2 }
 0x2b6   :  { %1628 = vrot.lane.b32.xlu0 %v13285_v30, %s12670_s26 }
 0x2b9   :  { %1075 = vrot.lane.b32.xlu1 %v13394_v18, %s12668_s2 }
 0x2ba   :  { %1632 = vrot.lane.b32.xlu0 %v13280_v62, %s12670_s26 }
 0x2bc   :  { %v1549_v49 = vpop.permute.xlu1 %1548 }
 0x2bd   :  { %978 = vrot.lane.b32.xlu1 %v13386_v13, %s12669_s25  ;;  %v1545_v47 = vpop.permute.xlu0 %1544 }
 0x2be   :  { %1624 = vrot.lane.b32.xlu0 %v13328_v35, %s12670_s26  ;;  %v1559_v38 = vsel %vm1556_vm3, %v1545_v47, %v1549_v49 }
 0x2bf   :  { %v1589_v4 = vmul.f32 %v1575_v37, %v1559_v38 }
 0x2c1   :  { %982 = vrot.lane.b32.xlu1 %v13352_v23, %s12669_s25 }
 0x2c2   :  { %1636 = vrot.lane.b32.xlu0 %v13311_v6, %s12670_s26 }
 0x2c4   :  { %v1553_v43 = vpop.permute.xlu0 %1552 }
 0x2c5   :  { %986 = vrot.lane.b32.xlu1 %v13375_v57, %s12669_s25  ;;  %v1557_v1 = vsel %vm1556_vm3, %v1549_v49, %v1553_v43 }
 0x2c6   :  { %1764 = vperm.xlu0 %12082, %v1750_v16   ;;  %v1590_v7 = vmul.f32 %v1579_v59, %v1557_v1 }
 0x2c7   :  { %v1541_v21 = vpop.permute.xlu1 %1540 }
 0x2c8   :  { %v13496_v9 = vpop.permute.xlu0 %1460  ;;  %v1561_v61 = vsel %vm1556_vm3, %v1541_v21, %v1545_v47  ;;  %v1563_v48 = vsel %vm1556_vm3, %v1553_v43, %v1541_v21 }
 0x2c9   :  { %990 = vrot.lane.b32.xlu1 %v13394_v18, %s12669_s25  ;;  %v1588_v39 = vmul.f32 %v1571_v63, %v1561_v61  ;;  %v1591_v27 = vmul.f32 %v1583_v26, %v1563_v48 }
 0x2ca   :  { %1754 = vperm.xlu0 %12082, %v1748_v25   ;;  %v1487_v25 = vrot.slane %v10416_v24, %v13529_v40 }
 0x2cc   :  { %v13506_v22 = vpop.permute.xlu0 %1464 }
 0x2cd   :  { %1630 = vrot.lane.b32.xlu1 %v13352_v23, %s12670_s26  ;;  %v1547_v29 = vpop.permute.xlu1 %1546  ;;  %v1475_v47 = vsel %vm1472_vm5, %v13496_v9, %v13506_v22 }
 0x2ce   :  { %v1505_v21 = vmul.f32 %v1491_v31, %v1475_v47 }
 0x2d0   :  { %v13521_v51 = vpop.permute.xlu0 %1456 }
 0x2d1   :  { %1634 = vrot.lane.b32.xlu1 %v13375_v57, %s12670_s26 }
 0x2d2   :  { %v1551_v50 = vpop.permute.xlu1 %1550 }
 0x2d3   :  { %v1560_v17 = vsel %vm1556_vm3, %v1547_v29, %v1551_v50 }
 0x2d4   :  { %v1593_v33 = vmul.f32 %v1575_v37, %v1560_v17  ;;  %v1469_v10 = vpop.permute.xlu0 %1468 }
 0x2d5   :  { %1626 = vrot.lane.b32.xlu1 %v13386_v13, %s12670_s26  ;;  %v1473_v61 = vsel %vm1472_vm5, %v13506_v22, %v1469_v10  ;;  %v10411_v22 = vld [vmem:[%s17295_s11 + $0x5] ss:$8 sm:$0xf] }
 0x2d6   :  { %v1543_v3 = vpop.permute.xlu1 %1542  ;;  %v11287_v14 = vpack.c.bf16 %v1593_v33, %v1589_v4  ;;  %v1495_v4 = vrot.slane %v10416_v24, %v13540_v46 }
 0x2d7   :  { %v1562_v32 = vsel %vm1556_vm3, %v1543_v3, %v1547_v29  ;;  %v1477_v29 = vsel %vm1472_vm5, %v13521_v51, %v13496_v9  ;;  %v1479_v9 = vsel %vm1472_vm5, %v1469_v10, %v13521_v51 }
 0x2d8   :  { %v1592_v52 = vmul.f32 %v1571_v63, %v1562_v32  ;;  %1977 = vmatprep.subr.bf16.mxu0 %v11287_v14  ;;  %v13547_v56 = vpop.permute.xlu0 %1376  ;;  %v1504_v17 = vmul.f32 %v1487_v25, %v1477_v29  ;;  %v1499_v63 = vrot.slane %v10416_v24, %v13543_v36  ;;  %v1403_v24 = vrot.slane %v10411_v22, %v13529_v40 }
 0x2d9   :  { %1638 = vrot.lane.b32.xlu1 %v13394_v18, %s12670_s26  ;;  %v1415_v29 = vrot.slane %v10411_v22, %v13543_v36 }
 0x2da   :  { %v11286_v34 = vpack.c.bf16 %v1592_v52, %v1588_v39 }
 0x2db   :  { %v1555_v41 = vpop.permute.xlu1 %1554 }
 0x2dc   :  { %v1558_v8 = vsel %vm1556_vm3, %v1551_v50, %v1555_v41  ;;  %v1564_v42 = vsel %vm1556_vm3, %v1555_v41, %v1543_v3  ;;  %1978 = vmatpush1.bf16.msra.mxu0 %v11286_v34  ;;  %v13564_v5 = vpop.permute.xlu0 %1380  ;;  %v1407_v41 = vrot.slane %v10411_v22, %v13514_v45 }
 0x2dd   :  { %v1594_v44 = vmul.f32 %v1579_v59, %v1558_v8  ;;  %v1595_v58 = vmul.f32 %v1583_v26, %v1564_v42  ;;  %1769 = vperm.xlu1 %12083, %v1751_v2   ;;  %v1506_v59 = vmul.f32 %v1495_v4, %v1473_v61  ;;  %v1507_v26 = vmul.f32 %v1499_v63, %v1479_v9 }
 0x2de   :  { %v1391_v8 = vsel %vm1388_vm6, %v13547_v56, %v13564_v5 }
 0x2df   :  { %v11288_v19 = vpack.c.bf16 %v1594_v44, %v1590_v7  ;;  %v1463_v20 = vpop.permute.xlu1 %1462  ;;  %v11289_v12 = vpack.c.bf16 %v1595_v58, %v1591_v27  ;;  %v10406_v7 = vld [vmem:[%s17295_s11 + $0x4] ss:$8 sm:$0xf]  ;;  %v1421_v58 = vmul.f32 %v1407_v41, %v1391_v8 }
 0x2e0   :  { %v13573_v0 = vpop.permute.xlu0 %1372  ;;  %v1319_v47 = vrot.slane %v10406_v7, %v13529_v40 }
 0x2e1   :  { %1759 = vperm.xlu1 %12083, %v1749_v60   ;;  %2030 = vmatprep.subr.bf16.mxu1 %v11289_v12 }
 0x2e2   :  { %2031 = vmatpush1.bf16.msra.mxu1 %v11288_v19  ;;  %v1393_v19 = vsel %vm1388_vm6, %v13573_v0, %v13547_v56 }
 0x2e3   :  { %v1467_v49 = vpop.permute.xlu1 %1466 }
 0x2e4   :  { %v1476_v16 = vsel %vm1472_vm5, %v1463_v20, %v1467_v49  ;;  %v1385_v43 = vpop.permute.xlu0 %1384 }
 0x2e5   :  { %v1509_v28 = vmul.f32 %v1491_v31, %v1476_v16  ;;  %v1389_v56 = vsel %vm1388_vm6, %v13564_v5, %v1385_v43 }
 0x2e7   :  { %v1459_v53 = vpop.permute.xlu1 %1458  ;;  %v11283_v37 = vpack.c.bf16 %v1509_v28, %v1505_v21  ;;  %v1411_v28 = vrot.slane %v10411_v22, %v13540_v46 }
 0x2e8   :  { %v1478_v38 = vsel %vm1472_vm5, %v1459_v53, %v1463_v20  ;;  %v13589_v50 = vpop.permute.xlu0 %1229  ;;  %v1323_v20 = vrot.slane %v10406_v7, %v13514_v45 }
 0x2e9   :  { %v1508_v33 = vmul.f32 %v1487_v25, %v1478_v38  ;;  %1979 = vmatprep.subr.bf16.mxu0 %v11283_v37  ;;  %v1420_v25 = vmul.f32 %v1403_v24, %v1393_v19  ;;  %v1395_v37 = vsel %vm1388_vm6, %v1385_v43, %v13573_v0 }
 0x2ea   :  { %v1341_v16 = vmul.f32 %v1323_v20, %v13352_v23  ;;  %v1337_v38 = vmul.f32 %v1323_v20, %v13285_v30  ;;  %v1331_v23 = vrot.slane %v10406_v7, %v13543_v36  ;;  %v1422_v30 = vmul.f32 %v1411_v28, %v1389_v56 }
 0x2eb   :  { %v11282_v3 = vpack.c.bf16 %v1508_v33, %v1504_v17  ;;  %v1471_v14 = vpop.permute.xlu1 %1470  ;;  %v1340_v33 = vmul.f32 %v1319_v47, %v13386_v13  ;;  %v1423_v43 = vmul.f32 %v1415_v29, %v1395_v37 }
 0x2ec   :  { %v1474_v32 = vsel %vm1472_vm5, %v1467_v49, %v1471_v14  ;;  %v1480_v39 = vsel %vm1472_vm5, %v1471_v14, %v1459_v53  ;;  %v13603_v52 = vpop.permute.xlu0 %1233  ;;  %v11275_v9 = vpack.c.bf16 %v1341_v16, %v1337_v38  ;;  %v1343_v0 = vmul.f32 %v1331_v23, %v13394_v18 }
 0x2ed   :  { %v1510_v1 = vmul.f32 %v1495_v4, %v1474_v32  ;;  %v1511_v48 = vmul.f32 %v1499_v63, %v1480_v39  ;;  %1980 = vmatpush1.bf16.msra.mxu0 %v11282_v3  ;;  %v1336_v63 = vmul.f32 %v1319_v47, %v13328_v35  ;;  %v10401_v35 = vld [vmem:[%s17295_s11 + $0x3] ss:$8 sm:$0xf]  ;;  %v1339_v13 = vmul.f32 %v1331_v23, %v13311_v6 }
 0x2ee   :  { %v1327_v39 = vrot.slane %v10406_v7, %v13540_v46  ;;  %v1250_v6 = vsel %vm1245_vm7, %v13589_v50, %v13603_v52  ;;  %v1260_v19 = vrot.slane %v10401_v35, %v13529_v40  ;;  %v1272_v20 = vrot.slane %v10401_v35, %v13543_v36 }
 0x2ef   :  { %v11284_v51 = vpack.c.bf16 %v1510_v1, %v1506_v59  ;;  %v1379_v10 = vpop.permute.xlu1 %1378  ;;  %v11285_v34 = vpack.c.bf16 %v1511_v48, %v1507_v26  ;;  %v11274_v1 = vpack.c.bf16 %v1340_v33, %v1336_v63 }
 0x2f0   :  { %v13609_v2 = vpop.permute.xlu0 %1237  ;;  %v1342_v48 = vmul.f32 %v1327_v39, %v13375_v57 }
 0x2f1   :  { %2032 = vmatprep.subr.bf16.mxu1 %v11285_v34  ;;  %v1338_v34 = vmul.f32 %v1327_v39, %v13280_v62 }
 0x2f2   :  { %2033 = vmatpush1.bf16.msra.mxu1 %v11284_v51  ;;  %v1264_v51 = vrot.slane %v10401_v35, %v13514_v45 }
 0x2f3   :  { %v1383_v42 = vpop.permute.xlu1 %1382  ;;  %v11276_v8 = vpack.c.bf16 %v1342_v48, %v1338_v34 }
 0x2f4   :  { %v1392_v27 = vsel %vm1388_vm6, %v1379_v10, %v1383_v42  ;;  %v13621_v44 = vpop.permute.xlu0 %1241  ;;  %v1278_v7 = vmul.f32 %v1264_v51, %v1250_v6 }
 0x2f5   :  { %v1425_v60 = vmul.f32 %v1407_v41, %v1392_v27  ;;  %v1252_v47 = vsel %vm1245_vm7, %v13621_v44, %v13589_v50 }
 0x2f6   :  { %v1277_v56 = vmul.f32 %v1260_v19, %v1252_v47 }
 0x2f7   :  { %v1375_v12 = vpop.permute.xlu1 %1374  ;;  %v11279_v31 = vpack.c.bf16 %v1425_v60, %v1421_v58 }
 0x2f8   :  { %v1394_v49 = vsel %vm1388_vm6, %v1375_v12, %v1379_v10  ;;  %v13633_v21 = vpop.permute.xlu0 %1145  ;;  %v11277_v10 = vpack.c.bf16 %v1343_v0, %v1339_v13 }
 0x2f9   :  { %v1424_v53 = vmul.f32 %v1403_v24, %v1394_v49  ;;  %1981 = vmatprep.subr.bf16.mxu0 %v11279_v31  ;;  %v1246_v31 = vsel %vm1245_vm7, %v13609_v2, %v13621_v44  ;;  %v1248_v49 = vsel %vm1245_vm7, %v13603_v52, %v13609_v2  ;;  %v10396_v44 = vld [vmem:[%s17295_s11 + $0x2] ss:$8 sm:$0xf] }
 0x2fa   :  { %v1280_v37 = vmul.f32 %v1272_v20, %v1246_v31  ;;  %v1180_v63 = vrot.slane %v10396_v44, %v13514_v45  ;;  %v1188_v13 = vrot.slane %v10396_v44, %v13543_v36 }
 0x2fb   :  { %v11278_v17 = vpack.c.bf16 %v1424_v53, %v1420_v25  ;;  %v1387_v4 = vpop.permute.xlu1 %1386 }
 0x2fc   :  { %v1390_v61 = vsel %vm1388_vm6, %v1383_v42, %v1387_v4  ;;  %v1396_v5 = vsel %vm1388_vm6, %v1387_v4, %v1375_v12  ;;  %v13651_v3 = vpop.permute.xlu0 %1149  ;;  %v1268_v12 = vrot.slane %v10401_v35, %v13540_v46  ;;  %v1176_v35 = vrot.slane %v10396_v44, %v13529_v40 }
 0x2fd   :  { %v1426_v14 = vmul.f32 %v1411_v28, %v1390_v61  ;;  %v1427_v32 = vmul.f32 %v1415_v29, %v1396_v5  ;;  %1982 = vmatpush1.bf16.msra.mxu0 %v11278_v17  ;;  %v1166_v61 = vsel %vm1161_vm8, %v13633_v21, %v13651_v3 }
 0x2fe   :  { %1983 = vmatprep.subr.bf16.mxu0 %v11275_v9  ;;  %v1279_v50 = vmul.f32 %v1268_v12, %v1248_v49  ;;  %v1194_v0 = vmul.f32 %v1180_v63, %v1166_v61 }
 0x2ff   :  { %v11280_v59 = vpack.c.bf16 %v1426_v14, %v1422_v30  ;;  %v1232_v26 = vpop.permute.xlu1 %1231  ;;  %v11281_v18 = vpack.c.bf16 %v1427_v32, %v1423_v43 }
 0x300   :  { %v13661_v22 = vpop.permute.xlu0 %1153 }
 0x301   :  { %1984 = vmatpush1.bf16.msra.mxu0 %v11274_v1  ;;  %2034 = vmatprep.subr.bf16.mxu1 %v11281_v18  ;;  %v1164_v18 = vsel %vm1161_vm8, %v13651_v3, %v13661_v22 }
 0x302   :  { %2035 = vmatpush1.bf16.msra.mxu1 %v11280_v59  ;;  %v1184_v59 = vrot.slane %v10396_v44, %v13540_v46 }
 0x303   :  { %2036 = vmatprep.subr.bf16.mxu1 %v11277_v10  ;;  %v1236_v41 = vpop.permute.xlu1 %1235 }
 0x304   :  { %v1251_v57 = vsel %vm1245_vm7, %v1232_v26, %v1236_v41  ;;  %v1158_v42 = vpop.permute.xlu0 %1157 }
 0x305   :  { %v1282_v27 = vmul.f32 %v1264_v51, %v1251_v57  ;;  %v1168_v1 = vsel %vm1161_vm8, %v1158_v42, %v13633_v21  ;;  %v1195_v21 = vmul.f32 %v1184_v59, %v1164_v18 }
 0x306   :  { %2037 = vmatpush1.bf16.msra.mxu1 %v11276_v8  ;;  %v1193_v34 = vmul.f32 %v1176_v35, %v1168_v1 }
 0x307   :  { %v1240_v58 = vpop.permute.xlu1 %1239  ;;  %v11271_v24 = vpack.c.bf16 %v1282_v27, %v1278_v7 }
 0x308   :  { %v13671_v60 = vpop.permute.xlu0 %1061  ;;  %v1249_v62 = vsel %vm1245_vm7, %v1236_v41, %v1240_v58 }
 0x309   :  { %1985 = vmatprep.subr.bf16.mxu0 %v11271_v24  ;;  %v1283_v25 = vmul.f32 %v1268_v12, %v1249_v62 }
 0x30b   :  { %v1244_v16 = vpop.permute.xlu1 %1243  ;;  %v11272_v4 = vpack.c.bf16 %v1283_v25, %v1279_v50 }
 0x30c   :  { %v1247_v28 = vsel %vm1245_vm7, %v1240_v58, %v1244_v16  ;;  %v1253_v29 = vsel %vm1245_vm7, %v1244_v16, %v1232_v26  ;;  %v13694_v53 = vpop.permute.xlu0 %1065  ;;  %v1162_v26 = vsel %vm1161_vm8, %v13661_v22, %v1158_v42  ;;  %v10391_v42 = vld [vmem:[%s17295_s11 + $0x1] ss:$8 sm:$0xf] }
 0x30d   :  { %v1281_v38 = vmul.f32 %v1260_v19, %v1253_v29  ;;  %v1284_v23 = vmul.f32 %v1272_v20, %v1247_v28  ;;  %v1196_v41 = vmul.f32 %v1188_v13, %v1162_v26  ;;  %v1096_v24 = vrot.slane %v10391_v42, %v13514_v45 }
 0x30e   :  { %v1082_v19 = vsel %vm1077_vm9, %v13671_v60, %v13694_v53  ;;  %v1092_v25 = vrot.slane %v10391_v42, %v13529_v40  ;;  %v1104_v28 = vrot.slane %v10391_v42, %v13543_v36 }
 0x30f   :  { %v11270_v52 = vpack.c.bf16 %v1281_v38, %v1277_v56  ;;  %v1148_v2 = vpop.permute.xlu1 %1147  ;;  %v11273_v17 = vpack.c.bf16 %v1284_v23, %v1280_v37  ;;  %v1110_v31 = vmul.f32 %v1096_v24, %v1082_v19  ;;  %v1100_v37 = vrot.slane %v10391_v42, %v13540_v46 }
 0x310   :  { %v1070_v33 = vpop.permute.xlu0 %1069 }
 0x311   :  { %1986 = vmatpush1.bf16.msra.mxu0 %v11270_v52  ;;  %2038 = vmatprep.subr.bf16.mxu1 %v11273_v17  ;;  %v1080_v50 = vsel %vm1077_vm9, %v13694_v53, %v1070_v33 }
 0x312   :  { %2039 = vmatpush1.bf16.msra.mxu1 %v11272_v4 }
 0x313   :  { %v1152_v5 = vpop.permute.xlu1 %1151 }
 0x314   :  { %v1167_v9 = vsel %vm1161_vm8, %v1148_v2, %v1152_v5  ;;  %v1074_v32 = vpop.permute.xlu0 %1073 }
 0x315   :  { %v1198_v30 = vmul.f32 %v1180_v63, %v1167_v9  ;;  %v1078_v38 = vsel %vm1077_vm9, %v1070_v33, %v1074_v32  ;;  %v1084_v23 = vsel %vm1077_vm9, %v1074_v32, %v13671_v60  ;;  %v1111_v9 = vmul.f32 %v1100_v37, %v1080_v50  ;;  %v1003_v60 = vld [vmem:[%s17295_s11] ss:$8 sm:$0xf] }
 0x316   :  { %v1109_v4 = vmul.f32 %v1092_v25, %v1084_v23  ;;  %v1112_v63 = vmul.f32 %v1104_v28, %v1078_v38 }
 0x317   :  { %v1156_v43 = vpop.permute.xlu1 %1155  ;;  %v11267_v14 = vpack.c.bf16 %v1198_v30, %v1194_v0 }
 0x318   :  { %v1165_v39 = vsel %vm1161_vm8, %v1152_v5, %v1156_v43  ;;  %v13726_v7 = vpop.permute.xlu0 %976 }
 0x319   :  { %1987 = vmatprep.subr.bf16.mxu0 %v11267_v14  ;;  %v1199_v51 = vmul.f32 %v1184_v59, %v1165_v39  ;;  %v1012_v14 = vrot.slane %v1003_v60, %v13514_v45 }
 0x31b   :  { %v1160_v48 = vpop.permute.xlu1 %1159  ;;  %v11268_v58 = vpack.c.bf16 %v1199_v51, %v1195_v21  ;;  %v1020_v51 = vrot.slane %v1003_v60, %v13543_v36 }
 0x31c   :  { %v1163_v10 = vsel %vm1161_vm8, %v1156_v43, %v1160_v48  ;;  %v1169_v6 = vsel %vm1161_vm8, %v1160_v48, %v1148_v2  ;;  %v981_v20 = vpop.permute.xlu0 %980  ;;  %v1008_v48 = vrot.slane %v1003_v60, %v13529_v40 }
 0x31d   :  { %v1197_v57 = vmul.f32 %v1176_v35, %v1169_v6  ;;  %v1200_v8 = vmul.f32 %v1188_v13, %v1163_v10  ;;  %v999_v32 = vsel %vm994_vm10, %v13726_v7, %v981_v20  ;;  %v1016_v6 = vrot.slane %v1003_v60, %v13540_v46 }
 0x31e   :  { %v1026_v39 = vmul.f32 %v1012_v14, %v999_v32 }
 0x31f   :  { %v11266_v3 = vpack.c.bf16 %v1197_v57, %v1193_v34  ;;  %v1064_v22 = vpop.permute.xlu1 %1063  ;;  %v11269_v27 = vpack.c.bf16 %v1200_v8, %v1196_v41 }
 0x320   :  { %v985_v29 = vpop.permute.xlu0 %984 }
 0x321   :  { %1988 = vmatpush1.bf16.msra.mxu0 %v11266_v3  ;;  %2040 = vmatprep.subr.bf16.mxu1 %v11269_v27  ;;  %v997_v57 = vsel %vm994_vm10, %v981_v20, %v985_v29 }
 0x322   :  { %2041 = vmatpush1.bf16.msra.mxu1 %v11268_v58 }
 0x323   :  { %v1068_v62 = vpop.permute.xlu1 %1067 }
 0x324   :  { %v1083_v12 = vsel %vm1077_vm9, %v1064_v22, %v1068_v62  ;;  %v989_v53 = vpop.permute.xlu0 %988 }
 0x325   :  { %v1114_v47 = vmul.f32 %v1096_v24, %v1083_v12  ;;  %v995_v34 = vsel %vm994_vm10, %v985_v29, %v989_v53  ;;  %v1001_v41 = vsel %vm994_vm10, %v989_v53, %v13726_v7  ;;  %v10426_v7 = vld [vmem:[%s17295_s11 + $0x20] ss:$8 sm:$0xf] }
 0x326   :  { %v1025_v27 = vmul.f32 %v1008_v48, %v1001_v41  ;;  %v1028_v58 = vmul.f32 %v1020_v51, %v995_v34 }
 0x327   :  { %v1072_v49 = vpop.permute.xlu1 %1071  ;;  %v11263_v16 = vpack.c.bf16 %v1114_v47, %v1110_v31 }
 0x328   :  { %v1081_v56 = vsel %vm1077_vm9, %v1068_v62, %v1072_v49  ;;  %v1629_v59 = vpop.permute.xlu0 %1628  ;;  %v1027_v62 = vmul.f32 %v1016_v6, %v997_v57 }
 0x329   :  { %1989 = vmatprep.subr.bf16.mxu0 %v11263_v16  ;;  %v1115_v52 = vmul.f32 %v1100_v37, %v1081_v56  ;;  %v1655_v37 = vrot.slane %v10426_v7, %v13529_v40 }
 0x32b   :  { %v1076_v44 = vpop.permute.xlu1 %1075  ;;  %v11264_v43 = vpack.c.bf16 %v1115_v52, %v1111_v9 }
 0x32c   :  { %v1079_v2 = vsel %vm1077_vm9, %v1072_v49, %v1076_v44  ;;  %v1085_v17 = vsel %vm1077_vm9, %v1076_v44, %v1064_v22  ;;  %v1633_v8 = vpop.permute.xlu0 %1632  ;;  %v1659_v49 = vrot.slane %v10426_v7, %v13514_v45 }
 0x32d   :  { %v1113_v61 = vmul.f32 %v1092_v25, %v1085_v17  ;;  %v1116_v5 = vmul.f32 %v1104_v28, %v1079_v2  ;;  %v1643_v25 = vsel %vm1640_vm11, %v1629_v59, %v1633_v8 }
 0x32e   :  { %v1673_v56 = vmul.f32 %v1659_v49, %v1643_v25 }
 0x32f   :  { %v11262_v33 = vpack.c.bf16 %v1113_v61, %v1109_v4  ;;  %v979_v0 = vpop.permute.xlu1 %978  ;;  %v11265_v30 = vpack.c.bf16 %v1116_v5, %v1112_v63  ;;  %v1663_v4 = vrot.slane %v10426_v7, %v13540_v46  ;;  %v1667_v63 = vrot.slane %v10426_v7, %v13543_v36 }
 0x330   :  { %v1625_v16 = vpop.permute.xlu0 %1624 }
 0x331   :  { %1990 = vmatpush1.bf16.msra.mxu0 %v11262_v33  ;;  %2042 = vmatprep.subr.bf16.mxu1 %v11265_v30  ;;  %v1645_v23 = vsel %vm1640_vm11, %v1625_v16, %v1629_v59  ;;  %v12087_v30 = vld [vmem:[%s17289_s5] ss:$8 sps:$4 sm:$0xff]  }
 0x332   :  { %2043 = vmatpush1.bf16.msra.mxu1 %v11264_v43  ;;  %v1672_v17 = vmul.f32 %v1655_v37, %v1645_v23 }
 0x333   :  { %v983_v35 = vpop.permute.xlu1 %982 }
 0x334   :  { %v1000_v13 = vsel %vm994_vm10, %v979_v0, %v983_v35  ;;  %v1637_v50 = vpop.permute.xlu0 %1636 }
 0x335   :  { %v1030_v26 = vmul.f32 %v1012_v14, %v1000_v13  ;;  %v1641_v5 = vsel %vm1640_vm11, %v1633_v8, %v1637_v50  ;;  %v1647_v9 = vsel %vm1640_vm11, %v1637_v50, %v1625_v16  ;;  %v12088_v13 = vld [vmem:[%s17289_s5 + $0x14] ss:$8 sps:$4 sm:$0xff]  }
 0x336   :  { %v1674_v43 = vmul.f32 %v1663_v4, %v1641_v5  ;;  %v1675_v14 = vmul.f32 %v1667_v63, %v1647_v9 }
 0x337   :  { %v987_v1 = vpop.permute.xlu1 %986  ;;  %v11259_v18 = vpack.c.bf16 %v1030_v26, %v1026_v39  ;;  %v12090_v26 = vld [vmem:[%s17289_s5 + $0x10] ss:$8 sps:$4 sm:$0xff]  }
 0x338   :  { %v998_v10 = vsel %vm994_vm10, %v983_v35, %v987_v1 }
 0x339   :  { %1991 = vmatprep.subr.bf16.mxu0 %v11259_v18  ;;  %v1031_v42 = vmul.f32 %v1016_v6, %v998_v10 }
 0x33b   :  { %v991_v21 = vpop.permute.xlu1 %990  ;;  %v11260_v47 = vpack.c.bf16 %v1031_v42, %v1027_v62 }
 0x33c   :  { %v996_v3 = vsel %vm994_vm10, %v987_v1, %v991_v21  ;;  %v1002_v22 = vsel %vm994_vm10, %v991_v21, %v979_v0 }
 0x33d   :  { %v1029_v24 = vmul.f32 %v1008_v48, %v1002_v22  ;;  %v1032_v19 = vmul.f32 %v1020_v51, %v996_v3 }
 0x33f   :  { %v11258_v20 = vpack.c.bf16 %v1029_v24, %v1025_v27  ;;  %v1631_v12 = vpop.permute.xlu1 %1630  ;;  %v11261_v31 = vpack.c.bf16 %v1032_v19, %v1028_v58 }
 0x341   :  { %1992 = vmatpush1.bf16.msra.mxu0 %v11258_v20  ;;  %2044 = vmatprep.subr.bf16.mxu1 %v11261_v31  ;;  %v13818_v1 = vpop.permute.xlu0 %1764 }
 0x342   :  { %2045 = vmatpush1.bf16.msra.mxu1 %v11260_v47 }
 0x343   :  { %v1635_v28 = vpop.permute.xlu1 %1634 }
 0x344   :  { %v1644_v29 = vsel %vm1640_vm11, %v1631_v12, %v1635_v28 }
 0x345   :  { %v1677_v38 = vmul.f32 %v1659_v49, %v1644_v29  ;;  %v1755_v48 = vpop.permute.xlu0 %1754 }
 0x347   :  { %v1627_v44 = vpop.permute.xlu1 %1626  ;;  %v11291_v52 = vpack.c.bf16 %v1677_v38, %v1673_v56 }
 0x348   :  { %v1646_v2 = vsel %vm1640_vm11, %v1627_v44, %v1631_v12 }
 0x349   :  { %v1676_v61 = vmul.f32 %v1655_v37, %v1646_v2  ;;  %2007 = vmatprep.subr.bf16.mxu0 %v11291_v52 }
 0x34b   :  { %v11290_v60 = vpack.c.bf16 %v1676_v61, %v1672_v17  ;;  %v1639_v53 = vpop.permute.xlu1 %1638 }
 0x34c   :  { %v1642_v33 = vsel %vm1640_vm11, %v1635_v28, %v1639_v53  ;;  %v1648_v0 = vsel %vm1640_vm11, %v1639_v53, %v1627_v44 }
 0x34d   :  { %v1678_v32 = vmul.f32 %v1663_v4, %v1642_v33  ;;  %v1679_v35 = vmul.f32 %v1667_v63, %v1648_v0  ;;  %2008 = vmatpush2.bf16.msra.mxu0 %v11290_v60 }
 0x34f   :  { %v11292_v39 = vpack.c.bf16 %v1678_v32, %v1674_v43  ;;  %v11293_v59 = vpack.c.bf16 %v1679_v35, %v1675_v14 }
 0x350   :  { %2010 = vmatmul.mubr.bf16.vlgmr.msra.gmra.mxu0 %v12087_v30 }
 0x351   :  { %2060 = vmatprep.subr.bf16.mxu1 %v11293_v59  ;;  %10472 = vmatprep.mubr.msk.bf16.mxu0 %vm1970_vm4, %v12088_v13 }
 0x352   :  { %2061 = vmatpush2.bf16.msra.mxu1 %v11292_v39 }
 0x355   :  { %2063 = vmatmul.mubr.bf16.vlgmr.msra.gmra.mxu1 %v12087_v30 }
 0x356   :  { %10474 = vmatprep.mubr.msk.bf16.mxu1 %vm1970_vm4, %v12088_v13 }
 0x358   :  { %2020 = vmatmul.mubr.bf16.gmra.mxu0 %v12090_v26  ;;  %v13820_v18 = vpop.permute.xlu1 %1769 }
 0x35c   :  { %v1760_v41 = vpop.permute.xlu1 %1759 }
 0x35d   :  { %2073 = vmatmul.mubr.bf16.gmra.mxu1 %v12090_v26 }
 0x35e   :  { %3915 = vmatprep.mubr.bf16.mxu1 %v17300_v15 }
 0x410   :  { %v2011_v51 = vpop.f32.mrf.mxu0 }
 0x411   :  { %v2012_v10 = vadd.f32 %v2011_v51, %v1755_v48 }
 0x412   :  { %v2013_v6 = vpop.f32.mrf.mxu0 }
 0x413   :  { %v13822_v34 = vmax.f32 %v2012_v10, 0.0  ;;  %v2014_v62 = vadd.f32 %v2013_v6, %v1755_v48 }
 0x414   :  { %v2015_v57 = vpop.f32.mrf.mxu0 }
 0x415   :  { %17398 = vst [vmem:[#allocation14_spill] sm:$0xff] %v13822_v34  ;;  %v2016_v8 = vadd.f32 %v2015_v57, %v1760_v41  ;;  %2525 = vrot.lane.b32.xlu0 %v13822_v34, %s12666_s23  ;;  %v2064_v21 = vpop.f32.mrf.mxu1  ;;  %v13884_v20 = vmax.f32 %v2014_v62, 0.0 }
 0x416   :  { %v2065_v42 = vadd.f32 %v2064_v21, %v1755_v48  ;;  %v2017_v7 = vpop.f32.mrf.mxu0 }
 0x417   :  { %v13826_v3 = vmax.f32 %v2016_v8, 0.0  ;;  %v2066_v22 = vpop.f32.mrf.mxu1  ;;  %17402 = vst [vmem:[#allocation18_spill] sm:$0xff] %v13884_v20  ;;  %v2018_v12 = vadd.f32 %v2017_v7, %v1760_v41 }
 0x418   :  { %v13828_v27 = vmax.f32 %v2065_v42, 0.0  ;;  %v2067_v31 = vadd.f32 %v2066_v22, %v1755_v48  ;;  %v2021_v29 = vpop.f32.mrf.mxu0 }
 0x419   :  { %17399 = vst [vmem:[#allocation15_spill] sm:$0xff] %v13826_v3  ;;  %v2068_v58 = vpop.f32.mrf.mxu1  ;;  %2527 = vrot.lane.b32.xlu1 %v13826_v3, %s12666_s23  ;;  %v13890_v49 = vmax.f32 %v2018_v12, 0.0  ;;  %v2022_v38 = vadd.f32 %v2021_v29, %v13818_v1 }
 0x41a   :  { %17400 = vst [vmem:[#allocation16_spill] sm:$0xff] %v13828_v27  ;;  %v2069_v24 = vadd.f32 %v2068_v58, %v1760_v41  ;;  %3203 = vrot.lane.b32.xlu0 %v13828_v27, %s12670_s26  ;;  %v13892_v16 = vmax.f32 %v2067_v31, 0.0  ;;  %v13932_v56 = vpop.f32.mrf.mxu0 }
 0x41b   :  { %v2070_v47 = vpop.f32.mrf.mxu1  ;;  %17403 = vst [vmem:[#allocation19_spill] sm:$0xff] %v13890_v49  ;;  %v13945_v44 = vmax.f32 %v2022_v38, 0.0  ;;  %v2024_v22 = vadd.f32 %v13932_v56, %v13818_v1 }
 0x41c   :  { %v13834_v19 = vmax.f32 %v2069_v24, 0.0  ;;  %17404 = vst [vmem:[#allocation20_spill] sm:$0xff] %v13892_v16  ;;  %v2071_v25 = vadd.f32 %v2070_v47, %v1760_v41  ;;  %v2025_v23 = vpop.f32.mrf.mxu0 }
 0x41d   :  { %v2074_v37 = vpop.f32.mrf.mxu1  ;;  %17406 = vst [vmem:[#allocation22_spill] sm:$0xff] %v13945_v44  ;;  %v2026_v52 = vadd.f32 %v2025_v23, %v13820_v18  ;;  %v14072_v7 = vmax.f32 %v2024_v22, 0.0 }
 0x41e   :  { %17401 = vst [vmem:[#allocation17_spill] sm:$0xff] %v13834_v19  ;;  %3187 = vrot.lane.b32.xlu0 %v13822_v34, %s12670_s26  ;;  %3205 = vrot.lane.b32.xlu1 %v13834_v19, %s12670_s26  ;;  %v13898_v28 = vmax.f32 %v2071_v25, 0.0  ;;  %v2075_v2 = vadd.f32 %v2074_v37, %v13818_v1  ;;  %v2027_v62 = vpop.f32.mrf.mxu0 }
 0x41f   :  { %v13939_v50 = vpop.f32.mrf.mxu1  ;;  %v13953_v4 = vmax.f32 %v2026_v52, 0.0  ;;  %v2028_v12 = vadd.f32 %v2027_v62, %v13820_v18 }
 0x420   :  { %17405 = vst [vmem:[#allocation21_spill] sm:$0xff] %v13898_v28  ;;  %v13955_v63 = vmax.f32 %v2075_v2, 0.0  ;;  %v2077_v31 = vadd.f32 %v13939_v50, %v13818_v1 }
 0x421   :  { %v2078_v17 = vpop.f32.mrf.mxu1  ;;  %17407 = vst [vmem:[#allocation23_spill] sm:$0xff] %v13953_v4  ;;  %v14085_v56 = vmax.f32 %v2028_v12, 0.0 }
 0x422   :  { %2383 = vrot.lane.b32.xlu0 %v13822_v34, %s12667_s24  ;;  %3189 = vrot.lane.b32.xlu1 %v13826_v3, %s12670_s26  ;;  %17408 = vst [vmem:[#allocation24_spill] sm:$0xff] %v13955_v63  ;;  %v2079_v61 = vadd.f32 %v2078_v17, %v13820_v18  ;;  %v14087_v37 = vmax.f32 %v2077_v31, 0.0 }
 0x423   :  { %v2080_v29 = vpop.f32.mrf.mxu1  ;;  %17427 = vst [vmem:[#allocation43_spill] sm:$0xff] %v14085_v56 }
 0x424   :  { %v13962_v5 = vmax.f32 %v2079_v61, 0.0  ;;  %17428 = vst [vmem:[#allocation44_spill] sm:$0xff] %v14087_v37  ;;  %v2081_v1 = vadd.f32 %v2080_v29, %v13820_v18 }
 0x426   :  { %2541 = vrot.lane.b32.xlu0 %v13828_v27, %s12666_s23  ;;  %2385 = vrot.lane.b32.xlu1 %v13826_v3, %s12667_s24  ;;  %17409 = vst [vmem:[#allocation25_spill] sm:$0xff] %v13962_v5  ;;  %v14102_v2 = vmax.f32 %v2081_v1, 0.0 }
 0x428   :  { %17430 = vst [vmem:[#allocation46_spill] sm:$0xff] %v14102_v2 }
 0x42a   :  { %2241 = vrot.lane.b32.xlu0 %v13822_v34, %s12668_s2  ;;  %2543 = vrot.lane.b32.xlu1 %v13834_v19, %s12666_s23 }
 0x42e   :  { %2399 = vrot.lane.b32.xlu0 %v13828_v27, %s12667_s24  ;;  %2243 = vrot.lane.b32.xlu1 %v13826_v3, %s12668_s2 }
 0x432   :  { %2099 = vrot.lane.b32.xlu0 %v13822_v34, %s12669_s25  ;;  %2401 = vrot.lane.b32.xlu1 %v13834_v19, %s12667_s24 }
 0x436   :  { %2257 = vrot.lane.b32.xlu0 %v13828_v27, %s12668_s2  ;;  %2101 = vrot.lane.b32.xlu1 %v13826_v3, %s12669_s25 }
 0x43a   :  { %3061 = vrot.lane.b32.xlu0 %v13828_v27, %s12663_s3  ;;  %2259 = vrot.lane.b32.xlu1 %v13834_v19, %s12668_s2 }
 0x43e   :  { %3045 = vrot.lane.b32.xlu0 %v13822_v34, %s12663_s3  ;;  %3063 = vrot.lane.b32.xlu1 %v13834_v19, %s12663_s3 }
 0x442   :  { %2115 = vrot.lane.b32.xlu0 %v13828_v27, %s12669_s25  ;;  %3047 = vrot.lane.b32.xlu1 %v13826_v3, %s12663_s3 }
 0x446   :  { %2919 = vrot.lane.b32.xlu0 %v13828_v27, %s12664_s4  ;;  %2117 = vrot.lane.b32.xlu1 %v13834_v19, %s12669_s25 }
 0x44a   :  { %2903 = vrot.lane.b32.xlu0 %v13822_v34, %s12664_s4  ;;  %2921 = vrot.lane.b32.xlu1 %v13834_v19, %s12664_s4 }
 0x44e   :  { %2533 = vrot.lane.b32.xlu0 %v13884_v20, %s12666_s23  ;;  %2905 = vrot.lane.b32.xlu1 %v13826_v3, %s12664_s4 }
 0x452   :  { %2549 = vrot.lane.b32.xlu0 %v13892_v16, %s12666_s23  ;;  %2535 = vrot.lane.b32.xlu1 %v13890_v49, %s12666_s23 }
 0x456   :  { %3195 = vrot.lane.b32.xlu0 %v13884_v20, %s12670_s26  ;;  %2551 = vrot.lane.b32.xlu1 %v13898_v28, %s12666_s23 }
 0x45a   :  { %2391 = vrot.lane.b32.xlu0 %v13884_v20, %s12667_s24  ;;  %3197 = vrot.lane.b32.xlu1 %v13890_v49, %s12670_s26 }
 0x45e   :  { %2407 = vrot.lane.b32.xlu0 %v13892_v16, %s12667_s24  ;;  %2393 = vrot.lane.b32.xlu1 %v13890_v49, %s12667_s24 }
 0x462   :  { %2249 = vrot.lane.b32.xlu0 %v13884_v20, %s12668_s2  ;;  %2409 = vrot.lane.b32.xlu1 %v13898_v28, %s12667_s24 }
 0x466   :  { %2265 = vrot.lane.b32.xlu0 %v13892_v16, %s12668_s2  ;;  %2251 = vrot.lane.b32.xlu1 %v13890_v49, %s12668_s2 }
 0x46a   :  { %2107 = vrot.lane.b32.xlu0 %v13884_v20, %s12669_s25  ;;  %2267 = vrot.lane.b32.xlu1 %v13898_v28, %s12668_s2 }
 0x46e   :  { %2123 = vrot.lane.b32.xlu0 %v13892_v16, %s12669_s25  ;;  %2109 = vrot.lane.b32.xlu1 %v13890_v49, %s12669_s25 }
 0x472   :  { %3053 = vrot.lane.b32.xlu0 %v13884_v20, %s12663_s3  ;;  %2125 = vrot.lane.b32.xlu1 %v13898_v28, %s12669_s25 }
 0x476   :  { %2911 = vrot.lane.b32.xlu0 %v13884_v20, %s12664_s4  ;;  %3055 = vrot.lane.b32.xlu1 %v13890_v49, %s12663_s3 }
 0x47a   :  { %3069 = vrot.lane.b32.xlu0 %v13892_v16, %s12663_s3  ;;  %2913 = vrot.lane.b32.xlu1 %v13890_v49, %s12664_s4 }
 0x47e   :  { %2529 = vrot.lane.b32.xlu0 %v13945_v44, %s12666_s23  ;;  %3071 = vrot.lane.b32.xlu1 %v13898_v28, %s12663_s3 }
 0x482   :  { %3207 = vrot.lane.b32.xlu0 %v13955_v63, %s12670_s26  ;;  %2531 = vrot.lane.b32.xlu1 %v13953_v4, %s12666_s23 }
 0x486   :  { %3191 = vrot.lane.b32.xlu0 %v13945_v44, %s12670_s26  ;;  %3209 = vrot.lane.b32.xlu1 %v13962_v5, %s12670_s26 }
 0x487   :  { %v13968_v9 = vpop.permute.xlu0 %2525 }
 0x48a   :  { %2387 = vrot.lane.b32.xlu0 %v13945_v44, %s12667_s24  ;;  %3193 = vrot.lane.b32.xlu1 %v13953_v4, %s12670_s26 }
 0x48b   :  { %v13974_v60 = vpop.permute.xlu1 %2527 }
 0x48c   :  { %v13976_v53 = vpop.permute.xlu0 %3203 }
 0x48d   :  { %17410 = vst [vmem:[#allocation26_spill] sm:$0xff] %v13976_v53 }
 0x48e   :  { %2545 = vrot.lane.b32.xlu0 %v13955_v63, %s12666_s23  ;;  %2389 = vrot.lane.b32.xlu1 %v13953_v4, %s12667_s24 }
 0x490   :  { %v13982_v33 = vpop.permute.xlu0 %3187  ;;  %v13984_v0 = vpop.permute.xlu1 %3205 }
 0x491   :  { %17411 = vst [vmem:[#allocation27_spill] sm:$0xff] %v13982_v33  ;;  %17412 = vst [vmem:[#allocation28_spill] sm:$0xff] %v13984_v0 }
 0x492   :  { %2245 = vrot.lane.b32.xlu0 %v13945_v44, %s12668_s2  ;;  %2547 = vrot.lane.b32.xlu1 %v13962_v5, %s12666_s23 }
 0x494   :  { %v13990_v30 = vpop.permute.xlu0 %2383  ;;  %v13992_v43 = vpop.permute.xlu1 %3189 }
 0x495   :  { %17413 = vst [vmem:[#allocation29_spill] sm:$0xff] %v13992_v43 }
 0x496   :  { %2403 = vrot.lane.b32.xlu0 %v13955_v63, %s12667_s24  ;;  %2247 = vrot.lane.b32.xlu1 %v13953_v4, %s12668_s2 }
 0x498   :  { %v13998_v14 = vpop.permute.xlu0 %2541  ;;  %v14000_v32 = vpop.permute.xlu1 %2385 }
 0x49a   :  { %2103 = vrot.lane.b32.xlu0 %v13945_v44, %s12669_s25  ;;  %2405 = vrot.lane.b32.xlu1 %v13962_v5, %s12667_s24 }
 0x49c   :  { %v14006_v35 = vpop.permute.xlu0 %2241  ;;  %v14008_v13 = vpop.permute.xlu1 %2543 }
 0x49e   :  { %2261 = vrot.lane.b32.xlu0 %v13955_v63, %s12668_s2  ;;  %2105 = vrot.lane.b32.xlu1 %v13953_v4, %s12669_s25 }
 0x4a0   :  { %v14014_v39 = vpop.permute.xlu0 %2399  ;;  %v14016_v59 = vpop.permute.xlu1 %2243 }
 0x4a1   :  { %17414 = vst [vmem:[#allocation30_spill] sm:$0xff] %v14016_v59 }
 0x4a2   :  { %3065 = vrot.lane.b32.xlu0 %v13955_v63, %s12663_s3  ;;  %2263 = vrot.lane.b32.xlu1 %v13962_v5, %s12668_s2 }
 0x4a4   :  { %v14022_v26 = vpop.permute.xlu0 %2099  ;;  %v14024_v48 = vpop.permute.xlu1 %2401 }
 0x4a5   :  { %17415 = vst [vmem:[#allocation31_spill] sm:$0xff] %v14022_v26  ;;  %v14297_v26 = vld [vmem:[%s17295_s11 + $0x4] ss:$8 sm:$0xf] }
 0x4a6   :  { %3049 = vrot.lane.b32.xlu0 %v13945_v44, %s12663_s3  ;;  %3067 = vrot.lane.b32.xlu1 %v13962_v5, %s12663_s3  ;;  %17460 = vst [vmem:[#allocation76_spill] sm:$0xff] %v14297_v26 }
 0x4a8   :  { %v14030_v51 = vpop.permute.xlu0 %2257  ;;  %v14032_v10 = vpop.permute.xlu1 %2101 }
 0x4a9   :  { %17416 = vst [vmem:[#allocation32_spill] sm:$0xff] %v14032_v10 }
 0x4aa   :  { %2119 = vrot.lane.b32.xlu0 %v13955_v63, %s12669_s25  ;;  %3051 = vrot.lane.b32.xlu1 %v13953_v4, %s12663_s3 }
 0x4ac   :  { %v14038_v6 = vpop.permute.xlu0 %3061  ;;  %v14040_v41 = vpop.permute.xlu1 %2259 }
 0x4ad   :  { %17417 = vst [vmem:[#allocation33_spill] sm:$0xff] %v14038_v6  ;;  %17418 = vst [vmem:[#allocation34_spill] sm:$0xff] %v14040_v41 }
 0x4ae   :  { %2923 = vrot.lane.b32.xlu0 %v13955_v63, %s12664_s4  ;;  %2121 = vrot.lane.b32.xlu1 %v13962_v5, %s12669_s25 }
 0x4b0   :  { %v14046_v57 = vpop.permute.xlu0 %3045  ;;  %v14048_v8 = vpop.permute.xlu1 %3063 }
 0x4b1   :  { %17419 = vst [vmem:[#allocation35_spill] sm:$0xff] %v14046_v57  ;;  %17420 = vst [vmem:[#allocation36_spill] sm:$0xff] %v14048_v8 }
 0x4b2   :  { %2907 = vrot.lane.b32.xlu0 %v13945_v44, %s12664_s4  ;;  %2925 = vrot.lane.b32.xlu1 %v13962_v5, %s12664_s4 }
 0x4b4   :  { %v14054_v21 = vpop.permute.xlu0 %2115  ;;  %v14056_v42 = vpop.permute.xlu1 %3047 }
 0x4b5   :  { %17421 = vst [vmem:[#allocation37_spill] sm:$0xff] %v14054_v21  ;;  %17422 = vst [vmem:[#allocation38_spill] sm:$0xff] %v14056_v42 }
 0x4b6   :  { %2781 = vrot.lane.b32.xlu0 %v13955_v63, %s12665_s22  ;;  %2909 = vrot.lane.b32.xlu1 %v13953_v4, %s12664_s4 }
 0x4b8   :  { %v14064_v58 = vpop.permute.xlu0 %2919  ;;  %v14066_v24 = vpop.permute.xlu1 %2117 }
 0x4b9   :  { %17423 = vst [vmem:[#allocation39_spill] sm:$0xff] %v14064_v58  ;;  %17424 = vst [vmem:[#allocation40_spill] sm:$0xff] %v14066_v24 }
 0x4ba   :  { %2765 = vrot.lane.b32.xlu0 %v13945_v44, %s12665_s22  ;;  %2783 = vrot.lane.b32.xlu1 %v13962_v5, %s12665_s22 }
 0x4bc   :  { %v14077_v47 = vpop.permute.xlu0 %2903  ;;  %v14079_v25 = vpop.permute.xlu1 %2921 }
 0x4bd   :  { %17425 = vst [vmem:[#allocation41_spill] sm:$0xff] %v14077_v47  ;;  %17426 = vst [vmem:[#allocation42_spill] sm:$0xff] %v14079_v25 }
 0x4be   :  { %2537 = vrot.lane.b32.xlu0 %v14072_v7, %s12666_s23  ;;  %2767 = vrot.lane.b32.xlu1 %v13953_v4, %s12665_s22 }
 0x4c0   :  { %v14089_v38 = vpop.permute.xlu0 %2533  ;;  %v14091_v23 = vpop.permute.xlu1 %2905 }
 0x4c1   :  { %17429 = vst [vmem:[#allocation45_spill] sm:$0xff] %v14091_v23 }
 0x4c2   :  { %2553 = vrot.lane.b32.xlu0 %v14087_v37, %s12666_s23  ;;  %2539 = vrot.lane.b32.xlu1 %v14085_v56, %s12666_s23 }
 0x4c4   :  { %v14098_v50 = vpop.permute.xlu0 %2549  ;;  %v14100_v52 = vpop.permute.xlu1 %2535 }
 0x4c5   :  { %v2566_v59 = vsel %vm1245_vm7, %v13974_v60, %v14100_v52 }
 0x4c6   :  { %3199 = vrot.lane.b32.xlu0 %v14072_v7, %s12670_s26  ;;  %2555 = vrot.lane.b32.xlu1 %v14102_v2, %s12666_s23 }
 0x4c8   :  { %v14108_v17 = vpop.permute.xlu0 %3195  ;;  %v14110_v18 = vpop.permute.xlu1 %2551 }
 0x4ca   :  { %2395 = vrot.lane.b32.xlu0 %v14072_v7, %s12667_s24  ;;  %3201 = vrot.lane.b32.xlu1 %v14085_v56, %s12670_s26 }
 0x4cc   :  { %v14116_v61 = vpop.permute.xlu0 %2391  ;;  %v14118_v22 = vpop.permute.xlu1 %3197 }
 0x4ce   :  { %2411 = vrot.lane.b32.xlu0 %v14087_v37, %s12667_s24  ;;  %2397 = vrot.lane.b32.xlu1 %v14085_v56, %s12667_s24 }
 0x4d0   :  { %v14124_v62 = vpop.permute.xlu0 %2407  ;;  %v14126_v12 = vpop.permute.xlu1 %2393 }
 0x4d2   :  { %2253 = vrot.lane.b32.xlu0 %v14072_v7, %s12668_s2  ;;  %2413 = vrot.lane.b32.xlu1 %v14102_v2, %s12667_s24 }
 0x4d4   :  { %v14132_v31 = vpop.permute.xlu0 %2249  ;;  %v14134_v29 = vpop.permute.xlu1 %2409 }
 0x4d6   :  { %2269 = vrot.lane.b32.xlu0 %v14087_v37, %s12668_s2  ;;  %2255 = vrot.lane.b32.xlu1 %v14085_v56, %s12668_s2 }
 0x4d8   :  { %v14140_v1 = vpop.permute.xlu0 %2265  ;;  %v14142_v54 = vpop.permute.xlu1 %2251 }
 0x4d9   :  { %17431 = vst [vmem:[#allocation47_spill] sm:$0xff] %v14140_v1  ;;  %17432 = vst [vmem:[#allocation48_spill] sm:$0xff] %v14142_v54 }
 0x4da   :  { %2111 = vrot.lane.b32.xlu0 %v14072_v7, %s12669_s25  ;;  %2271 = vrot.lane.b32.xlu1 %v14102_v2, %s12668_s2 }
 0x4dc   :  { %v14148_v15 = vpop.permute.xlu0 %2107  ;;  %v14150_v55 = vpop.permute.xlu1 %2267 }
 0x4dd   :  { %17433 = vst [vmem:[#allocation49_spill] sm:$0xff] %v14148_v15  ;;  %17434 = vst [vmem:[#allocation50_spill] sm:$0xff] %v14150_v55 }
 0x4de   :  { %2127 = vrot.lane.b32.xlu0 %v14087_v37, %s12669_s25  ;;  %2113 = vrot.lane.b32.xlu1 %v14085_v56, %s12669_s25 }
 0x4e0   :  { %v14156_v63 = vpop.permute.xlu0 %2123  ;;  %v14158_v5 = vpop.permute.xlu1 %2109 }
 0x4e1   :  { %17435 = vst [vmem:[#allocation51_spill] sm:$0xff] %v14156_v63  ;;  %17436 = vst [vmem:[#allocation52_spill] sm:$0xff] %v14158_v5 }
 0x4e2   :  { %2769 = vrot.lane.b32.xlu0 %v13884_v20, %s12665_s22  ;;  %2129 = vrot.lane.b32.xlu1 %v14102_v2, %s12669_s25 }
 0x4e4   :  { %v14164_v44 = vpop.permute.xlu0 %3053  ;;  %v14166_v4 = vpop.permute.xlu1 %2125 }
 0x4e5   :  { %17437 = vst [vmem:[#allocation53_spill] sm:$0xff] %v14164_v44  ;;  %17438 = vst [vmem:[#allocation54_spill] sm:$0xff] %v14166_v4  ;;  %v14235_v44 = vld [vmem:[%s17291_s7 + $0x4] ss:$12 sps:$4 sm:$0xff]  }
 0x4e6   :  { %3057 = vrot.lane.b32.xlu0 %v14072_v7, %s12663_s3  ;;  %2771 = vrot.lane.b32.xlu1 %v13890_v49, %s12665_s22  ;;  %17445 = vst [vmem:[#allocation61_spill] sm:$0xff] %v14235_v44 }
 0x4e7   :  { %3862 = vmatprep.mubr.bf16.mxu0 %v14235_v44  ;;  %v3409_v44 = vld [vmem:[%s17292_s8] sm:$0xff] }
 0x4e8   :  { %v14172_v23 = vpop.permute.xlu0 %2911  ;;  %v14174_v25 = vpop.permute.xlu1 %3055 }
 0x4e9   :  { %17439 = vst [vmem:[#allocation55_spill] sm:$0xff] %v14172_v23  ;;  %17440 = vst [vmem:[#allocation56_spill] sm:$0xff] %v14174_v25 }
 0x4ea   :  { %2915 = vrot.lane.b32.xlu0 %v14072_v7, %s12664_s4  ;;  %3059 = vrot.lane.b32.xlu1 %v14085_v56, %s12663_s3 }
 0x4ec   :  { %v14180_v20 = vpop.permute.xlu0 %3069  ;;  %v14182_v58 = vpop.permute.xlu1 %2913 }
 0x4ed   :  { %17441 = vst [vmem:[#allocation57_spill] sm:$0xff] %v14180_v20  ;;  %17442 = vst [vmem:[#allocation58_spill] sm:$0xff] %v14182_v58 }
 0x4ee   :  { %3073 = vrot.lane.b32.xlu0 %v14087_v37, %s12663_s3  ;;  %2779 = vrot.lane.b32.xlu1 %v13834_v19, %s12665_s22 }
 0x4f0   :  { %v14188_v49 = vpop.permute.xlu0 %2529  ;;  %v14190_v47 = vpop.permute.xlu1 %3071 }
 0x4f1   :  { %17443 = vst [vmem:[#allocation59_spill] sm:$0xff] %v14190_v47 }
 0x4f2   :  { %2773 = vrot.lane.b32.xlu0 %v14072_v7, %s12665_s22  ;;  %2917 = vrot.lane.b32.xlu1 %v14085_v56, %s12664_s4 }
 0x4f4   :  { %v14196_v23 = vpop.permute.xlu0 %3207  ;;  %v14198_v20 = vpop.permute.xlu1 %2531 }
 0x4f6   :  { %2777 = vrot.lane.b32.xlu0 %v13828_v27, %s12665_s22  ;;  %3075 = vrot.lane.b32.xlu1 %v14102_v2, %s12663_s3 }
 0x4f8   :  { %v14204_v19 = vpop.permute.xlu0 %3191  ;;  %v14206_v58 = vpop.permute.xlu1 %3209 }
 0x4fa   :  { %2761 = vrot.lane.b32.xlu0 %v13822_v34, %s12665_s22  ;;  %2775 = vrot.lane.b32.xlu1 %v14085_v56, %s12665_s22 }
 0x4fc   :  { %v14212_v47 = vpop.permute.xlu0 %2387  ;;  %v14214_v42 = vpop.permute.xlu1 %3193 }
 0x4fe   :  { %2931 = vrot.lane.b32.xlu0 %v14087_v37, %s12664_s4  ;;  %2763 = vrot.lane.b32.xlu1 %v13826_v3, %s12665_s22 }
 0x500   :  { %v14220_v27 = vpop.permute.xlu0 %2545  ;;  %v14222_v57 = vpop.permute.xlu1 %2389 }
 0x502   :  { %2927 = vrot.lane.b32.xlu0 %v13892_v16, %s12664_s4  ;;  %2933 = vrot.lane.b32.xlu1 %v14102_v2, %s12664_s4 }
 0x504   :  { %v14228_v34 = vpop.permute.xlu0 %2245  ;;  %v14230_v56 = vpop.permute.xlu1 %2547 }
 0x505   :  { %17444 = vst [vmem:[#allocation60_spill] sm:$0xff] %v14228_v34 }
 0x506   :  { %2789 = vrot.lane.b32.xlu0 %v14087_v37, %s12665_s22  ;;  %2929 = vrot.lane.b32.xlu1 %v13898_v28, %s12664_s4 }
 0x508   :  { %v14242_v3 = vpop.permute.xlu0 %2403  ;;  %v14244_v6 = vpop.permute.xlu1 %2247 }
 0x509   :  { %17446 = vst [vmem:[#allocation62_spill] sm:$0xff] %v14244_v6 }
 0x50a   :  { %2785 = vrot.lane.b32.xlu0 %v13892_v16, %s12665_s22  ;;  %2791 = vrot.lane.b32.xlu1 %v14102_v2, %s12665_s22 }
 0x50c   :  { %v14250_v25 = vpop.permute.xlu0 %2103  ;;  %v14252_v8 = vpop.permute.xlu1 %2405 }
 0x50d   :  { %17447 = vst [vmem:[#allocation63_spill] sm:$0xff] %v14250_v25 }
 0x50e   :  { %3215 = vrot.lane.b32.xlu0 %v14087_v37, %s12670_s26  ;;  %2787 = vrot.lane.b32.xlu1 %v13898_v28, %s12665_s22 }
 0x510   :  { %v14258_v4 = vpop.permute.xlu0 %2261  ;;  %v14260_v24 = vpop.permute.xlu1 %2105 }
 0x511   :  { %17448 = vst [vmem:[#allocation64_spill] sm:$0xff] %v14258_v4  ;;  %17449 = vst [vmem:[#allocation65_spill] sm:$0xff] %v14260_v24  ;;  %v3410_v24 = vld [vmem:[%s17292_s8 + $0x8] sm:$0xff] }
 0x512   :  { %3211 = vrot.lane.b32.xlu0 %v13892_v16, %s12670_s26  ;;  %3217 = vrot.lane.b32.xlu1 %v14102_v2, %s12670_s26  ;;  %v14387_v4 = vld [vmem:[%s17295_s11 + $0x6] ss:$8 sm:$0xf] }
 0x513   :  { %17470 = vst [vmem:[#allocation86_spill] sm:$0xff] %v14387_v4 }
 0x514   :  { %v14269_v63 = vpop.permute.xlu0 %3065  ;;  %v14271_v37 = vpop.permute.xlu1 %2263 }
 0x515   :  { %17450 = vst [vmem:[#allocation66_spill] sm:$0xff] %v14269_v63  ;;  %17451 = vst [vmem:[#allocation67_spill] sm:$0xff] %v14271_v37 }
 0x516   :  { %3415 = vperm.xlu0 %12082, %v3409_v44   ;;  %3213 = vrot.lane.b32.xlu1 %v13898_v28, %s12670_s26 }
 0x518   :  { %v14278_v16 = vpop.permute.xlu0 %3049  ;;  %v14280_v10 = vpop.permute.xlu1 %3067 }
 0x519   :  { %17452 = vst [vmem:[#allocation68_spill] sm:$0xff] %v14278_v16  ;;  %17453 = vst [vmem:[#allocation69_spill] sm:$0xff] %v14280_v10  ;;  %v14319_v10 = vrot.slane %v14297_v26, %v13529_v40 }
 0x51a   :  { %3420 = vperm.xlu0 %12082, %v3410_v24   ;;  %v10501_v24 = vld [vmem:[%s17295_s11 + $0x3] ss:$8 sm:$0xf] }
 0x51b   :  { %17463 = vst [vmem:[#allocation79_spill] sm:$0xff] %v14319_v10  ;;  %v14322_v16 = vrot.slane %v10501_v24, %v13514_v45 }
 0x51c   :  { %v14282_v2 = vpop.permute.xlu0 %2119  ;;  %v14284_v5 = vpop.permute.xlu1 %3051 }
 0x51d   :  { %17454 = vst [vmem:[#allocation70_spill] sm:$0xff] %v14282_v2  ;;  %17455 = vst [vmem:[#allocation71_spill] sm:$0xff] %v14284_v5  ;;  %v14305_v5 = vld [vmem:[%s17295_s11 + $0x20] ss:$8 sm:$0xf]  ;;  %v14325_v2 = vrot.slane %v10501_v24, %v13540_v46 }
 0x51e   :  { %17461 = vst [vmem:[#allocation77_spill] sm:$0xff] %v14305_v5  ;;  %v14343_v10 = vrot.slane %v14305_v5, %v13529_v40  ;;  %v14347_v37 = vrot.slane %v14305_v5, %v13514_v45  ;;  %v10537_v5 = vld [vmem:[%s17295_s11 + $0x7] ss:$8 sm:$0xf] }
 0x520   :  { %v14286_v63 = vpop.permute.xlu0 %2923  ;;  %v14288_v25 = vpop.permute.xlu1 %2121 }
 0x521   :  { %17456 = vst [vmem:[#allocation72_spill] sm:$0xff] %v14286_v63  ;;  %17457 = vst [vmem:[#allocation73_spill] sm:$0xff] %v14288_v25  ;;  %v10492_v63 = vld [vmem:[%s17295_s11 + $0x2] ss:$8 sm:$0xf]  ;;  %v14328_v25 = vrot.slane %v10501_v24, %v13529_v40 }
 0x522   :  { %v14350_v55 = vrot.slane %v10492_v63, %v13514_v45 }
 0x524   :  { %v14290_v44 = vpop.permute.xlu0 %2907  ;;  %v14292_v28 = vpop.permute.xlu1 %2925 }
 0x525   :  { %17458 = vst [vmem:[#allocation74_spill] sm:$0xff] %v14290_v44  ;;  %17459 = vst [vmem:[#allocation75_spill] sm:$0xff] %v14292_v28  ;;  %v14312_v28 = vrot.slane %v14297_v26, %v13514_v45  ;;  %v10483_v44 = vld [vmem:[%s17295_s11 + $0x1] ss:$8 sm:$0xf]  ;;  %v14339_v26 = vrot.slane %v10501_v24, %v13543_v36  ;;  %v14359_v24 = vrot.slane %v10492_v63, %v13529_v40 }
 0x526   :  { %v14382_v34 = vrot.slane %v10483_v44, %v13529_v40  ;;  %v14390_v54 = vrot.slane %v10483_v44, %v13543_v36 }
 0x527   :  { %17462 = vst [vmem:[#allocation78_spill] sm:$0xff] %v14312_v28  ;;  %v14336_v6 = vmul.f32 %v14312_v28, %v14072_v7  ;;  %v14356_v7 = vrot.slane %v10492_v63, %v13540_v46  ;;  %v14365_v28 = vrot.slane %v10483_v44, %v13514_v45 }
 0x528   :  { %v14330_v15 = vpop.permute.xlu0 %2781  ;;  %v14332_v21 = vpop.permute.xlu1 %2909  ;;  %17469 = vst [vmem:[#allocation85_spill] sm:$0xff] %v14382_v34  ;;  %17471 = vst [vmem:[#allocation87_spill] sm:$0xff] %v14390_v54  ;;  %v14430_v54 = vrot.slane %v14387_v4, %v13529_v40 }
 0x529   :  { %17464 = vst [vmem:[#allocation80_spill] sm:$0xff] %v14330_v15  ;;  %17465 = vst [vmem:[#allocation81_spill] sm:$0xff] %v14332_v21  ;;  %v2147_v15 = vld [vmem:[%s17295_s11] ss:$8 sm:$0xf]  ;;  %v2562_v21 = vsel %vm1245_vm7, %v14100_v52, %v14008_v13 }
 0x52a   :  { %17466 = vst [vmem:[#allocation82_spill] sm:$0xff] %v14336_v6  ;;  %v14362_v6 = vrot.slane %v10492_v63, %v13543_v36  ;;  %17467 = vst [vmem:[#allocation83_spill] sm:$0xff] %v14365_v28  ;;  %v14379_v63 = vrot.slane %v10483_v44, %v13540_v46  ;;  %v14393_v41 = vrot.slane %v2147_v15, %v13514_v45 }
 0x52b   :  { %v14396_v1 = vrot.slane %v2147_v15, %v13540_v46  ;;  %v14399_v52 = vrot.slane %v2147_v15, %v13529_v40  ;;  %v2561_v28 = vsel %vm1245_vm7, %v14089_v38, %v13998_v14  ;;  %v2565_v44 = vsel %vm1245_vm7, %v13968_v9, %v14089_v38  ;;  %17477 = vst [vmem:[#allocation93_spill] sm:$0xff] %v14430_v54 }
 0x52c   :  { %17468 = vst [vmem:[#allocation84_spill] sm:$0xff] %v14379_v63  ;;  %17472 = vst [vmem:[#allocation88_spill] sm:$0xff] %v14393_v41  ;;  %v14401_v63 = vpop.permute.xlu0 %2765  ;;  %v14403_v34 = vpop.permute.xlu1 %2783  ;;  %v14414_v41 = vrot.slane %v2147_v15, %v13543_v36  ;;  %v2557_v15 = vsel %vm1245_vm7, %v13998_v14, %v14098_v50  ;;  %v14445_v38 = vrot.slane %v10537_v5, %v13540_v46 }
 0x52d   :  { %17473 = vst [vmem:[#allocation89_spill] sm:$0xff] %v14396_v1  ;;  %17474 = vst [vmem:[#allocation90_spill] sm:$0xff] %v14399_v52  ;;  %v14417_v1 = vrot.slane %v10537_v5, %v13529_v40  ;;  %v14426_v52 = vrot.slane %v10537_v5, %v13514_v45  ;;  %v14448_v40 = vmul.f32 %v14322_v16, %v2565_v44 }
 0x52e   :  { %17475 = vst [vmem:[#allocation91_spill] sm:$0xff] %v14401_v63  ;;  %17476 = vst [vmem:[#allocation92_spill] sm:$0xff] %v14403_v34  ;;  %v14420_v63 = vmul.f32 %v14322_v16, %v2566_v59  ;;  %v14423_v34 = vmul.f32 %v14325_v2, %v2562_v21  ;;  %v2569_v59 = vsel %vm1245_vm7, %v14098_v50, %v13968_v9 }
 0x52f   :  { %v14442_v21 = vrot.slane %v14387_v4, %v13514_v45  ;;  %17478 = vst [vmem:[#allocation94_spill] sm:$0xff] %v14445_v38  ;;  %v14451_v54 = vmul.f32 %v14325_v2, %v2561_v28  ;;  %v3227_v14 = vsel %vm1640_vm11, %v13982_v33, %v14108_v17  ;;  %v2570_v9 = vsel %vm1245_vm7, %v14110_v18, %v13974_v60 }
 0x530   :  { %v2538_v50 = vpop.permute.xlu0 %2537  ;;  %v14461_v4 = vpop.permute.xlu1 %2767  ;;  %v3223_v44 = vsel %vm1640_vm11, %v14108_v17, %v13976_v53  ;;  %v2558_v28 = vsel %vm1245_vm7, %v14008_v13, %v14110_v18  ;;  %v3228_v33 = vsel %vm1640_vm11, %v13992_v43, %v14118_v22  ;;  %v14476_v60 = vrot.slane %v10537_v5, %v13543_v36 }
 0x531   :  { %17479 = vst [vmem:[#allocation95_spill] sm:$0xff] %v14461_v4  ;;  %v14479_v46 = vmul.f32 %v14328_v25, %v2569_v59  ;;  %v14482_v4 = vmul.f32 %v14339_v26, %v2557_v15  ;;  %v14489_v18 = vmul.f32 %v14343_v10, %v3227_v14  ;;  %v14492_v43 = vmul.f32 %v14328_v25, %v2570_v9 }
 0x532   :  { %17480 = vst [vmem:[#allocation96_spill] sm:$0xff] %v14476_v60  ;;  %v2563_v5 = vsel %vm1245_vm7, %v2538_v50, %v14220_v27  ;;  %v2567_v15 = vsel %vm1245_vm7, %v14188_v49, %v2538_v50  ;;  %v14501_v59 = vmul.f32 %v14347_v37, %v3223_v44  ;;  %v14504_v17 = vmul.f32 %v14339_v26, %v2558_v28 }
 0x533   :  { %v3224_v14 = vsel %vm1640_vm11, %v14118_v22, %v13984_v0  ;;  %v14511_v9 = vmul.f32 %v14343_v10, %v3228_v33  ;;  %v2420_v50 = vsel %vm1161_vm8, %v14126_v12, %v14024_v48  ;;  %v2424_v44 = vsel %vm1161_vm8, %v14000_v32, %v14126_v12 }
 0x534   :  { %v2554_v13 = vpop.permute.xlu0 %2553  ;;  %v2540_v53 = vpop.permute.xlu1 %2539  ;;  %v2604_v22 = vmul.f32 %v14322_v16, %v2567_v15  ;;  %v14529_v0 = vmul.f32 %v14325_v2, %v2563_v5  ;;  %v11318_v12 = vpack.c.bf16 %v14492_v43, %v14479_v46  ;;  %v2419_v60 = vsel %vm1161_vm8, %v14116_v61, %v14014_v39 }
 0x535   :  { %v2564_v28 = vsel %vm1245_vm7, %v2540_v53, %v14230_v56  ;;  %v2568_v33 = vsel %vm1245_vm7, %v14198_v20, %v2540_v53  ;;  %v2423_v53 = vsel %vm1161_vm8, %v13990_v30, %v14116_v61  ;;  %v14546_v5 = vmul.f32 %v14347_v37, %v3224_v14 }
 0x536   :  { %v2608_v36 = vmul.f32 %v14322_v16, %v2568_v33  ;;  %v14533_v38 = vmul.f32 %v14325_v2, %v2564_v28  ;;  %v14549_v16 = vmul.f32 %v14356_v7, %v2420_v50  ;;  %v2571_v46 = vsel %vm1245_vm7, %v2554_v13, %v14188_v49 }
 0x537   :  { %v2415_v61 = vsel %vm1161_vm8, %v14014_v39, %v14124_v62  ;;  %v2427_v14 = vsel %vm1161_vm8, %v14124_v62, %v13990_v30  ;;  %v14565_v50 = vmul.f32 %v14350_v55, %v2424_v44  ;;  %v14570_v33 = vmul.f32 %v14350_v55, %v2423_v53 }
 0x538   :  { %v3200_v2 = vpop.permute.xlu0 %3199  ;;  %v11323_v15 = vpack.c.bf16 %v2608_v36, %v2604_v22  ;;  %v2556_v28 = vpop.permute.xlu1 %2555  ;;  %v14573_v36 = vmul.f32 %v14356_v7, %v2419_v60  ;;  %v11358_v39 = vpack.c.bf16 %v14511_v9, %v14489_v18  ;;  %v2603_v62 = vmul.f32 %v14328_v25, %v2571_v46  ;;  %v17492_v9 = vld [vmem:[#allocation67_spill] sm:$0xff] }
 0x539   :  { %v2572_v30 = vsel %vm1245_vm7, %v2556_v28, %v14198_v20  ;;  %v3225_v44 = vsel %vm1640_vm11, %v3200_v2, %v14196_v23  ;;  %v3229_v22 = vsel %vm1640_vm11, %v14204_v19, %v3200_v2  ;;  %v14589_v53 = vmul.f32 %v14359_v24, %v2427_v14 }
 0x53a   :  { %3830 = vmatprep.subr.bf16.mxu0 %v11323_v15  ;;  %v2607_v60 = vmul.f32 %v14328_v25, %v2572_v30  ;;  %v14592_v49 = vmul.f32 %v14362_v6, %v2415_v61  ;;  %v11359_v15 = vpack.c.bf16 %v14546_v5, %v14501_v59  ;;  %v2416_v2 = vsel %vm1161_vm8, %v14024_v48, %v14134_v29 }
 0x53b   :  { %v2428_v25 = vsel %vm1161_vm8, %v14134_v29, %v14000_v32  ;;  %v11311_v30 = vpack.c.bf16 %v14565_v50, %v14570_v33  ;;  %v3265_v20 = vmul.f32 %v14343_v10, %v3229_v22  ;;  %v3266_v43 = vmul.f32 %v14347_v37, %v3225_v44 }
 0x53c   :  { %v2396_v46 = vpop.permute.xlu0 %2395  ;;  %v11322_v14 = vpack.c.bf16 %v2607_v60, %v2603_v62  ;;  %v3202_v61 = vpop.permute.xlu1 %3201  ;;  %v2560_v32 = vsel %vm1245_vm7, %v14230_v56, %v2556_v28  ;;  %v2277_v44 = vsel %vm1077_vm9, %v14132_v31, %v14030_v51  ;;  %v2281_v22 = vsel %vm1077_vm9, %v14006_v35, %v14132_v31 }
 0x53d   :  { %v3226_v59 = vsel %vm1640_vm11, %v3202_v61, %v14206_v58  ;;  %v3230_v48 = vsel %vm1640_vm11, %v14214_v42, %v3202_v61  ;;  %v2425_v29 = vsel %vm1161_vm8, %v14212_v47, %v2396_v46  ;;  %v14633_v56 = vmul.f32 %v14359_v24, %v2428_v25 }
 0x53e   :  { %v3269_v5 = vmul.f32 %v14343_v10, %v3230_v48  ;;  %v3270_v62 = vmul.f32 %v14347_v37, %v3226_v59  ;;  %3831 = vmatpush1.bf16.msra.mxu0 %v11322_v14  ;;  %v2421_v10 = vsel %vm1161_vm8, %v2396_v46, %v14242_v3  ;;  %v17481_v37 = vpack.c.bf16 %v14420_v63, %v14448_v40 }
 0x53f   :  { %v14642_v60 = vmul.f32 %v14362_v6, %v2416_v2  ;;  %v2559_v14 = vsel %vm1245_vm7, %v14220_v27, %v2554_v13  ;;  %v2610_v59 = vmul.f32 %v14339_v26, %v2560_v32  ;;  %v2462_v48 = vmul.f32 %v14350_v55, %v2425_v29  ;;  %v17483_v2 = vld [vmem:[#allocation84_spill] sm:$0xff] }
 0x540   :  { %3832 = vmatprep.subr.bf16.mxu0 %v17481_v37  ;;  %v2412_v28 = vpop.permute.xlu0 %2411  ;;  %v11362_v31 = vpack.c.bf16 %v3269_v5, %v3265_v20  ;;  %v2398_v61 = vpop.permute.xlu1 %2397  ;;  %v11363_v25 = vpack.c.bf16 %v3270_v62, %v3266_v43  ;;  %v14656_v46 = vmul.f32 %v14356_v7, %v2421_v10  ;;  %v17482_v43 = vld [vmem:[#allocation83_spill] sm:$0xff]  ;;  %v14666_v32 = vmul.f32 %v17483_v2, %v2277_v44  ;;  %v17485_v10 = vld [vmem:[#allocation34_spill] sm:$0xff]  ;;  %v17486_v37 = vld [vmem:[#allocation48_spill] sm:$0xff] }
 0x541   :  { %v2422_v40 = vsel %vm1161_vm8, %v2398_v61, %v14252_v8  ;;  %v2426_v63 = vsel %vm1161_vm8, %v14222_v57, %v2398_v61  ;;  %v14663_v20 = vmul.f32 %v17482_v43, %v2281_v22  ;;  %v2606_v29 = vmul.f32 %v14339_v26, %v2559_v14  ;;  %v17488_v61 = vld [vmem:[#allocation60_spill] sm:$0xff] }
 0x542   :  { %v2466_v27 = vmul.f32 %v14350_v55, %v2426_v63  ;;  %v14660_v13 = vmul.f32 %v14356_v7, %v2422_v40  ;;  %3833 = vmatpush1.bf16.msra.mxu0 %v11318_v12  ;;  %3895 = vmatprep.subr.bf16.mxu1 %v11363_v25  ;;  %v2429_v5 = vsel %vm1161_vm8, %v2412_v28, %v14212_v47  ;;  %v17484_v12 = vld [vmem:[#allocation47_spill] sm:$0xff]  ;;  %v17489_v40 = vld [vmem:[#allocation85_spill] sm:$0xff] }
 0x543   :  { %3896 = vmatpush1.bf16.msra.mxu1 %v11362_v31  ;;  %v11310_v7 = vpack.c.bf16 %v14633_v56, %v14589_v53  ;;  %v2285_v62 = vsel %vm1077_vm9, %v17484_v12, %v14006_v35  ;;  %v2278_v47 = vsel %vm1077_vm9, %v17486_v37, %v17485_v10  ;;  %v11325_v56 = vpack.c.bf16 %v2610_v59, %v2606_v29  ;;  %v17487_v31 = vld [vmem:[#allocation64_spill] sm:$0xff] }
 0x544   :  { %v2254_v55 = vpop.permute.xlu0 %2253  ;;  %v11316_v44 = vpack.c.bf16 %v14660_v13, %v14656_v46  ;;  %3897 = vmatprep.subr.bf16.mxu1 %v11359_v15  ;;  %v2414_v22 = vpop.permute.xlu1 %2413  ;;  %v11315_v26 = vpack.c.bf16 %v2466_v27, %v2462_v48  ;;  %v11313_v14 = vpack.c.bf16 %v14642_v60, %v14592_v49  ;;  %v2461_v35 = vmul.f32 %v14359_v24, %v2429_v5  ;;  %v17490_v27 = vld [vmem:[#allocation30_spill] sm:$0xff]  ;;  %v17509_v46 = vld [vmem:[#allocation61_spill] sm:$0xff]  ;;  %v17510_v13 = vld [vmem:[#allocation40_spill] sm:$0xff] }
 0x545   :  { %v2430_v53 = vsel %vm1161_vm8, %v2414_v22, %v14222_v57  ;;  %v2279_v15 = vsel %vm1077_vm9, %v2254_v55, %v17487_v31  ;;  %v2283_v25 = vsel %vm1077_vm9, %v17488_v61, %v2254_v55  ;;  %v14700_v57 = vld [vmem:[%s17291_s7 + $0x8] ss:$12 sps:$4 sm:$0xff]   ;;  %v2273_v59 = vsel %vm1077_vm9, %v14030_v51, %v17484_v12 }
 0x546   :  { %v2465_v48 = vmul.f32 %v14359_v24, %v2430_v53  ;;  %3834 = vmatprep.subr.bf16.mxu0 %v11315_v26  ;;  %v14707_v63 = vmul.f32 %v17489_v40, %v2285_v62  ;;  %v2282_v29 = vsel %vm1077_vm9, %v17490_v27, %v17486_v37  ;;  %v2418_v24 = vsel %vm1161_vm8, %v14252_v8, %v2414_v22  ;;  %v17491_v51 = vld [vmem:[#allocation50_spill] sm:$0xff] }
 0x547   :  { %3898 = vmatpush1.bf16.msra.mxu1 %v11358_v39  ;;  %v14720_v55 = vmul.f32 %v17483_v2, %v2278_v47  ;;  %v2286_v12 = vsel %vm1077_vm9, %v17491_v51, %v17490_v27  ;;  %v2417_v62 = vsel %vm1161_vm8, %v14242_v3, %v2412_v28  ;;  %v2320_v22 = vmul.f32 %v17482_v43, %v2283_v25  ;;  %v17493_v37 = vld [vmem:[#allocation62_spill] sm:$0xff] }
 0x548   :  { %v2270_v5 = vpop.permute.xlu0 %2269  ;;  %v11314_v26 = vpack.c.bf16 %v2465_v48, %v2461_v35  ;;  %3936 = vmatprep.subr.bf16.mxu1 %v11325_v56  ;;  %v2256_v8 = vpop.permute.xlu1 %2255  ;;  %v14731_v18 = vmul.f32 %v17483_v2, %v2279_v15  ;;  %v2468_v53 = vmul.f32 %v14362_v6, %v2418_v24  ;;  %v17494_v56 = vld [vmem:[#allocation87_spill] sm:$0xff]  ;;  %v2316_v15 = vmul.f32 %v17482_v43, %v2282_v29  ;;  %v17512_v60 = vld [vmem:[#allocation90_spill] sm:$0xff] }
 0x549   :  { %v2280_v39 = vsel %vm1077_vm9, %v2256_v8, %v17492_v9  ;;  %v2284_v47 = vsel %vm1077_vm9, %v17493_v37, %v2256_v8  ;;  %v14747_v35 = vmul.f32 %v17494_v56, %v2273_v59  ;;  %v2287_v25 = vsel %vm1077_vm9, %v2270_v5, %v17488_v61  ;;  %v17499_v29 = vld [vmem:[#allocation31_spill] sm:$0xff] }
 0x54a   :  { %v2324_v3 = vmul.f32 %v17482_v43, %v2284_v47  ;;  %v14742_v28 = vmul.f32 %v17483_v2, %v2280_v39  ;;  %3835 = vmatpush1.bf16.msra.mxu0 %v11314_v26  ;;  %10633 = vmatmul.mubr.msk.bf16.vlgmr.msra.gmra.mxu1 %vm3823_vm12, %v14700_v57  ;;  %v17495_v2 = vpack.c.bf16 %v14533_v38, %v14529_v0  ;;  %v17497_v0 = vld [vmem:[#allocation37_spill] sm:$0xff]  ;;  %v17503_v47 = vld [vmem:[#allocation88_spill] sm:$0xff] }
 0x54b   :  { %3836 = vmatprep.subr.bf16.mxu0 %v11311_v30  ;;  %v2274_v59 = vsel %vm1077_vm9, %v17485_v10, %v17491_v51  ;;  %v2464_v43 = vmul.f32 %v14362_v6, %v2417_v62  ;;  %v17496_v50 = vpack.c.bf16 %v14504_v17, %v14482_v4  ;;  %v17498_v38 = vld [vmem:[#allocation49_spill] sm:$0xff]  ;;  %v2315_v6 = vmul.f32 %v17489_v40, %v2286_v12 }
 0x54c   :  { %3937 = vmatpush1.bf16.msra.mxu1 %v17495_v2  ;;  %v14759_v48 = vpop.permute.xlu0 %2111  ;;  %v11308_v61 = vpack.c.bf16 %v14742_v28, %v14731_v18  ;;  %v2272_v33 = vpop.permute.xlu1 %2271  ;;  %v11307_v30 = vpack.c.bf16 %v2324_v3, %v2320_v22  ;;  %v2135_v27 = vsel %vm994_vm10, %v17498_v38, %v17497_v0  ;;  %v2139_v10 = vsel %vm994_vm10, %v17499_v29, %v17498_v38  ;;  %v14791_v8 = vld [vmem:[%s17291_s7 + $0x20] ss:$12 sps:$4 sm:$0xff]   ;;  %v17505_v38 = vld [vmem:[#allocation52_spill] sm:$0xff] }
 0x54d   :  { %3938 = vmatprep.subr.bf16.mxu1 %v17496_v50  ;;  %v2288_v24 = vsel %vm1077_vm9, %v2272_v33, %v17493_v37  ;;  %v17500_v4 = vmov 0   ;;  %v11304_v17 = vpack.c.bf16 %v14720_v55, %v14666_v32  ;;  %v2319_v51 = vmul.f32 %v17489_v40, %v2287_v25  ;;  %v17501_v22 = vld [vmem:[#allocation63_spill] sm:$0xff]  ;;  %v17504_v3 = vld [vmem:[#allocation89_spill] sm:$0xff] }
 0x54e   :  { %3925 = vmatprep.mubr.bf16.mxu1 %v17500_v4  ;;  %v2323_v62 = vmul.f32 %v17489_v40, %v2288_v24  ;;  %3837 = vmatpush1.bf16.msra.mxu0 %v11310_v7  ;;  %v11317_v26 = vpack.c.bf16 %v2468_v53, %v2464_v43  ;;  %v14794_v12 = vmul.f32 %v17494_v56, %v2274_v59  ;;  %v17524_v18 = vld [vmem:[#allocation69_spill] sm:$0xff] }
 0x54f   :  { %v2141_v39 = vsel %vm994_vm10, %v17501_v22, %v14759_v48  ;;  %v2276_v37 = vsel %vm1077_vm9, %v17492_v9, %v2272_v33  ;;  %3838 = vmatprep.subr.bf16.mxu0 %v11307_v30  ;;  %v17502_v7 = vpack.c.bf16 %v14423_v34, %v14451_v54  ;;  %v2170_v53 = vmul.f32 %v17503_v47, %v2139_v10  ;;  %v17506_v9 = vld [vmem:[#allocation32_spill] sm:$0xff]  ;;  %v17507_v34 = vld [vmem:[#allocation65_spill] sm:$0xff] }
 0x550   :  { %v2128_v40 = vpop.permute.xlu0 %2127  ;;  %v14808_v25 = vmul.f32 %v17504_v3, %v2135_v27  ;;  %v11306_v2 = vpack.c.bf16 %v2323_v62, %v2319_v51  ;;  %v2114_v59 = vpop.permute.xlu1 %2113  ;;  %v11303_v43 = vpack.c.bf16 %v2316_v15, %v14663_v20  ;;  %v11302_v50 = vpack.c.bf16 %v2315_v6, %v14707_v63  ;;  %v17508_v63 = vld [vmem:[#allocation51_spill] sm:$0xff] }
 0x551   :  { %3939 = vmatpush1.bf16.msra.mxu1 %v17502_v7  ;;  %v2140_v33 = vsel %vm994_vm10, %v17506_v9, %v17505_v38  ;;  %v2275_v54 = vsel %vm1077_vm9, %v17487_v31, %v2270_v5  ;;  %v2142_v30 = vsel %vm994_vm10, %v17507_v34, %v2114_v59  ;;  %v2178_v27 = vmul.f32 %v17503_v47, %v2141_v39 }
 0x552   :  { %3940 = vmatprep.subr.bf16.mxu1 %v11317_v26  ;;  %v2326_v10 = vmul.f32 %v17494_v56, %v2276_v37  ;;  %v2182_v20 = vmul.f32 %v17503_v47, %v2142_v30  ;;  %3839 = vmatpush1.bf16.msra.mxu0 %v11306_v2  ;;  %v2131_v15 = vsel %vm994_vm10, %v17497_v0, %v17508_v63  ;;  %v17511_v26 = vld [vmem:[#allocation54_spill] sm:$0xff] }
 0x553   :  { %10634 = vmatmul.mubr.msk.bf16.gmra.mxu1 %vm3823_vm12, %v14791_v8  ;;  %v2145_v31 = vsel %vm994_vm10, %v2128_v40, %v17501_v22  ;;  %3840 = vmatprep.subr.bf16.mxu0 %v11303_v43  ;;  %v11305_v6 = vpack.c.bf16 %v14794_v12, %v14747_v35  ;;  %v2143_v24 = vsel %vm994_vm10, %v17508_v63, %v17499_v29  ;;  %v17513_v29 = vld [vmem:[#allocation73_spill] sm:$0xff] }
 0x554   :  { %v14837_v5 = vpop.permute.xlu0 %2769  ;;  %v2322_v0 = vmul.f32 %v17494_v56, %v2275_v54  ;;  %v2130_v51 = vpop.permute.xlu1 %2129  ;;  %v11299_v62 = vpack.c.bf16 %v2182_v20, %v2178_v27  ;;  %3968 = vmatprep.mubr.bf16.mxu1 %v17509_v46  ;;  %v2174_v35 = vmul.f32 %v17503_v47, %v2140_v33  ;;  %v2144_v56 = vsel %vm994_vm10, %v17511_v26, %v17506_v9  ;;  %v14870_v37 = vld [vmem:[%s17295_s11 + $0x5] ss:$8 sm:$0xf] }
 0x555   :  { %3941 = vmatpush1.bf16.msra.mxu1 %v11316_v44  ;;  %v2136_v44 = vsel %vm994_vm10, %v17505_v38, %v17510_v13  ;;  %v2146_v49 = vsel %vm994_vm10, %v2130_v51, %v17507_v34  ;;  %v2134_v12 = vsel %vm994_vm10, %v17513_v29, %v2130_v51  ;;  %v2169_v7 = vmul.f32 %v17512_v60, %v2143_v24  ;;  %v17515_v33 = vld [vmem:[#allocation70_spill] sm:$0xff]  ;;  %v17516_v27 = vld [vmem:[#allocation36_spill] sm:$0xff]  ;;  %v17520_v24 = vld [vmem:[#allocation35_spill] sm:$0xff] }
 0x556   :  { %3942 = vmatprep.subr.bf16.mxu1 %v11313_v14  ;;  %v2177_v14 = vmul.f32 %v17512_v60, %v2145_v31  ;;  %v2181_v22 = vmul.f32 %v17512_v60, %v2146_v49  ;;  %3841 = vmatpush1.bf16.msra.mxu0 %v11302_v50  ;;  %v11309_v39 = vpack.c.bf16 %v2326_v10, %v2322_v0  ;;  %v17517_v10 = vld [vmem:[#allocation56_spill] sm:$0xff]  ;;  %v17519_v31 = vld [vmem:[#allocation53_spill] sm:$0xff] }
 0x557   :  { %v14874_v47 = vmul.f32 %v14414_v41, %v2131_v15  ;;  %v2132_v2 = vsel %vm994_vm10, %v17510_v13, %v17511_v26  ;;  %3842 = vmatprep.subr.bf16.mxu0 %v11299_v62  ;;  %v17514_v43 = vpack.c.bf16 %v14549_v16, %v14573_v36  ;;  %v14884_v38 = vmul.f32 %v17504_v3, %v2136_v44  ;;  %v17518_v15 = vld [vmem:[#allocation33_spill] sm:$0xff]  ;;  %v17521_v62 = vld [vmem:[#allocation66_spill] sm:$0xff]  ;;  %v17522_v13 = vld [vmem:[#allocation68_spill] sm:$0xff] }
 0x558   :  { %v3058_v50 = vpop.permute.xlu0 %3057  ;;  %v2173_v9 = vmul.f32 %v17512_v60, %v2144_v56  ;;  %v2133_v54 = vsel %vm994_vm10, %v17515_v33, %v2128_v40  ;;  %v11298_v34 = vpack.c.bf16 %v2181_v22, %v2177_v14  ;;  %v14890_v30 = vpop.permute.xlu1 %2771  ;;  %v3082_v16 = vsel %vm1556_vm3, %v17517_v10, %v17516_v27 }
 0x559   :  { %3943 = vmatpush1.bf16.msra.mxu1 %v17514_v43  ;;  %v2184_v36 = vmul.f32 %v14414_v41, %v2134_v12  ;;  %v11295_v20 = vpack.c.bf16 %v2174_v35, %v2170_v53  ;;  %v14899_v63 = vrot.slane %v14870_v37, %v13514_v45  ;;  %v3081_v40 = vsel %vm1556_vm3, %v17519_v31, %v17518_v15  ;;  %v17527_v43 = vld [vmem:[#allocation41_spill] sm:$0xff] }
 0x55a   :  { %3944 = vmatprep.subr.bf16.mxu1 %v11309_v39  ;;  %v3085_v0 = vsel %vm1556_vm3, %v17520_v24, %v17519_v31  ;;  %v2176_v51 = vmul.f32 %v14414_v41, %v2132_v2  ;;  %v2138_v53 = vsel %vm994_vm10, %v2114_v59, %v17513_v29  ;;  %3843 = vmatpush1.bf16.msra.mxu0 %v11298_v34  ;;  %v17523_v59 = vld [vmem:[#allocation38_spill] sm:$0xff]  ;;  %v17526_v2 = vld [vmem:[#allocation55_spill] sm:$0xff] }
 0x55b   :  { %v2180_v45 = vmul.f32 %v14414_v41, %v2133_v54  ;;  %v3083_v46 = vsel %vm1556_vm3, %v3058_v50, %v17521_v62  ;;  %v3087_v44 = vsel %vm1556_vm3, %v17522_v13, %v3058_v50  ;;  %3844 = vmatprep.subr.bf16.mxu0 %v11295_v20  ;;  %v11294_v26 = vpack.c.bf16 %v2173_v9, %v2169_v7  ;;  %v17530_v31 = vld [vmem:[#allocation58_spill] sm:$0xff] }
 0x55c   :  { %v2916_v35 = vpop.permute.xlu0 %2915  ;;  %v3086_v41 = vsel %vm1556_vm3, %v17523_v59, %v17517_v10  ;;  %v3120_v56 = vmul.f32 %v14426_v52, %v3082_v16  ;;  %v2137_v49 = vsel %vm994_vm10, %v14759_v48, %v17515_v33  ;;  %v3060_v60 = vpop.permute.xlu1 %3059  ;;  %v2183_v14 = vmul.f32 %v17504_v3, %v2138_v53  ;;  %v17528_v10 = vld [vmem:[#allocation39_spill] sm:$0xff] }
 0x55d   :  { %3945 = vmatpush1.bf16.msra.mxu1 %v11308_v61  ;;  %v3084_v28 = vsel %vm1556_vm3, %v3060_v60, %v17524_v18  ;;  %v17525_v61 = vld [vmem:[#allocation71_spill] sm:$0xff]  ;;  %v11301_v12 = vpack.c.bf16 %v2184_v36, %v2180_v45  ;;  %v3123_v22 = vmul.f32 %v14417_v1, %v3087_v44  ;;  %v3124_v39 = vmul.f32 %v14426_v52, %v3083_v46  ;;  %v17533_v45 = vld [vmem:[#allocation74_spill] sm:$0xff] }
 0x55e   :  { %3946 = vmatprep.subr.bf16.mxu1 %v11305_v6  ;;  %v3088_v29 = vsel %vm1556_vm3, %v17525_v61, %v3060_v60  ;;  %v3128_v48 = vmul.f32 %v14426_v52, %v3084_v28  ;;  %3845 = vmatpush1.bf16.msra.mxu0 %v11294_v26  ;;  %v11296_v6 = vpack.c.bf16 %v14884_v38, %v14808_v25 }
 0x55f   :  { %v3127_v7 = vmul.f32 %v14417_v1, %v3088_v29  ;;  %v2943_v50 = vsel %vm1472_vm5, %v17527_v43, %v17526_v2  ;;  %v3119_v9 = vmul.f32 %v14417_v1, %v3086_v41  ;;  %v2179_v33 = vmul.f32 %v17504_v3, %v2137_v49  ;;  %v17529_v3 = vld [vmem:[#allocation42_spill] sm:$0xff]  ;;  %v17534_v41 = vld [vmem:[#allocation72_spill] sm:$0xff]  ;;  %v17536_v29 = vld [vmem:[#allocation45_spill] sm:$0xff] }
 0x560   :  { %v3074_v54 = vpop.permute.xlu0 %3073  ;;  %v3116_v34 = vmul.f32 %v14426_v52, %v3081_v40  ;;  %v2939_v25 = vsel %vm1472_vm5, %v17526_v2, %v17528_v10  ;;  %v14959_v16 = vpop.permute.xlu1 %2779  ;;  %v11355_v36 = vpack.c.bf16 %v3128_v48, %v3124_v39  ;;  %v3115_v20 = vmul.f32 %v14417_v1, %v3085_v0  ;;  %v17532_v40 = vld [vmem:[#allocation93_spill] sm:$0xff]  ;;  %v17538_v39 = vld [vmem:[#allocation75_spill] sm:$0xff] }
 0x561   :  { %3947 = vmatpush1.bf16.msra.mxu1 %v11304_v17  ;;  %v11354_v38 = vpack.c.bf16 %v3127_v7, %v3123_v22  ;;  %v2940_v32 = vsel %vm1472_vm5, %v17530_v31, %v17529_v3  ;;  %v11300_v55 = vpack.c.bf16 %v2183_v14, %v2179_v33  ;;  %v17531_v17 = vld [vmem:[#allocation11_spill] sm:$0xff]  ;;  %v14971_v53 = vmul.f32 %v17532_v40, %v2943_v50  ;;  %v17535_v14 = vld [vmem:[#allocation57_spill] sm:$0xff] }
 0x562   :  { %3948 = vmatprep.subr.bf16.mxu1 %v11301_v12  ;;  %v14968_v52 = vrot.slane %v14870_v37, %v17531_v17  ;;  %v2945_v46 = vsel %vm1472_vm5, %v17533_v45, %v2916_v35  ;;  %3846 = vmatprep.subr.bf16.mxu0 %v11355_v36  ;;  %v11351_v44 = vpack.c.bf16 %v3120_v56, %v3116_v34  ;;  %v17539_v7 = vld [vmem:[#allocation81_spill] sm:$0xff] }
 0x563   :  { %v11297_v1 = vpack.c.bf16 %v2176_v51, %v14874_v47  ;;  %v2974_v0 = vmul.f32 %v14442_v21, %v2939_v25  ;;  %v11350_v26 = vpack.c.bf16 %v3119_v9, %v3115_v20  ;;  %v2941_v49 = vsel %vm1472_vm5, %v2916_v35, %v17534_v41  ;;  %3847 = vmatpush2.bf16.msra.mxu0 %v11354_v38  ;;  %v17537_v35 = vld [vmem:[#allocation59_spill] sm:$0xff] }
 0x564   :  { %v2774_v60 = vpop.permute.xlu0 %2773  ;;  %v3077_v28 = vsel %vm1556_vm3, %v17518_v15, %v17535_v14  ;;  %v2944_v47 = vsel %vm1472_vm5, %v17536_v29, %v17530_v31  ;;  %v2978_v51 = vmul.f32 %v14442_v21, %v2940_v32  ;;  %3848 = vmatprep.subr.bf16.mxu0 %v11351_v44  ;;  %v2918_v56 = vpop.permute.xlu1 %2917  ;;  %v3090_v12 = vsel %vm1556_vm3, %v17537_v35, %v17523_v59 }
 0x565   :  { %3949 = vmatpush1.bf16.msra.mxu1 %v11300_v55  ;;  %v2981_v22 = vmul.f32 %v17532_v40, %v2945_v46  ;;  %v2942_v15 = vsel %vm1472_vm5, %v2918_v56, %v17538_v39  ;;  %v2946_v48 = vsel %vm1472_vm5, %v17539_v7, %v2918_v56  ;;  %v2982_v2 = vmul.f32 %v14442_v21, %v2941_v49  ;;  %v17541_v55 = vld [vmem:[#allocation94_spill] sm:$0xff] }
 0x566   :  { %3950 = vmatprep.subr.bf16.mxu1 %v11297_v1  ;;  %v3079_v50 = vsel %vm1556_vm3, %v17521_v62, %v3074_v54  ;;  %v2985_v9 = vmul.f32 %v17532_v40, %v2946_v48  ;;  %v2986_v59 = vmul.f32 %v14442_v21, %v2942_v15  ;;  %v3089_v33 = vsel %vm1556_vm3, %v17535_v14, %v17520_v24  ;;  %v17540_v24 = vld [vmem:[#allocation96_spill] sm:$0xff] }
 0x567   :  { %v2977_v34 = vmul.f32 %v17532_v40, %v2944_v47  ;;  %v3091_v25 = vsel %vm1556_vm3, %v3074_v54, %v17522_v13  ;;  %3849 = vmatpush2.bf16.msra.mxu0 %v11350_v26  ;;  %v3078_v21 = vsel %vm1556_vm3, %v17516_v27, %v17537_v35  ;;  %v11343_v31 = vpack.c.bf16 %v2978_v51, %v2974_v0  ;;  %v17542_v1 = vld [vmem:[#allocation80_spill] sm:$0xff]  ;;  %v17543_v0 = vld [vmem:[#allocation91_spill] sm:$0xff] }
 0x568   :  { %v15015_v38 = vpop.permute.xlu0 %2777  ;;  %v11346_v62 = vpack.c.bf16 %v2985_v9, %v2981_v22  ;;  %v3076_v36 = vpop.permute.xlu1 %3075  ;;  %v11347_v20 = vpack.c.bf16 %v2986_v59, %v2982_v2  ;;  %v3122_v32 = vmul.f32 %v17540_v24, %v3090_v12  ;;  %v3125_v17 = vmul.f32 %v17541_v55, %v3079_v50  ;;  %v17544_v12 = vld [vmem:[#allocation92_spill] sm:$0xff]  ;;  %v17545_v22 = vld [vmem:[#allocation95_spill] sm:$0xff] }
 0x569   :  { %3951 = vmatpush1.bf16.msra.mxu1 %v11296_v6  ;;  %v3080_v13 = vsel %vm1556_vm3, %v17524_v18, %v3076_v36  ;;  %v3092_v6 = vsel %vm1556_vm3, %v3076_v36, %v17525_v61  ;;  %v3126_v54 = vmul.f32 %v17540_v24, %v3091_v25  ;;  %v2797_v27 = vsel %vm1388_vm6, %v14837_v5, %v15015_v38  ;;  %v17546_v36 = vld [vmem:[#allocation12_spill] sm:$0xff] }
 0x56a   :  { %v3129_v40 = vmul.f32 %v17541_v55, %v3080_v13  ;;  %v3130_v46 = vmul.f32 %v17540_v24, %v3092_v6  ;;  %3850 = vmatprep.subr.bf16.mxu0 %v11347_v20  ;;  %v3118_v44 = vmul.f32 %v17540_v24, %v3089_v33  ;;  %v11342_v18 = vpack.c.bf16 %v2977_v34, %v14971_v53  ;;  %v17547_v20 = vld [vmem:[#allocation86_spill] sm:$0xff]  ;;  %v17550_v13 = vld [vmem:[#allocation13_spill] sm:$0xff] }
 0x56b   :  { %v2799_v61 = vsel %vm1388_vm6, %v2774_v60, %v17542_v1  ;;  %v2803_v26 = vsel %vm1388_vm6, %v17543_v0, %v2774_v60  ;;  %3851 = vmatpush2.bf16.msra.mxu0 %v11346_v62  ;;  %v3121_v14 = vmul.f32 %v17541_v55, %v3078_v21  ;;  %v2798_v47 = vsel %vm1388_vm6, %v14890_v30, %v14959_v16 }
 0x56c   :  { %v15044_v49 = vpop.permute.xlu0 %2761  ;;  %v11356_v51 = vpack.c.bf16 %v3129_v40, %v3125_v17  ;;  %3852 = vmatprep.subr.bf16.mxu0 %v11343_v31  ;;  %v2776_v53 = vpop.permute.xlu1 %2775  ;;  %v11357_v56 = vpack.c.bf16 %v3130_v46, %v3126_v54  ;;  %v2832_v35 = vmul.f32 %v14899_v63, %v2797_v27  ;;  %v11353_v48 = vpack.c.bf16 %v3122_v32, %v3118_v44  ;;  %v17548_v17 = vld [vmem:[#allocation43_spill] sm:$0xff] }
 0x56d   :  { %v2800_v60 = vsel %vm1388_vm6, %v2776_v53, %v17544_v12  ;;  %v2804_v15 = vsel %vm1388_vm6, %v17545_v22, %v2776_v53  ;;  %v2839_v2 = vmul.f32 %v14968_v52, %v2803_v26  ;;  %v2840_v50 = vmul.f32 %v14899_v63, %v2799_v61  ;;  %v17551_v61 = vld [vmem:[#allocation23_spill] sm:$0xff] }
 0x56e   :  { %v2843_v9 = vmul.f32 %v14968_v52, %v2804_v15  ;;  %v2844_v59 = vmul.f32 %v14899_v63, %v2800_v60  ;;  %3952 = vmatprep.subr.bf16.mxu1 %v11357_v56  ;;  %v3117_v33 = vmul.f32 %v17541_v55, %v3077_v28  ;;  %v2836_v34 = vmul.f32 %v14899_v63, %v2798_v47  ;;  %v17549_v28 = vld [vmem:[#allocation78_spill] sm:$0xff]  ;;  %v17552_v26 = vld [vmem:[#allocation79_spill] sm:$0xff] }
 0x56f   :  { %v2801_v25 = vsel %vm1388_vm6, %v15044_v49, %v14837_v5  ;;  %3853 = vmatpush2.bf16.msra.mxu0 %v11342_v18  ;;  %3953 = vmatpush2.bf16.msra.mxu1 %v11356_v51  ;;  %v2964_v31 = vrot.slane %v17547_v20, %v17546_v36  ;;  %v2702_v55 = vmul.f32 %v17549_v28, %v17548_v17  ;;  %v17556_v60 = vld [vmem:[#allocation18_spill] sm:$0xff] }
 0x570   :  { %v2932_v21 = vpop.permute.xlu0 %2931  ;;  %v11338_v62 = vpack.c.bf16 %v2843_v9, %v2839_v2  ;;  %3954 = vmatprep.subr.bf16.mxu1 %v11353_v48  ;;  %v15070_v24 = vpop.permute.xlu1 %2763  ;;  %v11339_v32 = vpack.c.bf16 %v2844_v59, %v2840_v50  ;;  %v11352_v63 = vpack.c.bf16 %v3121_v14, %v3117_v33  ;;  %v2968_v6 = vrot.slane %v17547_v20, %v17550_v13  ;;  %v17553_v14 = vld [vmem:[#allocation19_spill] sm:$0xff]  ;;  %v17557_v20 = vld [vmem:[#allocation14_spill] sm:$0xff] }
 0x571   :  { %v2802_v5 = vsel %vm1388_vm6, %v15070_v24, %v14890_v30  ;;  %v11335_v54 = vpack.c.bf16 %v2836_v34, %v2832_v35  ;;  %v2831_v27 = vmul.f32 %v14968_v52, %v2801_v25  ;;  %v2937_v40 = vsel %vm1472_vm5, %v17534_v41, %v2932_v21  ;;  %v17554_v41 = vld [vmem:[#allocation82_spill] sm:$0xff] }
 0x572   :  { %v2949_v46 = vsel %vm1472_vm5, %v2932_v21, %v17533_v45  ;;  %v2835_v44 = vmul.f32 %v14968_v52, %v2802_v5  ;;  %3854 = vmatprep.subr.bf16.mxu0 %v11339_v32  ;;  %v2701_v30 = vmul.f32 %v17552_v26, %v17551_v61  ;;  %v2694_v47 = vmul.f32 %v17549_v28, %v17553_v14  ;;  %v17555_v35 = vld [vmem:[#allocation22_spill] sm:$0xff]  ;;  %v17558_v32 = vld [vmem:[#allocation15_spill] sm:$0xff] }
 0x573   :  { %3855 = vmatpush2.bf16.msra.mxu0 %v11338_v62  ;;  %3955 = vmatpush2.bf16.msra.mxu1 %v11352_v63  ;;  %v11331_v56 = vpack.c.bf16 %v2702_v55, %v17554_v41  ;;  %v2697_v45 = vmul.f32 %v17552_v26, %v17555_v35  ;;  %v2690_v52 = vmul.f32 %v17549_v28, %v17556_v60  ;;  %v17561_v60 = vld [vmem:[#allocation77_spill] sm:$0xff] }
 0x574   :  { %v2928_v18 = vpop.permute.xlu0 %2927  ;;  %v11334_v51 = vpack.c.bf16 %v2835_v44, %v2831_v27  ;;  %3856 = vmatprep.subr.bf16.mxu0 %v11335_v54  ;;  %v2934_v53 = vpop.permute.xlu1 %2933  ;;  %v2983_v15 = vmul.f32 %v2964_v31, %v2937_v40  ;;  %v2984_v48 = vmul.f32 %v2968_v6, %v2949_v46  ;;  %v2826_v28 = vrot.slane %v14870_v37, %v17550_v13 }
 0x575   :  { %v2938_v2 = vsel %vm1472_vm5, %v17538_v39, %v2934_v53  ;;  %v2950_v50 = vsel %vm1472_vm5, %v2934_v53, %v17539_v7  ;;  %v2935_v9 = vsel %vm1472_vm5, %v17528_v10, %v2928_v18  ;;  %v2947_v59 = vsel %vm1472_vm5, %v2928_v18, %v17527_v43 }
 0x576   :  { %v2987_v33 = vmul.f32 %v2964_v31, %v2938_v2  ;;  %v2988_v34 = vmul.f32 %v2968_v6, %v2950_v50  ;;  %v11330_v21 = vpack.c.bf16 %v2701_v30, %v2697_v45  ;;  %v11327_v62 = vpack.c.bf16 %v2694_v47, %v2690_v52 }
 0x577   :  { %3857 = vmatpush2.bf16.msra.mxu0 %v11334_v51  ;;  %v2689_v39 = vmul.f32 %v17552_v26, %v17557_v20  ;;  %v2693_v7 = vmul.f32 %v17552_v26, %v17558_v32  ;;  %v2822_v10 = vrot.slane %v14870_v37, %v17546_v36  ;;  %v2975_v63 = vmul.f32 %v2964_v31, %v2935_v9 }
 0x578   :  { %v2790_v25 = vpop.permute.xlu0 %2789  ;;  %v11348_v17 = vpack.c.bf16 %v2987_v33, %v2983_v15  ;;  %3858 = vmatprep.subr.bf16.mxu0 %v11331_v56  ;;  %v2930_v43 = vpop.permute.xlu1 %2929  ;;  %v11349_v55 = vpack.c.bf16 %v2988_v34, %v2984_v48  ;;  %v2976_v5 = vmul.f32 %v2968_v6, %v2947_v59  ;;  %v15146_v56 = vld [vmem:[%s17291_s7] ss:$12 sps:$4 sm:$0xff]   ;;  %v3248_v52 = vrot.slane %v17561_v60, %v17546_v36 }
 0x579   :  { %v2936_v54 = vsel %vm1472_vm5, %v17529_v3, %v2930_v43  ;;  %v2948_v27 = vsel %vm1472_vm5, %v2930_v43, %v17536_v29  ;;  %v2795_v40 = vsel %vm1388_vm6, %v17542_v1, %v2790_v25  ;;  %v2807_v37 = vsel %vm1388_vm6, %v2790_v25, %v17543_v0  ;;  %v17559_v29 = vld [vmem:[#allocation76_spill] sm:$0xff] }
 0x57a   :  { %v2979_v46 = vmul.f32 %v2964_v31, %v2936_v54  ;;  %v2980_v44 = vmul.f32 %v2968_v6, %v2948_v27  ;;  %3956 = vmatprep.subr.bf16.mxu1 %v11349_v55  ;;  %v11326_v30 = vpack.c.bf16 %v2693_v7, %v2689_v39  ;;  %v2684_v14 = vrot.slane %v17559_v29, %v17550_v13  ;;  %v17564_v7 = vld [vmem:[#allocation25_spill] sm:$0xff]  ;;  %v17566_v54 = vld [vmem:[#allocation26_spill] sm:$0xff] }
 0x57b   :  { %3859 = vmatpush2.bf16.msra.mxu0 %v11330_v21  ;;  %3957 = vmatpush2.bf16.msra.mxu1 %v11348_v17  ;;  %v2841_v47 = vmul.f32 %v2822_v10, %v2795_v40  ;;  %v2842_v1 = vmul.f32 %v2826_v28, %v2807_v37  ;;  %v3252_v15 = vrot.slane %v17561_v60, %v17550_v13 }
 0x57c   :  { %v2786_v18 = vpop.permute.xlu0 %2785  ;;  %v11344_v61 = vpack.c.bf16 %v2979_v46, %v2975_v63  ;;  %3860 = vmatprep.subr.bf16.mxu0 %v11327_v62  ;;  %v2792_v3 = vpop.permute.xlu1 %2791  ;;  %v11345_v26 = vpack.c.bf16 %v2980_v44, %v2976_v5  ;;  %v12098_v46 = vld [vmem:[%s17291_s7 + $0x18] ss:$12 sps:$4 sm:$0xff]   ;;  %v17567_v44 = vld [vmem:[#allocation27_spill] sm:$0xff] }
 0x57d   :  { %v2796_v0 = vsel %vm1388_vm6, %v17544_v12, %v2792_v3  ;;  %v2808_v31 = vsel %vm1388_vm6, %v2792_v3, %v17545_v22  ;;  %v2793_v6 = vsel %vm1388_vm6, %v15015_v38, %v2786_v18  ;;  %v2805_v51 = vsel %vm1388_vm6, %v2786_v18, %v15044_v49  ;;  %v17560_v22 = vld [vmem:[#allocation46_spill] sm:$0xff]  ;;  %v17568_v18 = vld [vmem:[#allocation24_spill] sm:$0xff] }
 0x57e   :  { %v2845_v53 = vmul.f32 %v2822_v10, %v2796_v0  ;;  %v2846_v41 = vmul.f32 %v2826_v28, %v2808_v31  ;;  %3958 = vmatprep.subr.bf16.mxu1 %v11345_v26  ;;  %v2704_v35 = vmul.f32 %v2684_v14, %v17560_v22  ;;  %v15152_v38 = vld [vmem:[%s17291_s7 + $0x1c] ss:$12 sps:$4 sm:$0xff]   ;;  %v2680_v49 = vrot.slane %v17559_v29, %v17546_v36  ;;  %v17572_v22 = vld [vmem:[#allocation16_spill] sm:$0xff] }
 0x57f   :  { %3861 = vmatpush2.bf16.msra.mxu0 %v11326_v30  ;;  %3959 = vmatpush2.bf16.msra.mxu1 %v11344_v61  ;;  %v2833_v50 = vmul.f32 %v2822_v10, %v2793_v6  ;;  %v2834_v9 = vmul.f32 %v2826_v28, %v2805_v51  ;;  %v17569_v29 = vld [vmem:[#allocation17_spill] sm:$0xff] }
 0x580   :  { %v3216_v12 = vpop.permute.xlu0 %3215  ;;  %v11340_v45 = vpack.c.bf16 %v2845_v53, %v2841_v47  ;;  %v2788_v48 = vpop.permute.xlu1 %2787  ;;  %v11341_v2 = vpack.c.bf16 %v2846_v41, %v2842_v1  ;;  %v2703_v17 = vmul.f32 %v2680_v49, %v17564_v7  ;;  %v17570_v1 = vld [vmem:[#allocation28_spill] sm:$0xff]  ;;  %v17571_v31 = vld [vmem:[#allocation29_spill] sm:$0xff] }
 0x581   :  { %v2794_v59 = vsel %vm1388_vm6, %v14959_v16, %v2788_v48  ;;  %v2806_v33 = vsel %vm1388_vm6, %v2788_v48, %v15070_v24  ;;  %v3221_v34 = vsel %vm1640_vm11, %v14196_v23, %v3216_v12  ;;  %v3233_v13 = vsel %vm1640_vm11, %v3216_v12, %v14204_v19  ;;  %v17562_v16 = vld [vmem:[#allocation44_spill] sm:$0xff] }
 0x582   :  { %v2837_v36 = vmul.f32 %v2822_v10, %v2794_v59  ;;  %v2838_v25 = vmul.f32 %v2826_v28, %v2806_v33  ;;  %3863 = vmatmul.mubr.bf16.vlgmr.msra.gmra.mxu0 %v15146_v56  ;;  %3960 = vmatprep.subr.bf16.mxu1 %v11341_v2  ;;  %v2700_v62 = vmul.f32 %v2684_v14, %v17562_v16  ;;  %v17563_v24 = vld [vmem:[#allocation20_spill] sm:$0xff]  ;;  %v17565_v10 = vld [vmem:[#allocation21_spill] sm:$0xff] }
 0x583   :  { %3961 = vmatpush2.bf16.msra.mxu1 %v11340_v45  ;;  %3872 = vmatprep.mubr.bf16.mxu0 %v15152_v38  ;;  %v2692_v20 = vmul.f32 %v2684_v14, %v17563_v24  ;;  %v2696_v28 = vmul.f32 %v2684_v14, %v17565_v10  ;;  %v3267_v43 = vmul.f32 %v3248_v52, %v3221_v34 }
 0x584   :  { %v3212_v21 = vpop.permute.xlu0 %3211  ;;  %v11336_v39 = vpack.c.bf16 %v2837_v36, %v2833_v50  ;;  %v3218_v32 = vpop.permute.xlu1 %3217  ;;  %v11337_v23 = vpack.c.bf16 %v2838_v25, %v2834_v9  ;;  %v11333_v63 = vpack.c.bf16 %v2704_v35, %v2700_v62  ;;  %v3268_v5 = vmul.f32 %v3252_v15, %v3233_v13 }
 0x585   :  { %v3222_v19 = vsel %vm1640_vm11, %v14206_v58, %v3218_v32  ;;  %v3234_v55 = vsel %vm1640_vm11, %v3218_v32, %v14214_v42  ;;  %v3219_v27 = vsel %vm1640_vm11, %v17566_v54, %v3212_v21  ;;  %v3231_v58 = vsel %vm1640_vm11, %v3212_v21, %v17567_v44 }
 0x586   :  { %v3271_v40 = vmul.f32 %v3248_v52, %v3222_v19  ;;  %v3272_v37 = vmul.f32 %v3252_v15, %v3234_v55  ;;  %3962 = vmatprep.subr.bf16.mxu1 %v11337_v23  ;;  %v2699_v42 = vmul.f32 %v2680_v49, %v17568_v18  ;;  %v11329_v30 = vpack.c.bf16 %v2696_v28, %v2692_v20  ;;  %v4146_v55 = vld [vmem:[%s17293_s9] sm:$0xff] }
 0x587   :  { %3963 = vmatpush2.bf16.msra.mxu1 %v11336_v39  ;;  %v2695_v14 = vmul.f32 %v2680_v49, %v17569_v29  ;;  %v3259_v47 = vmul.f32 %v3248_v52, %v3219_v27  ;;  %v3260_v53 = vmul.f32 %v3252_v15, %v3231_v58  ;;  %v2691_v35 = vmul.f32 %v2680_v49, %v17572_v22 }
 0x588   :  { %v11364_v61 = vpack.c.bf16 %v3271_v40, %v3267_v43  ;;  %3964 = vmatprep.subr.bf16.mxu1 %v11333_v63  ;;  %v3214_v3 = vpop.permute.xlu1 %3213  ;;  %v11365_v26 = vpack.c.bf16 %v3272_v37, %v3268_v5  ;;  %v11332_v51 = vpack.c.bf16 %v2703_v17, %v2699_v42 }
 0x589   :  { %v3220_v0 = vsel %vm1640_vm11, %v17570_v1, %v3214_v3  ;;  %v3232_v6 = vsel %vm1640_vm11, %v3214_v3, %v17571_v31  ;;  %v11328_v48 = vpack.c.bf16 %v2695_v14, %v2691_v35  ;;  %v4147_v14 = vld [vmem:[%s17293_s9 + $0x8] sm:$0xff] }
 0x58a   :  { %v3263_v41 = vmul.f32 %v3248_v52, %v3220_v0  ;;  %v3264_v12 = vmul.f32 %v3252_v15, %v3232_v6  ;;  %4001 = vmatprep.subr.bf16.mxu0 %v11365_v26  ;;  %3873 = vmatmul.mubr.bf16.gmra.mxu0 %v12098_v46 }
 0x58b   :  { %3965 = vmatpush2.bf16.msra.mxu1 %v11332_v51  ;;  %4002 = vmatpush1.bf16.msra.mxu0 %v11364_v61 }
 0x58c   :  { %v11360_v45 = vpack.c.bf16 %v3263_v41, %v3259_v47  ;;  %3966 = vmatprep.subr.bf16.mxu1 %v11329_v30  ;;  %v11361_v60 = vpack.c.bf16 %v3264_v12, %v3260_v53  ;;  %4021 = vmatprep.mubr.bf16.mxu0 %v17500_v4 }
 0x58e   :  { %4003 = vmatprep.subr.bf16.mxu0 %v11361_v60 }
 0x58f   :  { %3967 = vmatpush2.bf16.msra.mxu1 %v11328_v48  ;;  %4004 = vmatpush1.bf16.msra.mxu0 %v11360_v45  ;;  %v4186_v48 = vld [vmem:[%s17294_s10] sm:$0xff] }
 0x592   :  { %3969 = vmatmul.mubr.bf16.vlgmr.msra.gmra.mxu1 %v15146_v56  ;;  %10635 = vmatmul.mubr.msk.bf16.vlgmr.msra.gmra.mxu0 %vm3823_vm12, %v14700_v57 }
 0x593   :  { %3978 = vmatprep.mubr.bf16.mxu1 %v15152_v38  ;;  %4031 = vmatprep.mubr.bf16.mxu0 %v17500_v4  ;;  %v3416_v38 = vpop.permute.xlu0 %3415 }
 0x597   :  { %v3421_v63 = vpop.permute.xlu0 %3420 }
 0x59a   :  { %3979 = vmatmul.mubr.bf16.gmra.mxu1 %v12098_v46  ;;  %10636 = vmatmul.mubr.msk.bf16.gmra.mxu0 %vm3823_vm12, %v14791_v8 }
 0x60a   :  { %v3917_v11 = vpop.f32.mrf.mxu1 }
 0x60c   :  { %v3919_v49 = vpop.f32.mrf.mxu1 }
 0x60e   :  { %v3921_v52 = vpop.f32.mrf.mxu1 }
 0x610   :  { %v3923_v15 = vpop.f32.mrf.mxu1 }
 0x613   :  { %v15210_v9 = vpop.f32.mrf.mxu1 }
 0x615   :  { %v15212_v33 = vpop.f32.mrf.mxu1 }
 0x617   :  { %v15218_v34 = vpop.f32.mrf.mxu1 }
 0x619   :  { %v15222_v13 = vpop.f32.mrf.mxu1 }
 0x642   :  { %v3864_v2 = vpop.f32.mrf.mxu0 }
 0x643   :  { %v3865_v25 = vadd.f32 %v3864_v2, %v3416_v38  ;;  %v12099_v2 = vld [vmem:[%s17296_s12 + $0x78] sm:$0xff]  }
 0x644   :  { %v3866_v50 = vpop.f32.mrf.mxu0  ;;  %11366 = vmatprep.subr.bf16.mxu0 %v12099_v2 }
 0x645   :  { %v3867_v8 = vadd.f32 %v3866_v50, %v3416_v38  ;;  %v3918_v20 = vadd.f32 %v3917_v11, %v3865_v25  ;;  %v3411_v11 = vld [vmem:[%s17292_s8 + $0x10] sm:$0xff]  ;;  %v12100_v50 = vld [vmem:[%s17296_s12 + $0x38] sm:$0xff]  }
 0x646   :  { %v3868_v56 = vpop.f32.mrf.mxu0  ;;  %11367 = vmatpush3.bf16.msra.mxu0 %v12100_v50 }
 0x647   :  { %v3920_v16 = vadd.f32 %v3919_v49, %v3867_v8  ;;  %v3869_v27 = vadd.f32 %v3868_v56, %v3421_v63  ;;  %v12102_v8 = vld [vmem:[%s17296_s12 + $0xb8] sm:$0xff]  }
 0x648   :  { %v3870_v59 = vpop.f32.mrf.mxu0 }
 0x649   :  { %v4042_v17 = vadd.f32 %v3920_v16, %v3918_v20  ;;  %v3871_v54 = vadd.f32 %v3870_v59, %v3421_v63  ;;  %v3922_v58 = vadd.f32 %v3921_v52, %v3869_v27 }
 0x64a   :  { %v15214_v57 = vpop.f32.mrf.mxu0 }
 0x64b   :  { %v3924_v46 = vadd.f32 %v3923_v15, %v3871_v54  ;;  %v12113_v54 = vld [vmem:[%s17296_s12 + $0xe0] sm:$0xff]  }
 0x64c   :  { %v15216_v4 = vpop.f32.mrf.mxu0 }
 0x64d   :  { %v4047_v61 = vadd.f32 %v3924_v46, %v3922_v58 }
 0x64e   :  { %v15220_v36 = vpop.f32.mrf.mxu0 }
 0x650   :  { %v15224_v21 = vpop.f32.mrf.mxu0 }
 0x652   :  { %v3970_v62 = vpop.f32.mrf.mxu1  ;;  %v4023_v24 = vpop.f32.mrf.mxu0 }
 0x653   :  { %v3971_v39 = vadd.f32 %v3970_v62, %v3416_v38 }
 0x654   :  { %v3972_v32 = vpop.f32.mrf.mxu1  ;;  %v4025_v10 = vpop.f32.mrf.mxu0 }
 0x655   :  { %v3973_v23 = vadd.f32 %v3972_v32, %v3416_v38  ;;  %v4024_v7 = vadd.f32 %v4023_v24, %v3971_v39  ;;  %v12101_v38 = vld [vmem:[%s17296_s12 + $0xf8] sm:$0xff]   ;;  %v12103_v24 = vld [vmem:[%s17296_s12 + $0x70] sm:$0xff]  }
 0x656   :  { %v3974_v5 = vpop.f32.mrf.mxu1  ;;  %v4027_v44 = vpop.f32.mrf.mxu0  ;;  %11388 = vmatprep.subr.bf16.mxu1 %v12101_v38  ;;  %11368 = vmatprep.subr.bf16.mxu0 %v12103_v24  ;;  %v12105_v32 = vld [vmem:[%s17296_s12 + $0xf0] sm:$0xff]  }
 0x657   :  { %v4043_v28 = vadd.f32 %v4042_v17, %v4024_v7  ;;  %v4026_v43 = vadd.f32 %v4025_v10, %v3973_v23  ;;  %v3975_v40 = vadd.f32 %v3974_v5, %v3421_v63  ;;  %11389 = vmatpush3.bf16.msra.mxu1 %v12102_v8  ;;  %v12106_v23 = vld [vmem:[%s17296_s12 + $0xb0] sm:$0xff]   ;;  %v12107_v10 = vld [vmem:[%s17296_s12 + $0x68] sm:$0xff]   ;;  %v12112_v5 = vld [vmem:[%s17296_s12 + $0x20] sm:$0xff]  }
 0x658   :  { %v3976_v37 = vpop.f32.mrf.mxu1  ;;  %v4029_v3 = vpop.f32.mrf.mxu0  ;;  %11390 = vmatprep.subr.bf16.mxu1 %v12105_v32 }
 0x659   :  { %v4044_v19 = vadd.f32 %v4043_v28, %v4026_v43  ;;  %v3977_v18 = vadd.f32 %v3976_v37, %v3421_v63  ;;  %v4028_v42 = vadd.f32 %v4027_v44, %v3975_v40  ;;  %v12108_v28 = vld [vmem:[%s17296_s12 + $0x28] sm:$0xff]   ;;  %v12111_v63 = vld [vmem:[%s17296_s12 + $0x60] sm:$0xff]   ;;  %v12115_v40 = vld [vmem:[%s17296_s12 + $0x58] sm:$0xff]  }
 0x65a   :  { %v12114_v37 = vld [vmem:[%s17296_s12 + $0xa0] sm:$0xff]   ;;  %v12117_v44 = vld [vmem:[%s17296_s12 + $0xd8] sm:$0xff]   ;;  %v3980_v2 = vpop.f32.mrf.mxu1  ;;  %v4033_v24 = vpop.f32.mrf.mxu0 }
 0x65b   :  { %4045 = vadd.xlane.f32.xlu1 %v4044_v19  ;;  %v4048_v26 = vadd.f32 %v4047_v61, %v4028_v42  ;;  %v4030_v30 = vadd.f32 %v4029_v3, %v3977_v18  ;;  %11391 = vmatpush3.bf16.msra.mxu1 %v12106_v23  ;;  %v12109_v19 = vld [vmem:[%s17296_s12 + $0xe8] sm:$0xff]   ;;  %v12119_v18 = vld [vmem:[%s17296_s12 + $0x50] sm:$0xff]  }
 0x65c   :  { %11392 = vmatprep.subr.bf16.mxu1 %v12109_v19  ;;  %v12121_v61 = vld [vmem:[%s17296_s12 + $0xd0] sm:$0xff]  }
 0x65d   :  { %v4049_v29 = vadd.f32 %v4048_v26, %v4030_v30  ;;  %v12120_v3 = vld [vmem:[%s17296_s12 + $0x10] sm:$0xff]   ;;  %v12123_v26 = vld [vmem:[%s17296_s12 + $0x48] sm:$0xff]  }
 0x66c   :  { %4152 = vperm.xlu1 %12083, %v4146_v55   ;;  %v12110_v55 = vld [vmem:[%s17296_s12 + $0xa8] sm:$0xff]  }
 0x66d   :  { %11393 = vmatpush3.bf16.msra.mxu1 %v12110_v55 }
 0x66e   :  { %11394 = vmatprep.subr.bf16.mxu1 %v12113_v54 }
 0x671   :  { %11395 = vmatpush3.bf16.msra.mxu1 %v12114_v37 }
 0x672   :  { %11396 = vmatprep.subr.bf16.mxu1 %v12117_v44 }
 0x690   :  { %4050 = vadd.xlane.f32.xlu1 %v4049_v29  ;;  %v12125_v29 = vld [vmem:[%s17296_s12 + $0xc8] sm:$0xff]  }
 0x6a1   :  { %4157 = vperm.xlu1 %12083, %v4147_v14   ;;  %v12124_v14 = vld [vmem:[%s17296_s12 + $0x8] sm:$0xff]  }
 0x6e4   :  { %v4046_v47 = vpop.xlane.xlu1 %4045 }
 0x6e5   :  { %v4062_v1 = vmul.f32 0.001953125, %v4046_v47  ;;  %v12127_v47 = vld [vmem:[%s17296_s12 + $0x40] sm:$0xff]  }
 0x6e7   :  { %v15232_v0 = vsub.f32 %v3918_v20, %v4062_v1  ;;  %v15234_v31 = vsub.f32 %v3920_v16, %v4062_v1  ;;  %v15236_v6 = vsub.f32 %v4024_v7, %v4062_v1  ;;  %v15238_v51 = vsub.f32 %v4026_v43, %v4062_v1  ;;  %v12104_v20 = vld [vmem:[%s17296_s12 + $0x30] sm:$0xff]   ;;  %v12126_v1 = vld [vmem:[%s17296_s12 + $0x88] sm:$0xff]  }
 0x6e8   :  { %v15254_v49 = vpop.permute.xlu1 %4152  ;;  %11369 = vmatpush3.bf16.msra.mxu0 %v12104_v20 }
 0x6e9   :  { %v4082_v53 = vmul.f32 %v15232_v0, %v15232_v0  ;;  %v4083_v41 = vmul.f32 %v15234_v31, %v15234_v31  ;;  %v4084_v12 = vmul.f32 %v15236_v6, %v15236_v6  ;;  %v4085_v35 = vmul.f32 %v15238_v51, %v15238_v51  ;;  %11370 = vmatprep.subr.bf16.mxu0 %v12107_v10 }
 0x6eb   :  { %v4098_v22 = vadd.f32 %v4083_v41, %v4082_v53  ;;  %v12129_v53 = vld [vmem:[%s17296_s12 + $0xc0] sm:$0xff]  }
 0x6ec   :  { %11371 = vmatpush3.bf16.msra.mxu0 %v12108_v28  ;;  %v12128_v41 = vld [vmem:[%s17296_s12] sm:$0xff]  }
 0x6ed   :  { %v4099_v45 = vadd.f32 %v4098_v22, %v4084_v12  ;;  %11372 = vmatprep.subr.bf16.mxu0 %v12111_v63  ;;  %v12131_v12 = vld [vmem:[%s17296_s12 + $0x178] sm:$0xff]   ;;  %v12130_v22 = vld [vmem:[%s17296_s12 + $0x80] sm:$0xff]  }
 0x6ef   :  { %v4100_v60 = vadd.f32 %v4099_v45, %v4085_v35  ;;  %v12134_v35 = vld [vmem:[%s17296_s12 + $0x1f8] sm:$0xff]   ;;  %v4187_v45 = vld [vmem:[%s17294_s10 + $0x8] sm:$0xff] }
 0x6f0   :  { %11373 = vmatpush3.bf16.msra.mxu0 %v12112_v5 }
 0x6f1   :  { %4101 = vadd.xlane.f32.xlu0 %v4100_v60  ;;  %11374 = vmatprep.subr.bf16.mxu0 %v12115_v40  ;;  %v3412_v60 = vld [vmem:[%s17292_s8 + $0x18] sm:$0xff] }
 0x707   :  { %4192 = vperm.xlu0 %12082, %v4186_v48  }
 0x70b   :  { %3425 = vperm.xlu0 %12082, %v3411_v11  }
 0x719   :  { %v4051_v52 = vpop.xlane.xlu1 %4050 }
 0x71a   :  { %v4063_v15 = vmul.f32 0.001953125, %v4051_v52 }
 0x71c   :  { %v15262_v56 = vsub.f32 %v3922_v58, %v4063_v15  ;;  %v15264_v59 = vsub.f32 %v3924_v46, %v4063_v15  ;;  %v15272_v25 = vsub.f32 %v4028_v42, %v4063_v15  ;;  %v15290_v7 = vsub.f32 %v4030_v30, %v4063_v15  ;;  %v12116_v58 = vld [vmem:[%s17296_s12 + $0x18] sm:$0xff]   ;;  %v12122_v30 = vld [vmem:[%s17296_s12 + $0x90] sm:$0xff]  }
 0x71d   :  { %v12118_v42 = vld [vmem:[%s17296_s12 + $0x98] sm:$0xff]   ;;  %11375 = vmatpush3.bf16.msra.mxu0 %v12116_v58  ;;  %v17573_v58 = vlaneseq }
 0x71e   :  { %v4086_v16 = vmul.f32 %v15262_v56, %v15262_v56  ;;  %v4087_v62 = vmul.f32 %v15264_v59, %v15264_v59  ;;  %v4088_v17 = vmul.f32 %v15272_v25, %v15272_v25  ;;  %v4089_v27 = vmul.f32 %v15290_v7, %v15290_v7  ;;  %11376 = vmatprep.subr.bf16.mxu0 %v12119_v18  ;;  %v12449_v18 = vld [vmem:[%s17296_s12 + $0xa98] sm:$0xff]  }
 0x71f   :  { %11397 = vmatpush3.bf16.msra.mxu1 %v12118_v42  ;;  %vm15405_vm13 = vcmp.lt.s32.totalorder %v17573_v58, 256  ;;  %v12142_v58 = vld [vmem:[%s17296_s12 + $0x128] sm:$0xff]  }
 0x720   :  { %v4103_v39 = vadd.f32 %v4087_v62, %v4086_v16  ;;  %11398 = vmatprep.subr.bf16.mxu1 %v12121_v61  ;;  %v3982_v62 = vpop.f32.mrf.mxu1  ;;  %v12671_v61 = vmov 1983009808  }
 0x721   :  { %11377 = vmatpush3.bf16.msra.mxu0 %v12120_v3  ;;  %v4550_v3 = vunpack.c.l.s4 %v12671_v61  ;;  %v12144_v61 = vld [vmem:[%s17296_s12 + $0x1a8] sm:$0xff]  }
 0x722   :  { %v4104_v43 = vadd.f32 %v4103_v39, %v4088_v17  ;;  %11378 = vmatprep.subr.bf16.mxu0 %v12123_v26 }
 0x723   :  { %11399 = vmatpush3.bf16.msra.mxu1 %v12122_v30 }
 0x724   :  { %v4105_v46 = vadd.f32 %v4104_v43, %v4089_v27  ;;  %11400 = vmatprep.subr.bf16.mxu1 %v12125_v29 }
 0x725   :  { %11379 = vmatpush3.bf16.msra.mxu0 %v12124_v14 }
 0x726   :  { %11380 = vmatprep.subr.bf16.mxu0 %v12127_v47  ;;  %v4148_v47 = vld [vmem:[%s17293_s9 + $0x10] sm:$0xff] }
 0x727   :  { %11401 = vmatpush3.bf16.msra.mxu1 %v12126_v1 }
 0x728   :  { %11402 = vmatprep.subr.bf16.mxu1 %v12129_v53 }
 0x729   :  { %11381 = vmatpush3.bf16.msra.mxu0 %v12128_v41 }
 0x72a   :  { %4106 = vadd.xlane.f32.xlu0 %v4105_v46  ;;  %11410 = vmatprep.subr.bf16.mxu0 %v12131_v12 }
 0x72b   :  { %11403 = vmatpush3.bf16.msra.mxu1 %v12130_v22  ;;  %v4551_v22 = vunpack.c.0.s8 %v4550_v3  ;;  %v12147_v3 = vld [vmem:[%s17296_s12 + $0x1e0] sm:$0xff]  }
 0x72c   :  { %11432 = vmatprep.subr.bf16.mxu1 %v12134_v35 }
 0x740   :  { %4197 = vperm.xlu0 %12082, %v4187_v45  }
 0x744   :  { %3430 = vperm.xlu0 %12082, %v3412_v60  }
 0x77a   :  { %v4102_v48 = vpop.xlane.xlu0 %4101 }
 0x77b   :  { %v4118_v11 = vmul.f32 0.001953125, %v4102_v48 }
 0x77d   :  { %v4122_v52 = vadd.f32 1e-05, %v4118_v11 }
 0x77f   :  { %12631 = vrsqrt.f32 %v4122_v52 }
 0x782   :  { %v4193_v15 = vpop.permute.xlu0 %4192 }
 0x786   :  { %v3426_v50 = vpop.permute.xlu0 %3425 }
 0x787   :  { %v3875_v38 = vadd.f32 %v15214_v57, %v3426_v50  ;;  %v3877_v8 = vadd.f32 %v15216_v4, %v3426_v50  ;;  %v3981_v16 = vadd.f32 %v3980_v2, %v3426_v50  ;;  %v3983_v32 = vadd.f32 %v3982_v62, %v3426_v50 }
 0x789   :  { %v15383_v20 = vadd.f32 %v15210_v9, %v3875_v38  ;;  %v15386_v39 = vadd.f32 %v15212_v33, %v3877_v8  ;;  %v15390_v10 = vadd.f32 %v4033_v24, %v3981_v16  ;;  %v4035_v9 = vpop.f32.mrf.mxu0 }
 0x78a   :  { %v15396_v19 = vadd.f32 %v4035_v9, %v3983_v32 }
 0x78b   :  { %v4052_v23 = vadd.f32 %v15386_v39, %v15383_v20 }
 0x78c   :  { %v12632_v17 = vpop.eup %12631 }
 0x78d   :  { %v4130_v57 = vmul.f32 %v12632_v17, %v15232_v0  ;;  %v4131_v4 = vmul.f32 %v12632_v17, %v15234_v31  ;;  %v4132_v28 = vmul.f32 %v12632_v17, %v15236_v6  ;;  %v4133_v43 = vmul.f32 %v12632_v17, %v15238_v51 }
 0x78e   :  { %v4053_v33 = vadd.f32 %v4052_v23, %v15390_v10 }
 0x78f   :  { %v4170_v55 = vmul.f32 %v15254_v49, %v4130_v57  ;;  %v4171_v63 = vmul.f32 %v15254_v49, %v4131_v4  ;;  %v4172_v5 = vmul.f32 %v15254_v49, %v4132_v28  ;;  %v4173_v54 = vmul.f32 %v15254_v49, %v4133_v43  ;;  %v12132_v28 = vld [vmem:[%s17296_s12 + $0x138] sm:$0xff]  }
 0x790   :  { %v4054_v0 = vadd.f32 %v4053_v33, %v15396_v19 }
 0x791   :  { %v4210_v31 = vadd.f32 %v4193_v15, %v4170_v55  ;;  %v4211_v27 = vadd.f32 %v4193_v15, %v4171_v63  ;;  %v4212_v6 = vadd.f32 %v4193_v15, %v4172_v5  ;;  %v4213_v40 = vadd.f32 %v4193_v15, %v4173_v54  ;;  %v17576_v15 = vld [vmem:[#allocation10_spill] sm:$0xff]  ;;  %v12135_v63 = vld [vmem:[%s17296_s12 + $0x1b8] sm:$0xff]   ;;  %v12136_v5 = vld [vmem:[%s17296_s12 + $0x170] sm:$0xff]  }
 0x792   :  { %4055 = vadd.xlane.f32.xlu1 %v4054_v0  ;;  %v15445_v2 = vsub.s32 %v4551_v22, %v17576_v15  ;;  %v4037_v15 = vpop.f32.mrf.mxu0 }
 0x793   :  { %v4226_v51 = vmax.f32 %v4210_v31, 0.0  ;;  %v4227_v37 = vmax.f32 %v4211_v27, 0.0  ;;  %v4228_v46 = vmax.f32 %v4212_v6, 0.0  ;;  %v4229_v44 = vmax.f32 %v4213_v40, 0.0  ;;  %v12139_v31 = vld [vmem:[%s17296_s12 + $0x1f0] sm:$0xff]   ;;  %v12141_v40 = vld [vmem:[%s17296_s12 + $0x168] sm:$0xff]  }
 0x794   :  { %v12138_v27 = vld [vmem:[%s17296_s12 + $0x130] sm:$0xff]  }
 0x795   :  { %4242 = vst [vmem:[#allocation5] sm:$0xff] %v4226_v51  ;;  %4243 = vst [vmem:[#allocation5 + $0x8] sm:$0xff] %v4227_v37  ;;  %v12140_v51 = vld [vmem:[%s17296_s12 + $0x1b0] sm:$0xff]  }
 0x796   :  { %4244 = vst [vmem:[#allocation5 + $0x10] sm:$0xff] %v4228_v46  ;;  %4245 = vst [vmem:[#allocation5 + $0x18] sm:$0xff] %v4229_v44  ;;  %v12143_v44 = vld [vmem:[%s17296_s12 + $0x1e8] sm:$0xff]  }
 0x79c   :  { %v4258_v49 = vld [vmem:[#allocation5] ss:$8 sm:$0x3]  ;;  %v4265_v42 = vld [vmem:[#allocation5 + $0x1] ss:$8 sm:$0x3] }
 0x79d   :  { %v4269_v26 = vld [vmem:[#allocation5 + $0x2] ss:$8 sm:$0x3]  ;;  %v4273_v30 = vld [vmem:[#allocation5 + $0x3] ss:$8 sm:$0x3] }
 0x79e   :  { %4263 = vst.msk [vmem:[#allocation6] ss:$2 sm:$0x3] %vm15405_vm13, %v4258_v49  ;;  %4267 = vst.msk [vmem:[#allocation6 + $0x4] ss:$2 sm:$0x3] %vm15405_vm13, %v4265_v42 }
 0x79f   :  { %v4277_v29 = vld [vmem:[#allocation5 + $0x4] ss:$8 sm:$0x3]  ;;  %v4281_v14 = vld [vmem:[#allocation5 + $0x5] ss:$8 sm:$0x3] }
 0x7a0   :  { %4271 = vst.msk [vmem:[#allocation6 + $0x8] ss:$2 sm:$0x3] %vm15405_vm13, %v4269_v26  ;;  %4275 = vst.msk [vmem:[#allocation6 + $0xc] ss:$2 sm:$0x3] %vm15405_vm13, %v4273_v30 }
 0x7a1   :  { %v4285_v1 = vld [vmem:[#allocation5 + $0x6] ss:$8 sm:$0x3]  ;;  %v4289_v53 = vld [vmem:[#allocation5 + $0x7] ss:$8 sm:$0x3] }
 0x7a2   :  { %4279 = vst.msk [vmem:[#allocation6 + $0x10] ss:$2 sm:$0x3] %vm15405_vm13, %v4277_v29  ;;  %4283 = vst.msk [vmem:[#allocation6 + $0x14] ss:$2 sm:$0x3] %vm15405_vm13, %v4281_v14 }
 0x7a3   :  { %v4389_v41 = vld [vmem:[#allocation5 + $0x10] ss:$8 sm:$0x3]  ;;  %v4393_v12 = vld [vmem:[#allocation5 + $0x11] ss:$8 sm:$0x3]  ;;  %4162 = vperm.xlu1 %12083, %v4148_v47  }
 0x7a4   :  { %4287 = vst.msk [vmem:[#allocation6 + $0x18] ss:$2 sm:$0x3] %vm15405_vm13, %v4285_v1  ;;  %4291 = vst.msk [vmem:[#allocation6 + $0x1c] ss:$2 sm:$0x3] %vm15405_vm13, %v4289_v53  ;;  %v3984_v53 = vpop.f32.mrf.mxu1 }
 0x7a5   :  { %v4397_v35 = vld [vmem:[#allocation5 + $0x12] ss:$8 sm:$0x3]  ;;  %v4401_v45 = vld [vmem:[#allocation5 + $0x13] ss:$8 sm:$0x3] }
 0x7a6   :  { %4391 = vst.msk [vmem:[#allocation6 + $0x1] ss:$2 sm:$0x3] %vm15405_vm13, %v4389_v41  ;;  %4395 = vst.msk [vmem:[#allocation6 + $0x5] ss:$2 sm:$0x3] %vm15405_vm13, %v4393_v12 }
 0x7a7   :  { %v4405_v60 = vld [vmem:[#allocation5 + $0x14] ss:$8 sm:$0x3]  ;;  %v4409_v48 = vld [vmem:[#allocation5 + $0x15] ss:$8 sm:$0x3] }
 0x7a8   :  { %4399 = vst.msk [vmem:[#allocation6 + $0x9] ss:$2 sm:$0x3] %vm15405_vm13, %v4397_v35  ;;  %4403 = vst.msk [vmem:[#allocation6 + $0xd] ss:$2 sm:$0x3] %vm15405_vm13, %v4401_v45 }
 0x7a9   :  { %v4413_v11 = vld [vmem:[#allocation5 + $0x16] ss:$8 sm:$0x3]  ;;  %v4417_v52 = vld [vmem:[#allocation5 + $0x17] ss:$8 sm:$0x3] }
 0x7aa   :  { %4407 = vst.msk [vmem:[#allocation6 + $0x11] ss:$2 sm:$0x3] %vm15405_vm13, %v4405_v60  ;;  %4411 = vst.msk [vmem:[#allocation6 + $0x15] ss:$2 sm:$0x3] %vm15405_vm13, %v4409_v48 }
 0x7ab   :  { %4415 = vst.msk [vmem:[#allocation6 + $0x19] ss:$2 sm:$0x3] %vm15405_vm13, %v4413_v11  ;;  %4419 = vst.msk [vmem:[#allocation6 + $0x1d] ss:$2 sm:$0x3] %vm15405_vm13, %v4417_v52  ;;  %v3986_v52 = vpop.f32.mrf.mxu1 }
 0x7ac   :  { %v12145_v42 = vld [vmem:[%s17296_s12 + $0x160] sm:$0xff]   ;;  %v12149_v30 = vld [vmem:[%s17296_s12 + $0x158] sm:$0xff]   ;;  %v12153_v41 = vld [vmem:[%s17296_s12 + $0x150] sm:$0xff]  }
 0x7ad   :  { %v4516_v50 = vld [vmem:[#allocation6] sm:$0xff]  ;;  %v12151_v47 = vld [vmem:[%s17296_s12 + $0x1d8] sm:$0xff]   ;;  %v12155_v60 = vld [vmem:[%s17296_s12 + $0x1d0] sm:$0xff]  }
 0x7ae   :  { %v4555_v38 = vrot.slane %v4516_v50, %v15445_v2  ;;  %v4548_v8 = vcombine.high %v4516_v50, %v4516_v50  ;;  %v12146_v26 = vld [vmem:[%s17296_s12 + $0x120] sm:$0xff]   ;;  %v12150_v1 = vld [vmem:[%s17296_s12 + $0x118] sm:$0xff]   ;;  %v12154_v11 = vld [vmem:[%s17296_s12 + $0x110] sm:$0xff]  }
 0x7af   :  { %v4517_v16 = vld [vmem:[#allocation6 + $0x8] sm:$0xff]  ;;  %v12148_v29 = vld [vmem:[%s17296_s12 + $0x1a0] sm:$0xff]   ;;  %v12152_v12 = vld [vmem:[%s17296_s12 + $0x198] sm:$0xff]  }
 0x7b0   :  { %v15449_v62 = vrot.slane %v4517_v16, %v15445_v2  ;;  %v4565_v24 = vcombine.high %v4517_v16, %v4517_v16  ;;  %v4563_v32 = vcombine.high %v4555_v38, %v4555_v38  ;;  %v4562_v23 = vrot.slane %v4548_v8, %v15445_v2  ;;  %v12156_v16 = vld [vmem:[%s17296_s12 + $0x190] sm:$0xff]  }
 0x7b1   :  { %v4884_v9 = vpack.c.bf16 %v4555_v38, %v4555_v38  ;;  %v4518_v38 = vld [vmem:[#allocation6 + $0x10] sm:$0xff] }
 0x7b2   :  { %v4580_v17 = vcombine.high %v15449_v62, %v15449_v62  ;;  %v15455_v57 = vrot.slane %v4565_v24, %v15445_v2  ;;  %v4885_v4 = vpack.c.bf16 %v4563_v32, %v4563_v32  ;;  %v4564_v43 = vcombine.high %v4562_v23, %v4562_v23 }
 0x7b3   :  { %v4886_v54 = vpack.c.bf16 %v4562_v23, %v4562_v23  ;;  %v4107_v37 = vpop.xlane.xlu0 %4106  ;;  %v12158_v23 = vld [vmem:[%s17296_s12 + $0x108] sm:$0xff]  }
 0x7b4   :  { %v4581_v33 = vcombine.high %v15455_v57, %v15455_v57  ;;  %9083 = vmatprep.mubr.bf16.mxu0 %v4885_v4  ;;  %v4887_v55 = vpack.c.bf16 %v4564_v43, %v4564_v43  ;;  %v4889_v0 = vpack.c.bf16 %v4580_v17, %v4580_v17  ;;  %v4119_v46 = vmul.f32 0.001953125, %v4107_v37  ;;  %v4039_v4 = vpop.f32.mrf.mxu0 }
 0x7b5   :  { %9084 = vmatmul.mubr.bf16.vlgmr.msra.gmra.mxu0 %v4884_v9  ;;  %v4582_v17 = vcombine.high %v4518_v38, %v4518_v38 }
 0x7b6   :  { %11411 = vmatpush3.bf16.msra.mxu0 %v12132_v28  ;;  %9123 = vmatprep.mubr.bf16.mxu1 %v4887_v55  ;;  %v4891_v6 = vpack.c.bf16 %v4581_v33, %v4581_v33  ;;  %v4123_v49 = vadd.f32 1e-05, %v4119_v46  ;;  %v12161_v55 = vld [vmem:[%s17296_s12 + $0x140] sm:$0xff]  }
 0x7b7   :  { %9163 = vmatprep.mubr.bf16.mxu0 %v4889_v0  ;;  %9124 = vmatmul.mubr.bf16.vlgmr.msra.gmra.mxu1 %v4886_v54 }
 0x7b8   :  { %11433 = vmatpush3.bf16.msra.mxu1 %v12135_v63  ;;  %11412 = vmatprep.subr.bf16.mxu0 %v12136_v5  ;;  %12633 = vrsqrt.f32 %v4123_v49  ;;  %v4158_v63 = vpop.permute.xlu1 %4157  ;;  %v12160_v5 = vld [vmem:[%s17296_s12 + $0x188] sm:$0xff]   ;;  %v12165_v49 = vld [vmem:[%s17296_s12 + $0x278] sm:$0xff]  }
 0x7b9   :  { %9203 = vmatprep.mubr.bf16.mxu1 %v4891_v6  ;;  %11434 = vmatprep.subr.bf16.mxu1 %v12139_v31  ;;  %v12162_v6 = vld [vmem:[%s17296_s12 + $0x100] sm:$0xff]  }
 0x7ba   :  { %11413 = vmatpush3.bf16.msra.mxu0 %v12138_v27  ;;  %v12163_v27 = vld [vmem:[%s17296_s12 + $0x1c0] sm:$0xff]  }
 0x7bb   :  { %11414 = vmatprep.subr.bf16.mxu0 %v12141_v40  ;;  %v4198_v14 = vpop.permute.xlu0 %4197 }
 0x7bc   :  { %11435 = vmatpush3.bf16.msra.mxu1 %v12140_v51  ;;  %v15570_v51 = vrot.slane %v4582_v17, %v15445_v2  ;;  %v12179_v17 = vld [vmem:[%s17296_s12 + $0x220] sm:$0xff]  }
 0x7bd   :  { %11436 = vmatprep.subr.bf16.mxu1 %v12143_v44 }
 0x7be   :  { %11415 = vmatpush3.bf16.msra.mxu0 %v12142_v58 }
 0x7bf   :  { %11416 = vmatprep.subr.bf16.mxu0 %v12145_v42  ;;  %v3431_v22 = vpop.permute.xlu0 %3430  ;;  %v12164_v42 = vld [vmem:[%s17296_s12 + $0x180] sm:$0xff]  }
 0x7c0   :  { %11437 = vmatpush3.bf16.msra.mxu1 %v12144_v61  ;;  %v3879_v35 = vadd.f32 %v15220_v36, %v3431_v22  ;;  %v3881_v45 = vadd.f32 %v15224_v21, %v3431_v22  ;;  %v3985_v48 = vadd.f32 %v3984_v53, %v3431_v22  ;;  %v12157_v21 = vld [vmem:[%s17296_s12 + $0x148] sm:$0xff]   ;;  %v3987_v8 = vadd.f32 %v3986_v52, %v3431_v22  ;;  %v12168_v22 = vld [vmem:[%s17296_s12 + $0x2b8] sm:$0xff]  }
 0x7c1   :  { %11438 = vmatprep.subr.bf16.mxu1 %v12147_v3  ;;  %v4888_v53 = vpack.c.bf16 %v15449_v62, %v15449_v62  ;;  %v12172_v62 = vld [vmem:[%s17296_s12 + $0x2f0] sm:$0xff]   ;;  %v12176_v52 = vld [vmem:[%s17296_s12 + $0x2e8] sm:$0xff]  }
 0x7c2   :  { %11417 = vmatpush3.bf16.msra.mxu0 %v12146_v26  ;;  %v15525_v50 = vadd.f32 %v15218_v34, %v3879_v35  ;;  %v15528_v36 = vadd.f32 %v15222_v13, %v3881_v45  ;;  %v12159_v34 = vld [vmem:[%s17296_s12 + $0x1c8] sm:$0xff]   ;;  %v15541_v32 = vadd.f32 %v4037_v15, %v3985_v48  ;;  %v15556_v54 = vadd.f32 %v4039_v4, %v3987_v8  ;;  %v12178_v15 = vld [vmem:[%s17296_s12 + $0x260] sm:$0xff]   ;;  %v4149_v4 = vld [vmem:[%s17293_s9 + $0x18] sm:$0xff] }
 0x7c3   :  { %11418 = vmatprep.subr.bf16.mxu0 %v12149_v30  ;;  %v4890_v35 = vpack.c.bf16 %v15455_v57, %v15455_v57  ;;  %v12174_v48 = vld [vmem:[%s17296_s12 + $0x268] sm:$0xff]   ;;  %v12173_v57 = vld [vmem:[%s17296_s12 + $0x2b0] sm:$0xff]  }
 0x7c4   :  { %11439 = vmatpush3.bf16.msra.mxu1 %v12148_v29  ;;  %v4057_v13 = vadd.f32 %v15528_v36, %v15525_v50  ;;  %v12177_v8 = vld [vmem:[%s17296_s12 + $0x2a8] sm:$0xff]  }
 0x7c5   :  { %11440 = vmatprep.subr.bf16.mxu1 %v12151_v47  ;;  %v12634_v24 = vpop.eup %12633  ;;  %v12166_v47 = vld [vmem:[%s17296_s12 + $0x238] sm:$0xff]  }
 0x7c6   :  { %11419 = vmatpush3.bf16.msra.mxu0 %v12150_v1  ;;  %v4134_v28 = vmul.f32 %v12634_v24, %v15262_v56  ;;  %v4135_v43 = vmul.f32 %v12634_v24, %v15264_v59  ;;  %v4136_v9 = vmul.f32 %v12634_v24, %v15272_v25  ;;  %v4137_v33 = vmul.f32 %v12634_v24, %v15290_v7 }
 0x7c7   :  { %11420 = vmatprep.subr.bf16.mxu0 %v12153_v41  ;;  %v4058_v56 = vadd.f32 %v4057_v13, %v15541_v32  ;;  %v15560_v59 = vrot.slane %v4518_v38, %v15445_v2  ;;  %v4598_v1 = vcombine.high %v15570_v51, %v15570_v51  ;;  %v12170_v41 = vld [vmem:[%s17296_s12 + $0x270] sm:$0xff]   ;;  %v12180_v13 = vld [vmem:[%s17296_s12 + $0x2e0] sm:$0xff]  }
 0x7c8   :  { %11441 = vmatpush3.bf16.msra.mxu1 %v12152_v12  ;;  %v4174_v25 = vmul.f32 %v4158_v63, %v4134_v28  ;;  %v4175_v7 = vmul.f32 %v4158_v63, %v4135_v43  ;;  %v4176_v0 = vmul.f32 %v4158_v63, %v4136_v9  ;;  %v4177_v31 = vmul.f32 %v4158_v63, %v4137_v33  ;;  %v12182_v9 = vld [vmem:[%s17296_s12 + $0x258] sm:$0xff]   ;;  %v12181_v63 = vld [vmem:[%s17296_s12 + $0x2a0] sm:$0xff]  }
 0x7c9   :  { %11442 = vmatprep.subr.bf16.mxu1 %v12155_v60  ;;  %v4059_v40 = vadd.f32 %v4058_v56, %v15556_v54  ;;  %v4597_v61 = vcombine.high %v15560_v59, %v15560_v59  ;;  %v4895_v45 = vpack.c.bf16 %v4598_v1, %v4598_v1  ;;  %v12171_v60 = vld [vmem:[%s17296_s12 + $0x230] sm:$0xff]   ;;  %v12195_v1 = vld [vmem:[%s17296_s12 + $0x200] sm:$0xff]  }
 0x7ca   :  { %11421 = vmatpush3.bf16.msra.mxu0 %v12154_v11  ;;  %v4214_v37 = vadd.f32 %v4198_v14, %v4174_v25  ;;  %v4215_v46 = vadd.f32 %v4198_v14, %v4175_v7  ;;  %v4216_v44 = vadd.f32 %v4198_v14, %v4176_v0  ;;  %v4217_v58 = vadd.f32 %v4198_v14, %v4177_v31  ;;  %v12167_v14 = vld [vmem:[%s17296_s12 + $0x2f8] sm:$0xff]   ;;  %v12175_v11 = vld [vmem:[%s17296_s12 + $0x228] sm:$0xff]  }
 0x7cb   :  { %11422 = vmatprep.subr.bf16.mxu0 %v12157_v21  ;;  %4060 = vadd.xlane.f32.xlu1 %v4059_v40  ;;  %v4893_v12 = vpack.c.bf16 %v4597_v61, %v4597_v61  ;;  %v12184_v25 = vld [vmem:[%s17296_s12 + $0x2d8] sm:$0xff]   ;;  %v12186_v40 = vld [vmem:[%s17296_s12 + $0x250] sm:$0xff]   ;;  %v12192_v61 = vld [vmem:[%s17296_s12 + $0x2c8] sm:$0xff]  }
 0x7cc   :  { %11443 = vmatpush3.bf16.msra.mxu1 %v12156_v16  ;;  %v4230_v3 = vmax.f32 %v4214_v37, 0.0  ;;  %v4231_v26 = vmax.f32 %v4215_v46, 0.0  ;;  %v4232_v30 = vmax.f32 %v4216_v44, 0.0  ;;  %v4233_v29 = vmax.f32 %v4217_v58, 0.0  ;;  %v12185_v37 = vld [vmem:[%s17296_s12 + $0x298] sm:$0xff]   ;;  %v12188_v46 = vld [vmem:[%s17296_s12 + $0x2d0] sm:$0xff]  }
 0x7cd   :  { %11444 = vmatprep.subr.bf16.mxu1 %v12159_v34  ;;  %v12187_v44 = vld [vmem:[%s17296_s12 + $0x210] sm:$0xff]   ;;  %v12190_v58 = vld [vmem:[%s17296_s12 + $0x248] sm:$0xff]  }
 0x7ce   :  { %11423 = vmatpush3.bf16.msra.mxu0 %v12158_v23  ;;  %4246 = vst [vmem:[#allocation5 + $0x20] sm:$0xff] %v4230_v3  ;;  %4247 = vst [vmem:[#allocation5 + $0x28] sm:$0xff] %v4231_v26  ;;  %v12191_v3 = vld [vmem:[%s17296_s12 + $0x208] sm:$0xff]  }
 0x7cf   :  { %11424 = vmatprep.subr.bf16.mxu0 %v12161_v55  ;;  %4248 = vst [vmem:[#allocation5 + $0x30] sm:$0xff] %v4232_v30  ;;  %4249 = vst [vmem:[#allocation5 + $0x38] sm:$0xff] %v4233_v29  ;;  %v12194_v30 = vld [vmem:[%s17296_s12 + $0x240] sm:$0xff]   ;;  %v12193_v29 = vld [vmem:[%s17296_s12 + $0x288] sm:$0xff]  }
 0x7d0   :  { %11445 = vmatpush3.bf16.msra.mxu1 %v12160_v5 }
 0x7d1   :  { %11446 = vmatprep.subr.bf16.mxu1 %v12163_v27 }
 0x7d2   :  { %11425 = vmatpush3.bf16.msra.mxu0 %v12162_v6  ;;  %v12183_v6 = vld [vmem:[%s17296_s12 + $0x218] sm:$0xff]  }
 0x7d3   :  { %11454 = vmatprep.subr.bf16.mxu0 %v12165_v49  ;;  %v4519_v49 = vld [vmem:[#allocation6 + $0x18] sm:$0xff] }
 0x7d4   :  { %11447 = vmatpush3.bf16.msra.mxu1 %v12164_v42  ;;  %v12189_v42 = vld [vmem:[%s17296_s12 + $0x290] sm:$0xff]   ;;  %v4599_v26 = vcombine.high %v4519_v49, %v4519_v49 }
 0x7d5   :  { %9164 = vmatmul.mubr.bf16.vlgmr.msra.gmra.mxu0 %v4888_v53  ;;  %11476 = vmatprep.subr.bf16.mxu1 %v12167_v14  ;;  %v4293_v21 = vld [vmem:[#allocation5 + $0x20] ss:$8 sm:$0x3]  ;;  %v4297_v38 = vld [vmem:[#allocation5 + $0x21] ss:$8 sm:$0x3]  ;;  %v15706_v14 = vrot.slane %v4519_v49, %v15445_v2 }
 0x7d6   :  { %11455 = vmatpush3.bf16.msra.mxu0 %v12166_v47  ;;  %9243 = vmatprep.mubr.bf16.mxu0 %v4893_v12  ;;  %v4301_v16 = vld [vmem:[#allocation5 + $0x22] ss:$8 sm:$0x3]  ;;  %v4305_v34 = vld [vmem:[#allocation5 + $0x23] ss:$8 sm:$0x3]  ;;  %v15715_v53 = vrot.slane %v4599_v26, %v15445_v2 }
 0x7d7   :  { %9204 = vmatmul.mubr.bf16.vlgmr.msra.gmra.mxu1 %v4890_v35  ;;  %11456 = vmatprep.subr.bf16.mxu0 %v12170_v41  ;;  %4295 = vst.msk [vmem:[#allocation6 + $0x20] ss:$2 sm:$0x3] %vm15405_vm13, %v4293_v21  ;;  %4299 = vst.msk [vmem:[#allocation6 + $0x24] ss:$2 sm:$0x3] %vm15405_vm13, %v4297_v38 }
 0x7d8   :  { %11477 = vmatpush3.bf16.msra.mxu1 %v12168_v22  ;;  %9283 = vmatprep.mubr.bf16.mxu1 %v4895_v45  ;;  %v4309_v24 = vld [vmem:[#allocation5 + $0x24] ss:$8 sm:$0x3]  ;;  %v4313_v23 = vld [vmem:[#allocation5 + $0x25] ss:$8 sm:$0x3]  ;;  %v4614_v22 = vcombine.high %v15706_v14, %v15706_v14  ;;  %v4615_v45 = vcombine.high %v15715_v53, %v15715_v53 }
 0x7d9   :  { %11478 = vmatprep.subr.bf16.mxu1 %v12172_v62  ;;  %4303 = vst.msk [vmem:[#allocation6 + $0x28] ss:$2 sm:$0x3] %vm15405_vm13, %v4301_v16  ;;  %4307 = vst.msk [vmem:[#allocation6 + $0x2c] ss:$2 sm:$0x3] %vm15405_vm13, %v4305_v34 }
 0x7da   :  { %11457 = vmatpush3.bf16.msra.mxu0 %v12171_v60  ;;  %v4317_v28 = vld [vmem:[#allocation5 + $0x26] ss:$8 sm:$0x3]  ;;  %v4321_v43 = vld [vmem:[#allocation5 + $0x27] ss:$8 sm:$0x3]  ;;  %v4892_v60 = vpack.c.bf16 %v15560_v59, %v15560_v59 }
 0x7db   :  { %11458 = vmatprep.subr.bf16.mxu0 %v12174_v48  ;;  %4311 = vst.msk [vmem:[#allocation6 + $0x30] ss:$2 sm:$0x3] %vm15405_vm13, %v4309_v24  ;;  %4315 = vst.msk [vmem:[#allocation6 + $0x34] ss:$2 sm:$0x3] %vm15405_vm13, %v4313_v23 }
 0x7dc   :  { %11479 = vmatpush3.bf16.msra.mxu1 %v12173_v57  ;;  %v4421_v33 = vld [vmem:[#allocation5 + $0x30] ss:$8 sm:$0x3]  ;;  %v4425_v55 = vld [vmem:[#allocation5 + $0x31] ss:$8 sm:$0x3]  ;;  %4167 = vperm.xlu1 %12083, %v4149_v4   ;;  %v4897_v57 = vpack.c.bf16 %v4614_v22, %v4614_v22 }
 0x7dd   :  { %11480 = vmatprep.subr.bf16.mxu1 %v12176_v52  ;;  %4319 = vst.msk [vmem:[#allocation6 + $0x38] ss:$2 sm:$0x3] %vm15405_vm13, %v4317_v28  ;;  %4323 = vst.msk [vmem:[#allocation6 + $0x3c] ss:$2 sm:$0x3] %vm15405_vm13, %v4321_v43  ;;  %v4894_v52 = vpack.c.bf16 %v15570_v51, %v15570_v51 }
 0x7de   :  { %11459 = vmatpush3.bf16.msra.mxu0 %v12175_v11  ;;  %v4429_v5 = vld [vmem:[#allocation5 + $0x32] ss:$8 sm:$0x3]  ;;  %v4433_v56 = vld [vmem:[#allocation5 + $0x33] ss:$8 sm:$0x3] }
 0x7df   :  { %4423 = vst.msk [vmem:[#allocation6 + $0x21] ss:$2 sm:$0x3] %vm15405_vm13, %v4421_v33  ;;  %4427 = vst.msk [vmem:[#allocation6 + $0x25] ss:$2 sm:$0x3] %vm15405_vm13, %v4425_v55  ;;  %11460 = vmatprep.subr.bf16.mxu0 %v12178_v15  ;;  %v4899_v15 = vpack.c.bf16 %v4615_v45, %v4615_v45 }
 0x7e0   :  { %v4437_v7 = vld [vmem:[#allocation5 + $0x34] ss:$8 sm:$0x3]  ;;  %v4441_v0 = vld [vmem:[#allocation5 + $0x35] ss:$8 sm:$0x3]  ;;  %11481 = vmatpush3.bf16.msra.mxu1 %v12177_v8 }
 0x7e1   :  { %4431 = vst.msk [vmem:[#allocation6 + $0x29] ss:$2 sm:$0x3] %vm15405_vm13, %v4429_v5  ;;  %4435 = vst.msk [vmem:[#allocation6 + $0x2d] ss:$2 sm:$0x3] %vm15405_vm13, %v4433_v56  ;;  %11482 = vmatprep.subr.bf16.mxu1 %v12180_v13 }
 0x7e2   :  { %v4445_v31 = vld [vmem:[#allocation5 + $0x36] ss:$8 sm:$0x3]  ;;  %v4449_v27 = vld [vmem:[#allocation5 + $0x37] ss:$8 sm:$0x3]  ;;  %11461 = vmatpush3.bf16.msra.mxu0 %v12179_v17 }
 0x7e3   :  { %4439 = vst.msk [vmem:[#allocation6 + $0x31] ss:$2 sm:$0x3] %vm15405_vm13, %v4437_v7  ;;  %4443 = vst.msk [vmem:[#allocation6 + $0x35] ss:$2 sm:$0x3] %vm15405_vm13, %v4441_v0  ;;  %11462 = vmatprep.subr.bf16.mxu0 %v12182_v9 }
 0x7e4   :  { %4447 = vst.msk [vmem:[#allocation6 + $0x39] ss:$2 sm:$0x3] %vm15405_vm13, %v4445_v31  ;;  %4451 = vst.msk [vmem:[#allocation6 + $0x3d] ss:$2 sm:$0x3] %vm15405_vm13, %v4449_v27  ;;  %11483 = vmatpush3.bf16.msra.mxu1 %v12181_v63 }
 0x7e5   :  { %11484 = vmatprep.subr.bf16.mxu1 %v12184_v25  ;;  %v12196_v47 = vld [vmem:[%s17296_s12 + $0x2c0] sm:$0xff]   ;;  %v12198_v41 = vld [vmem:[%s17296_s12 + $0x378] sm:$0xff]   ;;  %v12203_v48 = vld [vmem:[%s17296_s12 + $0x370] sm:$0xff]  }
 0x7e6   :  { %11463 = vmatpush3.bf16.msra.mxu0 %v12183_v6  ;;  %v12197_v12 = vld [vmem:[%s17296_s12 + $0x280] sm:$0xff]   ;;  %v12200_v35 = vld [vmem:[%s17296_s12 + $0x3f8] sm:$0xff]   ;;  %v12205_v59 = vld [vmem:[%s17296_s12 + $0x3f0] sm:$0xff]  }
 0x7e7   :  { %11464 = vmatprep.subr.bf16.mxu0 %v12186_v40  ;;  %v12199_v62 = vld [vmem:[%s17296_s12 + $0x338] sm:$0xff]   ;;  %v12204_v21 = vld [vmem:[%s17296_s12 + $0x330] sm:$0xff]   ;;  %v12207_v38 = vld [vmem:[%s17296_s12 + $0x368] sm:$0xff]  }
 0x7e8   :  { %11485 = vmatpush3.bf16.msra.mxu1 %v12185_v37  ;;  %v12201_v11 = vld [vmem:[%s17296_s12 + $0x3b8] sm:$0xff]   ;;  %v12206_v51 = vld [vmem:[%s17296_s12 + $0x3b0] sm:$0xff]   ;;  %v12209_v8 = vld [vmem:[%s17296_s12 + $0x3e8] sm:$0xff]  }
 0x7e9   :  { %11486 = vmatprep.subr.bf16.mxu1 %v12188_v46  ;;  %v12208_v16 = vld [vmem:[%s17296_s12 + $0x328] sm:$0xff]   ;;  %v12211_v34 = vld [vmem:[%s17296_s12 + $0x360] sm:$0xff]   ;;  %v12215_v17 = vld [vmem:[%s17296_s12 + $0x358] sm:$0xff]  }
 0x7ea   :  { %11465 = vmatpush3.bf16.msra.mxu0 %v12187_v44  ;;  %v12210_v13 = vld [vmem:[%s17296_s12 + $0x3a8] sm:$0xff]   ;;  %v12213_v24 = vld [vmem:[%s17296_s12 + $0x3e0] sm:$0xff]   ;;  %v12217_v28 = vld [vmem:[%s17296_s12 + $0x3d8] sm:$0xff]  }
 0x7eb   :  { %11466 = vmatprep.subr.bf16.mxu0 %v12190_v58  ;;  %v12212_v23 = vld [vmem:[%s17296_s12 + $0x320] sm:$0xff]   ;;  %v12216_v43 = vld [vmem:[%s17296_s12 + $0x318] sm:$0xff]   ;;  %v12219_v9 = vld [vmem:[%s17296_s12 + $0x350] sm:$0xff]  }
 0x7ec   :  { %11487 = vmatpush3.bf16.msra.mxu1 %v12189_v42  ;;  %v12214_v4 = vld [vmem:[%s17296_s12 + $0x3a0] sm:$0xff]   ;;  %v12218_v33 = vld [vmem:[%s17296_s12 + $0x398] sm:$0xff]   ;;  %v12221_v55 = vld [vmem:[%s17296_s12 + $0x3d0] sm:$0xff]  }
 0x7ed   :  { %11488 = vmatprep.subr.bf16.mxu1 %v12192_v61  ;;  %v12220_v63 = vld [vmem:[%s17296_s12 + $0x310] sm:$0xff]   ;;  %v12223_v5 = vld [vmem:[%s17296_s12 + $0x348] sm:$0xff]   ;;  %v4520_v56 = vld [vmem:[#allocation6 + $0x20] sm:$0xff] }
 0x7ee   :  { %11467 = vmatpush3.bf16.msra.mxu0 %v12191_v3  ;;  %v12222_v25 = vld [vmem:[%s17296_s12 + $0x390] sm:$0xff]   ;;  %v12225_v7 = vld [vmem:[%s17296_s12 + $0x3c8] sm:$0xff]   ;;  %v4616_v31 = vcombine.high %v4520_v56, %v4520_v56  ;;  %v12227_v27 = vld [vmem:[%s17296_s12 + $0x340] sm:$0xff]   ;;  %v15816_v40 = vrot.slane %v4520_v56, %v15445_v2 }
 0x7ef   :  { %11468 = vmatprep.subr.bf16.mxu0 %v12194_v30  ;;  %v12224_v0 = vld [vmem:[%s17296_s12 + $0x308] sm:$0xff]   ;;  %v12229_v37 = vld [vmem:[%s17296_s12 + $0x3c0] sm:$0xff]   ;;  %v12231_v58 = vld [vmem:[%s17296_s12 + $0x478] sm:$0xff]   ;;  %v4896_v30 = vpack.c.bf16 %v15706_v14, %v15706_v14 }
 0x7f0   :  { %11489 = vmatpush3.bf16.msra.mxu1 %v12193_v29  ;;  %v12226_v6 = vld [vmem:[%s17296_s12 + $0x388] sm:$0xff]   ;;  %v12228_v46 = vld [vmem:[%s17296_s12 + $0x300] sm:$0xff]   ;;  %v15825_v44 = vrot.slane %v4616_v31, %v15445_v2  ;;  %v4631_v42 = vcombine.high %v15816_v40, %v15816_v40  ;;  %v12233_v61 = vld [vmem:[%s17296_s12 + $0x4f8] sm:$0xff]  }
 0x7f1   :  { %11490 = vmatprep.subr.bf16.mxu1 %v12196_v47  ;;  %v12230_v49 = vld [vmem:[%s17296_s12 + $0x380] sm:$0xff]   ;;  %v12232_v3 = vld [vmem:[%s17296_s12 + $0x438] sm:$0xff]   ;;  %v12236_v29 = vld [vmem:[%s17296_s12 + $0x470] sm:$0xff]  }
 0x7f2   :  { %11469 = vmatpush3.bf16.msra.mxu0 %v12195_v1  ;;  %v4632_v26 = vcombine.high %v15825_v44, %v15825_v44  ;;  %v4901_v47 = vpack.c.bf16 %v4631_v42, %v4631_v42  ;;  %v12234_v1 = vld [vmem:[%s17296_s12 + $0x4b8] sm:$0xff]   ;;  %v12238_v14 = vld [vmem:[%s17296_s12 + $0x4f0] sm:$0xff]   ;;  %v12241_v45 = vld [vmem:[%s17296_s12 + $0x428] sm:$0xff]  }
 0x7f3   :  { %11498 = vmatprep.subr.bf16.mxu0 %v12198_v41  ;;  %v4898_v41 = vpack.c.bf16 %v15715_v53, %v15715_v53  ;;  %v12237_v22 = vld [vmem:[%s17296_s12 + $0x430] sm:$0xff]   ;;  %v12266_v42 = vld [vmem:[%s17296_s12 + $0x5f8] sm:$0xff]  }
 0x7f4   :  { %11491 = vmatpush3.bf16.msra.mxu1 %v12197_v12  ;;  %v4903_v12 = vpack.c.bf16 %v4632_v26, %v4632_v26  ;;  %v12239_v53 = vld [vmem:[%s17296_s12 + $0x4b0] sm:$0xff]   ;;  %v4900_v26 = vpack.c.bf16 %v15816_v40, %v15816_v40 }
 0x7f5   :  { %9244 = vmatmul.mubr.bf16.vlgmr.msra.gmra.mxu0 %v4892_v60  ;;  %11520 = vmatprep.subr.bf16.mxu1 %v12200_v35  ;;  %v12240_v35 = vld [vmem:[%s17296_s12 + $0x468] sm:$0xff]   ;;  %v12244_v60 = vld [vmem:[%s17296_s12 + $0x460] sm:$0xff]   ;;  %v12271_v40 = vld [vmem:[%s17296_s12 + $0x5f0] sm:$0xff]  }
 0x7f6   :  { %11499 = vmatpush3.bf16.msra.mxu0 %v12199_v62  ;;  %9323 = vmatprep.mubr.bf16.mxu0 %v4897_v57  ;;  %v12242_v62 = vld [vmem:[%s17296_s12 + $0x4e8] sm:$0xff]   ;;  %v12246_v57 = vld [vmem:[%s17296_s12 + $0x4e0] sm:$0xff]  }
 0x7f7   :  { %9284 = vmatmul.mubr.bf16.vlgmr.msra.gmra.mxu1 %v4894_v52  ;;  %11500 = vmatprep.subr.bf16.mxu0 %v12203_v48  ;;  %v12243_v48 = vld [vmem:[%s17296_s12 + $0x4a8] sm:$0xff]   ;;  %v12248_v52 = vld [vmem:[%s17296_s12 + $0x458] sm:$0xff]  }
 0x7f8   :  { %11521 = vmatpush3.bf16.msra.mxu1 %v12201_v11  ;;  %9363 = vmatprep.mubr.bf16.mxu1 %v4899_v15  ;;  %v12245_v11 = vld [vmem:[%s17296_s12 + $0x420] sm:$0xff]  }
 0x7f9   :  { %11522 = vmatprep.subr.bf16.mxu1 %v12205_v59  ;;  %v12247_v59 = vld [vmem:[%s17296_s12 + $0x4a0] sm:$0xff]  }
 0x7fa   :  { %11501 = vmatpush3.bf16.msra.mxu0 %v12204_v21 }
 0x7fb   :  { %11502 = vmatprep.subr.bf16.mxu0 %v12207_v38  ;;  %v12250_v38 = vld [vmem:[%s17296_s12 + $0x4d8] sm:$0xff]  }
 0x7fc   :  { %11523 = vmatpush3.bf16.msra.mxu1 %v12206_v51  ;;  %v12249_v51 = vld [vmem:[%s17296_s12 + $0x418] sm:$0xff]  }
 0x7fd   :  { %11524 = vmatprep.subr.bf16.mxu1 %v12209_v8 }
 0x7fe   :  { %11503 = vmatpush3.bf16.msra.mxu0 %v12208_v16 }
 0x7ff   :  { %11504 = vmatprep.subr.bf16.mxu0 %v12211_v34 }
 0x800   :  { %11525 = vmatpush3.bf16.msra.mxu1 %v12210_v13  ;;  %v12252_v13 = vld [vmem:[%s17296_s12 + $0x450] sm:$0xff]  }
 0x801   :  { %11526 = vmatprep.subr.bf16.mxu1 %v12213_v24  ;;  %v12251_v24 = vld [vmem:[%s17296_s12 + $0x498] sm:$0xff]  }
 0x802   :  { %11505 = vmatpush3.bf16.msra.mxu0 %v12212_v23 }
 0x803   :  { %11506 = vmatprep.subr.bf16.mxu0 %v12215_v17  ;;  %v12253_v17 = vld [vmem:[%s17296_s12 + $0x410] sm:$0xff]  }
 0x804   :  { %11527 = vmatpush3.bf16.msra.mxu1 %v12214_v4  ;;  %v12256_v4 = vld [vmem:[%s17296_s12 + $0x448] sm:$0xff]  }
 0x805   :  { %11528 = vmatprep.subr.bf16.mxu1 %v12217_v28 }
 0x806   :  { %11507 = vmatpush3.bf16.msra.mxu0 %v12216_v43  ;;  %v4521_v43 = vld [vmem:[#allocation6 + $0x28] sm:$0xff] }
 0x807   :  { %11508 = vmatprep.subr.bf16.mxu0 %v12219_v9  ;;  %v12255_v9 = vld [vmem:[%s17296_s12 + $0x490] sm:$0xff]   ;;  %v4633_v56 = vcombine.high %v4521_v43, %v4521_v43  ;;  %v15946_v31 = vrot.slane %v4521_v43, %v15445_v2  ;;  %v12295_v43 = vld [vmem:[%s17296_s12 + $0x5c0] sm:$0xff]  }
 0x808   :  { %11529 = vmatpush3.bf16.msra.mxu1 %v12218_v33  ;;  %v12258_v33 = vld [vmem:[%s17296_s12 + $0x4c8] sm:$0xff]  }
 0x809   :  { %11530 = vmatprep.subr.bf16.mxu1 %v12221_v55 }
 0x80a   :  { %11509 = vmatpush3.bf16.msra.mxu0 %v12220_v63 }
 0x80b   :  { %11510 = vmatprep.subr.bf16.mxu0 %v12223_v5  ;;  %v12257_v5 = vld [vmem:[%s17296_s12 + $0x408] sm:$0xff]  }
 0x80c   :  { %11531 = vmatpush3.bf16.msra.mxu1 %v12222_v25  ;;  %v12260_v25 = vld [vmem:[%s17296_s12 + $0x440] sm:$0xff]  }
 0x80d   :  { %11532 = vmatprep.subr.bf16.mxu1 %v12225_v7 }
 0x80e   :  { %11511 = vmatpush3.bf16.msra.mxu0 %v12224_v0  ;;  %v12259_v0 = vld [vmem:[%s17296_s12 + $0x488] sm:$0xff]  }
 0x80f   :  { %11512 = vmatprep.subr.bf16.mxu0 %v12227_v27  ;;  %v12262_v27 = vld [vmem:[%s17296_s12 + $0x4c0] sm:$0xff]  }
 0x810   :  { %11533 = vmatpush3.bf16.msra.mxu1 %v12226_v6  ;;  %v12261_v6 = vld [vmem:[%s17296_s12 + $0x400] sm:$0xff]  }
 0x811   :  { %11534 = vmatprep.subr.bf16.mxu1 %v12229_v37  ;;  %v15955_v37 = vrot.slane %v4633_v56, %v15445_v2  ;;  %v12299_v56 = vld [vmem:[%s17296_s12 + $0x6f8] sm:$0xff]  }
 0x812   :  { %11513 = vmatpush3.bf16.msra.mxu0 %v12228_v46  ;;  %v12264_v46 = vld [vmem:[%s17296_s12 + $0x578] sm:$0xff]  }
 0x813   :  { %11542 = vmatprep.subr.bf16.mxu0 %v12231_v58  ;;  %v12263_v58 = vld [vmem:[%s17296_s12 + $0x480] sm:$0xff]  }
 0x814   :  { %11535 = vmatpush3.bf16.msra.mxu1 %v12230_v49  ;;  %v4648_v49 = vcombine.high %v15946_v31, %v15946_v31 }
 0x815   :  { %9324 = vmatmul.mubr.bf16.vlgmr.msra.gmra.mxu0 %v4896_v30  ;;  %11564 = vmatprep.subr.bf16.mxu1 %v12233_v61  ;;  %v12265_v61 = vld [vmem:[%s17296_s12 + $0x538] sm:$0xff]   ;;  %v12269_v30 = vld [vmem:[%s17296_s12 + $0x570] sm:$0xff]  }
 0x816   :  { %11543 = vmatpush3.bf16.msra.mxu0 %v12232_v3  ;;  %9403 = vmatprep.mubr.bf16.mxu0 %v4901_v47  ;;  %v4649_v3 = vcombine.high %v15955_v37, %v15955_v37  ;;  %v12267_v47 = vld [vmem:[%s17296_s12 + $0x5b8] sm:$0xff]  }
 0x817   :  { %9364 = vmatmul.mubr.bf16.vlgmr.msra.gmra.mxu1 %v4898_v41  ;;  %11544 = vmatprep.subr.bf16.mxu0 %v12236_v29  ;;  %v4905_v29 = vpack.c.bf16 %v4648_v49, %v4648_v49  ;;  %v4906_v49 = vpack.c.bf16 %v15955_v37, %v15955_v37  ;;  %v12305_v37 = vld [vmem:[%s17296_s12 + $0x6b0] sm:$0xff]  }
 0x818   :  { %11565 = vmatpush3.bf16.msra.mxu1 %v12234_v1  ;;  %9443 = vmatprep.mubr.bf16.mxu1 %v4903_v12  ;;  %v4902_v1 = vpack.c.bf16 %v15825_v44, %v15825_v44  ;;  %v4907_v41 = vpack.c.bf16 %v4649_v3, %v4649_v3  ;;  %v12273_v12 = vld [vmem:[%s17296_s12 + $0x568] sm:$0xff]   ;;  %v12272_v44 = vld [vmem:[%s17296_s12 + $0x5b0] sm:$0xff]  }
 0x819   :  { %11566 = vmatprep.subr.bf16.mxu1 %v12238_v14  ;;  %v12270_v14 = vld [vmem:[%s17296_s12 + $0x530] sm:$0xff]   ;;  %v12306_v3 = vld [vmem:[%s17296_s12 + $0x668] sm:$0xff]  }
 0x81a   :  { %11545 = vmatpush3.bf16.msra.mxu0 %v12237_v22  ;;  %v12275_v22 = vld [vmem:[%s17296_s12 + $0x5e8] sm:$0xff]  }
 0x81b   :  { %11546 = vmatprep.subr.bf16.mxu0 %v12240_v35  ;;  %v4056_v15 = vpop.xlane.xlu1 %4055  ;;  %v12274_v35 = vld [vmem:[%s17296_s12 + $0x528] sm:$0xff]  }
 0x81c   :  { %11567 = vmatpush3.bf16.msra.mxu1 %v12239_v53  ;;  %v4064_v21 = vmul.f32 0.001953125, %v4056_v15  ;;  %v12277_v53 = vld [vmem:[%s17296_s12 + $0x560] sm:$0xff]   ;;  %v12285_v15 = vld [vmem:[%s17296_s12 + $0x550] sm:$0xff]  }
 0x81d   :  { %11568 = vmatprep.subr.bf16.mxu1 %v12242_v62  ;;  %v12276_v62 = vld [vmem:[%s17296_s12 + $0x5a8] sm:$0xff]  }
 0x81e   :  { %11547 = vmatpush3.bf16.msra.mxu0 %v12241_v45  ;;  %v15896_v8 = vsub.f32 %v15383_v20, %v4064_v21  ;;  %v15899_v16 = vsub.f32 %v15386_v39, %v4064_v21  ;;  %v15902_v34 = vsub.f32 %v15390_v10, %v4064_v21  ;;  %v12254_v20 = vld [vmem:[%s17296_s12 + $0x4d0] sm:$0xff]   ;;  %v15914_v39 = vsub.f32 %v15396_v19, %v4064_v21  ;;  %v12279_v45 = vld [vmem:[%s17296_s12 + $0x5e0] sm:$0xff]   ;;  %v12284_v21 = vld [vmem:[%s17296_s12 + $0x598] sm:$0xff]  }
 0x81f   :  { %11548 = vmatprep.subr.bf16.mxu0 %v12244_v60  ;;  %v12278_v60 = vld [vmem:[%s17296_s12 + $0x520] sm:$0xff]  }
 0x820   :  { %11569 = vmatpush3.bf16.msra.mxu1 %v12243_v48  ;;  %v4090_v10 = vmul.f32 %v15896_v8, %v15896_v8  ;;  %v4091_v23 = vmul.f32 %v15899_v16, %v15899_v16  ;;  %v4092_v19 = vmul.f32 %v15902_v34, %v15902_v34  ;;  %v4093_v55 = vmul.f32 %v15914_v39, %v15914_v39  ;;  %v12281_v48 = vld [vmem:[%s17296_s12 + $0x558] sm:$0xff]  }
 0x821   :  { %11570 = vmatprep.subr.bf16.mxu1 %v12246_v57  ;;  %v12280_v57 = vld [vmem:[%s17296_s12 + $0x5a0] sm:$0xff]  }
 0x822   :  { %11549 = vmatpush3.bf16.msra.mxu0 %v12245_v11  ;;  %v4108_v28 = vadd.f32 %v4091_v23, %v4090_v10  ;;  %v4188_v11 = vld [vmem:[%s17294_s10 + $0x10] sm:$0xff]  ;;  %v12291_v10 = vld [vmem:[%s17296_s12 + $0x5c8] sm:$0xff]  }
 0x823   :  { %11550 = vmatprep.subr.bf16.mxu0 %v12248_v52  ;;  %v12283_v52 = vld [vmem:[%s17296_s12 + $0x5d8] sm:$0xff]   ;;  %v12290_v23 = vld [vmem:[%s17296_s12 + $0x508] sm:$0xff]  }
 0x824   :  { %11571 = vmatpush3.bf16.msra.mxu1 %v12247_v59  ;;  %v4109_v63 = vadd.f32 %v4108_v28, %v4092_v19  ;;  %v12282_v59 = vld [vmem:[%s17296_s12 + $0x518] sm:$0xff]   ;;  %v12292_v19 = vld [vmem:[%s17296_s12 + $0x588] sm:$0xff]  }
 0x825   :  { %11572 = vmatprep.subr.bf16.mxu1 %v12250_v38  ;;  %v12287_v38 = vld [vmem:[%s17296_s12 + $0x5d0] sm:$0xff]  }
 0x826   :  { %11551 = vmatpush3.bf16.msra.mxu0 %v12249_v51  ;;  %v4110_v7 = vadd.f32 %v4109_v63, %v4093_v55  ;;  %v12286_v51 = vld [vmem:[%s17296_s12 + $0x510] sm:$0xff]   ;;  %v12297_v55 = vld [vmem:[%s17296_s12 + $0x678] sm:$0xff]   ;;  %v12296_v63 = vld [vmem:[%s17296_s12 + $0x580] sm:$0xff]  }
 0x827   :  { %11552 = vmatprep.subr.bf16.mxu0 %v12252_v13  ;;  %v12289_v13 = vld [vmem:[%s17296_s12 + $0x548] sm:$0xff]  }
 0x828   :  { %11573 = vmatpush3.bf16.msra.mxu1 %v12251_v24  ;;  %4111 = vadd.xlane.f32.xlu0 %v4110_v7  ;;  %v4522_v24 = vld [vmem:[#allocation6 + $0x30] sm:$0xff] }
 0x829   :  { %11574 = vmatprep.subr.bf16.mxu1 %v12254_v20  ;;  %v12288_v20 = vld [vmem:[%s17296_s12 + $0x590] sm:$0xff]   ;;  %v16059_v28 = vrot.slane %v4522_v24, %v15445_v2 }
 0x82a   :  { %11553 = vmatpush3.bf16.msra.mxu0 %v12253_v17  ;;  %v4650_v17 = vcombine.high %v4522_v24, %v4522_v24  ;;  %v12324_v24 = vld [vmem:[%s17296_s12 + $0x6c8] sm:$0xff]  }
 0x82b   :  { %11554 = vmatprep.subr.bf16.mxu0 %v12256_v4  ;;  %v12293_v4 = vld [vmem:[%s17296_s12 + $0x540] sm:$0xff]  }
 0x82c   :  { %11575 = vmatpush3.bf16.msra.mxu1 %v12255_v9  ;;  %v12294_v9 = vld [vmem:[%s17296_s12 + $0x500] sm:$0xff]  }
 0x82d   :  { %11576 = vmatprep.subr.bf16.mxu1 %v12258_v33  ;;  %v16068_v33 = vrot.slane %v4650_v17, %v15445_v2  ;;  %v12325_v17 = vld [vmem:[%s17296_s12 + $0x688] sm:$0xff]  }
 0x82e   :  { %11555 = vmatpush3.bf16.msra.mxu0 %v12257_v5  ;;  %v4665_v5 = vcombine.high %v16059_v28, %v16059_v28 }
 0x82f   :  { %11556 = vmatprep.subr.bf16.mxu0 %v12260_v25  ;;  %v12298_v25 = vld [vmem:[%s17296_s12 + $0x638] sm:$0xff]   ;;  %v4666_v7 = vcombine.high %v16068_v33, %v16068_v33 }
 0x830   :  { %11577 = vmatpush3.bf16.msra.mxu1 %v12259_v0  ;;  %v4904_v0 = vpack.c.bf16 %v15946_v31, %v15946_v31  ;;  %v12304_v31 = vld [vmem:[%s17296_s12 + $0x6f0] sm:$0xff]  }
 0x831   :  { %11578 = vmatprep.subr.bf16.mxu1 %v12262_v27  ;;  %v12302_v27 = vld [vmem:[%s17296_s12 + $0x670] sm:$0xff]  }
 0x832   :  { %11557 = vmatpush3.bf16.msra.mxu0 %v12261_v6  ;;  %v4909_v6 = vpack.c.bf16 %v4665_v5, %v4665_v5 }
 0x833   :  { %11586 = vmatprep.subr.bf16.mxu0 %v12264_v46  ;;  %v12300_v46 = vld [vmem:[%s17296_s12 + $0x6b8] sm:$0xff]  }
 0x834   :  { %11579 = vmatpush3.bf16.msra.mxu1 %v12263_v58  ;;  %v16094_v58 = vpop.permute.xlu1 %4162 }
 0x835   :  { %9404 = vmatmul.mubr.bf16.vlgmr.msra.gmra.mxu0 %v4900_v26  ;;  %11608 = vmatprep.subr.bf16.mxu1 %v12266_v42  ;;  %v4911_v42 = vpack.c.bf16 %v4666_v7, %v4666_v7 }
 0x836   :  { %11587 = vmatpush3.bf16.msra.mxu0 %v12265_v61  ;;  %9483 = vmatprep.mubr.bf16.mxu0 %v4905_v29  ;;  %v12303_v61 = vld [vmem:[%s17296_s12 + $0x630] sm:$0xff]  }
 0x837   :  { %9444 = vmatmul.mubr.bf16.vlgmr.msra.gmra.mxu1 %v4902_v1  ;;  %11588 = vmatprep.subr.bf16.mxu0 %v12269_v30  ;;  %v12308_v30 = vld [vmem:[%s17296_s12 + $0x6e8] sm:$0xff]   ;;  %v12310_v1 = vld [vmem:[%s17296_s12 + $0x660] sm:$0xff]  }
 0x838   :  { %11609 = vmatpush3.bf16.msra.mxu1 %v12267_v47  ;;  %9523 = vmatprep.mubr.bf16.mxu1 %v4907_v41  ;;  %v12307_v47 = vld [vmem:[%s17296_s12 + $0x628] sm:$0xff]  }
 0x839   :  { %11610 = vmatprep.subr.bf16.mxu1 %v12271_v40 }
 0x83a   :  { %11589 = vmatpush3.bf16.msra.mxu0 %v12270_v14 }
 0x83b   :  { %11590 = vmatprep.subr.bf16.mxu0 %v12273_v12  ;;  %v12309_v12 = vld [vmem:[%s17296_s12 + $0x6a8] sm:$0xff]  }
 0x83c   :  { %11611 = vmatpush3.bf16.msra.mxu1 %v12272_v44  ;;  %v12312_v44 = vld [vmem:[%s17296_s12 + $0x6e0] sm:$0xff]  }
 0x83d   :  { %11612 = vmatprep.subr.bf16.mxu1 %v12275_v22 }
 0x83e   :  { %11591 = vmatpush3.bf16.msra.mxu0 %v12274_v35  ;;  %4202 = vperm.xlu0 %12082, %v4188_v11   ;;  %v12314_v35 = vld [vmem:[%s17296_s12 + $0x658] sm:$0xff]   ;;  %v12318_v11 = vld [vmem:[%s17296_s12 + $0x650] sm:$0xff]  }
 0x83f   :  { %11592 = vmatprep.subr.bf16.mxu0 %v12277_v53  ;;  %v12313_v53 = vld [vmem:[%s17296_s12 + $0x6a0] sm:$0xff]  }
 0x840   :  { %11613 = vmatpush3.bf16.msra.mxu1 %v12276_v62 }
 0x841   :  { %11614 = vmatprep.subr.bf16.mxu1 %v12279_v45  ;;  %v12316_v45 = vld [vmem:[%s17296_s12 + $0x6d8] sm:$0xff]  }
 0x842   :  { %11593 = vmatpush3.bf16.msra.mxu0 %v12278_v60  ;;  %v12315_v60 = vld [vmem:[%s17296_s12 + $0x618] sm:$0xff]  }
 0x843   :  { %11594 = vmatprep.subr.bf16.mxu0 %v12281_v48 }
 0x844   :  { %11615 = vmatpush3.bf16.msra.mxu1 %v12280_v57 }
 0x845   :  { %11616 = vmatprep.subr.bf16.mxu1 %v12283_v52  ;;  %v12317_v52 = vld [vmem:[%s17296_s12 + $0x698] sm:$0xff]  }
 0x846   :  { %11595 = vmatpush3.bf16.msra.mxu0 %v12282_v59 }
 0x847   :  { %11596 = vmatprep.subr.bf16.mxu0 %v12285_v15  ;;  %v12320_v15 = vld [vmem:[%s17296_s12 + $0x6d0] sm:$0xff]  }
 0x848   :  { %11617 = vmatpush3.bf16.msra.mxu1 %v12284_v21  ;;  %v12319_v21 = vld [vmem:[%s17296_s12 + $0x610] sm:$0xff]  }
 0x849   :  { %11618 = vmatprep.subr.bf16.mxu1 %v12287_v38  ;;  %v12322_v38 = vld [vmem:[%s17296_s12 + $0x648] sm:$0xff]  }
 0x84a   :  { %11597 = vmatpush3.bf16.msra.mxu0 %v12286_v51  ;;  %v4523_v51 = vld [vmem:[#allocation6 + $0x38] sm:$0xff] }
 0x84b   :  { %11598 = vmatprep.subr.bf16.mxu0 %v12289_v13  ;;  %v12321_v13 = vld [vmem:[%s17296_s12 + $0x690] sm:$0xff]  }
 0x84c   :  { %11619 = vmatpush3.bf16.msra.mxu1 %v12288_v20  ;;  %v12323_v20 = vld [vmem:[%s17296_s12 + $0x608] sm:$0xff]  }
 0x84d   :  { %11620 = vmatprep.subr.bf16.mxu1 %v12291_v10  ;;  %v4667_v10 = vcombine.high %v4523_v51, %v4523_v51 }
 0x84e   :  { %11599 = vmatpush3.bf16.msra.mxu0 %v12290_v23  ;;  %v12326_v23 = vld [vmem:[%s17296_s12 + $0x640] sm:$0xff]  }
 0x84f   :  { %11600 = vmatprep.subr.bf16.mxu0 %v12293_v4  ;;  %v16191_v4 = vrot.slane %v4523_v51, %v15445_v2  ;;  %v12353_v51 = vld [vmem:[%s17296_s12 + $0x7d0] sm:$0xff]  }
 0x850   :  { %11621 = vmatpush3.bf16.msra.mxu1 %v12292_v19  ;;  %v12328_v19 = vld [vmem:[%s17296_s12 + $0x6c0] sm:$0xff]  }
 0x851   :  { %11622 = vmatprep.subr.bf16.mxu1 %v12295_v43  ;;  %v12327_v43 = vld [vmem:[%s17296_s12 + $0x600] sm:$0xff]   ;;  %v4682_v5 = vcombine.high %v16191_v4, %v16191_v4 }
 0x852   :  { %11601 = vmatpush3.bf16.msra.mxu0 %v12294_v9  ;;  %v16200_v9 = vrot.slane %v4667_v10, %v15445_v2  ;;  %v12357_v10 = vld [vmem:[%s17296_s12 + $0x7c8] sm:$0xff]  }
 0x853   :  { %11630 = vmatprep.subr.bf16.mxu0 %v12297_v55  ;;  %v12330_v55 = vld [vmem:[%s17296_s12 + $0x778] sm:$0xff]  }
 0x854   :  { %11623 = vmatpush3.bf16.msra.mxu1 %v12296_v63  ;;  %v4061_v26 = vpop.xlane.xlu1 %4060  ;;  %v12329_v63 = vld [vmem:[%s17296_s12 + $0x680] sm:$0xff]   ;;  %v4683_v7 = vcombine.high %v16200_v9, %v16200_v9 }
 0x855   :  { %9484 = vmatmul.mubr.bf16.vlgmr.msra.gmra.mxu0 %v4904_v0  ;;  %11652 = vmatprep.subr.bf16.mxu1 %v12299_v56  ;;  %v4065_v29 = vmul.f32 0.001953125, %v4061_v26  ;;  %v12332_v56 = vld [vmem:[%s17296_s12 + $0x7f8] sm:$0xff]   ;;  %v4908_v0 = vpack.c.bf16 %v16059_v28, %v16059_v28  ;;  %v12337_v28 = vld [vmem:[%s17296_s12 + $0x7f0] sm:$0xff]  }
 0x856   :  { %11631 = vmatpush3.bf16.msra.mxu0 %v12298_v25  ;;  %9563 = vmatprep.mubr.bf16.mxu0 %v4909_v6  ;;  %v12331_v25 = vld [vmem:[%s17296_s12 + $0x738] sm:$0xff]   ;;  %v4913_v6 = vpack.c.bf16 %v4682_v5, %v4682_v5  ;;  %v12362_v5 = vld [vmem:[%s17296_s12 + $0x780] sm:$0xff]  }
 0x857   :  { %9524 = vmatmul.mubr.bf16.vlgmr.msra.gmra.mxu1 %v4906_v49  ;;  %11632 = vmatprep.subr.bf16.mxu0 %v12302_v27  ;;  %v16120_v40 = vsub.f32 %v15525_v50, %v4065_v29  ;;  %v16123_v41 = vsub.f32 %v15528_v36, %v4065_v29  ;;  %v16126_v14 = vsub.f32 %v15541_v32, %v4065_v29  ;;  %v12311_v50 = vld [vmem:[%s17296_s12 + $0x620] sm:$0xff]   ;;  %v12335_v27 = vld [vmem:[%s17296_s12 + $0x770] sm:$0xff]  }
 0x858   :  { %11653 = vmatpush3.bf16.msra.mxu1 %v12300_v46  ;;  %9603 = vmatprep.mubr.bf16.mxu1 %v4911_v42  ;;  %v16138_v36 = vsub.f32 %v15556_v54, %v4065_v29  ;;  %v12333_v46 = vld [vmem:[%s17296_s12 + $0x7b8] sm:$0xff]   ;;  %v4915_v42 = vpack.c.bf16 %v4683_v7, %v4683_v7  ;;  %v12338_v29 = vld [vmem:[%s17296_s12 + $0x7b0] sm:$0xff]   ;;  %v4912_v7 = vpack.c.bf16 %v16191_v4, %v16191_v4 }
 0x859   :  { %11654 = vmatprep.subr.bf16.mxu1 %v12304_v31  ;;  %v4094_v32 = vmul.f32 %v16120_v40, %v16120_v40  ;;  %v4095_v22 = vmul.f32 %v16123_v41, %v16123_v41  ;;  %v4096_v54 = vmul.f32 %v16126_v14, %v16126_v14  ;;  %v4910_v31 = vpack.c.bf16 %v16068_v33, %v16068_v33  ;;  %v12339_v33 = vld [vmem:[%s17296_s12 + $0x768] sm:$0xff]   ;;  %v12369_v4 = vld [vmem:[%s17296_s12 + $0x8f0] sm:$0xff]  }
 0x85a   :  { %11633 = vmatpush3.bf16.msra.mxu0 %v12303_v61  ;;  %v4097_v48 = vmul.f32 %v16138_v36, %v16138_v36  ;;  %v12336_v61 = vld [vmem:[%s17296_s12 + $0x730] sm:$0xff]  }
 0x85b   :  { %11634 = vmatprep.subr.bf16.mxu0 %v12306_v3  ;;  %v4113_v62 = vadd.f32 %v4095_v22, %v4094_v32  ;;  %v10637_v3 = vld [vmem:[%s17297_s13] ss:$0 sm:$0xff]  ;;  %v12340_v22 = vld [vmem:[%s17296_s12 + $0x728] sm:$0xff]  }
 0x85c   :  { %11655 = vmatpush3.bf16.msra.mxu1 %v12305_v37 }
 0x85d   :  { %11656 = vmatprep.subr.bf16.mxu1 %v12308_v30  ;;  %v4114_v57 = vadd.f32 %v4113_v62, %v4096_v54  ;;  %v12343_v54 = vld [vmem:[%s17296_s12 + $0x760] sm:$0xff]  }
 0x85e   :  { %11635 = vmatpush3.bf16.msra.mxu0 %v12307_v47 }
 0x85f   :  { %11636 = vmatprep.subr.bf16.mxu0 %v12310_v1  ;;  %v4115_v59 = vadd.f32 %v4114_v57, %v4097_v48  ;;  %v12345_v48 = vld [vmem:[%s17296_s12 + $0x7e0] sm:$0xff]  }
 0x860   :  { %11657 = vmatpush3.bf16.msra.mxu1 %v12309_v12  ;;  %v12341_v12 = vld [vmem:[%s17296_s12 + $0x7e8] sm:$0xff]   ;;  %v12344_v57 = vld [vmem:[%s17296_s12 + $0x720] sm:$0xff]  }
 0x861   :  { %11658 = vmatprep.subr.bf16.mxu1 %v12312_v44  ;;  %4116 = vadd.xlane.f32.xlu0 %v4115_v59  ;;  %v4189_v44 = vld [vmem:[%s17294_s10 + $0x18] sm:$0xff] }
 0x862   :  { %11637 = vmatpush3.bf16.msra.mxu0 %v12311_v50  ;;  %v12349_v59 = vld [vmem:[%s17296_s12 + $0x7d8] sm:$0xff]  }
 0x863   :  { %11638 = vmatprep.subr.bf16.mxu0 %v12314_v35 }
 0x864   :  { %11659 = vmatpush3.bf16.msra.mxu1 %v12313_v53 }
 0x865   :  { %11660 = vmatprep.subr.bf16.mxu1 %v12316_v45  ;;  %v12342_v45 = vld [vmem:[%s17296_s12 + $0x7a8] sm:$0xff]  }
 0x866   :  { %11639 = vmatpush3.bf16.msra.mxu0 %v12315_v60 }
 0x867   :  { %11640 = vmatprep.subr.bf16.mxu0 %v12318_v11  ;;  %v12347_v11 = vld [vmem:[%s17296_s12 + $0x758] sm:$0xff]  }
 0x868   :  { %11661 = vmatpush3.bf16.msra.mxu1 %v12317_v52  ;;  %v12346_v52 = vld [vmem:[%s17296_s12 + $0x7a0] sm:$0xff]  }
 0x869   :  { %11662 = vmatprep.subr.bf16.mxu1 %v12320_v15  ;;  %v12348_v15 = vld [vmem:[%s17296_s12 + $0x718] sm:$0xff]  }
 0x86a   :  { %11641 = vmatpush3.bf16.msra.mxu0 %v12319_v21  ;;  %v12351_v21 = vld [vmem:[%s17296_s12 + $0x750] sm:$0xff]  }
 0x86b   :  { %11642 = vmatprep.subr.bf16.mxu0 %v12322_v38  ;;  %v12350_v38 = vld [vmem:[%s17296_s12 + $0x798] sm:$0xff]  }
 0x86c   :  { %11663 = vmatpush3.bf16.msra.mxu1 %v12321_v13  ;;  %v12352_v13 = vld [vmem:[%s17296_s12 + $0x710] sm:$0xff]  }
 0x86d   :  { %11664 = vmatprep.subr.bf16.mxu1 %v12324_v24  ;;  %v12355_v24 = vld [vmem:[%s17296_s12 + $0x748] sm:$0xff]  }
 0x86e   :  { %11643 = vmatpush3.bf16.msra.mxu0 %v12323_v20  ;;  %v12354_v20 = vld [vmem:[%s17296_s12 + $0x790] sm:$0xff]  }
 0x86f   :  { %11644 = vmatprep.subr.bf16.mxu0 %v12326_v23  ;;  %v12356_v23 = vld [vmem:[%s17296_s12 + $0x708] sm:$0xff]  }
 0x870   :  { %11665 = vmatpush3.bf16.msra.mxu1 %v12325_v17  ;;  %v12359_v17 = vld [vmem:[%s17296_s12 + $0x740] sm:$0xff]  }
 0x871   :  { %11666 = vmatprep.subr.bf16.mxu1 %v12328_v19  ;;  %v12358_v19 = vld [vmem:[%s17296_s12 + $0x788] sm:$0xff]  }
 0x872   :  { %11645 = vmatpush3.bf16.msra.mxu0 %v12327_v43  ;;  %v12361_v43 = vld [vmem:[%s17296_s12 + $0x7c0] sm:$0xff]  }
 0x873   :  { %11674 = vmatprep.subr.bf16.mxu0 %v12330_v55  ;;  %v12360_v55 = vld [vmem:[%s17296_s12 + $0x700] sm:$0xff]  }
 0x874   :  { %11667 = vmatpush3.bf16.msra.mxu1 %v12329_v63  ;;  %v12363_v63 = vld [vmem:[%s17296_s12 + $0x878] sm:$0xff]  }
 0x875   :  { %9564 = vmatmul.mubr.bf16.vlgmr.msra.gmra.mxu0 %v4908_v0  ;;  %v11382_v49 = vpop.f32.mrf.mxu0  ;;  %11696 = vmatprep.subr.bf16.mxu1 %v12332_v56  ;;  %v12365_v56 = vld [vmem:[%s17296_s12 + $0x8f8] sm:$0xff]   ;;  %v12367_v0 = vld [vmem:[%s17296_s12 + $0x870] sm:$0xff]  }
 0x876   :  { %11675 = vmatpush3.bf16.msra.mxu0 %v12331_v25  ;;  %9643 = vmatprep.mubr.bf16.mxu0 %v4913_v6  ;;  %v12364_v25 = vld [vmem:[%s17296_s12 + $0x838] sm:$0xff]  }
 0x877   :  { %9604 = vmatmul.mubr.bf16.vlgmr.msra.gmra.mxu1 %v4910_v31  ;;  %v11383_v37 = vpop.f32.mrf.mxu0  ;;  %v11404_v26 = vpop.f32.mrf.mxu1  ;;  %11676 = vmatprep.subr.bf16.mxu0 %v12335_v27  ;;  %v12366_v27 = vld [vmem:[%s17296_s12 + $0x8b8] sm:$0xff]  }
 0x878   :  { %v11384_v30 = vadd.f32 %v11383_v37, %v11382_v49  ;;  %11697 = vmatpush3.bf16.msra.mxu1 %v12333_v46  ;;  %9683 = vmatprep.mubr.bf16.mxu1 %v4915_v42  ;;  %v4914_v46 = vpack.c.bf16 %v16200_v9, %v16200_v9  ;;  %v12368_v49 = vld [vmem:[%s17296_s12 + $0x830] sm:$0xff]   ;;  %v12371_v42 = vld [vmem:[%s17296_s12 + $0x868] sm:$0xff]  }
 0x879   :  { %v11385_v47 = vpop.f32.mrf.mxu0  ;;  %v11405_v1 = vpop.f32.mrf.mxu1  ;;  %11698 = vmatprep.subr.bf16.mxu1 %v12337_v28  ;;  %4207 = vperm.xlu0 %12082, %v4189_v44   ;;  %v12370_v9 = vld [vmem:[%s17296_s12 + $0x8b0] sm:$0xff]  }
 0x87a   :  { %v9086_v50 = vadd.f32 %v11384_v30, %v10637_v3  ;;  %v11406_v32 = vadd.f32 %v11405_v1, %v11404_v26  ;;  %11677 = vmatpush3.bf16.msra.mxu0 %v12336_v61  ;;  %v12373_v26 = vld [vmem:[%s17296_s12 + $0x8e8] sm:$0xff]  }
 0x87b   :  { %v11386_v35 = vpop.f32.mrf.mxu0  ;;  %v11407_v53 = vpop.f32.mrf.mxu1  ;;  %11678 = vmatprep.subr.bf16.mxu0 %v12339_v33 }
 0x87c   :  { %v16255_v62 = vadd.f32 %v11406_v32, %v9086_v50  ;;  %11699 = vmatpush3.bf16.msra.mxu1 %v12338_v29  ;;  %v12372_v29 = vld [vmem:[%s17296_s12 + $0x828] sm:$0xff]   ;;  %v12376_v35 = vld [vmem:[%s17296_s12 + $0x820] sm:$0xff]   ;;  %v12379_v53 = vld [vmem:[%s17296_s12 + $0x858] sm:$0xff]  }
 0x87d   :  { %v11408_v60 = vpop.f32.mrf.mxu1  ;;  %11700 = vmatprep.subr.bf16.mxu1 %v12341_v12  ;;  %v12375_v12 = vld [vmem:[%s17296_s12 + $0x860] sm:$0xff]   ;;  %v12374_v50 = vld [vmem:[%s17296_s12 + $0x8a8] sm:$0xff]  }
 0x87e   :  { %11679 = vmatpush3.bf16.msra.mxu0 %v12340_v22  ;;  %v12377_v22 = vld [vmem:[%s17296_s12 + $0x8e0] sm:$0xff]   ;;  %v12383_v60 = vld [vmem:[%s17296_s12 + $0x850] sm:$0xff]  }
 0x87f   :  { %11680 = vmatprep.subr.bf16.mxu0 %v12343_v54  ;;  %v12378_v54 = vld [vmem:[%s17296_s12 + $0x8a0] sm:$0xff]  }
 0x880   :  { %11701 = vmatpush3.bf16.msra.mxu1 %v12342_v45  ;;  %v12380_v45 = vld [vmem:[%s17296_s12 + $0x818] sm:$0xff]  }
 0x881   :  { %11702 = vmatprep.subr.bf16.mxu1 %v12345_v48  ;;  %v12382_v48 = vld [vmem:[%s17296_s12 + $0x898] sm:$0xff]  }
 0x882   :  { %11681 = vmatpush3.bf16.msra.mxu0 %v12344_v57  ;;  %v12385_v57 = vld [vmem:[%s17296_s12 + $0x8d0] sm:$0xff]  }
 0x883   :  { %11682 = vmatprep.subr.bf16.mxu0 %v12347_v11  ;;  %v12384_v11 = vld [vmem:[%s17296_s12 + $0x810] sm:$0xff]  }
 0x884   :  { %11703 = vmatpush3.bf16.msra.mxu1 %v12346_v52  ;;  %v12387_v52 = vld [vmem:[%s17296_s12 + $0x848] sm:$0xff]  }
 0x885   :  { %11704 = vmatprep.subr.bf16.mxu1 %v12349_v59  ;;  %v12386_v59 = vld [vmem:[%s17296_s12 + $0x890] sm:$0xff]  }
 0x886   :  { %11683 = vmatpush3.bf16.msra.mxu0 %v12348_v15  ;;  %v12389_v15 = vld [vmem:[%s17296_s12 + $0x8c8] sm:$0xff]  }
 0x887   :  { %11684 = vmatprep.subr.bf16.mxu0 %v12351_v21  ;;  %v12388_v21 = vld [vmem:[%s17296_s12 + $0x808] sm:$0xff]  }
 0x888   :  { %11705 = vmatpush3.bf16.msra.mxu1 %v12350_v38  ;;  %v12391_v38 = vld [vmem:[%s17296_s12 + $0x840] sm:$0xff]  }
 0x889   :  { %11706 = vmatprep.subr.bf16.mxu1 %v12353_v51  ;;  %v12390_v51 = vld [vmem:[%s17296_s12 + $0x888] sm:$0xff]  }
 0x88a   :  { %11685 = vmatpush3.bf16.msra.mxu0 %v12352_v13  ;;  %v12393_v13 = vld [vmem:[%s17296_s12 + $0x8c0] sm:$0xff]  }
 0x88b   :  { %11686 = vmatprep.subr.bf16.mxu0 %v12355_v24  ;;  %v12392_v24 = vld [vmem:[%s17296_s12 + $0x800] sm:$0xff]  }
 0x88c   :  { %11707 = vmatpush3.bf16.msra.mxu1 %v12354_v20  ;;  %v12395_v20 = vld [vmem:[%s17296_s12 + $0x978] sm:$0xff]  }
 0x88d   :  { %11708 = vmatprep.subr.bf16.mxu1 %v12357_v10  ;;  %v12394_v10 = vld [vmem:[%s17296_s12 + $0x880] sm:$0xff]  }
 0x88e   :  { %11687 = vmatpush3.bf16.msra.mxu0 %v12356_v23  ;;  %v12398_v23 = vld [vmem:[%s17296_s12 + $0x9f8] sm:$0xff]  }
 0x88f   :  { %11688 = vmatprep.subr.bf16.mxu0 %v12359_v17 }
 0x890   :  { %11709 = vmatpush3.bf16.msra.mxu1 %v12358_v19 }
 0x891   :  { %11710 = vmatprep.subr.bf16.mxu1 %v12361_v43 }
 0x892   :  { %11689 = vmatpush3.bf16.msra.mxu0 %v12360_v55 }
 0x893   :  { %11718 = vmatprep.subr.bf16.mxu0 %v12363_v63 }
 0x894   :  { %11711 = vmatpush3.bf16.msra.mxu1 %v12362_v5 }
 0x895   :  { %v11426_v6 = vpop.f32.mrf.mxu0  ;;  %9644 = vmatmul.mubr.bf16.vlgmr.msra.gmra.mxu0 %v4912_v7  ;;  %11740 = vmatprep.subr.bf16.mxu1 %v12365_v56 }
 0x896   :  { %11719 = vmatpush3.bf16.msra.mxu0 %v12364_v25 }
 0x897   :  { %v11427_v31 = vpop.f32.mrf.mxu0  ;;  %v11448_v28 = vpop.f32.mrf.mxu1  ;;  %9684 = vmatmul.mubr.bf16.vlgmr.msra.gmra.mxu1 %v4914_v46  ;;  %11720 = vmatprep.subr.bf16.mxu0 %v12367_v0 }
 0x898   :  { %v11428_v61 = vadd.f32 %v11427_v31, %v11426_v6  ;;  %11741 = vmatpush3.bf16.msra.mxu1 %v12366_v27 }
 0x899   :  { %v11429_v3 = vpop.f32.mrf.mxu0  ;;  %v11449_v37 = vpop.f32.mrf.mxu1  ;;  %11742 = vmatprep.subr.bf16.mxu1 %v12369_v4 }
 0x89a   :  { %v9166_v33 = vadd.f32 %v11428_v61, %v16255_v62  ;;  %v11450_v30 = vadd.f32 %v11449_v37, %v11448_v28  ;;  %11721 = vmatpush3.bf16.msra.mxu0 %v12368_v49  ;;  %v12381_v62 = vld [vmem:[%s17296_s12 + $0x8d8] sm:$0xff]  }
 0x89b   :  { %v11430_v47 = vpop.f32.mrf.mxu0  ;;  %v11451_v1 = vpop.f32.mrf.mxu1  ;;  %11722 = vmatprep.subr.bf16.mxu0 %v12371_v42 }
 0x89c   :  { %v9206_v44 = vadd.f32 %v11450_v30, %v9166_v33  ;;  %11743 = vmatpush3.bf16.msra.mxu1 %v12370_v9 }
 0x89d   :  { %v11452_v32 = vpop.f32.mrf.mxu1  ;;  %11744 = vmatprep.subr.bf16.mxu1 %v12373_v26 }
 0x89e   :  { %11723 = vmatpush3.bf16.msra.mxu0 %v12372_v29 }
 0x89f   :  { %11724 = vmatprep.subr.bf16.mxu0 %v12375_v12 }
 0x8a0   :  { %11745 = vmatpush3.bf16.msra.mxu1 %v12374_v50 }
 0x8a1   :  { %11746 = vmatprep.subr.bf16.mxu1 %v12377_v22 }
 0x8a2   :  { %11725 = vmatpush3.bf16.msra.mxu0 %v12376_v35 }
 0x8a3   :  { %11726 = vmatprep.subr.bf16.mxu0 %v12379_v53 }
 0x8a4   :  { %11747 = vmatpush3.bf16.msra.mxu1 %v12378_v54 }
 0x8a5   :  { %11748 = vmatprep.subr.bf16.mxu1 %v12381_v62 }
 0x8a6   :  { %11727 = vmatpush3.bf16.msra.mxu0 %v12380_v45 }
 0x8a7   :  { %11728 = vmatprep.subr.bf16.mxu0 %v12383_v60 }
 0x8a8   :  { %11749 = vmatpush3.bf16.msra.mxu1 %v12382_v48 }
 0x8a9   :  { %11750 = vmatprep.subr.bf16.mxu1 %v12385_v57 }
 0x8aa   :  { %11729 = vmatpush3.bf16.msra.mxu0 %v12384_v11 }
 0x8ab   :  { %11730 = vmatprep.subr.bf16.mxu0 %v12387_v52 }
 0x8ac   :  { %11751 = vmatpush3.bf16.msra.mxu1 %v12386_v59 }
 0x8ad   :  { %11752 = vmatprep.subr.bf16.mxu1 %v12389_v15 }
 0x8ae   :  { %11731 = vmatpush3.bf16.msra.mxu0 %v12388_v21 }
 0x8af   :  { %11732 = vmatprep.subr.bf16.mxu0 %v12391_v38 }
 0x8b0   :  { %11753 = vmatpush3.bf16.msra.mxu1 %v12390_v51 }
 0x8b1   :  { %11754 = vmatprep.subr.bf16.mxu1 %v12393_v13  ;;  %v4112_v19 = vpop.xlane.xlu0 %4111 }
 0x8b2   :  { %11733 = vmatpush3.bf16.msra.mxu0 %v12392_v24  ;;  %v4120_v63 = vmul.f32 0.001953125, %v4112_v19 }
 0x8b3   :  { %11762 = vmatprep.subr.bf16.mxu0 %v12395_v20 }
 0x8b4   :  { %11755 = vmatpush3.bf16.msra.mxu1 %v12394_v10  ;;  %v4124_v7 = vadd.f32 1e-05, %v4120_v63 }
 0x8b5   :  { %v11470_v17 = vpop.f32.mrf.mxu0  ;;  %11784 = vmatprep.subr.bf16.mxu1 %v12398_v23 }
 0x8b6   :  { %12635 = vrsqrt.f32 %v4124_v7 }
 0x8b7   :  { %v11471_v43 = vpop.f32.mrf.mxu0  ;;  %v11492_v55 = vpop.f32.mrf.mxu1 }
 0x8b8   :  { %v11472_v5 = vadd.f32 %v11471_v43, %v11470_v17 }
 0x8b9   :  { %v11473_v56 = vpop.f32.mrf.mxu0  ;;  %v11493_v25 = vpop.f32.mrf.mxu1 }
 0x8ba   :  { %v9246_v0 = vadd.f32 %v11472_v5, %v9206_v44  ;;  %v11494_v27 = vadd.f32 %v11493_v25, %v11492_v55  ;;  %v4203_v30 = vpop.permute.xlu0 %4202 }
 0x8bb   :  { %v11474_v6 = vpop.f32.mrf.mxu0  ;;  %v11495_v46 = vpop.f32.mrf.mxu1 }
 0x8bc   :  { %v9286_v4 = vadd.f32 %v11494_v27, %v9246_v0 }
 0x8bd   :  { %v11496_v49 = vpop.f32.mrf.mxu1 }
 0x8be   :  { %v12396_v49 = vld [vmem:[%s17296_s12 + $0x938] sm:$0xff]  }
 0x8c3   :  { %v12636_v31 = vpop.eup %12635 }
 0x8c4   :  { %v4138_v28 = vmul.f32 %v12636_v31, %v15896_v8  ;;  %v4139_v42 = vmul.f32 %v12636_v31, %v15899_v16  ;;  %v4140_v61 = vmul.f32 %v12636_v31, %v15902_v34  ;;  %v4141_v9 = vmul.f32 %v12636_v31, %v15914_v39 }
 0x8c6   :  { %v4178_v3 = vmul.f32 %v16094_v58, %v4138_v28  ;;  %v4179_v37 = vmul.f32 %v16094_v58, %v4139_v42  ;;  %v4180_v26 = vmul.f32 %v16094_v58, %v4140_v61  ;;  %v4181_v33 = vmul.f32 %v16094_v58, %v4141_v9  ;;  %v12399_v9 = vld [vmem:[%s17296_s12 + $0x9b8] sm:$0xff]  }
 0x8c8   :  { %v4218_v29 = vadd.f32 %v4203_v30, %v4178_v3  ;;  %v4219_v47 = vadd.f32 %v4203_v30, %v4179_v37  ;;  %v4220_v1 = vadd.f32 %v4203_v30, %v4180_v26  ;;  %v4221_v12 = vadd.f32 %v4203_v30, %v4181_v33  ;;  %v12400_v3 = vld [vmem:[%s17296_s12 + $0x970] sm:$0xff]  }
 0x8c9   :  { %v12403_v33 = vld [vmem:[%s17296_s12 + $0x9f0] sm:$0xff]  }
 0x8ca   :  { %v4234_v8 = vmax.f32 %v4218_v29, 0.0  ;;  %v4235_v44 = vmax.f32 %v4219_v47, 0.0  ;;  %v4236_v16 = vmax.f32 %v4220_v1, 0.0  ;;  %v4237_v50 = vmax.f32 %v4221_v12, 0.0  ;;  %v12402_v30 = vld [vmem:[%s17296_s12 + $0x930] sm:$0xff]   ;;  %v12405_v47 = vld [vmem:[%s17296_s12 + $0x968] sm:$0xff]  }
 0x8cb   :  { %v12404_v1 = vld [vmem:[%s17296_s12 + $0x9b0] sm:$0xff]  }
 0x8cc   :  { %4250 = vst [vmem:[#allocation5 + $0x40] sm:$0xff] %v4234_v8  ;;  %4251 = vst [vmem:[#allocation5 + $0x48] sm:$0xff] %v4235_v44  ;;  %v12407_v44 = vld [vmem:[%s17296_s12 + $0x9e8] sm:$0xff]  }
 0x8cd   :  { %4252 = vst [vmem:[#allocation5 + $0x50] sm:$0xff] %v4236_v16  ;;  %4253 = vst [vmem:[#allocation5 + $0x58] sm:$0xff] %v4237_v50  ;;  %v12406_v16 = vld [vmem:[%s17296_s12 + $0x928] sm:$0xff]  }
 0x8d3   :  { %v4325_v22 = vld [vmem:[#allocation5 + $0x40] ss:$8 sm:$0x3]  ;;  %v4329_v35 = vld [vmem:[#allocation5 + $0x41] ss:$8 sm:$0x3] }
 0x8d4   :  { %v4333_v58 = vld [vmem:[#allocation5 + $0x42] ss:$8 sm:$0x3]  ;;  %v4337_v54 = vld [vmem:[#allocation5 + $0x43] ss:$8 sm:$0x3] }
 0x8d5   :  { %v11514_v34 = vpop.f32.mrf.mxu0  ;;  %4327 = vst.msk [vmem:[#allocation6 + $0x40] ss:$2 sm:$0x3] %vm15405_vm13, %v4325_v22  ;;  %4331 = vst.msk [vmem:[#allocation6 + $0x44] ss:$2 sm:$0x3] %vm15405_vm13, %v4329_v35 }
 0x8d6   :  { %v4341_v60 = vld [vmem:[#allocation5 + $0x44] ss:$8 sm:$0x3]  ;;  %v4345_v48 = vld [vmem:[#allocation5 + $0x45] ss:$8 sm:$0x3] }
 0x8d7   :  { %v11515_v39 = vpop.f32.mrf.mxu0  ;;  %v11536_v32 = vpop.f32.mrf.mxu1  ;;  %4335 = vst.msk [vmem:[#allocation6 + $0x48] ss:$2 sm:$0x3] %vm15405_vm13, %v4333_v58  ;;  %4339 = vst.msk [vmem:[#allocation6 + $0x4c] ss:$2 sm:$0x3] %vm15405_vm13, %v4337_v54 }
 0x8d8   :  { %v11516_v53 = vadd.f32 %v11515_v39, %v11514_v34  ;;  %v4349_v52 = vld [vmem:[#allocation5 + $0x46] ss:$8 sm:$0x3]  ;;  %v4353_v59 = vld [vmem:[#allocation5 + $0x47] ss:$8 sm:$0x3] }
 0x8d9   :  { %v11517_v62 = vpop.f32.mrf.mxu0  ;;  %v11537_v45 = vpop.f32.mrf.mxu1  ;;  %4343 = vst.msk [vmem:[#allocation6 + $0x50] ss:$2 sm:$0x3] %vm15405_vm13, %v4341_v60  ;;  %4347 = vst.msk [vmem:[#allocation6 + $0x54] ss:$2 sm:$0x3] %vm15405_vm13, %v4345_v48 }
 0x8da   :  { %v9326_v57 = vadd.f32 %v11516_v53, %v9286_v4  ;;  %v11538_v11 = vadd.f32 %v11537_v45, %v11536_v32  ;;  %v4453_v38 = vld [vmem:[#allocation5 + $0x50] ss:$8 sm:$0x3]  ;;  %v4457_v51 = vld [vmem:[#allocation5 + $0x51] ss:$8 sm:$0x3] }
 0x8db   :  { %v11518_v15 = vpop.f32.mrf.mxu0  ;;  %v11539_v21 = vpop.f32.mrf.mxu1  ;;  %4351 = vst.msk [vmem:[#allocation6 + $0x58] ss:$2 sm:$0x3] %vm15405_vm13, %v4349_v52  ;;  %4355 = vst.msk [vmem:[#allocation6 + $0x5c] ss:$2 sm:$0x3] %vm15405_vm13, %v4353_v59 }
 0x8dc   :  { %v16448_v13 = vadd.f32 %v11538_v11, %v9326_v57  ;;  %v4461_v24 = vld [vmem:[#allocation5 + $0x52] ss:$8 sm:$0x3]  ;;  %v4465_v20 = vld [vmem:[#allocation5 + $0x53] ss:$8 sm:$0x3] }
 0x8dd   :  { %4455 = vst.msk [vmem:[#allocation6 + $0x41] ss:$2 sm:$0x3] %vm15405_vm13, %v4453_v38  ;;  %4459 = vst.msk [vmem:[#allocation6 + $0x45] ss:$2 sm:$0x3] %vm15405_vm13, %v4457_v51  ;;  %v11540_v10 = vpop.f32.mrf.mxu1 }
 0x8de   :  { %v4469_v23 = vld [vmem:[#allocation5 + $0x54] ss:$8 sm:$0x3]  ;;  %v4473_v17 = vld [vmem:[#allocation5 + $0x55] ss:$8 sm:$0x3] }
 0x8df   :  { %4463 = vst.msk [vmem:[#allocation6 + $0x49] ss:$2 sm:$0x3] %vm15405_vm13, %v4461_v24  ;;  %4467 = vst.msk [vmem:[#allocation6 + $0x4d] ss:$2 sm:$0x3] %vm15405_vm13, %v4465_v20 }
 0x8e0   :  { %v4477_v19 = vld [vmem:[#allocation5 + $0x56] ss:$8 sm:$0x3]  ;;  %v4481_v43 = vld [vmem:[#allocation5 + $0x57] ss:$8 sm:$0x3] }
 0x8e1   :  { %4471 = vst.msk [vmem:[#allocation6 + $0x51] ss:$2 sm:$0x3] %vm15405_vm13, %v4469_v23  ;;  %4475 = vst.msk [vmem:[#allocation6 + $0x55] ss:$2 sm:$0x3] %vm15405_vm13, %v4473_v17 }
 0x8e2   :  { %4479 = vst.msk [vmem:[#allocation6 + $0x59] ss:$2 sm:$0x3] %vm15405_vm13, %v4477_v19  ;;  %4483 = vst.msk [vmem:[#allocation6 + $0x5d] ss:$2 sm:$0x3] %vm15405_vm13, %v4481_v43 }
 0x8e3   :  { %v12409_v34 = vld [vmem:[%s17296_s12 + $0x960] sm:$0xff]   ;;  %v12408_v39 = vld [vmem:[%s17296_s12 + $0x9a8] sm:$0xff]   ;;  %v12413_v53 = vld [vmem:[%s17296_s12 + $0x958] sm:$0xff]  }
 0x8e4   :  { %v4524_v55 = vld [vmem:[#allocation6 + $0x40] sm:$0xff]  ;;  %v12415_v60 = vld [vmem:[%s17296_s12 + $0x9d8] sm:$0xff]   ;;  %v12417_v15 = vld [vmem:[%s17296_s12 + $0x950] sm:$0xff]  }
 0x8e5   :  { %v4691_v63 = vrot.slane %v4524_v55, %v15445_v2  ;;  %v4684_v5 = vcombine.high %v4524_v55, %v4524_v55  ;;  %v12411_v32 = vld [vmem:[%s17296_s12 + $0x9e0] sm:$0xff]   ;;  %v12414_v11 = vld [vmem:[%s17296_s12 + $0x918] sm:$0xff]   ;;  %v12418_v10 = vld [vmem:[%s17296_s12 + $0x910] sm:$0xff]  }
 0x8e6   :  { %v4525_v56 = vld [vmem:[#allocation6 + $0x48] sm:$0xff]  ;;  %v12410_v35 = vld [vmem:[%s17296_s12 + $0x920] sm:$0xff]   ;;  %v12416_v51 = vld [vmem:[%s17296_s12 + $0x998] sm:$0xff]  }
 0x8e7   :  { %v16468_v25 = vrot.slane %v4525_v56, %v15445_v2  ;;  %v4701_v7 = vcombine.high %v4525_v56, %v4525_v56  ;;  %v4699_v0 = vcombine.high %v4691_v63, %v4691_v63  ;;  %v4698_v27 = vrot.slane %v4684_v5, %v15445_v2  ;;  %v12412_v62 = vld [vmem:[%s17296_s12 + $0x9a0] sm:$0xff]   ;;  %v12421_v23 = vld [vmem:[%s17296_s12 + $0x948] sm:$0xff]   ;;  %v12420_v19 = vld [vmem:[%s17296_s12 + $0x990] sm:$0xff]  }
 0x8e8   :  { %v4916_v28 = vpack.c.bf16 %v4691_v63, %v4691_v63  ;;  %v4526_v17 = vld [vmem:[#allocation6 + $0x50] sm:$0xff]  ;;  %v12423_v43 = vld [vmem:[%s17296_s12 + $0x9c8] sm:$0xff]  }
 0x8e9   :  { %v4716_v6 = vcombine.high %v16468_v25, %v16468_v25  ;;  %v16474_v46 = vrot.slane %v4701_v7, %v15445_v2  ;;  %v4917_v4 = vpack.c.bf16 %v4699_v0, %v4699_v0  ;;  %v4700_v31 = vcombine.high %v4698_v27, %v4698_v27  ;;  %v12422_v63 = vld [vmem:[%s17296_s12 + $0x908] sm:$0xff]  }
 0x8ea   :  { %v4918_v26 = vpack.c.bf16 %v4698_v27, %v4698_v27  ;;  %v4117_v12 = vpop.xlane.xlu0 %4116  ;;  %v4718_v5 = vcombine.high %v4526_v17, %v4526_v17 }
 0x8eb   :  { %v4717_v42 = vcombine.high %v16474_v46, %v16474_v46  ;;  %9723 = vmatprep.mubr.bf16.mxu0 %v4917_v4  ;;  %v4919_v61 = vpack.c.bf16 %v4700_v31, %v4700_v31  ;;  %v4921_v37 = vpack.c.bf16 %v4716_v6, %v4716_v6  ;;  %v4121_v8 = vmul.f32 0.001953125, %v4117_v12  ;;  %v12425_v6 = vld [vmem:[%s17296_s12 + $0x940] sm:$0xff]   ;;  %v4168_v4 = vpop.permute.xlu1 %4167 }
 0x8ec   :  { %9724 = vmatmul.mubr.bf16.vlgmr.msra.gmra.mxu0 %v4916_v28  ;;  %v16567_v31 = vrot.slane %v4526_v17, %v15445_v2 }
 0x8ed   :  { %11763 = vmatpush3.bf16.msra.mxu0 %v12396_v49  ;;  %9763 = vmatprep.mubr.bf16.mxu1 %v4919_v61  ;;  %v4923_v29 = vpack.c.bf16 %v4717_v42, %v4717_v42  ;;  %v4125_v50 = vadd.f32 1e-05, %v4121_v8  ;;  %v12424_v49 = vld [vmem:[%s17296_s12 + $0x988] sm:$0xff]   ;;  %v12426_v61 = vld [vmem:[%s17296_s12 + $0x900] sm:$0xff]  }
 0x8ee   :  { %9803 = vmatprep.mubr.bf16.mxu0 %v4921_v37  ;;  %9764 = vmatmul.mubr.bf16.vlgmr.msra.gmra.mxu1 %v4918_v26 }
 0x8ef   :  { %11785 = vmatpush3.bf16.msra.mxu1 %v12399_v9  ;;  %11764 = vmatprep.subr.bf16.mxu0 %v12400_v3  ;;  %12637 = vrsqrt.f32 %v4125_v50  ;;  %v16576_v9 = vrot.slane %v4718_v5, %v15445_v2  ;;  %v12430_v50 = vld [vmem:[%s17296_s12 + $0xa38] sm:$0xff]  }
 0x8f0   :  { %9843 = vmatprep.mubr.bf16.mxu1 %v4923_v29  ;;  %11786 = vmatprep.subr.bf16.mxu1 %v12403_v33  ;;  %v12428_v29 = vld [vmem:[%s17296_s12 + $0x980] sm:$0xff]  }
 0x8f1   :  { %11765 = vmatpush3.bf16.msra.mxu0 %v12402_v30  ;;  %v12429_v30 = vld [vmem:[%s17296_s12 + $0xa78] sm:$0xff]  }
 0x8f2   :  { %11766 = vmatprep.subr.bf16.mxu0 %v12405_v47  ;;  %v4733_v47 = vcombine.high %v16567_v31, %v16567_v31 }
 0x8f3   :  { %11787 = vmatpush3.bf16.msra.mxu1 %v12404_v1 }
 0x8f4   :  { %11788 = vmatprep.subr.bf16.mxu1 %v12407_v44  ;;  %v4208_v42 = vpop.permute.xlu0 %4207 }
 0x8f5   :  { %11767 = vmatpush3.bf16.msra.mxu0 %v12406_v16  ;;  %v11558_v22 = vpop.f32.mrf.mxu0  ;;  %v12431_v16 = vld [vmem:[%s17296_s12 + $0xaf8] sm:$0xff]  }
 0x8f6   :  { %11768 = vmatprep.subr.bf16.mxu0 %v12409_v34  ;;  %v4734_v34 = vcombine.high %v16576_v9, %v16576_v9 }
 0x8f7   :  { %11789 = vmatpush3.bf16.msra.mxu1 %v12408_v39  ;;  %v11559_v58 = vpop.f32.mrf.mxu0  ;;  %v11580_v54 = vpop.f32.mrf.mxu1  ;;  %v4920_v39 = vpack.c.bf16 %v16468_v25, %v16468_v25  ;;  %v12436_v25 = vld [vmem:[%s17296_s12 + $0xaf0] sm:$0xff]  }
 0x8f8   :  { %v11560_v45 = vadd.f32 %v11559_v58, %v11558_v22  ;;  %11790 = vmatprep.subr.bf16.mxu1 %v12411_v32  ;;  %v12434_v32 = vld [vmem:[%s17296_s12 + $0xa70] sm:$0xff]   ;;  %v4925_v22 = vpack.c.bf16 %v4733_v47, %v4733_v47  ;;  %v4927_v58 = vpack.c.bf16 %v4734_v34, %v4734_v34  ;;  %v4527_v47 = vld [vmem:[#allocation6 + $0x58] sm:$0xff] }
 0x8f9   :  { %11769 = vmatpush3.bf16.msra.mxu0 %v12410_v35  ;;  %v11561_v48 = vpop.f32.mrf.mxu0  ;;  %v11581_v57 = vpop.f32.mrf.mxu1  ;;  %v12432_v35 = vld [vmem:[%s17296_s12 + $0xab8] sm:$0xff]   ;;  %v16712_v34 = vrot.slane %v4527_v47, %v15445_v2 }
 0x8fa   :  { %v9406_v52 = vadd.f32 %v11560_v45, %v16448_v13  ;;  %v11582_v59 = vadd.f32 %v11581_v57, %v11580_v54  ;;  %11770 = vmatprep.subr.bf16.mxu0 %v12413_v53  ;;  %v12419_v13 = vld [vmem:[%s17296_s12 + $0x9d0] sm:$0xff]   ;;  %v4922_v53 = vpack.c.bf16 %v16474_v46, %v16474_v46  ;;  %v12439_v45 = vld [vmem:[%s17296_s12 + $0xa28] sm:$0xff]   ;;  %v12442_v48 = vld [vmem:[%s17296_s12 + $0xa60] sm:$0xff]  }
 0x8fb   :  { %11791 = vmatpush3.bf16.msra.mxu1 %v12412_v62  ;;  %v11562_v21 = vpop.f32.mrf.mxu0  ;;  %v11583_v38 = vpop.f32.mrf.mxu1  ;;  %v12435_v54 = vld [vmem:[%s17296_s12 + $0xa30] sm:$0xff]   ;;  %v12438_v62 = vld [vmem:[%s17296_s12 + $0xa68] sm:$0xff]  }
 0x8fc   :  { %v16536_v24 = vadd.f32 %v11582_v59, %v9406_v52  ;;  %11792 = vmatprep.subr.bf16.mxu1 %v12415_v60  ;;  %v12638_v55 = vpop.eup %12637  ;;  %v12437_v46 = vld [vmem:[%s17296_s12 + $0xab0] sm:$0xff]   ;;  %v12440_v60 = vld [vmem:[%s17296_s12 + $0xae8] sm:$0xff]   ;;  %v12444_v21 = vld [vmem:[%s17296_s12 + $0xae0] sm:$0xff]  }
 0x8fd   :  { %11771 = vmatpush3.bf16.msra.mxu0 %v12414_v11  ;;  %v11584_v20 = vpop.f32.mrf.mxu1  ;;  %v4142_v56 = vmul.f32 %v12638_v55, %v16120_v40  ;;  %v4143_v7 = vmul.f32 %v12638_v55, %v16123_v41  ;;  %v4144_v0 = vmul.f32 %v12638_v55, %v16126_v14  ;;  %v4145_v27 = vmul.f32 %v12638_v55, %v16138_v36  ;;  %v12427_v36 = vld [vmem:[%s17296_s12 + $0x9c0] sm:$0xff]   ;;  %v12441_v52 = vld [vmem:[%s17296_s12 + $0xaa8] sm:$0xff]  }
 0x8fe   :  { %11772 = vmatprep.subr.bf16.mxu0 %v12417_v15  ;;  %v12445_v55 = vld [vmem:[%s17296_s12 + $0xaa0] sm:$0xff]  }
 0x8ff   :  { %11793 = vmatpush3.bf16.msra.mxu1 %v12416_v51  ;;  %v4182_v40 = vmul.f32 %v4168_v4, %v4142_v56  ;;  %v4183_v41 = vmul.f32 %v4168_v4, %v4143_v7  ;;  %v4184_v28 = vmul.f32 %v4168_v4, %v4144_v0  ;;  %v4185_v14 = vmul.f32 %v4168_v4, %v4145_v27  ;;  %v12448_v56 = vld [vmem:[%s17296_s12 + $0xad8] sm:$0xff]  }
 0x900   :  { %11794 = vmatprep.subr.bf16.mxu1 %v12419_v13  ;;  %v12443_v13 = vld [vmem:[%s17296_s12 + $0xa20] sm:$0xff]  }
 0x901   :  { %11773 = vmatpush3.bf16.msra.mxu0 %v12418_v10  ;;  %v4222_v3 = vadd.f32 %v4208_v42, %v4182_v40  ;;  %v4223_v37 = vadd.f32 %v4208_v42, %v4183_v41  ;;  %v4224_v26 = vadd.f32 %v4208_v42, %v4184_v28  ;;  %v4225_v33 = vadd.f32 %v4208_v42, %v4185_v14  ;;  %v12447_v14 = vld [vmem:[%s17296_s12 + $0xa18] sm:$0xff]  }
 0x902   :  { %11774 = vmatprep.subr.bf16.mxu0 %v12421_v23  ;;  %v12446_v23 = vld [vmem:[%s17296_s12 + $0xa58] sm:$0xff]  }
 0x903   :  { %11795 = vmatpush3.bf16.msra.mxu1 %v12420_v19  ;;  %v4238_v1 = vmax.f32 %v4222_v3, 0.0  ;;  %v4239_v12 = vmax.f32 %v4223_v37, 0.0  ;;  %v4240_v8 = vmax.f32 %v4224_v26, 0.0  ;;  %v4241_v44 = vmax.f32 %v4225_v33, 0.0 }
 0x904   :  { %11796 = vmatprep.subr.bf16.mxu1 %v12423_v43 }
 0x905   :  { %11775 = vmatpush3.bf16.msra.mxu0 %v12422_v63  ;;  %4254 = vst [vmem:[#allocation5 + $0x60] sm:$0xff] %v4238_v1  ;;  %4255 = vst [vmem:[#allocation5 + $0x68] sm:$0xff] %v4239_v12  ;;  %v12453_v1 = vld [vmem:[%s17296_s12 + $0xa90] sm:$0xff]   ;;  %v12456_v12 = vld [vmem:[%s17296_s12 + $0xac8] sm:$0xff]  }
 0x906   :  { %11776 = vmatprep.subr.bf16.mxu0 %v12425_v6  ;;  %4256 = vst [vmem:[#allocation5 + $0x70] sm:$0xff] %v4240_v8  ;;  %4257 = vst [vmem:[#allocation5 + $0x78] sm:$0xff] %v4241_v44  ;;  %v12455_v8 = vld [vmem:[%s17296_s12 + $0xa08] sm:$0xff]   ;;  %v4735_v44 = vcombine.high %v4527_v47, %v4527_v47  ;;  %v12492_v47 = vld [vmem:[%s17296_s12 + $0xb00] sm:$0xff]  }
 0x907   :  { %11797 = vmatpush3.bf16.msra.mxu1 %v12424_v49 }
 0x908   :  { %11798 = vmatprep.subr.bf16.mxu1 %v12427_v36 }
 0x909   :  { %11777 = vmatpush3.bf16.msra.mxu0 %v12426_v61  ;;  %v12450_v61 = vld [vmem:[%s17296_s12 + $0xa50] sm:$0xff]  }
 0x90a   :  { %11806 = vmatprep.subr.bf16.mxu0 %v12429_v30  ;;  %v12451_v30 = vld [vmem:[%s17296_s12 + $0xa10] sm:$0xff]  }
 0x90b   :  { %11799 = vmatpush3.bf16.msra.mxu1 %v12428_v29  ;;  %v12454_v29 = vld [vmem:[%s17296_s12 + $0xa48] sm:$0xff]  }
 0x90c   :  { %9804 = vmatmul.mubr.bf16.vlgmr.msra.gmra.mxu0 %v4920_v39  ;;  %11828 = vmatprep.subr.bf16.mxu1 %v12431_v16  ;;  %v4357_v57 = vld [vmem:[#allocation5 + $0x60] ss:$8 sm:$0x3]  ;;  %v4361_v11 = vld [vmem:[#allocation5 + $0x61] ss:$8 sm:$0x3] }
 0x90d   :  { %11807 = vmatpush3.bf16.msra.mxu0 %v12430_v50  ;;  %9883 = vmatprep.mubr.bf16.mxu0 %v4925_v22  ;;  %4359 = vst.msk [vmem:[#allocation6 + $0x60] ss:$2 sm:$0x3] %vm15405_vm13, %v4357_v57  ;;  %4363 = vst.msk [vmem:[#allocation6 + $0x64] ss:$2 sm:$0x3] %vm15405_vm13, %v4361_v11  ;;  %v16721_v22 = vrot.slane %v4735_v44, %v15445_v2  ;;  %v4926_v57 = vpack.c.bf16 %v16576_v9, %v16576_v9 }
 0x90e   :  { %9844 = vmatmul.mubr.bf16.vlgmr.msra.gmra.mxu1 %v4922_v53  ;;  %11808 = vmatprep.subr.bf16.mxu0 %v12434_v32  ;;  %v4365_v59 = vld [vmem:[#allocation5 + $0x62] ss:$8 sm:$0x3]  ;;  %v4369_v15 = vld [vmem:[#allocation5 + $0x63] ss:$8 sm:$0x3] }
 0x90f   :  { %11829 = vmatpush3.bf16.msra.mxu1 %v12432_v35  ;;  %9923 = vmatprep.mubr.bf16.mxu1 %v4927_v58  ;;  %4367 = vst.msk [vmem:[#allocation6 + $0x68] ss:$2 sm:$0x3] %vm15405_vm13, %v4365_v59  ;;  %4371 = vst.msk [vmem:[#allocation6 + $0x6c] ss:$2 sm:$0x3] %vm15405_vm13, %v4369_v15 }
 0x910   :  { %11830 = vmatprep.subr.bf16.mxu1 %v12436_v25  ;;  %v4373_v38 = vld [vmem:[#allocation5 + $0x64] ss:$8 sm:$0x3]  ;;  %v4377_v51 = vld [vmem:[#allocation5 + $0x65] ss:$8 sm:$0x3]  ;;  %v4750_v25 = vcombine.high %v16712_v34, %v16712_v34 }
 0x911   :  { %11809 = vmatpush3.bf16.msra.mxu0 %v12435_v54  ;;  %4375 = vst.msk [vmem:[#allocation6 + $0x70] ss:$2 sm:$0x3] %vm15405_vm13, %v4373_v38  ;;  %4379 = vst.msk [vmem:[#allocation6 + $0x74] ss:$2 sm:$0x3] %vm15405_vm13, %v4377_v51 }
 0x912   :  { %11810 = vmatprep.subr.bf16.mxu0 %v12438_v62  ;;  %v4381_v20 = vld [vmem:[#allocation5 + $0x66] ss:$8 sm:$0x3]  ;;  %v4385_v10 = vld [vmem:[#allocation5 + $0x67] ss:$8 sm:$0x3]  ;;  %v4751_v62 = vcombine.high %v16721_v22, %v16721_v22 }
 0x913   :  { %11831 = vmatpush3.bf16.msra.mxu1 %v12437_v46  ;;  %4383 = vst.msk [vmem:[#allocation6 + $0x78] ss:$2 sm:$0x3] %vm15405_vm13, %v4381_v20  ;;  %4387 = vst.msk [vmem:[#allocation6 + $0x7c] ss:$2 sm:$0x3] %vm15405_vm13, %v4385_v10  ;;  %v4924_v46 = vpack.c.bf16 %v16567_v31, %v16567_v31 }
 0x914   :  { %11832 = vmatprep.subr.bf16.mxu1 %v12440_v60  ;;  %v4485_v17 = vld [vmem:[#allocation5 + $0x70] ss:$8 sm:$0x3]  ;;  %v4489_v19 = vld [vmem:[#allocation5 + $0x71] ss:$8 sm:$0x3]  ;;  %v4929_v60 = vpack.c.bf16 %v4750_v25, %v4750_v25  ;;  %v4931_v11 = vpack.c.bf16 %v4751_v62, %v4751_v62 }
 0x915   :  { %11811 = vmatpush3.bf16.msra.mxu0 %v12439_v45  ;;  %v11602_v43 = vpop.f32.mrf.mxu0  ;;  %4487 = vst.msk [vmem:[#allocation6 + $0x61] ss:$2 sm:$0x3] %vm15405_vm13, %v4485_v17  ;;  %4491 = vst.msk [vmem:[#allocation6 + $0x65] ss:$2 sm:$0x3] %vm15405_vm13, %v4489_v19 }
 0x916   :  { %v4493_v63 = vld [vmem:[#allocation5 + $0x72] ss:$8 sm:$0x3]  ;;  %v4497_v5 = vld [vmem:[#allocation5 + $0x73] ss:$8 sm:$0x3]  ;;  %11812 = vmatprep.subr.bf16.mxu0 %v12442_v48 }
 0x917   :  { %4495 = vst.msk [vmem:[#allocation6 + $0x69] ss:$2 sm:$0x3] %vm15405_vm13, %v4493_v63  ;;  %4499 = vst.msk [vmem:[#allocation6 + $0x6d] ss:$2 sm:$0x3] %vm15405_vm13, %v4497_v5  ;;  %11833 = vmatpush3.bf16.msra.mxu1 %v12441_v52  ;;  %v11603_v27 = vpop.f32.mrf.mxu0  ;;  %v11624_v6 = vpop.f32.mrf.mxu1 }
 0x918   :  { %v4501_v7 = vld [vmem:[#allocation5 + $0x74] ss:$8 sm:$0x3]  ;;  %v4505_v0 = vld [vmem:[#allocation5 + $0x75] ss:$8 sm:$0x3]  ;;  %v11604_v40 = vadd.f32 %v11603_v27, %v11602_v43  ;;  %11834 = vmatprep.subr.bf16.mxu1 %v12444_v21 }
 0x919   :  { %4503 = vst.msk [vmem:[#allocation6 + $0x71] ss:$2 sm:$0x3] %vm15405_vm13, %v4501_v7  ;;  %4507 = vst.msk [vmem:[#allocation6 + $0x75] ss:$2 sm:$0x3] %vm15405_vm13, %v4505_v0  ;;  %11813 = vmatpush3.bf16.msra.mxu0 %v12443_v13  ;;  %v11605_v41 = vpop.f32.mrf.mxu0  ;;  %v11625_v28 = vpop.f32.mrf.mxu1 }
 0x91a   :  { %v4509_v4 = vld [vmem:[#allocation5 + $0x76] ss:$8 sm:$0x3]  ;;  %v4513_v49 = vld [vmem:[#allocation5 + $0x77] ss:$8 sm:$0x3]  ;;  %v9486_v36 = vadd.f32 %v11604_v40, %v16536_v24  ;;  %v11626_v42 = vadd.f32 %v11625_v28, %v11624_v6  ;;  %11814 = vmatprep.subr.bf16.mxu0 %v12446_v23 }
 0x91b   :  { %4511 = vst.msk [vmem:[#allocation6 + $0x79] ss:$2 sm:$0x3] %vm15405_vm13, %v4509_v4  ;;  %4515 = vst.msk [vmem:[#allocation6 + $0x7d] ss:$2 sm:$0x3] %vm15405_vm13, %v4513_v49  ;;  %11835 = vmatpush3.bf16.msra.mxu1 %v12445_v55  ;;  %v11606_v3 = vpop.f32.mrf.mxu0  ;;  %v11627_v37 = vpop.f32.mrf.mxu1 }
 0x91c   :  { %v16685_v26 = vadd.f32 %v11626_v42, %v9486_v36  ;;  %11836 = vmatprep.subr.bf16.mxu1 %v12448_v56  ;;  %v12452_v24 = vld [vmem:[%s17296_s12 + $0xad0] sm:$0xff]   ;;  %v12458_v16 = vld [vmem:[%s17296_s12 + $0xa40] sm:$0xff]   ;;  %v12457_v50 = vld [vmem:[%s17296_s12 + $0xa88] sm:$0xff]  }
 0x91d   :  { %11815 = vmatpush3.bf16.msra.mxu0 %v12447_v14  ;;  %v11628_v33 = vpop.f32.mrf.mxu1  ;;  %v12460_v39 = vld [vmem:[%s17296_s12 + $0xac0] sm:$0xff]   ;;  %v12462_v35 = vld [vmem:[%s17296_s12 + $0xb78] sm:$0xff]   ;;  %v12467_v45 = vld [vmem:[%s17296_s12 + $0xb70] sm:$0xff]  }
 0x91e   :  { %11816 = vmatprep.subr.bf16.mxu0 %v12450_v61  ;;  %v12459_v32 = vld [vmem:[%s17296_s12 + $0xa00] sm:$0xff]   ;;  %v12464_v58 = vld [vmem:[%s17296_s12 + $0xbf8] sm:$0xff]   ;;  %v12469_v31 = vld [vmem:[%s17296_s12 + $0xbf0] sm:$0xff]  }
 0x91f   :  { %11837 = vmatpush3.bf16.msra.mxu1 %v12449_v18  ;;  %v12461_v53 = vld [vmem:[%s17296_s12 + $0xa80] sm:$0xff]   ;;  %v12463_v54 = vld [vmem:[%s17296_s12 + $0xb38] sm:$0xff]   ;;  %v12468_v52 = vld [vmem:[%s17296_s12 + $0xb30] sm:$0xff]  }
 0x920   :  { %11838 = vmatprep.subr.bf16.mxu1 %v12452_v24  ;;  %v12465_v48 = vld [vmem:[%s17296_s12 + $0xbb8] sm:$0xff]   ;;  %v12471_v59 = vld [vmem:[%s17296_s12 + $0xb68] sm:$0xff]   ;;  %v12470_v9 = vld [vmem:[%s17296_s12 + $0xbb0] sm:$0xff]  }
 0x921   :  { %11817 = vmatpush3.bf16.msra.mxu0 %v12451_v30  ;;  %v12473_v15 = vld [vmem:[%s17296_s12 + $0xbe8] sm:$0xff]   ;;  %v12475_v38 = vld [vmem:[%s17296_s12 + $0xb60] sm:$0xff]   ;;  %v12479_v23 = vld [vmem:[%s17296_s12 + $0xb58] sm:$0xff]  }
 0x922   :  { %11818 = vmatprep.subr.bf16.mxu0 %v12454_v29  ;;  %v12472_v21 = vld [vmem:[%s17296_s12 + $0xb28] sm:$0xff]   ;;  %v12477_v13 = vld [vmem:[%s17296_s12 + $0xbe0] sm:$0xff]   ;;  %v12481_v63 = vld [vmem:[%s17296_s12 + $0xbd8] sm:$0xff]  }
 0x923   :  { %11839 = vmatpush3.bf16.msra.mxu1 %v12453_v1  ;;  %v12474_v51 = vld [vmem:[%s17296_s12 + $0xba8] sm:$0xff]   ;;  %v12476_v10 = vld [vmem:[%s17296_s12 + $0xb20] sm:$0xff]   ;;  %v12480_v7 = vld [vmem:[%s17296_s12 + $0xb18] sm:$0xff]  }
 0x924   :  { %11840 = vmatprep.subr.bf16.mxu1 %v12456_v12  ;;  %v12478_v43 = vld [vmem:[%s17296_s12 + $0xba0] sm:$0xff]   ;;  %v12483_v6 = vld [vmem:[%s17296_s12 + $0xb50] sm:$0xff]   ;;  %v12482_v40 = vld [vmem:[%s17296_s12 + $0xb98] sm:$0xff]  }
 0x925   :  { %11819 = vmatpush3.bf16.msra.mxu0 %v12455_v8  ;;  %v12485_v28 = vld [vmem:[%s17296_s12 + $0xbd0] sm:$0xff]   ;;  %v12487_v42 = vld [vmem:[%s17296_s12 + $0xb48] sm:$0xff]   ;;  %v4528_v61 = vld [vmem:[#allocation6 + $0x60] sm:$0xff] }
 0x926   :  { %11820 = vmatprep.subr.bf16.mxu0 %v12458_v16  ;;  %v12484_v36 = vld [vmem:[%s17296_s12 + $0xb10] sm:$0xff]   ;;  %v12489_v37 = vld [vmem:[%s17296_s12 + $0xbc8] sm:$0xff]   ;;  %v12491_v24 = vld [vmem:[%s17296_s12 + $0xb40] sm:$0xff]   ;;  %v16825_v30 = vrot.slane %v4528_v61, %v15445_v2 }
 0x927   :  { %11841 = vmatpush3.bf16.msra.mxu1 %v12457_v50  ;;  %v12486_v3 = vld [vmem:[%s17296_s12 + $0xb90] sm:$0xff]   ;;  %v12488_v18 = vld [vmem:[%s17296_s12 + $0xb08] sm:$0xff]   ;;  %v12493_v29 = vld [vmem:[%s17296_s12 + $0xbc0] sm:$0xff]  }
 0x928   :  { %11842 = vmatprep.subr.bf16.mxu1 %v12460_v39  ;;  %v12490_v33 = vld [vmem:[%s17296_s12 + $0xb88] sm:$0xff]   ;;  %v12495_v12 = vld [vmem:[%s17296_s12 + $0xc78] sm:$0xff]   ;;  %v12494_v8 = vld [vmem:[%s17296_s12 + $0xb80] sm:$0xff]   ;;  %v4767_v44 = vcombine.high %v16825_v30, %v16825_v30 }
 0x929   :  { %11821 = vmatpush3.bf16.msra.mxu0 %v12459_v32  ;;  %v12497_v16 = vld [vmem:[%s17296_s12 + $0xcf8] sm:$0xff]   ;;  %v4928_v32 = vpack.c.bf16 %v16712_v34, %v16712_v34  ;;  %v12502_v34 = vld [vmem:[%s17296_s12 + $0xcf0] sm:$0xff]  }
 0x92a   :  { %11850 = vmatprep.subr.bf16.mxu0 %v12462_v35  ;;  %v12496_v50 = vld [vmem:[%s17296_s12 + $0xc38] sm:$0xff]   ;;  %v12500_v35 = vld [vmem:[%s17296_s12 + $0xc70] sm:$0xff]  }
 0x92b   :  { %11843 = vmatpush3.bf16.msra.mxu1 %v12461_v53  ;;  %v4933_v53 = vpack.c.bf16 %v4767_v44, %v4767_v44  ;;  %v12498_v25 = vld [vmem:[%s17296_s12 + $0xcb8] sm:$0xff]   ;;  %v12501_v62 = vld [vmem:[%s17296_s12 + $0xc30] sm:$0xff]  }
 0x92c   :  { %9884 = vmatmul.mubr.bf16.vlgmr.msra.gmra.mxu0 %v4924_v46  ;;  %11872 = vmatprep.subr.bf16.mxu1 %v12464_v58  ;;  %v4930_v58 = vpack.c.bf16 %v16721_v22, %v16721_v22  ;;  %v12504_v46 = vld [vmem:[%s17296_s12 + $0xc68] sm:$0xff]   ;;  %v12503_v22 = vld [vmem:[%s17296_s12 + $0xcb0] sm:$0xff]   ;;  %v12531_v44 = vld [vmem:[%s17296_s12 + $0xdb8] sm:$0xff]  }
 0x92d   :  { %11851 = vmatpush3.bf16.msra.mxu0 %v12463_v54  ;;  %9963 = vmatprep.mubr.bf16.mxu0 %v4929_v60  ;;  %v12505_v60 = vld [vmem:[%s17296_s12 + $0xc28] sm:$0xff]  }
 0x92e   :  { %9924 = vmatmul.mubr.bf16.vlgmr.msra.gmra.mxu1 %v4926_v57  ;;  %11852 = vmatprep.subr.bf16.mxu0 %v12467_v45  ;;  %v12506_v45 = vld [vmem:[%s17296_s12 + $0xce8] sm:$0xff]  }
 0x92f   :  { %11873 = vmatpush3.bf16.msra.mxu1 %v12465_v48  ;;  %10003 = vmatprep.mubr.bf16.mxu1 %v4931_v11  ;;  %v12508_v48 = vld [vmem:[%s17296_s12 + $0xc60] sm:$0xff]   ;;  %v12507_v57 = vld [vmem:[%s17296_s12 + $0xca8] sm:$0xff]  }
 0x930   :  { %11874 = vmatprep.subr.bf16.mxu1 %v12469_v31  ;;  %v12510_v31 = vld [vmem:[%s17296_s12 + $0xce0] sm:$0xff]  }
 0x931   :  { %11853 = vmatpush3.bf16.msra.mxu0 %v12468_v52  ;;  %v12509_v52 = vld [vmem:[%s17296_s12 + $0xc20] sm:$0xff]  }
 0x932   :  { %11854 = vmatprep.subr.bf16.mxu0 %v12471_v59  ;;  %v12512_v59 = vld [vmem:[%s17296_s12 + $0xc58] sm:$0xff]  }
 0x933   :  { %11875 = vmatpush3.bf16.msra.mxu1 %v12470_v9 }
 0x934   :  { %11876 = vmatprep.subr.bf16.mxu1 %v12473_v15 }
 0x935   :  { %11855 = vmatpush3.bf16.msra.mxu0 %v12472_v21  ;;  %v11646_v20 = vpop.f32.mrf.mxu0  ;;  %v12511_v21 = vld [vmem:[%s17296_s12 + $0xca0] sm:$0xff]  }
 0x936   :  { %11856 = vmatprep.subr.bf16.mxu0 %v12475_v38 }
 0x937   :  { %11877 = vmatpush3.bf16.msra.mxu1 %v12474_v51  ;;  %v11647_v17 = vpop.f32.mrf.mxu0  ;;  %v11668_v19 = vpop.f32.mrf.mxu1  ;;  %v12514_v51 = vld [vmem:[%s17296_s12 + $0xcd8] sm:$0xff]  }
 0x938   :  { %v11648_v55 = vadd.f32 %v11647_v17, %v11646_v20  ;;  %11878 = vmatprep.subr.bf16.mxu1 %v12477_v13 }
 0x939   :  { %11857 = vmatpush3.bf16.msra.mxu0 %v12476_v10  ;;  %v11649_v5 = vpop.f32.mrf.mxu0  ;;  %v11669_v56 = vpop.f32.mrf.mxu1  ;;  %v12513_v10 = vld [vmem:[%s17296_s12 + $0xc18] sm:$0xff]  }
 0x93a   :  { %v9566_v0 = vadd.f32 %v11648_v55, %v16685_v26  ;;  %v11670_v27 = vadd.f32 %v11669_v56, %v11668_v19  ;;  %11858 = vmatprep.subr.bf16.mxu0 %v12479_v23  ;;  %v4752_v26 = vcombine.high %v4528_v61, %v4528_v61  ;;  %v12516_v19 = vld [vmem:[%s17296_s12 + $0xc50] sm:$0xff]   ;;  %v12525_v61 = vld [vmem:[%s17296_s12 + $0xc00] sm:$0xff]  }
 0x93b   :  { %11879 = vmatpush3.bf16.msra.mxu1 %v12478_v43  ;;  %v11650_v4 = vpop.f32.mrf.mxu0  ;;  %v11671_v49 = vpop.f32.mrf.mxu1  ;;  %v12518_v56 = vld [vmem:[%s17296_s12 + $0xcd0] sm:$0xff]  }
 0x93c   :  { %v16798_v41 = vadd.f32 %v11670_v27, %v9566_v0  ;;  %11880 = vmatprep.subr.bf16.mxu1 %v12481_v63  ;;  %v16834_v1 = vrot.slane %v4752_v26, %v15445_v2  ;;  %v12515_v63 = vld [vmem:[%s17296_s12 + $0xc98] sm:$0xff]   ;;  %v12517_v0 = vld [vmem:[%s17296_s12 + $0xc10] sm:$0xff]   ;;  %v12520_v27 = vld [vmem:[%s17296_s12 + $0xc48] sm:$0xff]  }
 0x93d   :  { %11859 = vmatpush3.bf16.msra.mxu0 %v12480_v7  ;;  %v11672_v14 = vpop.f32.mrf.mxu1  ;;  %v12519_v4 = vld [vmem:[%s17296_s12 + $0xc90] sm:$0xff]   ;;  %v12522_v49 = vld [vmem:[%s17296_s12 + $0xcc8] sm:$0xff]  }
 0x93e   :  { %11860 = vmatprep.subr.bf16.mxu0 %v12483_v6  ;;  %v4768_v39 = vcombine.high %v16834_v1, %v16834_v1  ;;  %v4529_v6 = vld [vmem:[#allocation6 + $0x68] sm:$0xff] }
 0x93f   :  { %11881 = vmatpush3.bf16.msra.mxu1 %v12482_v40  ;;  %v12521_v40 = vld [vmem:[%s17296_s12 + $0xc08] sm:$0xff]  }
 0x940   :  { %11882 = vmatprep.subr.bf16.mxu1 %v12485_v28  ;;  %v4935_v54 = vpack.c.bf16 %v4768_v39, %v4768_v39  ;;  %v12524_v28 = vld [vmem:[%s17296_s12 + $0xc40] sm:$0xff]   ;;  %v12523_v14 = vld [vmem:[%s17296_s12 + $0xc88] sm:$0xff]   ;;  %v12534_v39 = vld [vmem:[%s17296_s12 + $0xd30] sm:$0xff]  }
 0x941   :  { %11861 = vmatpush3.bf16.msra.mxu0 %v12484_v36  ;;  %v16938_v36 = vrot.slane %v4529_v6, %v15445_v2 }
 0x942   :  { %11862 = vmatprep.subr.bf16.mxu0 %v12487_v42  ;;  %v12526_v42 = vld [vmem:[%s17296_s12 + $0xcc0] sm:$0xff]  }
 0x943   :  { %11883 = vmatpush3.bf16.msra.mxu1 %v12486_v3  ;;  %v4784_v26 = vcombine.high %v16938_v36, %v16938_v36 }
 0x944   :  { %11884 = vmatprep.subr.bf16.mxu1 %v12489_v37  ;;  %v12528_v37 = vld [vmem:[%s17296_s12 + $0xd78] sm:$0xff]  }
 0x945   :  { %11863 = vmatpush3.bf16.msra.mxu0 %v12488_v18  ;;  %v12527_v18 = vld [vmem:[%s17296_s12 + $0xc80] sm:$0xff]  }
 0x946   :  { %11864 = vmatprep.subr.bf16.mxu0 %v12491_v24  ;;  %v12530_v24 = vld [vmem:[%s17296_s12 + $0xdf8] sm:$0xff]  }
 0x947   :  { %11885 = vmatpush3.bf16.msra.mxu1 %v12490_v33  ;;  %v12529_v33 = vld [vmem:[%s17296_s12 + $0xd38] sm:$0xff]  }
 0x948   :  { %11886 = vmatprep.subr.bf16.mxu1 %v12493_v29 }
 0x949   :  { %11865 = vmatpush3.bf16.msra.mxu0 %v12492_v47  ;;  %v4932_v47 = vpack.c.bf16 %v16825_v30, %v16825_v30  ;;  %v12535_v30 = vld [vmem:[%s17296_s12 + $0xdf0] sm:$0xff]  }
 0x94a   :  { %11894 = vmatprep.subr.bf16.mxu0 %v12495_v12  ;;  %v12533_v12 = vld [vmem:[%s17296_s12 + $0xd70] sm:$0xff]  }
 0x94b   :  { %11887 = vmatpush3.bf16.msra.mxu1 %v12494_v8  ;;  %v4937_v8 = vpack.c.bf16 %v4784_v26, %v4784_v26  ;;  %v12578_v26 = vld [vmem:[%s17296_s12 + $0xe58] sm:$0xff]  }
 0x94c   :  { %9964 = vmatmul.mubr.bf16.vlgmr.msra.gmra.mxu0 %v4928_v32  ;;  %11916 = vmatprep.subr.bf16.mxu1 %v12497_v16  ;;  %v4934_v16 = vpack.c.bf16 %v16834_v1, %v16834_v1  ;;  %v12537_v32 = vld [vmem:[%s17296_s12 + $0xd68] sm:$0xff]   ;;  %v12536_v1 = vld [vmem:[%s17296_s12 + $0xdb0] sm:$0xff]  }
 0x94d   :  { %11895 = vmatpush3.bf16.msra.mxu0 %v12496_v50  ;;  %10043 = vmatprep.mubr.bf16.mxu0 %v4933_v53  ;;  %v12538_v53 = vld [vmem:[%s17296_s12 + $0xd28] sm:$0xff]  }
 0x94e   :  { %10004 = vmatmul.mubr.bf16.vlgmr.msra.gmra.mxu1 %v4930_v58  ;;  %11896 = vmatprep.subr.bf16.mxu0 %v12500_v35  ;;  %v12539_v35 = vld [vmem:[%s17296_s12 + $0xde8] sm:$0xff]  }
 0x94f   :  { %11917 = vmatpush3.bf16.msra.mxu1 %v12498_v25  ;;  %10083 = vmatprep.mubr.bf16.mxu1 %v4935_v54  ;;  %v12541_v25 = vld [vmem:[%s17296_s12 + $0xd60] sm:$0xff]   ;;  %v12540_v58 = vld [vmem:[%s17296_s12 + $0xda8] sm:$0xff]  }
 0x950   :  { %11918 = vmatprep.subr.bf16.mxu1 %v12502_v34  ;;  %v12543_v34 = vld [vmem:[%s17296_s12 + $0xde0] sm:$0xff]  }
 0x951   :  { %11897 = vmatpush3.bf16.msra.mxu0 %v12501_v62  ;;  %v12542_v54 = vld [vmem:[%s17296_s12 + $0xd20] sm:$0xff]   ;;  %v12545_v62 = vld [vmem:[%s17296_s12 + $0xd58] sm:$0xff]  }
 0x952   :  { %11898 = vmatprep.subr.bf16.mxu0 %v12504_v46  ;;  %v12544_v46 = vld [vmem:[%s17296_s12 + $0xda0] sm:$0xff]  }
 0x953   :  { %11919 = vmatpush3.bf16.msra.mxu1 %v12503_v22  ;;  %v12547_v22 = vld [vmem:[%s17296_s12 + $0xdd8] sm:$0xff]  }
 0x954   :  { %11920 = vmatprep.subr.bf16.mxu1 %v12506_v45  ;;  %v12546_v45 = vld [vmem:[%s17296_s12 + $0xd18] sm:$0xff]  }
 0x955   :  { %11899 = vmatpush3.bf16.msra.mxu0 %v12505_v60  ;;  %v11690_v11 = vpop.f32.mrf.mxu0  ;;  %v12549_v60 = vld [vmem:[%s17296_s12 + $0xd50] sm:$0xff]  }
 0x956   :  { %11900 = vmatprep.subr.bf16.mxu0 %v12508_v48  ;;  %v12548_v48 = vld [vmem:[%s17296_s12 + $0xd98] sm:$0xff]  }
 0x957   :  { %11921 = vmatpush3.bf16.msra.mxu1 %v12507_v57  ;;  %v11691_v9 = vpop.f32.mrf.mxu0  ;;  %v11712_v15 = vpop.f32.mrf.mxu1  ;;  %v12551_v57 = vld [vmem:[%s17296_s12 + $0xdd0] sm:$0xff]  }
 0x958   :  { %v11692_v38 = vadd.f32 %v11691_v9, %v11690_v11  ;;  %11922 = vmatprep.subr.bf16.mxu1 %v12510_v31  ;;  %v12550_v31 = vld [vmem:[%s17296_s12 + $0xd10] sm:$0xff]   ;;  %v12553_v11 = vld [vmem:[%s17296_s12 + $0xd48] sm:$0xff]  }
 0x959   :  { %11901 = vmatpush3.bf16.msra.mxu0 %v12509_v52  ;;  %v11693_v13 = vpop.f32.mrf.mxu0  ;;  %v11713_v20 = vpop.f32.mrf.mxu1  ;;  %v4530_v52 = vld [vmem:[#allocation6 + $0x70] sm:$0xff]  ;;  %v12555_v9 = vld [vmem:[%s17296_s12 + $0xdc8] sm:$0xff]  }
 0x95a   :  { %v9646_v23 = vadd.f32 %v11692_v38, %v16798_v41  ;;  %v11714_v17 = vadd.f32 %v11713_v20, %v11712_v15  ;;  %11902 = vmatprep.subr.bf16.mxu0 %v12512_v59  ;;  %v4769_v41 = vcombine.high %v4529_v6, %v4529_v6  ;;  %v12552_v59 = vld [vmem:[%s17296_s12 + $0xd90] sm:$0xff]   ;;  %v12554_v15 = vld [vmem:[%s17296_s12 + $0xd08] sm:$0xff]   ;;  %v12557_v38 = vld [vmem:[%s17296_s12 + $0xd40] sm:$0xff]   ;;  %v17048_v13 = vrot.slane %v4530_v52, %v15445_v2 }
 0x95b   :  { %11923 = vmatpush3.bf16.msra.mxu1 %v12511_v21  ;;  %v11694_v43 = vpop.f32.mrf.mxu0  ;;  %v11715_v55 = vpop.f32.mrf.mxu1  ;;  %v4786_v21 = vcombine.high %v4530_v52, %v4530_v52  ;;  %v12559_v20 = vld [vmem:[%s17296_s12 + $0xdc0] sm:$0xff]   ;;  %v12564_v6 = vld [vmem:[%s17296_s12 + $0xeb8] sm:$0xff]  }
 0x95c   :  { %v16911_v5 = vadd.f32 %v11714_v17, %v9646_v23  ;;  %11924 = vmatprep.subr.bf16.mxu1 %v12514_v51  ;;  %v16947_v3 = vrot.slane %v4769_v41, %v15445_v2  ;;  %v12556_v51 = vld [vmem:[%s17296_s12 + $0xd88] sm:$0xff]   ;;  %v12561_v17 = vld [vmem:[%s17296_s12 + $0xe78] sm:$0xff]   ;;  %v4801_v43 = vcombine.high %v17048_v13, %v17048_v13  ;;  %v12567_v41 = vld [vmem:[%s17296_s12 + $0xe30] sm:$0xff]  }
 0x95d   :  { %11903 = vmatpush3.bf16.msra.mxu0 %v12513_v10  ;;  %v11716_v7 = vpop.f32.mrf.mxu1  ;;  %v12558_v10 = vld [vmem:[%s17296_s12 + $0xd00] sm:$0xff]   ;;  %v17057_v23 = vrot.slane %v4786_v21, %v15445_v2  ;;  %v12563_v55 = vld [vmem:[%s17296_s12 + $0xef8] sm:$0xff]   ;;  %v12600_v21 = vld [vmem:[%s17296_s12 + $0xf30] sm:$0xff]  }
 0x95e   :  { %11904 = vmatprep.subr.bf16.mxu0 %v12516_v19  ;;  %v4785_v29 = vcombine.high %v16947_v3, %v16947_v3  ;;  %v12560_v19 = vld [vmem:[%s17296_s12 + $0xd80] sm:$0xff]   ;;  %v4936_v7 = vpack.c.bf16 %v16938_v36, %v16938_v36  ;;  %v12572_v36 = vld [vmem:[%s17296_s12 + $0xee8] sm:$0xff]  }
 0x95f   :  { %11925 = vmatpush3.bf16.msra.mxu1 %v12515_v63  ;;  %v12562_v63 = vld [vmem:[%s17296_s12 + $0xe38] sm:$0xff]  }
 0x960   :  { %11926 = vmatprep.subr.bf16.mxu1 %v12518_v56  ;;  %v4939_v50 = vpack.c.bf16 %v4785_v29, %v4785_v29  ;;  %v4802_v56 = vcombine.high %v17057_v23, %v17057_v23  ;;  %v12579_v29 = vld [vmem:[%s17296_s12 + $0xe18] sm:$0xff]  }
 0x961   :  { %11905 = vmatpush3.bf16.msra.mxu0 %v12517_v0  ;;  %v12566_v0 = vld [vmem:[%s17296_s12 + $0xe70] sm:$0xff]  }
 0x962   :  { %11906 = vmatprep.subr.bf16.mxu0 %v12520_v27  ;;  %v4941_v27 = vpack.c.bf16 %v4801_v43, %v4801_v43 }
 0x963   :  { %11927 = vmatpush3.bf16.msra.mxu1 %v12519_v4  ;;  %v4938_v4 = vpack.c.bf16 %v16947_v3, %v16947_v3  ;;  %v12573_v3 = vld [vmem:[%s17296_s12 + $0xea8] sm:$0xff]  }
 0x964   :  { %11928 = vmatprep.subr.bf16.mxu1 %v12522_v49  ;;  %v12568_v49 = vld [vmem:[%s17296_s12 + $0xef0] sm:$0xff]  }
 0x965   :  { %11907 = vmatpush3.bf16.msra.mxu0 %v12521_v40  ;;  %v4943_v40 = vpack.c.bf16 %v4802_v56, %v4802_v56 }
 0x966   :  { %11908 = vmatprep.subr.bf16.mxu0 %v12524_v28  ;;  %v12570_v28 = vld [vmem:[%s17296_s12 + $0xe68] sm:$0xff]  }
 0x967   :  { %11929 = vmatpush3.bf16.msra.mxu1 %v12523_v14  ;;  %v12569_v14 = vld [vmem:[%s17296_s12 + $0xeb0] sm:$0xff]  }
 0x968   :  { %11930 = vmatprep.subr.bf16.mxu1 %v12526_v42  ;;  %v12571_v42 = vld [vmem:[%s17296_s12 + $0xe28] sm:$0xff]  }
 0x969   :  { %11909 = vmatpush3.bf16.msra.mxu0 %v12525_v61  ;;  %v12574_v61 = vld [vmem:[%s17296_s12 + $0xe60] sm:$0xff]  }
 0x96a   :  { %11938 = vmatprep.subr.bf16.mxu0 %v12528_v37  ;;  %v12576_v37 = vld [vmem:[%s17296_s12 + $0xee0] sm:$0xff]  }
 0x96b   :  { %11931 = vmatpush3.bf16.msra.mxu1 %v12527_v18  ;;  %v12575_v18 = vld [vmem:[%s17296_s12 + $0xe20] sm:$0xff]  }
 0x96c   :  { %10044 = vmatmul.mubr.bf16.vlgmr.msra.gmra.mxu0 %v4932_v47  ;;  %11960 = vmatprep.subr.bf16.mxu1 %v12530_v24  ;;  %v12577_v24 = vld [vmem:[%s17296_s12 + $0xea0] sm:$0xff]   ;;  %v12582_v47 = vld [vmem:[%s17296_s12 + $0xe50] sm:$0xff]  }
 0x96d   :  { %11939 = vmatpush3.bf16.msra.mxu0 %v12529_v33  ;;  %10123 = vmatprep.mubr.bf16.mxu0 %v4937_v8  ;;  %v12580_v33 = vld [vmem:[%s17296_s12 + $0xed8] sm:$0xff]   ;;  %v12584_v8 = vld [vmem:[%s17296_s12 + $0xed0] sm:$0xff]  }
 0x96e   :  { %10084 = vmatmul.mubr.bf16.vlgmr.msra.gmra.mxu1 %v4934_v16  ;;  %11940 = vmatprep.subr.bf16.mxu0 %v12533_v12  ;;  %v12581_v12 = vld [vmem:[%s17296_s12 + $0xe98] sm:$0xff]   ;;  %v12586_v16 = vld [vmem:[%s17296_s12 + $0xe48] sm:$0xff]  }
 0x96f   :  { %11961 = vmatpush3.bf16.msra.mxu1 %v12531_v44  ;;  %10163 = vmatprep.mubr.bf16.mxu1 %v4939_v50  ;;  %v12583_v44 = vld [vmem:[%s17296_s12 + $0xe10] sm:$0xff]  }
 0x970   :  { %11962 = vmatprep.subr.bf16.mxu1 %v12535_v30  ;;  %v4531_v30 = vld [vmem:[#allocation6 + $0x78] sm:$0xff]  ;;  %v12585_v50 = vld [vmem:[%s17296_s12 + $0xe90] sm:$0xff]  }
 0x971   :  { %11941 = vmatpush3.bf16.msra.mxu0 %v12534_v39  ;;  %v12588_v39 = vld [vmem:[%s17296_s12 + $0xec8] sm:$0xff]  }
 0x972   :  { %11942 = vmatprep.subr.bf16.mxu0 %v12537_v32  ;;  %v12587_v32 = vld [vmem:[%s17296_s12 + $0xe08] sm:$0xff]  }
 0x973   :  { %11963 = vmatpush3.bf16.msra.mxu1 %v12536_v1  ;;  %v4803_v1 = vcombine.high %v4531_v30, %v4531_v30 }
 0x974   :  { %11964 = vmatprep.subr.bf16.mxu1 %v12539_v35  ;;  %v12590_v35 = vld [vmem:[%s17296_s12 + $0xe40] sm:$0xff]  }
 0x975   :  { %11943 = vmatpush3.bf16.msra.mxu0 %v12538_v53  ;;  %v12589_v53 = vld [vmem:[%s17296_s12 + $0xe88] sm:$0xff]  }
 0x976   :  { %11944 = vmatprep.subr.bf16.mxu0 %v12541_v25  ;;  %v17158_v25 = vrot.slane %v4531_v30, %v15445_v2 }
 0x977   :  { %11965 = vmatpush3.bf16.msra.mxu1 %v12540_v58  ;;  %v12592_v58 = vld [vmem:[%s17296_s12 + $0xec0] sm:$0xff]  }
 0x978   :  { %11966 = vmatprep.subr.bf16.mxu1 %v12543_v34  ;;  %v12591_v34 = vld [vmem:[%s17296_s12 + $0xe00] sm:$0xff]  }
 0x979   :  { %11945 = vmatpush3.bf16.msra.mxu0 %v12542_v54  ;;  %v17167_v54 = vrot.slane %v4803_v1, %v15445_v2  ;;  %v12595_v2 = vld [vmem:[%s17296_s12 + $0xf38] sm:$0xff]  }
 0x97a   :  { %11946 = vmatprep.subr.bf16.mxu0 %v12545_v62  ;;  %v12594_v62 = vld [vmem:[%s17296_s12 + $0xf78] sm:$0xff]  }
 0x97b   :  { %11967 = vmatpush3.bf16.msra.mxu1 %v12544_v46  ;;  %v12593_v46 = vld [vmem:[%s17296_s12 + $0xe80] sm:$0xff]   ;;  %v4946_v30 = vpack.c.bf16 %v17167_v54, %v17167_v54 }
 0x97c   :  { %11968 = vmatprep.subr.bf16.mxu1 %v12547_v22  ;;  %v4818_v22 = vcombine.high %v17158_v25, %v17158_v25 }
 0x97d   :  { %11947 = vmatpush3.bf16.msra.mxu0 %v12546_v45  ;;  %v12596_v45 = vld [vmem:[%s17296_s12 + $0xff8] sm:$0xff]  }
 0x97e   :  { %11948 = vmatprep.subr.bf16.mxu0 %v12549_v60  ;;  %v4819_v60 = vcombine.high %v17167_v54, %v17167_v54 }
 0x97f   :  { %11969 = vmatpush3.bf16.msra.mxu1 %v12548_v48  ;;  %v4940_v48 = vpack.c.bf16 %v17048_v13, %v17048_v13  ;;  %v12603_v13 = vld [vmem:[%s17296_s12 + $0xf68] sm:$0xff]  }
 0x980   :  { %11970 = vmatprep.subr.bf16.mxu1 %v12551_v57  ;;  %v12599_v57 = vld [vmem:[%s17296_s12 + $0xf70] sm:$0xff]  }
 0x981   :  { %11949 = vmatpush3.bf16.msra.mxu0 %v12550_v31  ;;  %v4945_v31 = vpack.c.bf16 %v4818_v22, %v4818_v22 }
 0x982   :  { %11950 = vmatprep.subr.bf16.mxu0 %v12553_v11  ;;  %v12597_v11 = vld [vmem:[%s17296_s12 + $0xfb8] sm:$0xff]  }
 0x983   :  { %11971 = vmatpush3.bf16.msra.mxu1 %v12552_v59  ;;  %v4942_v59 = vpack.c.bf16 %v17057_v23, %v17057_v23 }
 0x984   :  { %11972 = vmatprep.subr.bf16.mxu1 %v12555_v9  ;;  %v12601_v9 = vld [vmem:[%s17296_s12 + $0xff0] sm:$0xff]  }
 0x985   :  { %11951 = vmatpush3.bf16.msra.mxu0 %v12554_v15  ;;  %v4947_v15 = vpack.c.bf16 %v4819_v60, %v4819_v60 }
 0x986   :  { %11952 = vmatprep.subr.bf16.mxu0 %v12557_v38 }
 0x987   :  { %11973 = vmatpush3.bf16.msra.mxu1 %v12556_v51 }
 0x988   :  { %11974 = vmatprep.subr.bf16.mxu1 %v12559_v20 }
 0x989   :  { %11953 = vmatpush3.bf16.msra.mxu0 %v12558_v10  ;;  %v12602_v10 = vld [vmem:[%s17296_s12 + $0xfb0] sm:$0xff]  }
 0x98a   :  { %11982 = vmatprep.subr.bf16.mxu0 %v12561_v17 }
 0x98b   :  { %11975 = vmatpush3.bf16.msra.mxu1 %v12560_v19  ;;  %v12605_v19 = vld [vmem:[%s17296_s12 + $0xfe8] sm:$0xff]  }
 0x98c   :  { %10124 = vmatmul.mubr.bf16.vlgmr.msra.gmra.mxu0 %v4936_v7  ;;  %12004 = vmatprep.subr.bf16.mxu1 %v12563_v55 }
 0x98d   :  { %11983 = vmatpush3.bf16.msra.mxu0 %v12562_v63  ;;  %10203 = vmatprep.mubr.bf16.mxu0 %v4941_v27  ;;  %v12604_v63 = vld [vmem:[%s17296_s12 + $0xf28] sm:$0xff]  }
 0x98e   :  { %10164 = vmatmul.mubr.bf16.vlgmr.msra.gmra.mxu1 %v4938_v4  ;;  %11984 = vmatprep.subr.bf16.mxu0 %v12566_v0  ;;  %v12607_v0 = vld [vmem:[%s17296_s12 + $0xf60] sm:$0xff]  }
 0x98f   :  { %12005 = vmatpush3.bf16.msra.mxu1 %v12564_v6  ;;  %10243 = vmatprep.mubr.bf16.mxu1 %v4943_v40  ;;  %v12606_v6 = vld [vmem:[%s17296_s12 + $0xfa8] sm:$0xff]   ;;  %v12609_v4 = vld [vmem:[%s17296_s12 + $0xfe0] sm:$0xff]   ;;  %v12611_v40 = vld [vmem:[%s17296_s12 + $0xf58] sm:$0xff]  }
 0x990   :  { %12006 = vmatprep.subr.bf16.mxu1 %v12568_v49  ;;  %v12608_v49 = vld [vmem:[%s17296_s12 + $0xf20] sm:$0xff]  }
 0x991   :  { %11985 = vmatpush3.bf16.msra.mxu0 %v12567_v41  ;;  %v12610_v41 = vld [vmem:[%s17296_s12 + $0xfa0] sm:$0xff]  }
 0x992   :  { %11986 = vmatprep.subr.bf16.mxu0 %v12570_v28  ;;  %v12613_v28 = vld [vmem:[%s17296_s12 + $0xfd8] sm:$0xff]  }
 0x993   :  { %12007 = vmatpush3.bf16.msra.mxu1 %v12569_v14  ;;  %v12612_v14 = vld [vmem:[%s17296_s12 + $0xf18] sm:$0xff]  }
 0x994   :  { %12008 = vmatprep.subr.bf16.mxu1 %v12572_v36  ;;  %v12615_v36 = vld [vmem:[%s17296_s12 + $0xf50] sm:$0xff]  }
 0x995   :  { %11987 = vmatpush3.bf16.msra.mxu0 %v12571_v42  ;;  %v12614_v42 = vld [vmem:[%s17296_s12 + $0xf98] sm:$0xff]  }
 0x996   :  { %11988 = vmatprep.subr.bf16.mxu0 %v12574_v61  ;;  %v12617_v61 = vld [vmem:[%s17296_s12 + $0xfd0] sm:$0xff]  }
 0x997   :  { %12009 = vmatpush3.bf16.msra.mxu1 %v12573_v3  ;;  %v12616_v3 = vld [vmem:[%s17296_s12 + $0xf10] sm:$0xff]  }
 0x998   :  { %12010 = vmatprep.subr.bf16.mxu1 %v12576_v37  ;;  %v12619_v37 = vld [vmem:[%s17296_s12 + $0xf48] sm:$0xff]  }
 0x999   :  { %11989 = vmatpush3.bf16.msra.mxu0 %v12575_v18  ;;  %v12618_v18 = vld [vmem:[%s17296_s12 + $0xf90] sm:$0xff]  }
 0x99a   :  { %11990 = vmatprep.subr.bf16.mxu0 %v12578_v26  ;;  %v12621_v26 = vld [vmem:[%s17296_s12 + $0xfc8] sm:$0xff]  }
 0x99b   :  { %12011 = vmatpush3.bf16.msra.mxu1 %v12577_v24  ;;  %v12620_v24 = vld [vmem:[%s17296_s12 + $0xf08] sm:$0xff]  }
 0x99c   :  { %12012 = vmatprep.subr.bf16.mxu1 %v12580_v33  ;;  %v12623_v33 = vld [vmem:[%s17296_s12 + $0xf40] sm:$0xff]  }
 0x99d   :  { %11991 = vmatpush3.bf16.msra.mxu0 %v12579_v29  ;;  %v12622_v29 = vld [vmem:[%s17296_s12 + $0xf88] sm:$0xff]  }
 0x99e   :  { %11992 = vmatprep.subr.bf16.mxu0 %v12582_v47  ;;  %v12625_v47 = vld [vmem:[%s17296_s12 + $0xfc0] sm:$0xff]  }
 0x99f   :  { %12013 = vmatpush3.bf16.msra.mxu1 %v12581_v12  ;;  %v12624_v12 = vld [vmem:[%s17296_s12 + $0xf00] sm:$0xff]  }
 0x9a0   :  { %12014 = vmatprep.subr.bf16.mxu1 %v12584_v8  ;;  %v12626_v8 = vld [vmem:[%s17296_s12 + $0xf80] sm:$0xff]   ;;  %s12672_s12 = smov [#allocation7]  }
 0x9a1   :  { %11993 = vmatpush3.bf16.msra.mxu0 %v12583_v44  ;;  %v4944_v44 = vpack.c.bf16 %v17158_v25, %v17158_v25  ;;  %s10338_s4 = sshll.u32 %s12672_s12, 4  ;;  %s10339_s4 = int_to_ptr.vmem [resolvable:$true] %s10338_s4 }
 0x9a2   :  { %11994 = vmatprep.subr.bf16.mxu0 %v12586_v16  ;;  %s12639_s10 = scalar_lea.vmem %s10339_s4, 32  ;;  %p12644_p1 = scmp.lt.s32.totalorder %s10339_s4, %s10339_s4 }
 0x9a3   :  { %12015 = vmatpush3.bf16.msra.mxu1 %v12585_v50  ;;  %p12640_p0 = scmp.ne.s32.totalorder %s10339_s4, %s12639_s10  ;;  %p12645_p2 = scmp.lt.s32.totalorder %s12639_s10, %s12639_s10 }
 0x9a4   :  { %12016 = vmatprep.subr.bf16.mxu1 %v12588_v39 }
 0x9a5   :  { %11995 = vmatpush3.bf16.msra.mxu0 %v12587_v32  ;;  %p12646_p3 = por %p12645_p2, %p12644_p1 }
 0x9a6   :  { %11996 = vmatprep.subr.bf16.mxu0 %v12590_v35 }
 0x9a7   :  { %12017 = vmatpush3.bf16.msra.mxu1 %v12589_v53  ;;  %p12647_p4 = pnand %p12646_p3, %p12640_p0 }
 0x9a8   :  { %12018 = vmatprep.subr.bf16.mxu1 %v12592_v58 }
 0x9a9   :  { %11997 = vmatpush3.bf16.msra.mxu0 %v12591_v34 }
 0x9aa   :  { %12026 = vmatprep.subr.bf16.mxu0 %v12594_v62 }
 0x9ab   :  { %12019 = vmatpush3.bf16.msra.mxu1 %v12593_v46 }
 0x9ac   :  { %10204 = vmatmul.mubr.bf16.vlgmr.msra.gmra.mxu0 %v4940_v48  ;;  %v11734_v52 = vpop.f32.mrf.mxu0  ;;  %12048 = vmatprep.subr.bf16.mxu1 %v12596_v45 }
 0x9ad   :  { %12027 = vmatpush3.bf16.msra.mxu0 %v12595_v2  ;;  %10283 = vmatprep.mubr.bf16.mxu0 %v4945_v31 }
 0x9ae   :  { %10244 = vmatmul.mubr.bf16.vlgmr.msra.gmra.mxu1 %v4942_v59  ;;  %v11735_v38 = vpop.f32.mrf.mxu0  ;;  %v11756_v51 = vpop.f32.mrf.mxu1  ;;  %12028 = vmatprep.subr.bf16.mxu0 %v12599_v57 }
 0x9af   :  { %v11736_v20 = vadd.f32 %v11735_v38, %v11734_v52  ;;  %12049 = vmatpush3.bf16.msra.mxu1 %v12597_v11  ;;  %10323 = vmatprep.mubr.bf16.mxu1 %v4947_v15 }
 0x9b0   :  { %v11737_v23 = vpop.f32.mrf.mxu0  ;;  %v11757_v17 = vpop.f32.mrf.mxu1  ;;  %12050 = vmatprep.subr.bf16.mxu1 %v12601_v9 }
 0x9b1   :  { %v9726_v43 = vadd.f32 %v11736_v20, %v16911_v5  ;;  %v11758_v55 = vadd.f32 %v11757_v17, %v11756_v51  ;;  %12029 = vmatpush3.bf16.msra.mxu0 %v12600_v21 }
 0x9b2   :  { %v11738_v56 = vpop.f32.mrf.mxu0  ;;  %v11759_v7 = vpop.f32.mrf.mxu1  ;;  %12030 = vmatprep.subr.bf16.mxu0 %v12603_v13 }
 0x9b3   :  { %v9766_v27 = vadd.f32 %v11758_v55, %v9726_v43  ;;  %12051 = vmatpush3.bf16.msra.mxu1 %v12602_v10 }
 0x9b4   :  { %v11760_v5 = vpop.f32.mrf.mxu1  ;;  %12052 = vmatprep.subr.bf16.mxu1 %v12605_v19 }
 0x9b5   :  { %12031 = vmatpush3.bf16.msra.mxu0 %v12604_v63 }
 0x9b6   :  { %12032 = vmatprep.subr.bf16.mxu0 %v12607_v0 }
 0x9b7   :  { %12053 = vmatpush3.bf16.msra.mxu1 %v12606_v6 }
 0x9b8   :  { %12054 = vmatprep.subr.bf16.mxu1 %v12609_v4 }
 0x9b9   :  { %12033 = vmatpush3.bf16.msra.mxu0 %v12608_v49 }
 0x9ba   :  { %12034 = vmatprep.subr.bf16.mxu0 %v12611_v40 }
 0x9bb   :  { %12055 = vmatpush3.bf16.msra.mxu1 %v12610_v41 }
 0x9bc   :  { %12056 = vmatprep.subr.bf16.mxu1 %v12613_v28 }
 0x9bd   :  { %12035 = vmatpush3.bf16.msra.mxu0 %v12612_v14 }
 0x9be   :  { %12036 = vmatprep.subr.bf16.mxu0 %v12615_v36 }
 0x9bf   :  { %12057 = vmatpush3.bf16.msra.mxu1 %v12614_v42 }
 0x9c0   :  { %12058 = vmatprep.subr.bf16.mxu1 %v12617_v61 }
 0x9c1   :  { %12037 = vmatpush3.bf16.msra.mxu0 %v12616_v3 }
 0x9c2   :  { %12038 = vmatprep.subr.bf16.mxu0 %v12619_v37 }
 0x9c3   :  { %12059 = vmatpush3.bf16.msra.mxu1 %v12618_v18 }
 0x9c4   :  { %12060 = vmatprep.subr.bf16.mxu1 %v12621_v26 }
 0x9c5   :  { %12039 = vmatpush3.bf16.msra.mxu0 %v12620_v24 }
 0x9c6   :  { %12040 = vmatprep.subr.bf16.mxu0 %v12623_v33 }
 0x9c7   :  { %12061 = vmatpush3.bf16.msra.mxu1 %v12622_v29 }
 0x9c8   :  { %12062 = vmatprep.subr.bf16.mxu1 %v12625_v47 }
 0x9c9   :  { %12041 = vmatpush3.bf16.msra.mxu0 %v12624_v12 }
 0x9cb   :  { %12063 = vmatpush3.bf16.msra.mxu1 %v12626_v8 }
 0x9cc   :  { %v11778_v16 = vpop.f32.mrf.mxu0  ;;  %10284 = vmatmul.mubr.bf16.vlgmr.msra.gmra.mxu0 %v4944_v44 }
 0x9ce   :  { %v11779_v50 = vpop.f32.mrf.mxu0  ;;  %v11800_v39 = vpop.f32.mrf.mxu1  ;;  %10324 = vmatmul.mubr.bf16.vlgmr.msra.gmra.mxu1 %v4946_v30 }
 0x9cf   :  { %v11780_v32 = vadd.f32 %v11779_v50, %v11778_v16 }
 0x9d0   :  { %v11781_v1 = vpop.f32.mrf.mxu0  ;;  %v11801_v35 = vpop.f32.mrf.mxu1 }
 0x9d1   :  { %v9806_v53 = vadd.f32 %v11780_v32, %v9766_v27  ;;  %v11802_v58 = vadd.f32 %v11801_v35, %v11800_v39 }
 0x9d2   :  { %v11782_v34 = vpop.f32.mrf.mxu0  ;;  %v11803_v62 = vpop.f32.mrf.mxu1 }
 0x9d3   :  { %v9846_v46 = vadd.f32 %v11802_v58, %v9806_v53 }
 0x9d4   :  { %v11804_v22 = vpop.f32.mrf.mxu1 }
 0x9ec   :  { %v11822_v45 = vpop.f32.mrf.mxu0 }
 0x9ee   :  { %v11823_v25 = vpop.f32.mrf.mxu0  ;;  %v11844_v2 = vpop.f32.mrf.mxu1 }
 0x9ef   :  { %v11824_v60 = vadd.f32 %v11823_v25, %v11822_v45 }
 0x9f0   :  { %v11825_v48 = vpop.f32.mrf.mxu0  ;;  %v11845_v57 = vpop.f32.mrf.mxu1 }
 0x9f1   :  { %v9886_v31 = vadd.f32 %v11824_v60, %v9846_v46  ;;  %v11846_v54 = vadd.f32 %v11845_v57, %v11844_v2 }
 0x9f2   :  { %v11826_v11 = vpop.f32.mrf.mxu0  ;;  %v11847_v52 = vpop.f32.mrf.mxu1 }
 0x9f3   :  { %v9926_v59 = vadd.f32 %v11846_v54, %v9886_v31 }
 0x9f4   :  { %v11848_v9 = vpop.f32.mrf.mxu1 }
 0xa0c   :  { %v11866_v15 = vpop.f32.mrf.mxu0 }
 0xa0e   :  { %v11867_v21 = vpop.f32.mrf.mxu0  ;;  %v11888_v38 = vpop.f32.mrf.mxu1 }
 0xa0f   :  { %v11868_v51 = vadd.f32 %v11867_v21, %v11866_v15 }
 0xa10   :  { %v11869_v13 = vpop.f32.mrf.mxu0  ;;  %v11889_v20 = vpop.f32.mrf.mxu1 }
 0xa11   :  { %v9966_v10 = vadd.f32 %v11868_v51, %v9926_v59  ;;  %v11890_v23 = vadd.f32 %v11889_v20, %v11888_v38 }
 0xa12   :  { %v11870_v17 = vpop.f32.mrf.mxu0  ;;  %v11891_v19 = vpop.f32.mrf.mxu1 }
 0xa13   :  { %v10006_v43 = vadd.f32 %v11890_v23, %v9966_v10 }
 0xa14   :  { %v11892_v55 = vpop.f32.mrf.mxu1 }
 0xa2c   :  { %v11910_v63 = vpop.f32.mrf.mxu0 }
 0xa2e   :  { %v11911_v56 = vpop.f32.mrf.mxu0  ;;  %v11932_v7 = vpop.f32.mrf.mxu1 }
 0xa2f   :  { %v11912_v0 = vadd.f32 %v11911_v56, %v11910_v63 }
 0xa30   :  { %v11913_v27 = vpop.f32.mrf.mxu0  ;;  %v11933_v6 = vpop.f32.mrf.mxu1 }
 0xa31   :  { %v10046_v5 = vadd.f32 %v11912_v0, %v10006_v43  ;;  %v11934_v4 = vadd.f32 %v11933_v6, %v11932_v7 }
 0xa32   :  { %v11914_v49 = vpop.f32.mrf.mxu0  ;;  %v11935_v40 = vpop.f32.mrf.mxu1 }
 0xa33   :  { %v10086_v41 = vadd.f32 %v11934_v4, %v10046_v5 }
 0xa34   :  { %v11936_v28 = vpop.f32.mrf.mxu1 }
 0xa4c   :  { %v11954_v14 = vpop.f32.mrf.mxu0 }
 0xa4e   :  { %v11955_v36 = vpop.f32.mrf.mxu0  ;;  %v11976_v42 = vpop.f32.mrf.mxu1 }
 0xa4f   :  { %v11956_v30 = vadd.f32 %v11955_v36, %v11954_v14 }
 0xa50   :  { %v11957_v61 = vpop.f32.mrf.mxu0  ;;  %v11977_v3 = vpop.f32.mrf.mxu1 }
 0xa51   :  { %v10126_v50 = vadd.f32 %v11956_v30, %v10086_v41  ;;  %v11978_v39 = vadd.f32 %v11977_v3, %v11976_v42 }
 0xa52   :  { %v11958_v37 = vpop.f32.mrf.mxu0  ;;  %v11979_v18 = vpop.f32.mrf.mxu1 }
 0xa53   :  { %v10166_v1 = vadd.f32 %v11978_v39, %v10126_v50 }
 0xa54   :  { %v11980_v26 = vpop.f32.mrf.mxu1 }
 0xa6c   :  { %v11998_v24 = vpop.f32.mrf.mxu0 }
 0xa6e   :  { %v11999_v33 = vpop.f32.mrf.mxu0  ;;  %v12020_v29 = vpop.f32.mrf.mxu1 }
 0xa6f   :  { %v12000_v32 = vadd.f32 %v11999_v33, %v11998_v24 }
 0xa70   :  { %v12001_v47 = vpop.f32.mrf.mxu0  ;;  %v12021_v12 = vpop.f32.mrf.mxu1 }
 0xa71   :  { %v10206_v35 = vadd.f32 %v12000_v32, %v10166_v1  ;;  %v12022_v53 = vadd.f32 %v12021_v12, %v12020_v29 }
 0xa72   :  { %v12002_v8 = vpop.f32.mrf.mxu0  ;;  %v12023_v44 = vpop.f32.mrf.mxu1 }
 0xa73   :  { %v10246_v46 = vadd.f32 %v12022_v53, %v10206_v35 }
 0xa74   :  { %v12024_v16 = vpop.f32.mrf.mxu1 }
 0xa8c   :  { %v12042_v58 = vpop.f32.mrf.mxu0 }
 0xa8e   :  { %v12043_v34 = vpop.f32.mrf.mxu0  ;;  %v12064_v62 = vpop.f32.mrf.mxu1 }
 0xa8f   :  { %v12044_v22 = vadd.f32 %v12043_v34, %v12042_v58 }
 0xa90   :  { %v12045_v45 = vpop.f32.mrf.mxu0  ;;  %v12065_v25 = vpop.f32.mrf.mxu1 }
 0xa91   :  { %v10286_v2 = vadd.f32 %v12044_v22, %v10246_v46  ;;  %v12066_v60 = vadd.f32 %v12065_v25, %v12064_v62 }
 0xa92   :  { %v12046_v48 = vpop.f32.mrf.mxu0  ;;  %v12067_v57 = vpop.f32.mrf.mxu1 }
 0xa93   :  { %v10326_v31 = vadd.f32 %v12066_v60, %v10286_v2 }
 0xa94   :  { %v12068_v54 = vpop.f32.mrf.mxu1 }
 0xa95   :  { %10331 = vst [vmem:[#allocation7] sm:$0x3] %v10326_v31 }
 0xa96   :  { %12650 = shalt.err (!%p12647_p4)
}
 0xa97   :  { %10341 = dma.vmem_to_hbm [thread:$0]  %s10339_s4, 32, %s17298_s14, [#allocation8]  }
 0xa98   :  { %12659 = dma.done.wait [#allocation8], 32  }
 0xa99   :  { %12660 = vsyncadd [#allocation8], 4294967264 }
 0xa9a   :  { %10345 = vsyncpa [#allocation8], 1 }

</bundles_post_ra>
